<compile_context>
chip_gen: v5e
topology: v5e:2x2
jax: 0.10.0
libtpu: 0.0.40
codegen_flags: <defaults>
</compile_context>

<pallas_src>
import functools

import jax
import jax.numpy as jnp
from jax.experimental import pallas as pl
from jax.experimental.pallas import tpu as pltpu


# ----------------------------------------------------------------------------
# helpers
# ----------------------------------------------------------------------------
def _round_up(x, m):
    return (x + m - 1) // m * m


def _pad_to(a, shape):
    return jnp.pad(a, [(0, s - d) for d, s in zip(a.shape, shape)])


def fold_bn(gamma, beta, mean, var, conv_bias, eps=1e-5):
    scale = gamma / jnp.sqrt(var + eps)
    shift = beta + (conv_bias - mean) * scale
    return scale, shift


def _sa_conv_matrix(w77, Ho, Wo):
    """Banded (Ho*Wo, Ho*Wo) matrix of the 7x7 / pad-3 spatial-attention conv.

    K[out=(oi,oj), in=(ii,jj)] = w77[ii-oi+3, jj-oj+3] when in range, else 0.
    """
    oi = jnp.arange(Ho)
    ii = jnp.arange(Ho)
    oj = jnp.arange(Wo)
    jj = jnp.arange(Wo)
    di = ii[None, :] - oi[:, None] + 3            # (Ho, Ho)
    dj = jj[None, :] - oj[:, None] + 3            # (Wo, Wo)
    vi = (di >= 0) & (di < 7)
    vj = (dj >= 0) & (dj < 7)
    w_sel = w77[jnp.clip(di, 0, 6)[:, None, :, None],
                jnp.clip(dj, 0, 6)[None, :, None, :]]          # (Ho, Wo, Ho, Wo)
    mask = vi[:, None, :, None] & vj[None, :, None, :]
    return jnp.where(mask, w_sel, 0.0).reshape(Ho * Wo, Ho * Wo).astype(jnp.float32)


# ----------------------------------------------------------------------------
# Fused ResidualBlock kernel.  Grid = (batch,); one image per step, everything
# between the conv1 im2col patches and the final activation stays in VMEM.
# ----------------------------------------------------------------------------
def _fused_residual_block_kernel(
        p1_ref,      # (1, HW, 9*Cin)  conv1 im2col patches (center tap == strided x)
        w1_ref,      # (9*Cin, Cp)     conv1 weights, BN1 scale folded
        sh1_ref,     # (1, Cp)         folded BN1 shift (+ conv1 bias)
        w2_ref,      # (9, Cp, Cp)     conv2 weights, BN2 scale folded
        sh2_ref,     # (1, Cp)         folded BN2 shift (+ conv2 bias)
        fc1_ref,     # (Cp, HidP)      channel-attention fc1
        b1_ref,      # (1, HidP)
        fc2_ref,     # (HidP, Cp)      channel-attention fc2
        b2_ref,      # (1, Cp)
        ka_ref,      # (HW, HW)        7x7 SA conv matrix for the avg map
        km_ref,      # (HW, HW)        7x7 SA conv matrix for the max map
        sab_ref,     # (1,)  SMEM      SA conv bias
        wsc_ref,     # (Cin, Cp)       shortcut 1x1 weights (BN folded / padded eye)
        shsc_ref,    # (1, Cp)         shortcut shift
        o_ref,       # (1, HW, Cp)     output
        sp1_ref,     # VMEM (Ho+2, Wo+2, Cp)  zero-bordered out1 for conv2 windows
        acc_ref,     # VMEM (HW, Cp)          conv2 accumulator
        pool_ref,    # VMEM (8, Cp)           stacked avg/max pooled rows
        *, Ho, Wo, Cin, Cout):
    HW = Ho * Wo
    Cp = o_ref.shape[-1]

    # ---- conv1 + BN1 + ReLU: a single K-packed GEMM (K = 9*Cin) -------------
    out1 = jnp.dot(p1_ref[0], w1_ref[...], preferred_element_type=jnp.float32)
    out1 = jnp.maximum(out1 + sh1_ref[...], 0.0)                 # (HW, Cp)

    # stage out1 into a zero-bordered scratch so conv2 windows read pad=1 zeros
    sp1_ref[...] = jnp.zeros_like(sp1_ref)
    sp1_ref[1:1 + Ho, 1:1 + Wo, :] = out1.reshape(Ho, Wo, Cp)

    # ---- conv2 + BN2: 9 tap GEMMs accumulated in VMEM -----------------------
    # (dj in {1,2} window slices are sublane-shifted reads; cheap/hidden under
    #  the MXU at these tile sizes.)
    acc_ref[...] = jnp.broadcast_to(sh2_ref[...], (HW, Cp))
    for tap in range(9):
        di, dj = tap // 3, tap % 3
        win = sp1_ref[di:di + Ho, dj:dj + Wo, :].reshape(HW, Cp)
        acc_ref[...] += jnp.dot(win, w2_ref[tap],
                                preferred_element_type=jnp.float32)
    out2 = acc_ref[...]                                          # (HW, Cp); padded lanes == 0

    # ---- channel attention: avg & max rows share ONE MLP pass ---------------
    pool_ref[...] = jnp.zeros_like(pool_ref)
    pool_ref[0:1, :] = jnp.mean(out2, axis=0, keepdims=True)
    pool_ref[1:2, :] = jnp.max(out2, axis=0, keepdims=True)
    h = jnp.dot(pool_ref[...], fc1_ref[...],
                preferred_element_type=jnp.float32) + b1_ref[...]
    h = jnp.maximum(h, 0.0)
    logits = jnp.dot(h, fc2_ref[...],
                     preferred_element_type=jnp.float32) + b2_ref[...]
    ca = jax.nn.sigmoid(logits[0:1, :] + logits[1:2, :])         # (1, Cp)
    x_ca = out2 * ca                                             # (HW, Cp); padded lanes stay 0

    # ---- spatial attention: 7x7 conv as two (HW, HW) banded matmuls ---------
    ch_mask = jax.lax.broadcasted_iota(jnp.int32, (1, Cp), 1) < Cout
    sp_avg = jnp.sum(x_ca, axis=-1, keepdims=True) * (1.0 / Cout)           # (HW, 1)
    sp_max = jnp.max(jnp.where(ch_mask, x_ca, -1e30), axis=-1, keepdims=True)
    sa_logit = (jnp.dot(ka_ref[...], sp_avg, preferred_element_type=jnp.float32)
                + jnp.dot(km_ref[...], sp_max, preferred_element_type=jnp.float32)
                + sab_ref[0])
    sa = jax.nn.sigmoid(sa_logit)                                # (HW, 1)

    # ---- shortcut 1x1 conv + folded BN (reads x from the patch center tap) --
    xc = p1_ref[0, :, 4 * Cin:5 * Cin]                           # (HW, Cin)
    sc = jnp.dot(xc, wsc_ref[...],
                 preferred_element_type=jnp.float32) + shsc_ref[...]

    # ---- residual add + relu -------------------------------------------------
    o_ref[0] = jnp.maximum(x_ca * sa + sc, 0.0).astype(o_ref.dtype)


# ----------------------------------------------------------------------------
# ResidualBlock forward
# ----------------------------------------------------------------------------
def residual_block_forward(x_nchw, p, stride=1):
    x = jnp.transpose(x_nchw, (0, 2, 3, 1)).astype(jnp.float32)  # NCHW -> NHWC
    B, H, W, Cin = x.shape
    Cout = p["conv1_w"].shape[-1]
    Cp = _round_up(Cout, 128)
    hidden = p["fc1_w"].shape[-1]
    HidP = _round_up(hidden, 128)
    Ho = (H - 1) // stride + 1
    Wo = (W - 1) // stride + 1
    HW = Ho * Wo

    # conv1 strided im2col, K-packed to 9*Cin (tiny, built once in XLA).
    # TODO(synk): for large Cin, build the patch tile in-kernel instead to
    #             avoid the 9x HBM inflation of x.
    xp = jnp.pad(x, ((0, 0), (1, 1), (1, 1), (0, 0)))
    taps = []
    for di in range(3):
        for dj in range(3):
            win = xp[:, di:di + H, dj:dj + W, :][:, ::stride, ::stride, :]
            taps.append(win.reshape(B, HW, Cin))
    patches = jnp.concatenate(taps, axis=-1)                     # (B, HW, 9*Cin)

    # fold BN (inference) into the conv weights
    s1, sh1 = fold_bn(p["bn1_g"], p["bn1_b"], p["bn1_m"], p["bn1_v"], p["conv1_b"])
    w1f = _pad_to((p["conv1_w"] * s1).reshape(9 * Cin, Cout), (9 * Cin, Cp))
    sh1p = _pad_to(sh1.reshape(1, Cout), (1, Cp))

    s2, sh2 = fold_bn(p["bn2_g"], p["bn2_b"], p["bn2_m"], p["bn2_v"], p["conv2_b"])
    w2f = _pad_to((p["conv2_w"] * s2).reshape(9, Cout, Cout), (9, Cp, Cp))
    sh2p = _pad_to(sh2.reshape(1, Cout), (1, Cp))

    # channel-attention MLP (zero-padded so padded channels stay exactly zero)
    fc1 = _pad_to(p["fc1_w"], (Cp, HidP))
    b1 = _pad_to(p["fc1_b"].reshape(1, hidden), (1, HidP))
    fc2 = _pad_to(p["fc2_w"], (HidP, Cp))
    b2 = _pad_to(p["fc2_b"].reshape(1, Cout), (1, Cp))

    # spatial-attention 7x7 conv as two banded (HW, HW) matrices (avg / max map)
    k_avg = _sa_conv_matrix(p["sa_w"][:, :, 0, 0], Ho, Wo)
    k_max = _sa_conv_matrix(p["sa_w"][:, :, 1, 0], Ho, Wo)
    sab = p["sa_b"].reshape(1)

    # shortcut: identity, or 1x1 conv (stride) + folded BN
    if stride == 1 and Cin == Cout:
        # TODO(synk): identity shortcut could skip the GEMM; kept as a padded-eye
        #             matmul so both cases share one (still cheap) code path.
        wsc = _pad_to(jnp.eye(Cin, dtype=jnp.float32), (Cin, Cp))
        shsc = jnp.zeros((1, Cp), jnp.float32)
    else:
        ss, shs = fold_bn(p["bns_g"], p["bns_b"], p["bns_m"], p["bns_v"], p["convs_b"])
        wsc = _pad_to(p["convs_w"] * ss, (Cin, Cp))
        shsc = _pad_to(shs.reshape(1, Cout), (1, Cp))

    kern = functools.partial(_fused_residual_block_kernel,
                             Ho=Ho, Wo=Wo, Cin=Cin, Cout=Cout)

    flops = B * (2 * HW * (9 * Cin) * Cp          # conv1
                 + 9 * 2 * HW * Cp * Cp           # conv2
                 + 2 * (2 * 8 * Cp * HidP)        # channel-attention MLP
                 + 2 * 2 * HW * HW                # spatial-attention matmuls
                 + 2 * HW * Cin * Cp              # shortcut 1x1
                 + 10 * HW * Cp)                  # elementwise epilogue
    trans = B * (HW + Cp)
    bytes_acc = 4 * (patches.size + w1f.size + w2f.size + fc1.size + fc2.size
                     + k_avg.size + k_max.size + wsc.size + B * HW * Cp)

    out = pl.pallas_call(
        kern,
        grid=(B,),
        in_specs=[
            pl.BlockSpec((1, HW, 9 * Cin), lambda b: (b, 0, 0)),   # patches
            pl.BlockSpec((9 * Cin, Cp), lambda b: (0, 0)),         # w1 folded
            pl.BlockSpec((1, Cp), lambda b: (0, 0)),               # sh1
            pl.BlockSpec((9, Cp, Cp), lambda b: (0, 0, 0)),        # w2 folded
            pl.BlockSpec((1, Cp), lambda b: (0, 0)),               # sh2
            pl.BlockSpec((Cp, HidP), lambda b: (0, 0)),            # fc1
            pl.BlockSpec((1, HidP), lambda b: (0, 0)),             # b1
            pl.BlockSpec((HidP, Cp), lambda b: (0, 0)),            # fc2
            pl.BlockSpec((1, Cp), lambda b: (0, 0)),               # b2
            pl.BlockSpec((HW, HW), lambda b: (0, 0)),              # K_avg
            pl.BlockSpec((HW, HW), lambda b: (0, 0)),              # K_max
            pl.BlockSpec(memory_space=pltpu.MemorySpace.SMEM),     # sa bias (1,)
            pl.BlockSpec((Cin, Cp), lambda b: (0, 0)),             # shortcut weights
            pl.BlockSpec((1, Cp), lambda b: (0, 0)),               # shortcut shift
        ],
        out_specs=pl.BlockSpec((1, HW, Cp), lambda b: (b, 0, 0)),
        out_shape=jax.ShapeDtypeStruct((B, HW, Cp), jnp.float32),
        scratch_shapes=[
            pltpu.VMEM((Ho + 2, Wo + 2, Cp), jnp.float32),   # padded out1
            pltpu.VMEM((HW, Cp), jnp.float32),               # conv2 accumulator
            pltpu.VMEM((8, Cp), jnp.float32),                # pooled avg/max rows
        ],
        compiler_params=pltpu.CompilerParams(
            dimension_semantics=("parallel",)),
        cost_estimate=pl.CostEstimate(flops=flops, transcendentals=trans,
                                      bytes_accessed=bytes_acc),
    )(patches, w1f, sh1p, w2f, sh2p, fc1, b1, fc2, b2,
      k_avg, k_max, sab, wsc, shsc)

    out = out[:, :, :Cout].reshape(B, Ho, Wo, Cout)
    return jnp.transpose(out, (0, 3, 1, 2))                      # back to NCHW


# ----------------------------------------------------------------------------
# Deterministic parameter initialization (synthetic; no checkpoint loading)
# ----------------------------------------------------------------------------
def init_params(key, in_channels, out_channels, reduction=16):
    hidden = max(out_channels // reduction, 1)
    ks = jax.random.split(key, 24)
    n = lambda k, shape, s=0.1: (s * jax.random.normal(k, shape, jnp.float32))
    return {
        "conv1_w": n(ks[0], (3, 3, in_channels, out_channels)),
        "conv1_b": n(ks[1], (out_channels,)),
        "bn1_g": 1.0 + n(ks[2], (out_channels,)),
        "bn1_b": n(ks[3], (out_channels,)),
        "bn1_m": n(ks[4], (out_channels,)),
        "bn1_v": 1.0 + jnp.abs(n(ks[5], (out_channels,))),
        "conv2_w": n(ks[6], (3, 3, out_channels, out_channels)),
        "conv2_b": n(ks[7], (out_channels,)),
        "bn2_g": 1.0 + n(ks[8], (out_channels,)),
        "bn2_b": n(ks[9], (out_channels,)),
        "bn2_m": n(ks[10], (out_channels,)),
        "bn2_v": 1.0 + jnp.abs(n(ks[11], (out_channels,))),
        "fc1_w": n(ks[12], (out_channels, hidden)),
        "fc1_b": n(ks[13], (hidden,)),
        "fc2_w": n(ks[14], (hidden, out_channels)),
        "fc2_b": n(ks[15], (out_channels,)),
        "sa_w": n(ks[16], (7, 7, 2, 1)),
        "sa_b": n(ks[17], (1,)),
        "convs_w": n(ks[18], (in_channels, out_channels)),
        "convs_b": n(ks[19], (out_channels,)),
        "bns_g": 1.0 + n(ks[20], (out_channels,)),
        "bns_b": n(ks[21], (out_channels,)),
        "bns_m": n(ks[22], (out_channels,)),
        "bns_v": 1.0 + jnp.abs(n(ks[23], (out_channels,))),
    }


if __name__ == "__main__":
    key = jax.random.PRNGKey(0)
    kx, kp = jax.random.split(key)

    # small shapes: batch=2, in_channels=4, out_channels=32, spatial=16x16
    x = jax.random.normal(kx, (2, 4, 16, 16), jnp.float32)   # NCHW, like PyTorch
    params = init_params(kp, in_channels=4, out_channels=32, reduction=16)

    fwd = jax.jit(functools.partial(residual_block_forward, stride=1))
    out = jax.block_until_ready(fwd(x, params))

    assert out.shape == (2, 32, 16, 16), out.shape
    assert bool(jnp.all(jnp.isfinite(out)))
    print("KERNEL_OK")
</pallas_src>

<mosaic_0001>
module attributes {stable_mosaic.version = 11 : i64} {
  func.func @_fused_residual_block_kernel(%arg0: i32, %arg1: memref<1x256x36xf32, #tpu.memory_space<vmem>>, %arg2: memref<36x128xf32, #tpu.memory_space<vmem>>, %arg3: memref<1x128xf32, #tpu.memory_space<vmem>>, %arg4: memref<9x128x128xf32, #tpu.memory_space<vmem>>, %arg5: memref<1x128xf32, #tpu.memory_space<vmem>>, %arg6: memref<128x128xf32, #tpu.memory_space<vmem>>, %arg7: memref<1x128xf32, #tpu.memory_space<vmem>>, %arg8: memref<128x128xf32, #tpu.memory_space<vmem>>, %arg9: memref<1x128xf32, #tpu.memory_space<vmem>>, %arg10: memref<256x256xf32, #tpu.memory_space<vmem>>, %arg11: memref<256x256xf32, #tpu.memory_space<vmem>>, %arg12: memref<1xf32, #tpu.memory_space<smem>>, %arg13: memref<4x128xf32, #tpu.memory_space<vmem>>, %arg14: memref<1x128xf32, #tpu.memory_space<vmem>>, %arg15: memref<1x256x128xf32, #tpu.memory_space<vmem>>, %arg16: memref<18x18x128xf32, #tpu.memory_space<vmem>>, %arg17: memref<256x128xf32, #tpu.memory_space<vmem>>, %arg18: memref<8x128xf32, #tpu.memory_space<vmem>>) attributes {dimension_semantics = [#tpu.dimension_semantics<parallel>], iteration_bounds = array<i64: 2>, scalar_prefetch = 0 : i64, scratch_operands = 3 : i64, tpu.core_type = #tpu.core_type<tc>, window_params = [{transform_indices = @transform_0, window_bounds = array<i64: 1, 256, 36>}, {pipeline_mode = #tpu.pipeline_mode<synchronous>, transform_indices = @transform_1, window_bounds = array<i64: 36, 128>}, {pipeline_mode = #tpu.pipeline_mode<synchronous>, transform_indices = @transform_2, window_bounds = array<i64: 1, 128>}, {pipeline_mode = #tpu.pipeline_mode<synchronous>, transform_indices = @transform_3, window_bounds = array<i64: 9, 128, 128>}, {pipeline_mode = #tpu.pipeline_mode<synchronous>, transform_indices = @transform_4, window_bounds = array<i64: 1, 128>}, {pipeline_mode = #tpu.pipeline_mode<synchronous>, transform_indices = @transform_5, window_bounds = array<i64: 128, 128>}, {pipeline_mode = #tpu.pipeline_mode<synchronous>, transform_indices = @transform_6, window_bounds = array<i64: 1, 128>}, {pipeline_mode = #tpu.pipeline_mode<synchronous>, transform_indices = @transform_7, window_bounds = array<i64: 128, 128>}, {pipeline_mode = #tpu.pipeline_mode<synchronous>, transform_indices = @transform_8, window_bounds = array<i64: 1, 128>}, {pipeline_mode = #tpu.pipeline_mode<synchronous>, transform_indices = @transform_9, window_bounds = array<i64: 256, 256>}, {pipeline_mode = #tpu.pipeline_mode<synchronous>, transform_indices = @transform_10, window_bounds = array<i64: 256, 256>}, {transform_indices = @transform_11, window_bounds = array<i64: 1>}, {pipeline_mode = #tpu.pipeline_mode<synchronous>, transform_indices = @transform_12, window_bounds = array<i64: 4, 128>}, {pipeline_mode = #tpu.pipeline_mode<synchronous>, transform_indices = @transform_13, window_bounds = array<i64: 1, 128>}, {transform_indices = @transform_14, window_bounds = array<i64: 1, 256, 128>}]} {
    %c0 = arith.constant 0 : index
    %c0_0 = arith.constant 0 : index
    %c0_1 = arith.constant 0 : index
    %0 = vector.load %arg1[%c0, %c0_0, %c0_1] : memref<1x256x36xf32, #tpu.memory_space<vmem>>, vector<1x256x36xf32>
    %1 = vector.shape_cast %0 : vector<1x256x36xf32> to vector<256x36xf32>
    %c0_2 = arith.constant 0 : index
    %c0_3 = arith.constant 0 : index
    %2 = vector.load %arg2[%c0_2, %c0_3] : memref<36x128xf32, #tpu.memory_space<vmem>>, vector<36x128xf32>
    %cst = arith.constant dense<0.000000e+00> : vector<256x128xf32>
    %3 = tpu.matmul %1, %2, %cst {dimension_numbers = #tpu.dot_dimension_numbers<[1], [0], [0], [1], [0, 0, 1, 1], [], []>} : vector<256x36xf32>, vector<36x128xf32>, vector<256x128xf32> -> vector<256x128xf32>
    %c0_4 = arith.constant 0 : index
    %c0_5 = arith.constant 0 : index
    %4 = vector.load %arg3[%c0_4, %c0_5] : memref<1x128xf32, #tpu.memory_space<vmem>>, vector<1x128xf32>
    %5 = vector.broadcast %4 : vector<1x128xf32> to vector<256x128xf32>
    %6 = arith.addf %3, %5 : vector<256x128xf32>
    %cst_6 = arith.constant 0.000000e+00 : f32
    %7 = vector.broadcast %cst_6 : f32 to vector<256x128xf32>
    %8 = arith.maximumf %6, %7 : vector<256x128xf32>
    %cst_7 = arith.constant 0.000000e+00 : f32
    %9 = vector.broadcast %cst_7 : f32 to vector<18x18x128xf32>
    %c0_8 = arith.constant 0 : index
    %c0_9 = arith.constant 0 : index
    %c0_10 = arith.constant 0 : index
    %10 = vector.load %arg16[%c0_8, %c0_9, %c0_10] : memref<18x18x128xf32, #tpu.memory_space<vmem>>, vector<18x18x128xf32>
    tpu.vector_store %arg16[%c0_8, %c0_9, %c0_10], %9 {strides = array<i32>} : memref<18x18x128xf32, #tpu.memory_space<vmem>>, vector<18x18x128xf32>,
    %11 = vector.shape_cast %8 : vector<256x128xf32> to vector<16x16x128xf32>
    %c1 = arith.constant 1 : index
    %c1_11 = arith.constant 1 : index
    %c0_12 = arith.constant 0 : index
    %12 = vector.load %arg16[%c1, %c1_11, %c0_12] : memref<18x18x128xf32, #tpu.memory_space<vmem>>, vector<16x16x128xf32>
    tpu.vector_store %arg16[%c1, %c1_11, %c0_12], %11 {strides = array<i32>} : memref<18x18x128xf32, #tpu.memory_space<vmem>>, vector<16x16x128xf32>,
    %c0_13 = arith.constant 0 : index
    %c0_14 = arith.constant 0 : index
    %13 = vector.load %arg5[%c0_13, %c0_14] : memref<1x128xf32, #tpu.memory_space<vmem>>, vector<1x128xf32>
    %14 = vector.shape_cast %13 : vector<1x128xf32> to vector<1x128xf32>
    %15 = vector.broadcast %14 : vector<1x128xf32> to vector<256x128xf32>
    %c0_15 = arith.constant 0 : index
    %c0_16 = arith.constant 0 : index
    %16 = vector.load %arg17[%c0_15, %c0_16] : memref<256x128xf32, #tpu.memory_space<vmem>>, vector<256x128xf32>
    tpu.vector_store %arg17[%c0_15, %c0_16], %15 {strides = array<i32>} : memref<256x128xf32, #tpu.memory_space<vmem>>, vector<256x128xf32>,
    %c0_17 = arith.constant 0 : index
    %c0_18 = arith.constant 0 : index
    %c0_19 = arith.constant 0 : index
    %17 = vector.load %arg16[%c0_17, %c0_18, %c0_19] : memref<18x18x128xf32, #tpu.memory_space<vmem>>, vector<16x16x128xf32>
    %18 = vector.shape_cast %17 : vector<16x16x128xf32> to vector<256x128xf32>
    %c0_20 = arith.constant 0 : index
    %c0_21 = arith.constant 0 : index
    %19 = vector.load %arg17[%c0_20, %c0_21] : memref<256x128xf32, #tpu.memory_space<vmem>>, vector<256x128xf32>
    %c0_22 = arith.constant 0 : index
    %c0_23 = arith.constant 0 : index
    %c0_24 = arith.constant 0 : index
    %20 = vector.load %arg4[%c0_22, %c0_23, %c0_24] : memref<9x128x128xf32, #tpu.memory_space<vmem>>, vector<1x128x128xf32>
    %21 = vector.shape_cast %20 : vector<1x128x128xf32> to vector<128x128xf32>
    %cst_25 = arith.constant dense<0.000000e+00> : vector<256x128xf32>
    %22 = tpu.matmul %18, %21, %cst_25 {dimension_numbers = #tpu.dot_dimension_numbers<[1], [0], [0], [1], [0, 0, 1, 1], [], []>} : vector<256x128xf32>, vector<128x128xf32>, vector<256x128xf32> -> vector<256x128xf32>
    %23 = arith.addf %19, %22 : vector<256x128xf32>
    %c0_26 = arith.constant 0 : index
    %c0_27 = arith.constant 0 : index
    %24 = vector.load %arg17[%c0_26, %c0_27] : memref<256x128xf32, #tpu.memory_space<vmem>>, vector<256x128xf32>
    tpu.vector_store %arg17[%c0_26, %c0_27], %23 {strides = array<i32>} : memref<256x128xf32, #tpu.memory_space<vmem>>, vector<256x128xf32>,
    %c0_28 = arith.constant 0 : index
    %c1_29 = arith.constant 1 : index
    %c0_30 = arith.constant 0 : index
    %25 = vector.load %arg16[%c0_28, %c1_29, %c0_30] : memref<18x18x128xf32, #tpu.memory_space<vmem>>, vector<16x16x128xf32>
    %26 = vector.shape_cast %25 : vector<16x16x128xf32> to vector<256x128xf32>
    %c0_31 = arith.constant 0 : index
    %c0_32 = arith.constant 0 : index
    %27 = vector.load %arg17[%c0_31, %c0_32] : memref<256x128xf32, #tpu.memory_space<vmem>>, vector<256x128xf32>
    %c1_33 = arith.constant 1 : index
    %c0_34 = arith.constant 0 : index
    %c0_35 = arith.constant 0 : index
    %28 = vector.load %arg4[%c1_33, %c0_34, %c0_35] : memref<9x128x128xf32, #tpu.memory_space<vmem>>, vector<1x128x128xf32>
    %29 = vector.shape_cast %28 : vector<1x128x128xf32> to vector<128x128xf32>
    %cst_36 = arith.constant dense<0.000000e+00> : vector<256x128xf32>
    %30 = tpu.matmul %26, %29, %cst_36 {dimension_numbers = #tpu.dot_dimension_numbers<[1], [0], [0], [1], [0, 0, 1, 1], [], []>} : vector<256x128xf32>, vector<128x128xf32>, vector<256x128xf32> -> vector<256x128xf32>
    %31 = arith.addf %27, %30 : vector<256x128xf32>
    %c0_37 = arith.constant 0 : index
    %c0_38 = arith.constant 0 : index
    %32 = vector.load %arg17[%c0_37, %c0_38] : memref<256x128xf32, #tpu.memory_space<vmem>>, vector<256x128xf32>
    tpu.vector_store %arg17[%c0_37, %c0_38], %31 {strides = array<i32>} : memref<256x128xf32, #tpu.memory_space<vmem>>, vector<256x128xf32>,
    %c0_39 = arith.constant 0 : index
    %c2 = arith.constant 2 : index
    %c0_40 = arith.constant 0 : index
    %33 = vector.load %arg16[%c0_39, %c2, %c0_40] : memref<18x18x128xf32, #tpu.memory_space<vmem>>, vector<16x16x128xf32>
    %34 = vector.shape_cast %33 : vector<16x16x128xf32> to vector<256x128xf32>
    %c0_41 = arith.constant 0 : index
    %c0_42 = arith.constant 0 : index
    %35 = vector.load %arg17[%c0_41, %c0_42] : memref<256x128xf32, #tpu.memory_space<vmem>>, vector<256x128xf32>
    %c2_43 = arith.constant 2 : index
    %c0_44 = arith.constant 0 : index
    %c0_45 = arith.constant 0 : index
    %36 = vector.load %arg4[%c2_43, %c0_44, %c0_45] : memref<9x128x128xf32, #tpu.memory_space<vmem>>, vector<1x128x128xf32>
    %37 = vector.shape_cast %36 : vector<1x128x128xf32> to vector<128x128xf32>
    %cst_46 = arith.constant dense<0.000000e+00> : vector<256x128xf32>
    %38 = tpu.matmul %34, %37, %cst_46 {dimension_numbers = #tpu.dot_dimension_numbers<[1], [0], [0], [1], [0, 0, 1, 1], [], []>} : vector<256x128xf32>, vector<128x128xf32>, vector<256x128xf32> -> vector<256x128xf32>
    %39 = arith.addf %35, %38 : vector<256x128xf32>
    %c0_47 = arith.constant 0 : index
    %c0_48 = arith.constant 0 : index
    %40 = vector.load %arg17[%c0_47, %c0_48] : memref<256x128xf32, #tpu.memory_space<vmem>>, vector<256x128xf32>
    tpu.vector_store %arg17[%c0_47, %c0_48], %39 {strides = array<i32>} : memref<256x128xf32, #tpu.memory_space<vmem>>, vector<256x128xf32>,
    %c1_49 = arith.constant 1 : index
    %c0_50 = arith.constant 0 : index
    %c0_51 = arith.constant 0 : index
    %41 = vector.load %arg16[%c1_49, %c0_50, %c0_51] : memref<18x18x128xf32, #tpu.memory_space<vmem>>, vector<16x16x128xf32>
    %42 = vector.shape_cast %41 : vector<16x16x128xf32> to vector<256x128xf32>
    %c0_52 = arith.constant 0 : index
    %c0_53 = arith.constant 0 : index
    %43 = vector.load %arg17[%c0_52, %c0_53] : memref<256x128xf32, #tpu.memory_space<vmem>>, vector<256x128xf32>
    %c3 = arith.constant 3 : index
    %c0_54 = arith.constant 0 : index
    %c0_55 = arith.constant 0 : index
    %44 = vector.load %arg4[%c3, %c0_54, %c0_55] : memref<9x128x128xf32, #tpu.memory_space<vmem>>, vector<1x128x128xf32>
    %45 = vector.shape_cast %44 : vector<1x128x128xf32> to vector<128x128xf32>
    %cst_56 = arith.constant dense<0.000000e+00> : vector<256x128xf32>
    %46 = tpu.matmul %42, %45, %cst_56 {dimension_numbers = #tpu.dot_dimension_numbers<[1], [0], [0], [1], [0, 0, 1, 1], [], []>} : vector<256x128xf32>, vector<128x128xf32>, vector<256x128xf32> -> vector<256x128xf32>
    %47 = arith.addf %43, %46 : vector<256x128xf32>
    %c0_57 = arith.constant 0 : index
    %c0_58 = arith.constant 0 : index
    %48 = vector.load %arg17[%c0_57, %c0_58] : memref<256x128xf32, #tpu.memory_space<vmem>>, vector<256x128xf32>
    tpu.vector_store %arg17[%c0_57, %c0_58], %47 {strides = array<i32>} : memref<256x128xf32, #tpu.memory_space<vmem>>, vector<256x128xf32>,
    %c1_59 = arith.constant 1 : index
    %c1_60 = arith.constant 1 : index
    %c0_61 = arith.constant 0 : index
    %49 = vector.load %arg16[%c1_59, %c1_60, %c0_61] : memref<18x18x128xf32, #tpu.memory_space<vmem>>, vector<16x16x128xf32>
    %50 = vector.shape_cast %49 : vector<16x16x128xf32> to vector<256x128xf32>
    %c0_62 = arith.constant 0 : index
    %c0_63 = arith.constant 0 : index
    %51 = vector.load %arg17[%c0_62, %c0_63] : memref<256x128xf32, #tpu.memory_space<vmem>>, vector<256x128xf32>
    %c4 = arith.constant 4 : index
    %c0_64 = arith.constant 0 : index
    %c0_65 = arith.constant 0 : index
    %52 = vector.load %arg4[%c4, %c0_64, %c0_65] : memref<9x128x128xf32, #tpu.memory_space<vmem>>, vector<1x128x128xf32>
    %53 = vector.shape_cast %52 : vector<1x128x128xf32> to vector<128x128xf32>
    %cst_66 = arith.constant dense<0.000000e+00> : vector<256x128xf32>
    %54 = tpu.matmul %50, %53, %cst_66 {dimension_numbers = #tpu.dot_dimension_numbers<[1], [0], [0], [1], [0, 0, 1, 1], [], []>} : vector<256x128xf32>, vector<128x128xf32>, vector<256x128xf32> -> vector<256x128xf32>
    %55 = arith.addf %51, %54 : vector<256x128xf32>
    %c0_67 = arith.constant 0 : index
    %c0_68 = arith.constant 0 : index
    %56 = vector.load %arg17[%c0_67, %c0_68] : memref<256x128xf32, #tpu.memory_space<vmem>>, vector<256x128xf32>
    tpu.vector_store %arg17[%c0_67, %c0_68], %55 {strides = array<i32>} : memref<256x128xf32, #tpu.memory_space<vmem>>, vector<256x128xf32>,
    %c1_69 = arith.constant 1 : index
    %c2_70 = arith.constant 2 : index
    %c0_71 = arith.constant 0 : index
    %57 = vector.load %arg16[%c1_69, %c2_70, %c0_71] : memref<18x18x128xf32, #tpu.memory_space<vmem>>, vector<16x16x128xf32>
    %58 = vector.shape_cast %57 : vector<16x16x128xf32> to vector<256x128xf32>
    %c0_72 = arith.constant 0 : index
    %c0_73 = arith.constant 0 : index
    %59 = vector.load %arg17[%c0_72, %c0_73] : memref<256x128xf32, #tpu.memory_space<vmem>>, vector<256x128xf32>
    %c5 = arith.constant 5 : index
    %c0_74 = arith.constant 0 : index
    %c0_75 = arith.constant 0 : index
    %60 = vector.load %arg4[%c5, %c0_74, %c0_75] : memref<9x128x128xf32, #tpu.memory_space<vmem>>, vector<1x128x128xf32>
    %61 = vector.shape_cast %60 : vector<1x128x128xf32> to vector<128x128xf32>
    %cst_76 = arith.constant dense<0.000000e+00> : vector<256x128xf32>
    %62 = tpu.matmul %58, %61, %cst_76 {dimension_numbers = #tpu.dot_dimension_numbers<[1], [0], [0], [1], [0, 0, 1, 1], [], []>} : vector<256x128xf32>, vector<128x128xf32>, vector<256x128xf32> -> vector<256x128xf32>
    %63 = arith.addf %59, %62 : vector<256x128xf32>
    %c0_77 = arith.constant 0 : index
    %c0_78 = arith.constant 0 : index
    %64 = vector.load %arg17[%c0_77, %c0_78] : memref<256x128xf32, #tpu.memory_space<vmem>>, vector<256x128xf32>
    tpu.vector_store %arg17[%c0_77, %c0_78], %63 {strides = array<i32>} : memref<256x128xf32, #tpu.memory_space<vmem>>, vector<256x128xf32>,
    %c2_79 = arith.constant 2 : index
    %c0_80 = arith.constant 0 : index
    %c0_81 = arith.constant 0 : index
    %65 = vector.load %arg16[%c2_79, %c0_80, %c0_81] : memref<18x18x128xf32, #tpu.memory_space<vmem>>, vector<16x16x128xf32>
    %66 = vector.shape_cast %65 : vector<16x16x128xf32> to vector<256x128xf32>
    %c0_82 = arith.constant 0 : index
    %c0_83 = arith.constant 0 : index
    %67 = vector.load %arg17[%c0_82, %c0_83] : memref<256x128xf32, #tpu.memory_space<vmem>>, vector<256x128xf32>
    %c6 = arith.constant 6 : index
    %c0_84 = arith.constant 0 : index
    %c0_85 = arith.constant 0 : index
    %68 = vector.load %arg4[%c6, %c0_84, %c0_85] : memref<9x128x128xf32, #tpu.memory_space<vmem>>, vector<1x128x128xf32>
    %69 = vector.shape_cast %68 : vector<1x128x128xf32> to vector<128x128xf32>
    %cst_86 = arith.constant dense<0.000000e+00> : vector<256x128xf32>
    %70 = tpu.matmul %66, %69, %cst_86 {dimension_numbers = #tpu.dot_dimension_numbers<[1], [0], [0], [1], [0, 0, 1, 1], [], []>} : vector<256x128xf32>, vector<128x128xf32>, vector<256x128xf32> -> vector<256x128xf32>
    %71 = arith.addf %67, %70 : vector<256x128xf32>
    %c0_87 = arith.constant 0 : index
    %c0_88 = arith.constant 0 : index
    %72 = vector.load %arg17[%c0_87, %c0_88] : memref<256x128xf32, #tpu.memory_space<vmem>>, vector<256x128xf32>
    tpu.vector_store %arg17[%c0_87, %c0_88], %71 {strides = array<i32>} : memref<256x128xf32, #tpu.memory_space<vmem>>, vector<256x128xf32>,
    %c2_89 = arith.constant 2 : index
    %c1_90 = arith.constant 1 : index
    %c0_91 = arith.constant 0 : index
    %73 = vector.load %arg16[%c2_89, %c1_90, %c0_91] : memref<18x18x128xf32, #tpu.memory_space<vmem>>, vector<16x16x128xf32>
    %74 = vector.shape_cast %73 : vector<16x16x128xf32> to vector<256x128xf32>
    %c0_92 = arith.constant 0 : index
    %c0_93 = arith.constant 0 : index
    %75 = vector.load %arg17[%c0_92, %c0_93] : memref<256x128xf32, #tpu.memory_space<vmem>>, vector<256x128xf32>
    %c7 = arith.constant 7 : index
    %c0_94 = arith.constant 0 : index
    %c0_95 = arith.constant 0 : index
    %76 = vector.load %arg4[%c7, %c0_94, %c0_95] : memref<9x128x128xf32, #tpu.memory_space<vmem>>, vector<1x128x128xf32>
    %77 = vector.shape_cast %76 : vector<1x128x128xf32> to vector<128x128xf32>
    %cst_96 = arith.constant dense<0.000000e+00> : vector<256x128xf32>
    %78 = tpu.matmul %74, %77, %cst_96 {dimension_numbers = #tpu.dot_dimension_numbers<[1], [0], [0], [1], [0, 0, 1, 1], [], []>} : vector<256x128xf32>, vector<128x128xf32>, vector<256x128xf32> -> vector<256x128xf32>
    %79 = arith.addf %75, %78 : vector<256x128xf32>
    %c0_97 = arith.constant 0 : index
    %c0_98 = arith.constant 0 : index
    %80 = vector.load %arg17[%c0_97, %c0_98] : memref<256x128xf32, #tpu.memory_space<vmem>>, vector<256x128xf32>
    tpu.vector_store %arg17[%c0_97, %c0_98], %79 {strides = array<i32>} : memref<256x128xf32, #tpu.memory_space<vmem>>, vector<256x128xf32>,
    %c2_99 = arith.constant 2 : index
    %c2_100 = arith.constant 2 : index
    %c0_101 = arith.constant 0 : index
    %81 = vector.load %arg16[%c2_99, %c2_100, %c0_101] : memref<18x18x128xf32, #tpu.memory_space<vmem>>, vector<16x16x128xf32>
    %82 = vector.shape_cast %81 : vector<16x16x128xf32> to vector<256x128xf32>
    %c0_102 = arith.constant 0 : index
    %c0_103 = arith.constant 0 : index
    %83 = vector.load %arg17[%c0_102, %c0_103] : memref<256x128xf32, #tpu.memory_space<vmem>>, vector<256x128xf32>
    %c8 = arith.constant 8 : index
    %c0_104 = arith.constant 0 : index
    %c0_105 = arith.constant 0 : index
    %84 = vector.load %arg4[%c8, %c0_104, %c0_105] : memref<9x128x128xf32, #tpu.memory_space<vmem>>, vector<1x128x128xf32>
    %85 = vector.shape_cast %84 : vector<1x128x128xf32> to vector<128x128xf32>
    %cst_106 = arith.constant dense<0.000000e+00> : vector<256x128xf32>
    %86 = tpu.matmul %82, %85, %cst_106 {dimension_numbers = #tpu.dot_dimension_numbers<[1], [0], [0], [1], [0, 0, 1, 1], [], []>} : vector<256x128xf32>, vector<128x128xf32>, vector<256x128xf32> -> vector<256x128xf32>
    %87 = arith.addf %83, %86 : vector<256x128xf32>
    %c0_107 = arith.constant 0 : index
    %c0_108 = arith.constant 0 : index
    %88 = vector.load %arg17[%c0_107, %c0_108] : memref<256x128xf32, #tpu.memory_space<vmem>>, vector<256x128xf32>
    tpu.vector_store %arg17[%c0_107, %c0_108], %87 {strides = array<i32>} : memref<256x128xf32, #tpu.memory_space<vmem>>, vector<256x128xf32>,
    %c0_109 = arith.constant 0 : index
    %c0_110 = arith.constant 0 : index
    %89 = vector.load %arg17[%c0_109, %c0_110] : memref<256x128xf32, #tpu.memory_space<vmem>>, vector<256x128xf32>
    %cst_111 = arith.constant 0.000000e+00 : f32
    %90 = vector.broadcast %cst_111 : f32 to vector<8x128xf32>
    %c0_112 = arith.constant 0 : index
    %c0_113 = arith.constant 0 : index
    %91 = vector.load %arg18[%c0_112, %c0_113] : memref<8x128xf32, #tpu.memory_space<vmem>>, vector<8x128xf32>
    tpu.vector_store %arg18[%c0_112, %c0_113], %90 {strides = array<i32>} : memref<8x128xf32, #tpu.memory_space<vmem>>, vector<8x128xf32>,
    %cst_114 = arith.constant dense<0.000000e+00> : vector<128xf32>
    %92 = vector.multi_reduction <add>, %89, %cst_114 [0] : vector<256x128xf32> to vector<128xf32>
    %93 = vector.shape_cast %92 : vector<128xf32> to vector<1x128xf32>
    %cst_115 = arith.constant 2.560000e+02 : f32
    %94 = vector.broadcast %cst_115 : f32 to vector<1x128xf32>
    %95 = arith.divf %93, %94 : vector<1x128xf32>
    %c0_116 = arith.constant 0 : index
    %c0_117 = arith.constant 0 : index
    %96 = vector.load %arg18[%c0_116, %c0_117] : memref<8x128xf32, #tpu.memory_space<vmem>>, vector<1x128xf32>
    tpu.vector_store %arg18[%c0_116, %c0_117], %95 {strides = array<i32>} : memref<8x128xf32, #tpu.memory_space<vmem>>, vector<1x128xf32>,
    %cst_118 = arith.constant dense<0xFF800000> : vector<128xf32>
    %97 = vector.multi_reduction <maximumf>, %89, %cst_118 [0] : vector<256x128xf32> to vector<128xf32>
    %98 = vector.shape_cast %97 : vector<128xf32> to vector<1x128xf32>
    %c1_119 = arith.constant 1 : index
    %c0_120 = arith.constant 0 : index
    %99 = vector.load %arg18[%c1_119, %c0_120] : memref<8x128xf32, #tpu.memory_space<vmem>>, vector<1x128xf32>
    tpu.vector_store %arg18[%c1_119, %c0_120], %98 {strides = array<i32>} : memref<8x128xf32, #tpu.memory_space<vmem>>, vector<1x128xf32>,
    %c0_121 = arith.constant 0 : index
    %c0_122 = arith.constant 0 : index
    %100 = vector.load %arg18[%c0_121, %c0_122] : memref<8x128xf32, #tpu.memory_space<vmem>>, vector<8x128xf32>
    %c0_123 = arith.constant 0 : index
    %c0_124 = arith.constant 0 : index
    %101 = vector.load %arg6[%c0_123, %c0_124] : memref<128x128xf32, #tpu.memory_space<vmem>>, vector<128x128xf32>
    %cst_125 = arith.constant dense<0.000000e+00> : vector<8x128xf32>
    %102 = tpu.matmul %100, %101, %cst_125 {dimension_numbers = #tpu.dot_dimension_numbers<[1], [0], [0], [1], [0, 0, 1, 1], [], []>} : vector<8x128xf32>, vector<128x128xf32>, vector<8x128xf32> -> vector<8x128xf32>
    %c0_126 = arith.constant 0 : index
    %c0_127 = arith.constant 0 : index
    %103 = vector.load %arg7[%c0_126, %c0_127] : memref<1x128xf32, #tpu.memory_space<vmem>>, vector<1x128xf32>
    %104 = vector.broadcast %103 : vector<1x128xf32> to vector<8x128xf32>
    %105 = arith.addf %102, %104 : vector<8x128xf32>
    %cst_128 = arith.constant 0.000000e+00 : f32
    %106 = vector.broadcast %cst_128 : f32 to vector<8x128xf32>
    %107 = arith.maximumf %105, %106 : vector<8x128xf32>
    %c0_129 = arith.constant 0 : index
    %c0_130 = arith.constant 0 : index
    %108 = vector.load %arg8[%c0_129, %c0_130] : memref<128x128xf32, #tpu.memory_space<vmem>>, vector<128x128xf32>
    %cst_131 = arith.constant dense<0.000000e+00> : vector<8x128xf32>
    %109 = tpu.matmul %107, %108, %cst_131 {dimension_numbers = #tpu.dot_dimension_numbers<[1], [0], [0], [1], [0, 0, 1, 1], [], []>} : vector<8x128xf32>, vector<128x128xf32>, vector<8x128xf32> -> vector<8x128xf32>
    %c0_132 = arith.constant 0 : index
    %c0_133 = arith.constant 0 : index
    %110 = vector.load %arg9[%c0_132, %c0_133] : memref<1x128xf32, #tpu.memory_space<vmem>>, vector<1x128xf32>
    %111 = vector.broadcast %110 : vector<1x128xf32> to vector<8x128xf32>
    %112 = arith.addf %109, %111 : vector<8x128xf32>
    %113 = vector.extract_strided_slice %112 {offsets = [0, 0], sizes = [1, 128], strides = [1, 1]} : vector<8x128xf32> to vector<1x128xf32>
    %114 = vector.extract_strided_slice %112 {offsets = [1, 0], sizes = [1, 128], strides = [1, 1]} : vector<8x128xf32> to vector<1x128xf32>
    %115 = arith.addf %113, %114 : vector<1x128xf32>
    %116 = arith.negf %115 : vector<1x128xf32>
    %117 = math.exp %116 : vector<1x128xf32>
    %cst_134 = arith.constant 1.000000e+00 : f32
    %118 = vector.broadcast %cst_134 : f32 to vector<1x128xf32>
    %119 = arith.addf %118, %117 : vector<1x128xf32>
    %120 = arith.divf %118, %119 : vector<1x128xf32>
    %121 = vector.broadcast %120 : vector<1x128xf32> to vector<256x128xf32>
    %122 = arith.mulf %89, %121 : vector<256x128xf32>
    %123 = tpu.iota {dimensions = array<i32: 1>} : vector<1x128xi32>
    %c32_i32 = arith.constant 32 : i32
    %124 = vector.broadcast %c32_i32 : i32 to vector<1x128xi32>
    %125 = arith.cmpi slt, %123, %124 : vector<1x128xi32>
    %cst_135 = arith.constant dense<0.000000e+00> : vector<256xf32>
    %126 = vector.multi_reduction <add>, %122, %cst_135 [1] : vector<256x128xf32> to vector<256xf32>
    %127 = vector.shape_cast %126 : vector<256xf32> to vector<256x1xf32>
    %cst_136 = arith.constant 3.125000e-02 : f32
    %128 = vector.broadcast %cst_136 : f32 to vector<256x1xf32>
    %129 = arith.mulf %127, %128 : vector<256x1xf32>
    %cst_137 = arith.constant -1.000000e+30 : f32
    %130 = vector.shape_cast %125 : vector<1x128xi1> to vector<1x128xi1>
    %131 = vector.broadcast %130 : vector<1x128xi1> to vector<256x128xi1>
    %132 = vector.broadcast %cst_137 : f32 to vector<256x128xf32>
    %133 = arith.select %131, %122, %132 : vector<256x128xi1>, vector<256x128xf32>
    %cst_138 = arith.constant dense<0xFF800000> : vector<256xf32>
    %134 = vector.multi_reduction <maximumf>, %133, %cst_138 [1] : vector<256x128xf32> to vector<256xf32>
    %135 = vector.shape_cast %134 : vector<256xf32> to vector<256x1xf32>
    %c0_139 = arith.constant 0 : index
    %c0_140 = arith.constant 0 : index
    %136 = vector.load %arg10[%c0_139, %c0_140] : memref<256x256xf32, #tpu.memory_space<vmem>>, vector<256x256xf32>
    %cst_141 = arith.constant dense<0.000000e+00> : vector<256x1xf32>
    %137 = tpu.matmul %136, %129, %cst_141 {dimension_numbers = #tpu.dot_dimension_numbers<[1], [0], [0], [1], [0, 0, 1, 1], [], []>} : vector<256x256xf32>, vector<256x1xf32>, vector<256x1xf32> -> vector<256x1xf32>
    %c0_142 = arith.constant 0 : index
    %c0_143 = arith.constant 0 : index
    %138 = vector.load %arg11[%c0_142, %c0_143] : memref<256x256xf32, #tpu.memory_space<vmem>>, vector<256x256xf32>
    %cst_144 = arith.constant dense<0.000000e+00> : vector<256x1xf32>
    %139 = tpu.matmul %138, %135, %cst_144 {dimension_numbers = #tpu.dot_dimension_numbers<[1], [0], [0], [1], [0, 0, 1, 1], [], []>} : vector<256x256xf32>, vector<256x1xf32>, vector<256x1xf32> -> vector<256x1xf32>
    %140 = arith.addf %137, %139 : vector<256x1xf32>
    %c0_145 = arith.constant 0 : index
    %141 = memref.load %arg12[%c0_145] : memref<1xf32, #tpu.memory_space<smem>>
    %142 = vector.broadcast %141 : f32 to vector<256x1xf32>
    %143 = arith.addf %140, %142 : vector<256x1xf32>
    %144 = arith.negf %143 : vector<256x1xf32>
    %145 = math.exp %144 : vector<256x1xf32>
    %cst_146 = arith.constant 1.000000e+00 : f32
    %146 = vector.broadcast %cst_146 : f32 to vector<256x1xf32>
    %147 = arith.addf %146, %145 : vector<256x1xf32>
    %148 = arith.divf %146, %147 : vector<256x1xf32>
    %c0_147 = arith.constant 0 : index
    %c0_148 = arith.constant 0 : index
    %c16 = arith.constant 16 : index
    %149 = vector.load %arg1[%c0_147, %c0_148, %c16] : memref<1x256x36xf32, #tpu.memory_space<vmem>>, vector<1x256x4xf32>
    %150 = vector.shape_cast %149 : vector<1x256x4xf32> to vector<256x4xf32>
    %c0_149 = arith.constant 0 : index
    %c0_150 = arith.constant 0 : index
    %151 = vector.load %arg13[%c0_149, %c0_150] : memref<4x128xf32, #tpu.memory_space<vmem>>, vector<4x128xf32>
    %cst_151 = arith.constant dense<0.000000e+00> : vector<256x128xf32>
    %152 = tpu.matmul %150, %151, %cst_151 {dimension_numbers = #tpu.dot_dimension_numbers<[1], [0], [0], [1], [0, 0, 1, 1], [], []>} : vector<256x4xf32>, vector<4x128xf32>, vector<256x128xf32> -> vector<256x128xf32>
    %c0_152 = arith.constant 0 : index
    %c0_153 = arith.constant 0 : index
    %153 = vector.load %arg14[%c0_152, %c0_153] : memref<1x128xf32, #tpu.memory_space<vmem>>, vector<1x128xf32>
    %154 = vector.broadcast %153 : vector<1x128xf32> to vector<256x128xf32>
    %155 = arith.addf %152, %154 : vector<256x128xf32>
    %156 = vector.broadcast %148 : vector<256x1xf32> to vector<256x128xf32>
    %157 = arith.mulf %122, %156 : vector<256x128xf32>
    %158 = arith.addf %157, %155 : vector<256x128xf32>
    %cst_154 = arith.constant 0.000000e+00 : f32
    %159 = vector.broadcast %cst_154 : f32 to vector<256x128xf32>
    %160 = arith.maximumf %158, %159 : vector<256x128xf32>
    %c0_155 = arith.constant 0 : index
    %c0_156 = arith.constant 0 : index
    %c0_157 = arith.constant 0 : index
    %161 = vector.load %arg15[%c0_155, %c0_156, %c0_157] : memref<1x256x128xf32, #tpu.memory_space<vmem>>, vector<1x256x128xf32>
    %162 = vector.shape_cast %161 : vector<1x256x128xf32> to vector<256x128xf32>
    %163 = vector.shape_cast %160 : vector<256x128xf32> to vector<1x256x128xf32>
    tpu.vector_store %arg15[%c0_155, %c0_156, %c0_157], %163 {strides = array<i32>} : memref<1x256x128xf32, #tpu.memory_space<vmem>>, vector<1x256x128xf32>,
    return
  }
  func.func @transform_0(%arg0: i32) -> (i32, i32, i32) {
    %c0_i32 = arith.constant 0 : i32
    %c0_i32_0 = arith.constant 0 : i32
    %c0_i32_1 = arith.constant 0 : i32
    return %arg0, %c0_i32, %c0_i32_0 : i32, i32, i32
  }
  func.func @transform_1(%arg0: i32) -> (i32, i32) {
    %c0_i32 = arith.constant 0 : i32
    %c0_i32_0 = arith.constant 0 : i32
    %c0_i32_1 = arith.constant 0 : i32
    return %c0_i32, %c0_i32_0 : i32, i32
  }
  func.func @transform_2(%arg0: i32) -> (i32, i32) {
    %c0_i32 = arith.constant 0 : i32
    %c0_i32_0 = arith.constant 0 : i32
    %c0_i32_1 = arith.constant 0 : i32
    return %c0_i32, %c0_i32_0 : i32, i32
  }
  func.func @transform_3(%arg0: i32) -> (i32, i32, i32) {
    %c0_i32 = arith.constant 0 : i32
    %c0_i32_0 = arith.constant 0 : i32
    %c0_i32_1 = arith.constant 0 : i32
    %c0_i32_2 = arith.constant 0 : i32
    return %c0_i32, %c0_i32_0, %c0_i32_1 : i32, i32, i32
  }
  func.func @transform_4(%arg0: i32) -> (i32, i32) {
    %c0_i32 = arith.constant 0 : i32
    %c0_i32_0 = arith.constant 0 : i32
    %c0_i32_1 = arith.constant 0 : i32
    return %c0_i32, %c0_i32_0 : i32, i32
  }
  func.func @transform_5(%arg0: i32) -> (i32, i32) {
    %c0_i32 = arith.constant 0 : i32
    %c0_i32_0 = arith.constant 0 : i32
    %c0_i32_1 = arith.constant 0 : i32
    return %c0_i32, %c0_i32_0 : i32, i32
  }
  func.func @transform_6(%arg0: i32) -> (i32, i32) {
    %c0_i32 = arith.constant 0 : i32
    %c0_i32_0 = arith.constant 0 : i32
    %c0_i32_1 = arith.constant 0 : i32
    return %c0_i32, %c0_i32_0 : i32, i32
  }
  func.func @transform_7(%arg0: i32) -> (i32, i32) {
    %c0_i32 = arith.constant 0 : i32
    %c0_i32_0 = arith.constant 0 : i32
    %c0_i32_1 = arith.constant 0 : i32
    return %c0_i32, %c0_i32_0 : i32, i32
  }
  func.func @transform_8(%arg0: i32) -> (i32, i32) {
    %c0_i32 = arith.constant 0 : i32
    %c0_i32_0 = arith.constant 0 : i32
    %c0_i32_1 = arith.constant 0 : i32
    return %c0_i32, %c0_i32_0 : i32, i32
  }
  func.func @transform_9(%arg0: i32) -> (i32, i32) {
    %c0_i32 = arith.constant 0 : i32
    %c0_i32_0 = arith.constant 0 : i32
    %c0_i32_1 = arith.constant 0 : i32
    return %c0_i32, %c0_i32_0 : i32, i32
  }
  func.func @transform_10(%arg0: i32) -> (i32, i32) {
    %c0_i32 = arith.constant 0 : i32
    %c0_i32_0 = arith.constant 0 : i32
    %c0_i32_1 = arith.constant 0 : i32
    return %c0_i32, %c0_i32_0 : i32, i32
  }
  func.func @transform_11(%arg0: i32) -> i32 {
    %c0_i32 = arith.constant 0 : i32
    %c0_i32_0 = arith.constant 0 : i32
    return %c0_i32 : i32
  }
  func.func @transform_12(%arg0: i32) -> (i32, i32) {
    %c0_i32 = arith.constant 0 : i32
    %c0_i32_0 = arith.constant 0 : i32
    %c0_i32_1 = arith.constant 0 : i32
    return %c0_i32, %c0_i32_0 : i32, i32
  }
  func.func @transform_13(%arg0: i32) -> (i32, i32) {
    %c0_i32 = arith.constant 0 : i32
    %c0_i32_0 = arith.constant 0 : i32
    %c0_i32_1 = arith.constant 0 : i32
    return %c0_i32, %c0_i32_0 : i32, i32
  }
  func.func @transform_14(%arg0: i32) -> (i32, i32, i32) {
    %c0_i32 = arith.constant 0 : i32
    %c0_i32_0 = arith.constant 0 : i32
    %c0_i32_1 = arith.constant 0 : i32
    return %arg0, %c0_i32, %c0_i32_0 : i32, i32, i32
  }
}

</mosaic_0001>

<bundles_post_ra>
// kernel: residual_block_forward.1
= control target key start
LH: loop header
LB: loop body
LE: loop exit
PB: predicated region body
PF: predicated region fallthrough
CT: control target
= control target key end

     0   :  { %s9858_s0 = inlined_call_operand.vmem [shape: f32[2,256,36], index: 0, kind: input, shape index: {}]   ;;  %s9859_s1 = inlined_call_operand.vmem [shape: f32[36,128], index: 1, kind: input, shape index: {}]   ;;  %s9860_s2 = inlined_call_operand.vmem [shape: f32[1,128], index: 2, kind: input, shape index: {}]   ;;  %s9861_s3 = inlined_call_operand.vmem [shape: f32[9,128,128], index: 3, kind: input, shape index: {}]   ;;  %s9862_s4 = inlined_call_operand.vmem [shape: f32[1,128], index: 4, kind: input, shape index: {}]   ;;  %s9863_s5 = inlined_call_operand.vmem [shape: f32[128,128], index: 5, kind: input, shape index: {}]   ;;  %s9864_s6 = inlined_call_operand.vmem [shape: f32[1,128], index: 6, kind: input, shape index: {}]   ;;  %s9865_s7 = inlined_call_operand.vmem [shape: f32[128,128], index: 7, kind: input, shape index: {}]   ;;  %s9866_s8 = inlined_call_operand.vmem [shape: f32[1,128], index: 8, kind: input, shape index: {}]   ;;  %s9867_s9 = inlined_call_operand.vmem [shape: f32[256,256], index: 9, kind: input, shape index: {}]   ;;  %s9868_s10 = inlined_call_operand.vmem [shape: f32[256,256], index: 10, kind: input, shape index: {}]   ;;  %s9869_s11 = inlined_call_operand.<no memory space> [shape: f32[1], index: 11, kind: input, shape index: {}]   ;;  %s9870_s12 = inlined_call_operand.vmem [shape: f32[4,128], index: 12, kind: input, shape index: {}]   ;;  %s9871_s13 = inlined_call_operand.vmem [shape: f32[1,128], index: 13, kind: input, shape index: {}]   ;;  %s9872_s14 = inlined_call_operand.hbm [shape: f32[2,256,128], index: 14, kind: output, shape index: {}]  }
   0x1   :  { %9895 = sst [smem:[#allocation121_spill]] %s9858_s0 }
   0x2   :  { %9896 = sst [smem:[#allocation122_spill]] %s9859_s1 }
   0x3   :  { %19 = sst [smem:[#allocation5]] %s9869_s11 }
   0x4   :  { %20 = vsyncpa [#allocation7], 0 }
   0x5   :  { %22 = vsyncpa [#allocation7 + $0x1], 0  ;;  %s6185_s15 = smov 0   ;;  %s6187_s16 = smov 0  }
   0x6   :  { %s6189_s17 = smov 0   ;;  %s6191_s18 = smov 0  }
   0x7 LB: > { %s6206_s11 = sadd.s32 4294967295, %s6099_s18   ;;  %s5553_s19 = sadd.s32 4294967294, %s6099_s18   ;;  %s6099_s18 = sphi %s6191_s18, %s10287_s18   ;;  %s6095_s17 = sphi %s6189_s17, %s10286_s17   ;;  %s6091_s16 = sphi %s6187_s16, %s10285_s16   ;;  %s6087_s15 = sphi %s6185_s15, %s10284_s15  }
   0x8   : > { %s6210_s20 = sadd.s32 1, %s6099_s18   ;;  %s334_s21 = sadd.s32 1, %s6095_s17 }
   0x9   : > { %s331_s22 = ssub.s32 %s6099_s18, %s6210_s20  ;;  %p344_p0 = scmp.ne.s32.totalorder %s6095_s17, %s6091_s16 }
   0xa   : > { %p332_p1 = scmp.eq.s32.totalorder %s331_s22, 0  ;;  %p345_p2 = scmp.eq.s32.totalorder %s6206_s11, 1 }
   0xb   : > { %p350_p3 = scmp.ne.s32.totalorder %s6091_s16, %s6087_s15  ;;  %p351_p4 = scmp.eq.s32.totalorder %s5553_s19, 1 }
   0xc   : > { %s6221_s23 = scalar_select %p332_p1, %s6095_s17, %s334_s21  }
   0xd   : > { %p6223_p5 = por %p345_p2, %p344_p0  ;;  %p6227_p6 = por %p351_p4, %p350_p3 }
   0xe   : > { %9897 = sst [smem:[#allocation9_spill]] %s6221_s23  ;;  %p5556_p7 = scmp.ge.s32.totalorder %s6099_s18, 1 }
   0xf   : > { %p416_p8 = scmp.lt.s32.totalorder %s6099_s18, 3 }
  0x11   : > { %p417_p9 = pnand %p5556_p7, %p416_p8 }
  0x13   : > { %420 = sbr.rel (%p417_p9) target bundleno = 2280 (0x8e8), region = 76 }
  0x18   : > { %s9900_s1 = sld [smem:[#allocation122_spill]]  ;;  %vm605_vm0 = vcmask 1043456   ;;  %p462_p10 = scmp.lt.s32.totalorder %s6206_s11, 1  ;;  %vm508_vm1 = vcmask 293888   ;;  %v6274_v12 = vld [vmem:[%s9861_s3 + $0xf8] sm:$0xff]  ;;  %v6280_v13 = vld [vmem:[%s9861_s3 + $0xf0] sm:$0xff] }
  0x19   : > { %s9901_s0 = sld [smem:[#allocation121_spill]]  ;;  %1215 = vmatpush.msra.mxu2 %v6274_v12  ;;  %v6287_v15 = vld [vmem:[%s9861_s3 + $0xe8] sm:$0xff]  ;;  %v956_v16 = vld [vmem:[%s9861_s3 + $0x78] sm:$0xff]  ;;  %v955_v17 = vld [vmem:[%s9861_s3 + $0x70] sm:$0xff]  ;;  %v6101_v38 = vmov 0.0   ;;  %vm5006_vm8 = vcmask 31744  }
  0x1a   : > { %s463_s21 = scalar_select %p462_p10, %s6206_s11, 1  ;;  %957 = vmatpush.msra.mxu1 %v956_v16  ;;  %v6300_v18 = vld [vmem:[%s9861_s3 + $0xe0] sm:$0xff]  ;;  %v954_v19 = vld [vmem:[%s9861_s3 + $0x68] sm:$0xff]  ;;  %v6309_v20 = vld [vmem:[%s9861_s3 + $0xd8] sm:$0xff]  ;;  %754 = vst [vmem:[#allocation2] sm:$0xff] %v6101_v38 }
  0x1b   : > { %1216 = vmatpush.msra.mxu2 %v6280_v13  ;;  %v6315_v21 = vld [vmem:[%s9861_s3 + $0xd0] sm:$0xff]  ;;  %v6322_v23 = vld [vmem:[%s9861_s3 + $0xc8] sm:$0xff]  ;;  %v953_v24 = vld [vmem:[%s9861_s3 + $0x60] sm:$0xff]  ;;  %755 = vst [vmem:[#allocation2 + $0x8] sm:$0xff] %v6101_v38  ;;  %s4231_s26 = sld [smem:[#allocation5]]  ;;  %s459_s29 = sand.u32 1, %s6091_s16  }
  0x1c   : > { %s5792_s27 = sshll.u32 %s463_s21, 8  ;;  %958 = vmatpush.msra.mxu1 %v955_v17  ;;  %v952_v25 = vld [vmem:[%s9861_s3 + $0x58] sm:$0xff]  ;;  %v6335_v26 = vld [vmem:[%s9861_s3 + $0xc0] sm:$0xff]  ;;  %v951_v27 = vld [vmem:[%s9861_s3 + $0x50] sm:$0xff]  ;;  %756 = vst [vmem:[#allocation2 + $0x10] sm:$0x3] %v6101_v38 }
  0x1d   : > { %1217 = vmatpush.msra.mxu2 %v6287_v15  ;;  %v6344_v28 = vld [vmem:[%s9861_s3 + $0xb8] sm:$0xff]  ;;  %v950_v29 = vld [vmem:[%s9861_s3 + $0x48] sm:$0xff]  ;;  %v6353_v30 = vld [vmem:[%s9861_s3 + $0xb0] sm:$0xff]  ;;  %757 = vst [vmem:[#allocation2 + $0x18] sm:$0xff] %v6101_v38  ;;  %s5557_s30 = sshll.u32 %s459_s29, 8  ;;  %s5793_s22 = sshll.u32 %s6206_s11, 8 }
  0x1e   : > { %v503_v0 = vld [vmem:[%s9900_s1 + $0x20] sm:$0xf]  ;;  %v502_v1 = vld [vmem:[%s9900_s1 + $0x18] sm:$0xff]  ;;  %v501_v2 = vld [vmem:[%s9900_s1 + $0x10] sm:$0xff]  ;;  %959 = vmatpush.msra.mxu1 %v954_v19  ;;  %758 = vst [vmem:[#allocation2 + $0x20] sm:$0xff] %v6101_v38 }
  0x1f   : > { %5560 = vmatpush.msk.msra.mxu0 %vm605_vm0, %v503_v0  ;;  %5794 = vmatpush.msk.msra.mxu3 %vm605_vm0, %v503_v0  ;;  %v500_v3 = vld [vmem:[%s9900_s1 + $0x8] sm:$0xff]  ;;  %s6252_s23 = scalar_lea.vmem %s9901_s0, %s5792_s27  ;;  %v499_v4 = vld [vmem:[%s9900_s1] sm:$0xff]  ;;  %v948_v34 = vld [vmem:[%s9861_s3 + $0x38] sm:$0xff]  ;;  %759 = vst [vmem:[#allocation2 + $0x28] sm:$0x3] %v6101_v38  ;;  %s6103_s27 = smov 112  }
  0x20   : > { %v467_v5 = vld [vmem:[%s6252_s23] sm:$0xff]  ;;  %v468_v6 = vld [vmem:[%s6252_s23 + $0x8] sm:$0xff]  ;;  %v469_v7 = vld [vmem:[%s6252_s23 + $0x10] sm:$0xff]  ;;  %1218 = vmatpush.msra.mxu2 %v6300_v18  ;;  %960 = vmatpush.msra.mxu1 %v953_v24  ;;  %760 = vst [vmem:[#allocation2 + $0x30] sm:$0xff] %v6101_v38  ;;  %s5487_s0 = scalar_lea.hbm %s9872_s14, %s5793_s22 }
  0x21   : > { %621 = vmatpush.msra.mxu0 %v502_v1  ;;  %5795 = vmatpush.msra.mxu3 %v502_v1  ;;  %v470_v8 = vld [vmem:[%s6252_s23 + $0x18] sm:$0xff]  ;;  %v471_v9 = vld [vmem:[%s6252_s23 + $0x20] sm:$0xff]  ;;  %v472_v10 = vld [vmem:[%s6252_s23 + $0x28] sm:$0xff]  ;;  %761 = vst [vmem:[#allocation2 + $0x38] sm:$0xff] %v6101_v38  ;;  %s5490_s28 = sshll.u32 %s5487_s0, 4  ;;  %s5491_s28 = int_to_ptr.hbm [resolvable:$true] %s5490_s28 }
  0x22   : > { %v473_v11 = vld [vmem:[%s6252_s23 + $0x30] sm:$0xff]  ;;  %v474_v14 = vld [vmem:[%s6252_s23 + $0x38] sm:$0xff]  ;;  %1219 = vmatpush.msra.mxu2 %v6309_v20  ;;  %v475_v22 = vld [vmem:[%s6252_s23 + $0x40] sm:$0xff]  ;;  %961 = vmatpush.msra.mxu1 %v952_v25  ;;  %762 = vst [vmem:[#allocation2 + $0x40] sm:$0x3] %v6101_v38  ;;  %s6051_s19 = sshra.s32 %s5491_s28, 4  ;;  %s6052_s19 = int_to_ptr.hbm [resolvable:$true] %s6051_s19 }
  0x23   : > { %622 = vmatpush.msra.mxu0 %v501_v2  ;;  %5796 = vmatpush.msra.mxu3 %v501_v2  ;;  %v476_v31 = vld [vmem:[%s6252_s23 + $0x48] sm:$0xff]  ;;  %v949_v33 = vld [vmem:[%s9861_s3 + $0x40] sm:$0xff]  ;;  %v947_v36 = vld [vmem:[%s9861_s3 + $0x30] sm:$0xff]  ;;  %763 = vst [vmem:[#allocation2 + $0x48] sm:$0xff] %v6101_v38  ;;  %s6053_s21 = scalar_lea.hbm %s6052_s19, 256  ;;  %p6058_p0 = scmp.lt.s32.totalorder %s6052_s19, %s9872_s14 }
  0x24   : > { %1220 = vmatpush.msra.mxu2 %v6315_v21  ;;  %962 = vmatpush.msra.mxu1 %v951_v27  ;;  %v6360_v32 = vld [vmem:[%s9861_s3 + $0xa8] sm:$0xff]  ;;  %v6373_v35 = vld [vmem:[%s9861_s3 + $0xa0] sm:$0xff]  ;;  %v6382_v37 = vld [vmem:[%s9861_s3 + $0x98] sm:$0xff]  ;;  %764 = vst [vmem:[#allocation2 + $0x50] sm:$0xff] %v6101_v38  ;;  %p6054_p11 = scmp.ne.s32.totalorder %s6052_s19, %s6053_s21 }
  0x25   : > { %623 = vmatpush.msra.mxu0 %v500_v3  ;;  %5797 = vmatpush.msra.mxu3 %v500_v3  ;;  %v946_v39 = vld [vmem:[%s9861_s3 + $0x28] sm:$0xff]  ;;  %v6393_v40 = vld [vmem:[%s9861_s3 + $0x90] sm:$0xff]  ;;  %v945_v43 = vld [vmem:[%s9861_s3 + $0x20] sm:$0xff]  ;;  %765 = vst [vmem:[#allocation2 + $0x58] sm:$0x3] %v6101_v38 }
  0x26   : > { %1221 = vmatpush.msra.mxu2 %v6322_v23  ;;  %963 = vmatpush.msra.mxu1 %v950_v29  ;;  %v477_v41 = vld [vmem:[%s6252_s23 + $0x50] sm:$0xff]  ;;  %v6402_v42 = vld [vmem:[%s9861_s3 + $0x88] sm:$0xff]  ;;  %v944_v44 = vld [vmem:[%s9861_s3 + $0x18] sm:$0xff]  ;;  %766 = vst [vmem:[#allocation2 + $0x60] sm:$0xff] %v6101_v38  ;;  %p6055_p12 = pnand %p6054_p11, %p6223_p5 }
  0x27   : > { %624 = vmatpush.msra.mxu0 %v499_v4  ;;  %5798 = vmatpush.msra.mxu3 %v499_v4  ;;  %v6418_v45 = vld [vmem:[%s9861_s3 + $0x80] sm:$0xff]  ;;  %v943_v46 = vld [vmem:[%s9861_s3 + $0x10] sm:$0xff]  ;;  %v942_v48 = vld [vmem:[%s9861_s3 + $0x8] sm:$0xff]  ;;  %767 = vst [vmem:[#allocation2 + $0x68] sm:$0xff] %v6101_v38 }
  0x28   : > { %5561 = vmatmul.msk.f32.vlgmr.msra.gmra.mxu0 %vm508_vm1, %v467_v5  ;;  %1222 = vmatpush.msra.mxu2 %v6335_v26  ;;  %v1134_v47 = vld [vmem:[#allocation2 + $0x1] sm:$0xff]  ;;  %v478_v49 = vld [vmem:[%s6252_s23 + $0x58] sm:$0xff]  ;;  %768 = vst [vmem:[#allocation2 + $0x70] sm:$0x3] %v6101_v38  ;;  %v1135_v51 = vld [vmem:[#allocation2 + $0x9] sm:$0xff]  ;;  %p6056_p13 = pneg %p6055_p12 }
  0x29   : > { %5799 = vmatpush.msrb.mxu3 %v956_v16  ;;  %964 = vmatpush.msra.mxu1 %v949_v33  ;;  %v941_v50 = vld [vmem:[%s9861_s3] sm:$0xff]  ;;  %769 = vst [vmem:[#allocation2 + $0x78] sm:$0xff] %v6101_v38  ;;  %v480_v53 = vld [vmem:[%s6252_s23 + $0x68] sm:$0xff]  ;;  %v481_v54 = vld [vmem:[%s6252_s23 + $0x70] sm:$0xff] }
  0x2a   : > { %1223 = vmatpush.msra.mxu2 %v6344_v28  ;;  %770 = vst [vmem:[#allocation2 + $0x80] sm:$0xff] %v6101_v38  ;;  %v479_v52 = vld [vmem:[%s6252_s23 + $0x60] sm:$0xff]  ;;  %v482_v55 = vld [vmem:[%s6252_s23 + $0x78] sm:$0xff]  ;;  %v484_v62 = vld [vmem:[%s6252_s23 + $0x88] sm:$0xff] }
  0x2b   : > { %5800 = vmatpush.msrb.mxu3 %v955_v17  ;;  %965 = vmatpush.msra.mxu1 %v948_v34  ;;  %771 = vst [vmem:[#allocation2 + $0x88] sm:$0x3] %v6101_v38  ;;  %v6487_v56 = vld [vmem:[%s9860_s2] ss:$0 sm:$0xff]  ;;  %v485_v3 = vld [vmem:[%s6252_s23 + $0x90] sm:$0xff] }
  0x2c   : > { %1224 = vmatpush.msra.mxu2 %v6353_v30  ;;  %772 = vst [vmem:[#allocation2 + $0x90] sm:$0xff] %v6101_v38  ;;  %v483_v58 = vld [vmem:[%s6252_s23 + $0x80] sm:$0xff] }
  0x2d   : > { %5801 = vmatpush.msrb.mxu3 %v954_v19  ;;  %966 = vmatpush.msra.mxu1 %v947_v36  ;;  %773 = vst [vmem:[#allocation2 + $0x98] sm:$0xff] %v6101_v38  ;;  %v487_v16 = vld [vmem:[%s6252_s23 + $0xa0] sm:$0xff] }
  0x2e   : > { %1225 = vmatpush.msra.mxu2 %v6360_v32  ;;  %774 = vst [vmem:[#allocation2 + $0xa0] sm:$0x3] %v6101_v38 }
  0x2f   : > { %5802 = vmatpush.msrb.mxu3 %v953_v24  ;;  %967 = vmatpush.msra.mxu1 %v946_v39  ;;  %775 = vst [vmem:[#allocation2 + $0xa8] sm:$0xff] %v6101_v38 }
  0x30   : > { %5562 = vmatmul.msk.f32.gmra.mxu0 %vm508_vm1, %v468_v6  ;;  %1226 = vmatpush.msra.mxu2 %v6373_v35  ;;  %776 = vst [vmem:[#allocation2 + $0xb0] sm:$0xff] %v6101_v38 }
  0x31   : > { %5803 = vmatpush.msrb.mxu3 %v952_v25  ;;  %968 = vmatpush.msra.mxu1 %v945_v43  ;;  %777 = vst [vmem:[#allocation2 + $0xb8] sm:$0x3] %v6101_v38  ;;  %v5639_v25 = vld [vmem:[%s9861_s3 + $0x1f0] sm:$0xff] }
  0x32   : > { %1227 = vmatpush.msra.mxu2 %v6382_v37  ;;  %778 = vst [vmem:[#allocation2 + $0xc0] sm:$0xff] %v6101_v38 }
  0x33   : > { %5804 = vmatpush.msrb.mxu3 %v951_v27  ;;  %969 = vmatpush.msra.mxu1 %v944_v44  ;;  %779 = vst [vmem:[#allocation2 + $0xc8] sm:$0xff] %v6101_v38  ;;  %v5638_v27 = vld [vmem:[%s9861_s3 + $0x1e8] sm:$0xff] }
  0x34   : > { %1228 = vmatpush.msra.mxu2 %v6393_v40  ;;  %780 = vst [vmem:[#allocation2 + $0xd0] sm:$0x3] %v6101_v38 }
  0x35   : > { %5805 = vmatpush.msrb.mxu3 %v950_v29  ;;  %970 = vmatpush.msra.mxu1 %v943_v46  ;;  %781 = vst [vmem:[#allocation2 + $0xd8] sm:$0xff] %v6101_v38 }
  0x36   : > { %1229 = vmatpush.msra.mxu2 %v6402_v42  ;;  %782 = vst [vmem:[#allocation2 + $0xe0] sm:$0xff] %v6101_v38 }
  0x37   : > { %5806 = vmatpush.msrb.mxu3 %v949_v33  ;;  %971 = vmatpush.msra.mxu1 %v942_v48  ;;  %783 = vst [vmem:[#allocation2 + $0xe8] sm:$0x3] %v6101_v38 }
  0x38   : > { %5563 = vmatmul.msk.f32.gmra.mxu0 %vm508_vm1, %v469_v7  ;;  %1230 = vmatpush.msra.mxu2 %v6418_v45  ;;  %784 = vst [vmem:[#allocation2 + $0xf0] sm:$0xff] %v6101_v38 }
  0x39   : > { %5807 = vmatpush.msrb.mxu3 %v948_v34  ;;  %1231 = vmatmul.f32.vlgmr.msra.gmra.mxu2 %v1134_v47  ;;  %785 = vst [vmem:[#allocation2 + $0xf8] sm:$0xff] %v6101_v38  ;;  %v5637_v34 = vld [vmem:[%s9861_s3 + $0x1e0] sm:$0xff] }
  0x3a   : > { %972 = vmatpush.msra.mxu1 %v941_v50  ;;  %786 = vst [vmem:[#allocation2 + $0x100] sm:$0x3] %v6101_v38 }
  0x3b   : > { %5808 = vmatpush.msrb.mxu3 %v947_v36  ;;  %973 = vmatmul.f32.vlgmr.msra.gmra.mxu1 %v6101_v38  ;;  %787 = vst [vmem:[#allocation2 + $0x108] sm:$0xff] %v6101_v38 }
  0x3c   : > { %788 = vst [vmem:[#allocation2 + $0x110] sm:$0xff] %v6101_v38 }
  0x3d   : > { %5809 = vmatpush.msrb.mxu3 %v946_v39  ;;  %789 = vst [vmem:[#allocation2 + $0x118] sm:$0x3] %v6101_v38 }
  0x3e   : > { %790 = vst [vmem:[#allocation2 + $0x120] sm:$0xff] %v6101_v38 }
  0x3f   : > { %5810 = vmatpush.msrb.mxu3 %v945_v43  ;;  %791 = vst [vmem:[#allocation2 + $0x128] sm:$0xff] %v6101_v38  ;;  %v5634_v43 = vld [vmem:[%s9861_s3 + $0x1c8] sm:$0xff] }
  0x40   : > { %5564 = vmatmul.msk.f32.gmra.mxu0 %vm508_vm1, %v470_v8  ;;  %792 = vst [vmem:[#allocation2 + $0x130] sm:$0x3] %v6101_v38  ;;  %v486_v8 = vld [vmem:[%s6252_s23 + $0x98] sm:$0xff] }
  0x41   : > { %5811 = vmatpush.msrb.mxu3 %v944_v44  ;;  %1234 = vmatmul.f32.gmra.mxu2 %v1135_v51  ;;  %793 = vst [vmem:[#allocation2 + $0x138] sm:$0xff] %v6101_v38 }
  0x42   : > { %794 = vst [vmem:[#allocation2 + $0x140] sm:$0xff] %v6101_v38 }
  0x43   : > { %5812 = vmatpush.msrb.mxu3 %v943_v46  ;;  %976 = vmatmul.f32.gmra.mxu1 %v6101_v38  ;;  %795 = vst [vmem:[#allocation2 + $0x148] sm:$0x3] %v6101_v38  ;;  %v489_v46 = vld [vmem:[%s6252_s23 + $0xb0] sm:$0xff] }
  0x44   : > { %796 = vst [vmem:[#allocation2 + $0x150] sm:$0xff] %v6101_v38 }
  0x45   : > { %5813 = vmatpush.msrb.mxu3 %v942_v48  ;;  %797 = vst [vmem:[#allocation2 + $0x158] sm:$0xff] %v6101_v38  ;;  %v5633_v48 = vld [vmem:[%s9861_s3 + $0x1c0] sm:$0xff] }
  0x46   : > { %798 = vst [vmem:[#allocation2 + $0x160] sm:$0x3] %v6101_v38 }
  0x47   : > { %5814 = vmatpush.msrb.mxu3 %v941_v50  ;;  %799 = vst [vmem:[#allocation2 + $0x168] sm:$0xff] %v6101_v38  ;;  %v5632_v50 = vld [vmem:[%s9861_s3 + $0x1b8] sm:$0xff] }
  0x48   : > { %5565 = vmatmul.msk.f32.gmra.mxu0 %vm508_vm1, %v471_v9  ;;  %800 = vst [vmem:[#allocation2 + $0x170] sm:$0xff] %v6101_v38 }
  0x49   : > { %801 = vst [vmem:[#allocation2 + $0x178] sm:$0x3] %v6101_v38 }
  0x4a   : > { %802 = vst [vmem:[#allocation2 + $0x180] sm:$0xff] %v6101_v38 }
  0x4b   : > { %803 = vst [vmem:[#allocation2 + $0x188] sm:$0xff] %v6101_v38 }
  0x4c   : > { %804 = vst [vmem:[#allocation2 + $0x190] sm:$0x3] %v6101_v38 }
  0x4d   : > { %805 = vst [vmem:[#allocation2 + $0x198] sm:$0xff] %v6101_v38 }
  0x4e   : > { %806 = vst [vmem:[#allocation2 + $0x1a0] sm:$0xff] %v6101_v38 }
  0x4f   : > { %807 = vst [vmem:[#allocation2 + $0x1a8] sm:$0x3] %v6101_v38 }
  0x50   : > { %5566 = vmatmul.msk.f32.gmra.mxu0 %vm508_vm1, %v472_v10  ;;  %3231 = vst [vmem:[#allocation4] sm:$0xff] %v6101_v38  ;;  %v5636_v38 = vld [vmem:[%s9861_s3 + $0x1d8] sm:$0xff] }
  0x58   : > { %5567 = vmatmul.msk.f32.gmra.mxu0 %vm508_vm1, %v473_v11 }
  0x60   : > { %5568 = vmatmul.msk.f32.gmra.mxu0 %vm508_vm1, %v474_v14 }
  0x68   : > { %5569 = vmatmul.msk.f32.gmra.mxu0 %vm508_vm1, %v475_v22  ;;  %v5640_v22 = vld [vmem:[%s9861_s3 + $0x1f8] sm:$0xff] }
  0x69   : > { %1731 = vmatpush.msrb.mxu0 %v5640_v22 }
  0x6b   : > { %1732 = vmatpush.msrb.mxu0 %v5639_v25 }
  0x6d   : > { %1733 = vmatpush.msrb.mxu0 %v5638_v27 }
  0x6f   : > { %1734 = vmatpush.msrb.mxu0 %v5637_v34  ;;  %v5670_v34 = vld [vmem:[%s9861_s3 + $0x2e8] sm:$0xff] }
  0x70   : > { %5570 = vmatmul.msk.f32.gmra.mxu0 %vm508_vm1, %v476_v31  ;;  %v488_v31 = vld [vmem:[%s6252_s23 + $0xa8] sm:$0xff] }
  0x71   : > { %1735 = vmatpush.msrb.mxu0 %v5636_v38 }
  0x78   : > { %5571 = vmatmul.msk.f32.gmra.mxu0 %vm508_vm1, %v477_v41  ;;  %v5635_v41 = vld [vmem:[%s9861_s3 + $0x1d0] sm:$0xff] }
  0x79   : > { %1736 = vmatpush.msrb.mxu0 %v5635_v41  ;;  %v5669_v41 = vld [vmem:[%s9861_s3 + $0x2e0] sm:$0xff] }
  0x7b   : > { %1737 = vmatpush.msrb.mxu0 %v5634_v43 }
  0x7d   : > { %1738 = vmatpush.msrb.mxu0 %v5633_v48  ;;  %v5666_v48 = vld [vmem:[%s9861_s3 + $0x2c8] sm:$0xff] }
  0x7f   : > { %1739 = vmatpush.msrb.mxu0 %v5632_v50 }
  0x80   : > { %5572 = vmatmul.msk.f32.gmra.mxu0 %vm508_vm1, %v478_v49 }
  0x88   : > { %5573 = vmatmul.msk.f32.gmra.mxu0 %vm508_vm1, %v479_v52  ;;  %v495_v52 = vld [vmem:[%s6252_s23 + $0xe0] sm:$0xff] }
  0x89   : > { %5589 = vmatmul.msk.f32.vlgmr.msra.gmra.mxu3 %vm508_vm1, %v495_v52  ;;  %v5665_v52 = vld [vmem:[%s9861_s3 + $0x2c0] sm:$0xff] }
  0x8a   : > { %5815 = vmatpush.msra.mxu3 %v6274_v12  ;;  %v5628_v12 = vld [vmem:[%s9861_s3 + $0x198] sm:$0xff] }
  0x8c   : > { %5816 = vmatpush.msra.mxu3 %v6280_v13  ;;  %v5627_v13 = vld [vmem:[%s9861_s3 + $0x190] sm:$0xff] }
  0x8e   : > { %5817 = vmatpush.msra.mxu3 %v6287_v15  ;;  %v5626_v15 = vld [vmem:[%s9861_s3 + $0x188] sm:$0xff] }
  0x90   : > { %5574 = vmatmul.msk.f32.gmra.mxu0 %vm508_vm1, %v480_v53  ;;  %v5631_v53 = vld [vmem:[%s9861_s3 + $0x1b0] sm:$0xff]  ;;  %5818 = vmatpush.msra.mxu3 %v6300_v18 }
  0x91   : > { %1740 = vmatpush.msrb.mxu0 %v5631_v53 }
  0x92   : > { %5819 = vmatpush.msra.mxu3 %v6309_v20  ;;  %v492_v20 = vld [vmem:[%s6252_s23 + $0xc8] sm:$0xff] }
  0x94   : > { %5820 = vmatpush.msra.mxu3 %v6315_v21 }
  0x96   : > { %5821 = vmatpush.msra.mxu3 %v6322_v23 }
  0x98   : > { %5575 = vmatmul.msk.f32.gmra.mxu0 %vm508_vm1, %v481_v54  ;;  %v5630_v54 = vld [vmem:[%s9861_s3 + $0x1a8] sm:$0xff]  ;;  %5822 = vmatpush.msra.mxu3 %v6335_v26  ;;  %v493_v26 = vld [vmem:[%s6252_s23 + $0xd0] sm:$0xff] }
  0x99   : > { %1741 = vmatpush.msrb.mxu0 %v5630_v54  ;;  %v5664_v54 = vld [vmem:[%s9861_s3 + $0x2b8] sm:$0xff] }
  0x9a   : > { %5823 = vmatpush.msra.mxu3 %v6344_v28 }
  0x9c   : > { %5824 = vmatpush.msra.mxu3 %v6353_v30 }
  0x9e   : > { %5825 = vmatpush.msra.mxu3 %v6360_v32 }
  0xa0   : > { %5576 = vmatmul.msk.f32.gmra.mxu0 %vm508_vm1, %v482_v55  ;;  %5826 = vmatpush.msra.mxu3 %v6373_v35  ;;  %v494_v35 = vld [vmem:[%s6252_s23 + $0xd8] sm:$0xff] }
  0xa2   : > { %5827 = vmatpush.msra.mxu3 %v6382_v37 }
  0xa4   : > { %5828 = vmatpush.msra.mxu3 %v6393_v40 }
  0xa5   : > { %v626_v57 = vpop.f32.mrf.mxu0 }
  0xa6   : > { %v627_v59 = vadd.f32 %v6487_v56, %v626_v57  ;;  %v490_v57 = vld [vmem:[%s6252_s23 + $0xb8] sm:$0xff]  ;;  %5829 = vmatpush.msra.mxu3 %v6402_v42 }
  0xa8   : > { %v6497_v60 = vmax.f32 %v627_v59, 0.0  ;;  %5577 = vmatmul.msk.f32.gmra.mxu0 %vm508_vm1, %v483_v58  ;;  %v5629_v59 = vld [vmem:[%s9861_s3 + $0x1a0] sm:$0xff]  ;;  %5830 = vmatpush.msra.mxu3 %v6418_v45 }
  0xa9   : > { %1742 = vmatpush.msrb.mxu0 %v5629_v59  ;;  %v5662_v59 = vld [vmem:[%s9861_s3 + $0x2a8] sm:$0xff] }
  0xaa   : > { %809 = vst [vmem:[#allocation2 + $0x19] sm:$0xff] %v6497_v60  ;;  %1237 = vmatmul.f32.gmra.mxu2 %v6497_v60 }
  0xab   : > { %1743 = vmatpush.msrb.mxu0 %v5628_v12 }
  0xad   : > { %v629_v61 = vpop.f32.mrf.mxu0  ;;  %1744 = vmatpush.msrb.mxu0 %v5627_v13 }
  0xae   : > { %v630_v63 = vadd.f32 %v6487_v56, %v629_v61 }
  0xaf   : > { %1745 = vmatpush.msrb.mxu0 %v5626_v15 }
  0xb0   : > { %v6504_v0 = vmax.f32 %v630_v63, 0.0  ;;  %5578 = vmatmul.msk.f32.gmra.mxu0 %vm508_vm1, %v484_v62  ;;  %v496_v63 = vld [vmem:[%s6252_s23 + $0xe8] sm:$0xff] }
  0xb1   : > { %v6507_v1 = vld [vmem:[#allocation2 + $0x18] sm:$0xff]  ;;  %5590 = vmatmul.msk.f32.gmra.mxu3 %vm508_vm1, %v496_v63  ;;  %v5661_v63 = vld [vmem:[%s9861_s3 + $0x2a0] sm:$0xff] }
  0xb2   : > { %810 = vst [vmem:[#allocation2 + $0x21] sm:$0xff] %v6504_v0  ;;  %979 = vmatmul.f32.gmra.mxu1 %v6507_v1  ;;  %1240 = vmatmul.f32.gmra.mxu2 %v6504_v0 }
  0xb5   : > { %v632_v2 = vpop.f32.mrf.mxu0 }
  0xb6   : > { %v633_v4 = vadd.f32 %v6487_v56, %v632_v2 }
  0xb8   : > { %v6514_v5 = vmax.f32 %v633_v4, 0.0  ;;  %5579 = vmatmul.msk.f32.gmra.mxu0 %vm508_vm1, %v485_v3  ;;  %v491_v3 = vld [vmem:[%s6252_s23 + $0xc0] sm:$0xff] }
  0xb9   : > { %v6517_v6 = vld [vmem:[#allocation2 + $0x20] sm:$0xff] }
  0xba   : > { %811 = vst [vmem:[#allocation2 + $0x31] sm:$0xff] %v6514_v5  ;;  %982 = vmatmul.f32.gmra.mxu1 %v6517_v6  ;;  %1243 = vmatmul.f32.gmra.mxu2 %v6514_v5 }
  0xbc   : > { %v6751_v15 = vpop.f32.mrf.mxu2 }
  0xbd   : > { %v635_v7 = vpop.f32.mrf.mxu0  ;;  %9903 = vst [vmem:[#allocation11_spill] sm:$0xff] %v6751_v15 }
  0xbe   : > { %v636_v9 = vadd.f32 %v6487_v56, %v635_v7  ;;  %v5625_v7 = vld [vmem:[%s9861_s3 + $0x180] sm:$0xff] }
  0xbf   : > { %1746 = vmatpush.msrb.mxu0 %v5625_v7 }
  0xc0   : > { %v6524_v10 = vmax.f32 %v636_v9, 0.0  ;;  %5580 = vmatmul.msk.f32.gmra.mxu0 %vm508_vm1, %v486_v8 }
  0xc1   : > { %v6527_v11 = vld [vmem:[#allocation2 + $0x30] sm:$0xff] }
  0xc2   : > { %812 = vst [vmem:[#allocation2 + $0x39] sm:$0xff] %v6524_v10  ;;  %985 = vmatmul.f32.gmra.mxu1 %v6527_v11  ;;  %1246 = vmatmul.f32.gmra.mxu2 %v6524_v10 }
  0xc5   : > { %v638_v14 = vpop.f32.mrf.mxu0 }
  0xc6   : > { %v639_v17 = vadd.f32 %v6487_v56, %v638_v14 }
  0xc8   : > { %v6534_v19 = vmax.f32 %v639_v17, 0.0  ;;  %5581 = vmatmul.msk.f32.gmra.mxu0 %vm508_vm1, %v487_v16 }
  0xc9   : > { %v6540_v24 = vld [vmem:[#allocation2 + $0x38] sm:$0xff] }
  0xca   : > { %813 = vst [vmem:[#allocation2 + $0x49] sm:$0xff] %v6534_v19  ;;  %988 = vmatmul.f32.gmra.mxu1 %v6540_v24  ;;  %1249 = vmatmul.f32.gmra.mxu2 %v6534_v19 }
  0xcd   : > { %v641_v29 = vpop.f32.mrf.mxu0 }
  0xce   : > { %v642_v33 = vadd.f32 %v6487_v56, %v641_v29  ;;  %v5672_v29 = vld [vmem:[%s9861_s3 + $0x2f8] sm:$0xff] }
  0xcf   : > { %2247 = vmatpush.msrb.mxu2 %v5672_v29 }
  0xd0   : > { %v6556_v36 = vmax.f32 %v642_v33, 0.0  ;;  %5582 = vmatmul.msk.f32.gmra.mxu0 %vm508_vm1, %v488_v31  ;;  %v5671_v31 = vld [vmem:[%s9861_s3 + $0x2f0] sm:$0xff] }
  0xd1   : > { %v6562_v39 = vld [vmem:[#allocation2 + $0x48] sm:$0xff]  ;;  %2248 = vmatpush.msrb.mxu2 %v5671_v31 }
  0xd2   : > { %814 = vst [vmem:[#allocation2 + $0x51] sm:$0xff] %v6556_v36  ;;  %991 = vmatmul.f32.gmra.mxu1 %v6562_v39  ;;  %1252 = vmatmul.f32.gmra.mxu2 %v6556_v36 }
  0xd3   : > { %2249 = vmatpush.msrb.mxu2 %v5670_v34 }
  0xd5   : > { %v644_v44 = vpop.f32.mrf.mxu0  ;;  %2250 = vmatpush.msrb.mxu2 %v5669_v41  ;;  %v5653_v41 = vld [vmem:[%s9861_s3 + $0x260] sm:$0xff] }
  0xd6   : > { %v645_v47 = vadd.f32 %v6487_v56, %v644_v44  ;;  %v5668_v44 = vld [vmem:[%s9861_s3 + $0x2d8] sm:$0xff] }
  0xd7   : > { %2251 = vmatpush.msrb.mxu2 %v5668_v44 }
  0xd8   : > { %v6578_v49 = vmax.f32 %v645_v47, 0.0  ;;  %5583 = vmatmul.msk.f32.gmra.mxu0 %vm508_vm1, %v489_v46 }
  0xd9   : > { %v6584_v51 = vld [vmem:[#allocation2 + $0x50] sm:$0xff] }
  0xda   : > { %815 = vst [vmem:[#allocation2 + $0x61] sm:$0xff] %v6578_v49  ;;  %994 = vmatmul.f32.gmra.mxu1 %v6584_v51  ;;  %1255 = vmatmul.f32.gmra.mxu2 %v6578_v49 }
  0xdd   : > { %v647_v55 = vpop.f32.mrf.mxu0 }
  0xde   : > { %v648_v58 = vadd.f32 %v6487_v56, %v647_v55  ;;  %v6734_v55 = vpop.f32.mrf.mxu1 }
  0xdf   : > { %9902 = vst [vmem:[#allocation10_spill] sm:$0xff] %v6734_v55  ;;  %v6960_v55 = vld [vmem:[#allocation2 + $0x52] sm:$0xff] }
  0xe0   : > { %v6604_v61 = vmax.f32 %v648_v58, 0.0  ;;  %5584 = vmatmul.msk.f32.gmra.mxu0 %vm508_vm1, %v490_v57 }
  0xe1   : > { %v6611_v62 = vld [vmem:[#allocation2 + $0x60] sm:$0xff] }
  0xe2   : > { %816 = vst [vmem:[#allocation2 + $0x69] sm:$0xff] %v6604_v61  ;;  %997 = vmatmul.f32.gmra.mxu1 %v6611_v62  ;;  %1258 = vmatmul.f32.gmra.mxu2 %v6604_v61 }
  0xe5   : > { %v650_v2 = vpop.f32.mrf.mxu0 }
  0xe6   : > { %v651_v4 = vadd.f32 %v6487_v56, %v650_v2  ;;  %v5660_v2 = vld [vmem:[%s9861_s3 + $0x298] sm:$0xff] }
  0xe8   : > { %v6631_v8 = vmax.f32 %v651_v4, 0.0  ;;  %5585 = vmatmul.msk.f32.gmra.mxu0 %vm508_vm1, %v491_v3  ;;  %v6762_v4 = vpop.f32.mrf.mxu1 }
  0xe9   : > { %v6635_v18 = vld [vmem:[#allocation2 + $0x68] sm:$0xff]  ;;  %9904 = vst [vmem:[#allocation12_spill] sm:$0xff] %v6762_v4 }
  0xea   : > { %817 = vst [vmem:[#allocation2 + $0x79] sm:$0xff] %v6631_v8  ;;  %1000 = vmatmul.f32.gmra.mxu1 %v6635_v18  ;;  %1261 = vmatmul.f32.gmra.mxu2 %v6631_v8 }
  0xed   : > { %v653_v9 = vpop.f32.mrf.mxu0 }
  0xee   : > { %v654_v14 = vadd.f32 %v6487_v56, %v653_v9  ;;  %v5658_v9 = vld [vmem:[%s9861_s3 + $0x288] sm:$0xff] }
  0xf0   : > { %v6645_v21 = vmax.f32 %v654_v14, 0.0  ;;  %5586 = vmatmul.msk.f32.gmra.mxu0 %vm508_vm1, %v492_v20  ;;  %v5657_v14 = vld [vmem:[%s9861_s3 + $0x280] sm:$0xff] }
  0xf1   : > { %v6648_v16 = vld [vmem:[#allocation2 + $0x78] sm:$0xff] }
  0xf2   : > { %818 = vst [vmem:[#allocation2 + $0x81] sm:$0xff] %v6645_v21  ;;  %1003 = vmatmul.f32.gmra.mxu1 %v6648_v16  ;;  %1264 = vmatmul.f32.gmra.mxu2 %v6645_v21 }
  0xf5   : > { %v656_v23 = vpop.f32.mrf.mxu0 }
  0xf6   : > { %v657_v28 = vadd.f32 %v6487_v56, %v656_v23 }
  0xf8   : > { %v6659_v17 = vmax.f32 %v657_v28, 0.0  ;;  %5587 = vmatmul.msk.f32.gmra.mxu0 %vm508_vm1, %v493_v26  ;;  %v6779_v26 = vpop.f32.mrf.mxu2 }
  0xf9   : > { %v6662_v30 = vld [vmem:[#allocation2 + $0x80] sm:$0xff]  ;;  %9905 = vst [vmem:[#allocation13_spill] sm:$0xff] %v6779_v26 }
  0xfa   : > { %819 = vst [vmem:[#allocation2 + $0x91] sm:$0xff] %v6659_v17  ;;  %1006 = vmatmul.f32.gmra.mxu1 %v6662_v30  ;;  %1267 = vmatmul.f32.gmra.mxu2 %v6659_v17 }
  0xfd   : > { %v659_v32 = vpop.f32.mrf.mxu0 }
  0xfe   : > { %v660_v37 = vadd.f32 %v6487_v56, %v659_v32 }
 0x100   : > { %v6672_v22 = vmax.f32 %v660_v37, 0.0  ;;  %5588 = vmatmul.msk.f32.gmra.mxu0 %vm508_vm1, %v494_v35 }
 0x101   : > { %v6675_v25 = vld [vmem:[#allocation2 + $0x90] sm:$0xff] }
 0x102   : > { %820 = vst [vmem:[#allocation2 + $0x99] sm:$0xff] %v6672_v22  ;;  %1009 = vmatmul.f32.gmra.mxu1 %v6675_v25  ;;  %1270 = vmatmul.f32.gmra.mxu2 %v6672_v22 }
 0x105   : > { %v662_v40 = vpop.f32.mrf.mxu0 }
 0x106   : > { %v663_v42 = vadd.f32 %v6487_v56, %v662_v40  ;;  %v5656_v40 = vld [vmem:[%s9861_s3 + $0x278] sm:$0xff] }
 0x107   : > { %1989 = vmatpush.msrb.mxu1 %v5656_v40 }
 0x108   : > { %v6681_v27 = vmax.f32 %v663_v42, 0.0  ;;  %1747 = vmatmul.f32.vlgmr.msrb.gmra.mxu0 %v6507_v1  ;;  %v5655_v42 = vld [vmem:[%s9861_s3 + $0x270] sm:$0xff] }
 0x109   : > { %v6684_v45 = vld [vmem:[#allocation2 + $0x98] sm:$0xff]  ;;  %1990 = vmatpush.msrb.mxu1 %v5655_v42 }
 0x10a   : > { %821 = vst [vmem:[#allocation2 + $0xa9] sm:$0xff] %v6681_v27  ;;  %1012 = vmatmul.f32.gmra.mxu1 %v6684_v45  ;;  %1273 = vmatmul.f32.gmra.mxu2 %v6681_v27  ;;  %v6864_v42 = vld [vmem:[#allocation2 + $0x1a] sm:$0xff] }
 0x10d   : > { %v665_v33 = vpop.f32.mrf.mxu0 }
 0x10e   : > { %v666_v1 = vadd.f32 %v6487_v56, %v665_v33  ;;  %v5654_v33 = vld [vmem:[%s9861_s3 + $0x268] sm:$0xff] }
 0x10f   : > { %1991 = vmatpush.msrb.mxu1 %v5654_v33 }
 0x110   : > { %v6699_v38 = vmax.f32 %v666_v1, 0.0  ;;  %1750 = vmatmul.f32.gmra.mxu0 %v6517_v6  ;;  %v5667_v6 = vld [vmem:[%s9861_s3 + $0x2d0] sm:$0xff] }
 0x111   : > { %v6705_v43 = vld [vmem:[#allocation2 + $0xa8] sm:$0xff]  ;;  %2252 = vmatpush.msrb.mxu2 %v5667_v6  ;;  %1992 = vmatpush.msrb.mxu1 %v5653_v41  ;;  %v497_v6 = vld [vmem:[%s6252_s23 + $0xf0] sm:$0xff] }
 0x112   : > { %822 = vst [vmem:[#allocation2 + $0xb1] sm:$0xff] %v6699_v38  ;;  %1015 = vmatmul.f32.gmra.mxu1 %v6705_v43  ;;  %1276 = vmatmul.f32.gmra.mxu2 %v6699_v38 }
 0x113   : > { %2253 = vmatpush.msrb.mxu2 %v5666_v48  ;;  %5591 = vmatmul.msk.f32.gmra.mxu3 %vm508_vm1, %v497_v6 }
 0x115   : > { %v668_v46 = vpop.f32.mrf.mxu0  ;;  %2254 = vmatpush.msrb.mxu2 %v5665_v52  ;;  %v5650_v52 = vld [vmem:[%s9861_s3 + $0x248] sm:$0xff] }
 0x116   : > { %v669_v47 = vadd.f32 %v6487_v56, %v668_v46  ;;  %v5652_v46 = vld [vmem:[%s9861_s3 + $0x258] sm:$0xff] }
 0x117   : > { %2255 = vmatpush.msrb.mxu2 %v5664_v54  ;;  %1993 = vmatpush.msrb.mxu1 %v5652_v46  ;;  %v5641_v46 = vld [vmem:[%s9861_s3 + $0x200] sm:$0xff] }
 0x118   : > { %v6720_v50 = vmax.f32 %v669_v47, 0.0  ;;  %1753 = vmatmul.f32.gmra.mxu0 %v6527_v11  ;;  %v5663_v11 = vld [vmem:[%s9861_s3 + $0x2b0] sm:$0xff] }
 0x119   : > { %v6726_v53 = vld [vmem:[#allocation2 + $0xb0] sm:$0xff]  ;;  %2256 = vmatpush.msrb.mxu2 %v5663_v11 }
 0x11a   : > { %823 = vst [vmem:[#allocation2 + $0xc1] sm:$0xff] %v6720_v50  ;;  %1018 = vmatmul.f32.gmra.mxu1 %v6726_v53  ;;  %1279 = vmatmul.f32.gmra.mxu2 %v6720_v50 }
 0x11b   : > { %2257 = vmatpush.msrb.mxu2 %v5662_v59 }
 0x11d   : > { %v671_v57 = vpop.f32.mrf.mxu0  ;;  %2258 = vmatpush.msrb.mxu2 %v5661_v63  ;;  %v498_v63 = vld [vmem:[%s6252_s23 + $0xf8] sm:$0xff] }
 0x11e   : > { %v672_v58 = vadd.f32 %v6487_v56, %v671_v57  ;;  %5592 = vmatmul.msk.f32.gmra.mxu3 %vm508_vm1, %v498_v63 }
 0x11f   : > { %2259 = vmatpush.msrb.mxu2 %v5660_v2  ;;  %v5648_v2 = vld [vmem:[%s9861_s3 + $0x238] sm:$0xff] }
 0x120   : > { %v6743_v12 = vmax.f32 %v672_v58, 0.0  ;;  %1756 = vmatmul.f32.gmra.mxu0 %v6540_v24  ;;  %v5659_v24 = vld [vmem:[%s9861_s3 + $0x290] sm:$0xff]  ;;  %v5649_v58 = vld [vmem:[%s9861_s3 + $0x240] sm:$0xff] }
 0x121   : > { %v6749_v13 = vld [vmem:[#allocation2 + $0xc0] sm:$0xff]  ;;  %2260 = vmatpush.msrb.mxu2 %v5659_v24 }
 0x122   : > { %824 = vst [vmem:[#allocation2 + $0xc9] sm:$0xff] %v6743_v12  ;;  %1021 = vmatmul.f32.gmra.mxu1 %v6749_v13  ;;  %1282 = vmatmul.f32.gmra.mxu2 %v6743_v12 }
 0x123   : > { %2261 = vmatpush.msrb.mxu2 %v5658_v9 }
 0x125   : > { %v674_v3 = vpop.f32.mrf.mxu0  ;;  %2262 = vmatpush.msrb.mxu2 %v5657_v14 }
 0x126   : > { %v675_v7 = vadd.f32 %v6487_v56, %v674_v3 }
 0x128   : > { %v6768_v20 = vmax.f32 %v675_v7, 0.0  ;;  %1759 = vmatmul.f32.gmra.mxu0 %v6562_v39  ;;  %v5646_v7 = vld [vmem:[%s9861_s3 + $0x228] sm:$0xff] }
 0x129   : > { %v6774_v23 = vld [vmem:[#allocation2 + $0xc8] sm:$0xff] }
 0x12a   : > { %825 = vst [vmem:[#allocation2 + $0xd9] sm:$0xff] %v6768_v20  ;;  %1024 = vmatmul.f32.gmra.mxu1 %v6774_v23  ;;  %1285 = vmatmul.f32.gmra.mxu2 %v6768_v20 }
 0x12d   : > { %v677_v28 = vpop.f32.mrf.mxu0 }
 0x12e   : > { %v678_v32 = vadd.f32 %v6487_v56, %v677_v28  ;;  %v5645_v28 = vld [vmem:[%s9861_s3 + $0x220] sm:$0xff] }
 0x12f   : > { %v6782_v35 = vpop.f32.mrf.mxu1 }
 0x130   : > { %v6784_v39 = vmax.f32 %v678_v32, 0.0  ;;  %1762 = vmatmul.f32.gmra.mxu0 %v6584_v51  ;;  %v6798_v51 = vpop.f32.mrf.mxu2 }
 0x131   : > { %v6787_v37 = vld [vmem:[#allocation2 + $0xd8] sm:$0xff] }
 0x132   : > { %826 = vst [vmem:[#allocation2 + $0xe1] sm:$0xff] %v6784_v39  ;;  %1027 = vmatmul.f32.gmra.mxu1 %v6787_v37  ;;  %1288 = vmatmul.f32.gmra.mxu2 %v6784_v39 }
 0x135   : > { %v680_v29 = vpop.f32.mrf.mxu0 }
 0x136   : > { %v681_v31 = vadd.f32 %v6487_v56, %v680_v29  ;;  %v5643_v29 = vld [vmem:[%s9861_s3 + $0x210] sm:$0xff] }
 0x137   : > { %v6804_v1 = vpop.f32.mrf.mxu1 }
 0x138   : > { %v740_v34 = vmax.f32 %v681_v31, 0.0  ;;  %1765 = vmatmul.f32.gmra.mxu0 %v6611_v62  ;;  %v5651_v62 = vld [vmem:[%s9861_s3 + $0x250] sm:$0xff]  ;;  %v6825_v54 = vpop.f32.mrf.mxu2 }
 0x139   : > { %v6810_v44 = vld [vmem:[#allocation2 + $0xe0] sm:$0xff]  ;;  %1994 = vmatpush.msrb.mxu1 %v5651_v62 }
 0x13a   : > { %827 = vst [vmem:[#allocation2 + $0xf1] sm:$0xff] %v740_v34  ;;  %1030 = vmatmul.f32.gmra.mxu1 %v6810_v44  ;;  %1291 = vmatmul.f32.gmra.mxu2 %v740_v34  ;;  %v5642_v34 = vld [vmem:[%s9861_s3 + $0x208] sm:$0xff] }
 0x13b   : > { %1995 = vmatpush.msrb.mxu1 %v5650_v52 }
 0x13d   : > { %v683_v47 = vpop.f32.mrf.mxu0  ;;  %1996 = vmatpush.msrb.mxu1 %v5649_v58 }
 0x13e   : > { %v684_v48 = vadd.f32 %v6487_v56, %v683_v47  ;;  %v6889_v47 = vld [vmem:[#allocation2 + $0x22] sm:$0xff] }
 0x13f   : > { %v6827_v11 = vpop.f32.mrf.mxu1  ;;  %1997 = vmatpush.msrb.mxu1 %v5648_v2 }
 0x140   : > { %v6829_v57 = vmax.f32 %v684_v48, 0.0  ;;  %1768 = vmatmul.f32.gmra.mxu0 %v6635_v18  ;;  %v5647_v18 = vld [vmem:[%s9861_s3 + $0x230] sm:$0xff]  ;;  %v6860_v32 = vpop.f32.mrf.mxu2 }
 0x141   : > { %v6835_v59 = vld [vmem:[#allocation2 + $0xf0] sm:$0xff]  ;;  %1998 = vmatpush.msrb.mxu1 %v5647_v18 }
 0x142   : > { %828 = vst [vmem:[#allocation2 + $0xf9] sm:$0xff] %v6829_v57  ;;  %1033 = vmatmul.f32.gmra.mxu1 %v6835_v59  ;;  %1294 = vmatmul.f32.gmra.mxu2 %v6829_v57  ;;  %v6904_v18 = vld [vmem:[#allocation2 + $0x32] sm:$0xff] }
 0x143   : > { %1999 = vmatpush.msrb.mxu1 %v5646_v7 }
 0x145   : > { %v686_v24 = vpop.f32.mrf.mxu0  ;;  %2000 = vmatpush.msrb.mxu1 %v5645_v28  ;;  %v710_v28 = vpop.f32.mrf.mxu3 }
 0x146   : > { %v687_v3 = vadd.f32 %v6487_v56, %v686_v24 }
 0x147   : > { %v6852_v9 = vpop.f32.mrf.mxu1 }
 0x148   : > { %v6854_v14 = vmax.f32 %v687_v3, 0.0  ;;  %1771 = vmatmul.f32.gmra.mxu0 %v6648_v16  ;;  %v5644_v16 = vld [vmem:[%s9861_s3 + $0x218] sm:$0xff]  ;;  %v6894_v48 = vpop.f32.mrf.mxu2 }
 0x149   : > { %v6862_v40 = vld [vmem:[#allocation2 + $0xf8] sm:$0xff]  ;;  %2001 = vmatpush.msrb.mxu1 %v5644_v16 }
 0x14a   : > { %829 = vst [vmem:[#allocation2 + $0x109] sm:$0xff] %v6854_v14  ;;  %1036 = vmatmul.f32.gmra.mxu1 %v6862_v40  ;;  %2263 = vmatmul.f32.vlgmr.msrb.gmra.mxu2 %v6864_v42 }
 0x14b   : > { %2002 = vmatpush.msrb.mxu1 %v5643_v29 }
 0x14d   : > { %v689_v31 = vpop.f32.mrf.mxu0  ;;  %2003 = vmatpush.msrb.mxu1 %v5642_v34 }
 0x14e   : > { %v690_v33 = vadd.f32 %v6487_v56, %v689_v31  ;;  %v6919_v31 = vld [vmem:[#allocation2 + $0x3a] sm:$0xff] }
 0x14f   : > { %v6879_v41 = vpop.f32.mrf.mxu1  ;;  %2004 = vmatpush.msrb.mxu1 %v5641_v46 }
 0x150   : > { %v6881_v6 = vmax.f32 %v690_v33, 0.0  ;;  %1774 = vmatmul.f32.gmra.mxu0 %v6662_v30  ;;  %v6909_v24 = vpop.f32.mrf.mxu2  ;;  %v711_v33 = vadd.f32 %v6487_v56, %v710_v28  ;;  %v6939_v28 = vld [vmem:[#allocation2 + $0x4a] sm:$0xff] }
 0x151   : > { %v6887_v62 = vld [vmem:[#allocation2 + $0x108] sm:$0xff] }
 0x152   : > { %830 = vst [vmem:[#allocation2 + $0x111] sm:$0xff] %v6881_v6  ;;  %1039 = vmatmul.f32.gmra.mxu1 %v6887_v62  ;;  %2266 = vmatmul.f32.gmra.mxu2 %v6889_v47  ;;  %v6925_v34 = vmax.f32 %v711_v33, 0.0 }
 0x154   : > { %837 = vst [vmem:[#allocation2 + $0x169] sm:$0xff] %v6925_v34 }
 0x155   : > { %v692_v52 = vpop.f32.mrf.mxu0 }
 0x156   : > { %v693_v30 = vadd.f32 %v6487_v56, %v692_v52 }
 0x157   : > { %v6897_v58 = vpop.f32.mrf.mxu1 }
 0x158   : > { %v6899_v63 = vmax.f32 %v693_v30, 0.0  ;;  %1777 = vmatmul.f32.gmra.mxu0 %v6675_v25  ;;  %v6929_v30 = vpop.f32.mrf.mxu2 }
 0x159   : > { %v6902_v2 = vld [vmem:[#allocation2 + $0x110] sm:$0xff]  ;;  %9907 = vst [vmem:[#allocation15_spill] sm:$0xff] %v6929_v30 }
 0x15a   : > { %831 = vst [vmem:[#allocation2 + $0x121] sm:$0xff] %v6899_v63  ;;  %1042 = vmatmul.f32.gmra.mxu1 %v6902_v2  ;;  %2269 = vmatmul.f32.gmra.mxu2 %v6904_v18 }
 0x15d   : > { %v695_v3 = vpop.f32.mrf.mxu0 }
 0x15e   : > { %v696_v7 = vadd.f32 %v6487_v56, %v695_v3 }
 0x15f   : > { %v6912_v16 = vpop.f32.mrf.mxu1 }
 0x160   : > { %9906 = vst [vmem:[#allocation14_spill] sm:$0xff] %v6912_v16  ;;  %v6914_v29 = vmax.f32 %v696_v7, 0.0  ;;  %1780 = vmatmul.f32.gmra.mxu0 %v6684_v45  ;;  %v713_v45 = vpop.f32.mrf.mxu3  ;;  %v6953_v15 = vpop.f32.mrf.mxu2 }
 0x161   : > { %v6917_v25 = vld [vmem:[#allocation2 + $0x120] sm:$0xff]  ;;  %v714_v7 = vadd.f32 %v6487_v56, %v713_v45  ;;  %9910 = vst [vmem:[#allocation18_spill] sm:$0xff] %v6953_v15 }
 0x162   : > { %832 = vst [vmem:[#allocation2 + $0x129] sm:$0xff] %v6914_v29  ;;  %1045 = vmatmul.f32.gmra.mxu1 %v6917_v25  ;;  %2272 = vmatmul.f32.gmra.mxu2 %v6919_v31 }
 0x163   : > { %v6941_v33 = vmax.f32 %v714_v7, 0.0 }
 0x165   : > { %v698_v46 = vpop.f32.mrf.mxu0  ;;  %838 = vst [vmem:[#allocation2 + $0x171] sm:$0xff] %v6941_v33 }
 0x166   : > { %v699_v52 = vadd.f32 %v6487_v56, %v698_v46 }
 0x167   : > { %v6931_v3 = vpop.f32.mrf.mxu1 }
 0x168   : > { %9908 = vst [vmem:[#allocation16_spill] sm:$0xff] %v6931_v3  ;;  %v6934_v26 = vmax.f32 %v699_v52, 0.0  ;;  %1783 = vmatmul.f32.gmra.mxu0 %v6705_v43  ;;  %v6976_v15 = vpop.f32.mrf.mxu2 }
 0x169   : > { %v6937_v4 = vld [vmem:[#allocation2 + $0x128] sm:$0xff]  ;;  %9912 = vst [vmem:[#allocation20_spill] sm:$0xff] %v6976_v15 }
 0x16a   : > { %833 = vst [vmem:[#allocation2 + $0x139] sm:$0xff] %v6934_v26  ;;  %1048 = vmatmul.f32.gmra.mxu1 %v6937_v4  ;;  %2275 = vmatmul.f32.gmra.mxu2 %v6939_v28 }
 0x16d   : > { %v701_v46 = vpop.f32.mrf.mxu0 }
 0x16e   : > { %v702_v52 = vadd.f32 %v6487_v56, %v701_v46 }
 0x16f   : > { %v6948_v45 = vpop.f32.mrf.mxu1 }
 0x170   : > { %9909 = vst [vmem:[#allocation17_spill] sm:$0xff] %v6948_v45  ;;  %v6950_v43 = vmax.f32 %v702_v52, 0.0  ;;  %1786 = vmatmul.f32.gmra.mxu0 %v6726_v53  ;;  %v6993_v15 = vpop.f32.mrf.mxu2 }
 0x171   : > { %v6955_v7 = vld [vmem:[#allocation2 + $0x138] sm:$0xff]  ;;  %9914 = vst [vmem:[#allocation22_spill] sm:$0xff] %v6993_v15 }
 0x172   : > { %834 = vst [vmem:[#allocation2 + $0x141] sm:$0xff] %v6950_v43  ;;  %1051 = vmatmul.f32.vlgmr.msrb.gmra.mxu3 %v6955_v7  ;;  %2005 = vmatmul.f32.vlgmr.msrb.gmra.mxu1 %v6497_v60  ;;  %v6974_v60 = vld [vmem:[#allocation2 + $0x62] sm:$0xff] }
 0x173   : > { %2278 = vmatmul.f32.gmra.mxu2 %v6960_v55 }
 0x175   : > { %v704_v46 = vpop.f32.mrf.mxu0 }
 0x176   : > { %v705_v52 = vadd.f32 %v6487_v56, %v704_v46 }
 0x177   : > { %v6964_v45 = vpop.f32.mrf.mxu1 }
 0x178   : > { %9911 = vst [vmem:[#allocation19_spill] sm:$0xff] %v6964_v45  ;;  %v6966_v53 = vmax.f32 %v705_v52, 0.0  ;;  %1789 = vmatmul.f32.gmra.mxu0 %v6749_v13  ;;  %v7009_v30 = vpop.f32.mrf.mxu2 }
 0x179   : > { %v6969_v3 = vld [vmem:[#allocation2 + $0x140] sm:$0xff]  ;;  %9918 = vst [vmem:[#allocation26_spill] sm:$0xff] %v7009_v30 }
 0x17a   : > { %835 = vst [vmem:[#allocation2 + $0x151] sm:$0xff] %v6966_v53  ;;  %1054 = vmatmul.f32.gmra.mxu3 %v6969_v3  ;;  %2008 = vmatmul.f32.gmra.mxu1 %v6504_v0  ;;  %v6990_v0 = vld [vmem:[#allocation2 + $0x6a] sm:$0xff] }
 0x17b   : > { %2281 = vmatmul.f32.gmra.mxu2 %v6974_v60 }
 0x17d   : > { %v707_v46 = vpop.f32.mrf.mxu0 }
 0x17e   : > { %v708_v52 = vadd.f32 %v6487_v56, %v707_v46 }
 0x17f   : > { %v6980_v45 = vpop.f32.mrf.mxu1 }
 0x180   : > { %9913 = vst [vmem:[#allocation21_spill] sm:$0xff] %v6980_v45  ;;  %v6982_v13 = vmax.f32 %v708_v52, 0.0  ;;  %1792 = vmatmul.f32.gmra.mxu0 %v6774_v23  ;;  %v7004_v45 = vld [vmem:[#allocation2 + $0x7a] sm:$0xff] }
 0x181   : > { %v6985_v16 = vld [vmem:[#allocation2 + $0x150] sm:$0xff] }
 0x182   : > { %836 = vst [vmem:[#allocation2 + $0x159] sm:$0xff] %v6982_v13  ;;  %1057 = vmatmul.f32.gmra.mxu3 %v6985_v16  ;;  %2011 = vmatmul.f32.gmra.mxu1 %v6514_v5 }
 0x183   : > { %2284 = vmatmul.f32.gmra.mxu2 %v6990_v0 }
 0x185   : > { %v6995_v46 = vpop.f32.mrf.mxu0 }
 0x186   : > { %9915 = vst [vmem:[#allocation23_spill] sm:$0xff] %v6995_v46  ;;  %v7013_v46 = vld [vmem:[#allocation2 + $0x168] sm:$0xff] }
 0x187   : > { %v6997_v52 = vpop.f32.mrf.mxu1 }
 0x188   : > { %9916 = vst [vmem:[#allocation24_spill] sm:$0xff] %v6997_v52  ;;  %1795 = vmatmul.f32.gmra.mxu0 %v6787_v37  ;;  %v7018_v37 = vld [vmem:[#allocation2 + $0x82] sm:$0xff] }
 0x189   : > { %v7000_v23 = vld [vmem:[#allocation2 + $0x158] sm:$0xff] }
 0x18a   : > { %1060 = vmatmul.f32.gmra.mxu3 %v7000_v23  ;;  %2014 = vmatmul.f32.gmra.mxu1 %v6524_v10 }
 0x18b   : > { %2287 = vmatmul.f32.gmra.mxu2 %v7004_v45 }
 0x18d   : > { %v7007_v5 = vpop.f32.mrf.mxu0 }
 0x18e   : > { %9917 = vst [vmem:[#allocation25_spill] sm:$0xff] %v7007_v5  ;;  %v7026_v5 = vpop.f32.mrf.mxu2 }
 0x18f   : > { %v7011_v15 = vpop.f32.mrf.mxu1 }
 0x190   : > { %9919 = vst [vmem:[#allocation27_spill] sm:$0xff] %v7011_v15  ;;  %1798 = vmatmul.f32.gmra.mxu0 %v6810_v44  ;;  %v7028_v15 = vld [vmem:[#allocation2 + $0x170] sm:$0xff] }
 0x191   : > { %v7032_v44 = vld [vmem:[#allocation2 + $0x92] sm:$0xff] }
 0x192   : > { %1063 = vmatmul.f32.gmra.mxu3 %v7013_v46  ;;  %2017 = vmatmul.f32.gmra.mxu1 %v6534_v19 }
 0x193   : > { %2290 = vmatmul.f32.gmra.mxu2 %v7018_v37 }
 0x195   : > { %v7021_v10 = vpop.f32.mrf.mxu0 }
 0x196   : > { %9920 = vst [vmem:[#allocation28_spill] sm:$0xff] %v7021_v10  ;;  %v7044_v10 = vpop.f32.mrf.mxu2 }
 0x197   : > { %v7023_v52 = vpop.f32.mrf.mxu1 }
 0x198   : > { %9921 = vst [vmem:[#allocation29_spill] sm:$0xff] %v7023_v52  ;;  %1801 = vmatmul.f32.gmra.mxu0 %v6835_v59  ;;  %v7042_v59 = vld [vmem:[#allocation2 + $0x9a] sm:$0xff] }
 0x19a   : > { %1066 = vmatmul.f32.gmra.mxu3 %v7028_v15  ;;  %2020 = vmatmul.f32.gmra.mxu1 %v6556_v36 }
 0x19b   : > { %2293 = vmatmul.f32.gmra.mxu2 %v7032_v44 }
 0x19d   : > { %v7035_v19 = vpop.f32.mrf.mxu0 }
 0x19e   : > { %9922 = vst [vmem:[#allocation30_spill] sm:$0xff] %v7035_v19 }
 0x19f   : > { %v7037_v30 = vpop.f32.mrf.mxu1 }
 0x1a0   : > { %9923 = vst [vmem:[#allocation31_spill] sm:$0xff] %v7037_v30  ;;  %1804 = vmatmul.f32.gmra.mxu0 %v6862_v40  ;;  %v7054_v40 = vld [vmem:[#allocation2 + $0xaa] sm:$0xff] }
 0x1a2   : > { %1297 = vmatmul.f32.vlgmr.msra.gmra.mxu3 %v6854_v14  ;;  %2023 = vmatmul.f32.gmra.mxu1 %v6578_v49  ;;  %v7057_v49 = vpop.f32.mrf.mxu2 }
 0x1a3   : > { %2296 = vmatmul.f32.gmra.mxu2 %v7042_v59  ;;  %9926 = vst [vmem:[#allocation34_spill] sm:$0xff] %v7057_v49  ;;  %v5614_v49 = vld [vmem:[%s9861_s3 + $0x128] sm:$0xff] }
 0x1a5   : > { %v7047_v36 = vpop.f32.mrf.mxu0 }
 0x1a6   : > { %9924 = vst [vmem:[#allocation32_spill] sm:$0xff] %v7047_v36  ;;  %v5623_v36 = vld [vmem:[%s9861_s3 + $0x170] sm:$0xff] }
 0x1a7   : > { %v7049_v52 = vpop.f32.mrf.mxu1 }
 0x1a8   : > { %9925 = vst [vmem:[#allocation33_spill] sm:$0xff] %v7049_v52  ;;  %1807 = vmatmul.f32.gmra.mxu0 %v6887_v62  ;;  %v7066_v62 = vld [vmem:[#allocation2 + $0xb2] sm:$0xff] }
 0x1aa   : > { %1300 = vmatmul.f32.gmra.mxu3 %v6881_v6  ;;  %2026 = vmatmul.f32.gmra.mxu1 %v6604_v61  ;;  %v5624_v61 = vld [vmem:[%s9861_s3 + $0x178] sm:$0xff] }
 0x1ab   : > { %2299 = vmatmul.f32.gmra.mxu2 %v7054_v40  ;;  %1473 = vmatpush.msrb.mxu3 %v5624_v61  ;;  %v5620_v61 = vld [vmem:[%s9861_s3 + $0x158] sm:$0xff] }
 0x1ad   : > { %v7061_v30 = vpop.f32.mrf.mxu0  ;;  %1474 = vmatpush.msrb.mxu3 %v5623_v36  ;;  %v7090_v36 = vld [vmem:[#allocation2 + $0xc2] sm:$0xff] }
 0x1ae   : > { %9928 = vst [vmem:[#allocation36_spill] sm:$0xff] %v7061_v30  ;;  %v7075_v30 = vpop.f32.mrf.mxu2 }
 0x1af   : > { %v7059_v19 = vpop.f32.mrf.mxu1  ;;  %9929 = vst [vmem:[#allocation37_spill] sm:$0xff] %v7075_v30 }
 0x1b0   : > { %9927 = vst [vmem:[#allocation35_spill] sm:$0xff] %v7059_v19  ;;  %1810 = vmatmul.f32.gmra.mxu0 %v6902_v2  ;;  %v5621_v19 = vld [vmem:[%s9861_s3 + $0x160] sm:$0xff] }
 0x1b2   : > { %1303 = vmatmul.f32.gmra.mxu3 %v6899_v63  ;;  %2029 = vmatmul.f32.gmra.mxu1 %v6631_v8  ;;  %v5622_v8 = vld [vmem:[%s9861_s3 + $0x168] sm:$0xff] }
 0x1b3   : > { %2302 = vmatmul.f32.gmra.mxu2 %v7066_v62  ;;  %1475 = vmatpush.msrb.mxu3 %v5622_v8  ;;  %v716_v8 = vpop.f32.mrf.mxu3 }
 0x1b5   : > { %v7086_v52 = vpop.f32.mrf.mxu0  ;;  %1476 = vmatpush.msrb.mxu3 %v5621_v19  ;;  %v5617_v19 = vld [vmem:[%s9861_s3 + $0x140] sm:$0xff] }
 0x1b6   : > { %9931 = vst [vmem:[#allocation39_spill] sm:$0xff] %v7086_v52  ;;  %v7111_v30 = vpop.f32.mrf.mxu2 }
 0x1b7   : > { %v7077_v2 = vpop.f32.mrf.mxu1  ;;  %1477 = vmatpush.msrb.mxu3 %v5620_v61  ;;  %9933 = vst [vmem:[#allocation41_spill] sm:$0xff] %v7111_v30 }
 0x1b8   : > { %9930 = vst [vmem:[#allocation38_spill] sm:$0xff] %v7077_v2  ;;  %1813 = vmatmul.f32.gmra.mxu0 %v6917_v25  ;;  %v5619_v25 = vld [vmem:[%s9861_s3 + $0x150] sm:$0xff]  ;;  %v7102_v2 = vadd.f32 %v6487_v56, %v716_v8  ;;  %v5616_v8 = vld [vmem:[%s9861_s3 + $0x138] sm:$0xff] }
 0x1b9   : > { %1478 = vmatpush.msrb.mxu3 %v5619_v25  ;;  %v7116_v25 = vld [vmem:[#allocation2 + $0xca] sm:$0xff] }
 0x1ba   : > { %1306 = vmatmul.f32.gmra.mxu3 %v6914_v29  ;;  %2032 = vmatmul.f32.gmra.mxu1 %v6645_v21  ;;  %v5618_v21 = vld [vmem:[%s9861_s3 + $0x148] sm:$0xff]  ;;  %v9873_v61 = vmax.f32 %v7102_v2, 0.0 }
 0x1bb   : > { %2305 = vmatmul.f32.gmra.mxu2 %v7090_v36  ;;  %1479 = vmatpush.msrb.mxu3 %v5618_v21  ;;  %v5615_v21 = vld [vmem:[%s9861_s3 + $0x130] sm:$0xff] }
 0x1bc   : > { %839 = vst [vmem:[#allocation2 + $0x181] sm:$0xff] %v9873_v61 }
 0x1bd   : > { %1480 = vmatpush.msrb.mxu3 %v5617_v19  ;;  %v5613_v19 = vld [vmem:[%s9861_s3 + $0x120] sm:$0xff] }
 0x1bf   : > { %v7099_v52 = vpop.f32.mrf.mxu1  ;;  %1481 = vmatpush.msrb.mxu3 %v5616_v8  ;;  %v5704_v8 = vld [vmem:[%s9861_s3 + $0x3f8] sm:$0xff] }
 0x1c0   : > { %9932 = vst [vmem:[#allocation40_spill] sm:$0xff] %v7099_v52  ;;  %1816 = vmatmul.f32.gmra.mxu0 %v6937_v4  ;;  %v7124_v4 = vpop.f32.mrf.mxu0 }
 0x1c1   : > { %9934 = vst [vmem:[#allocation42_spill] sm:$0xff] %v7124_v4  ;;  %1482 = vmatpush.msrb.mxu3 %v5615_v21  ;;  %2764 = vmatpush.msra.mxu0 %v5704_v8  ;;  %v5703_v21 = vld [vmem:[%s9861_s3 + $0x3f0] sm:$0xff]  ;;  %v5610_v8 = vld [vmem:[%s9861_s3 + $0x108] sm:$0xff] }
 0x1c2   : > { %1309 = vmatmul.f32.gmra.mxu3 %v6934_v26  ;;  %2035 = vmatmul.f32.gmra.mxu1 %v6659_v17  ;;  %v719_v17 = vpop.f32.mrf.mxu3 }
 0x1c3   : > { %2308 = vmatmul.f32.gmra.mxu2 %v7116_v25  ;;  %v720_v30 = vadd.f32 %v6487_v56, %v719_v17  ;;  %1483 = vmatpush.msrb.mxu3 %v5614_v49  ;;  %v7146_v56 = vld [vmem:[#allocation2 + $0xda] sm:$0xff]  ;;  %v7154_v17 = vpop.f32.mrf.mxu2 }
 0x1c4   : > { %2765 = vmatpush.msra.mxu0 %v5703_v21  ;;  %v5700_v21 = vld [vmem:[%s9861_s3 + $0x3d8] sm:$0xff] }
 0x1c5   : > { %v7142_v61 = vmax.f32 %v720_v30, 0.0  ;;  %1484 = vmatpush.msrb.mxu3 %v5613_v19  ;;  %v5702_v30 = vld [vmem:[%s9861_s3 + $0x3e8] sm:$0xff]  ;;  %v5701_v19 = vld [vmem:[%s9861_s3 + $0x3e0] sm:$0xff] }
 0x1c6   : > { %2766 = vmatpush.msra.mxu0 %v5702_v30 }
 0x1c7   : > { %v7129_v52 = vpop.f32.mrf.mxu1  ;;  %840 = vst [vmem:[#allocation2 + $0x189] sm:$0xff] %v7142_v61 }
 0x1c8   : > { %9935 = vst [vmem:[#allocation43_spill] sm:$0xff] %v7129_v52  ;;  %1819 = vmatmul.f32.gmra.mxu0 %v6955_v7  ;;  %v5612_v7 = vld [vmem:[%s9861_s3 + $0x118] sm:$0xff]  ;;  %v7164_v49 = vpop.f32.mrf.mxu0 }
 0x1c9   : > { %1485 = vmatpush.msrb.mxu3 %v5612_v7  ;;  %9936 = vst [vmem:[#allocation44_spill] sm:$0xff] %v7164_v49  ;;  %v5609_v7 = vld [vmem:[%s9861_s3 + $0x100] sm:$0xff]  ;;  %2767 = vmatpush.msra.mxu0 %v5701_v19 }
 0x1ca   : > { %1312 = vmatmul.f32.gmra.mxu3 %v6950_v43  ;;  %2038 = vmatmul.f32.gmra.mxu1 %v6672_v22  ;;  %v5611_v22 = vld [vmem:[%s9861_s3 + $0x110] sm:$0xff]  ;;  %v2684_v52 = vld [vmem:[#allocation2 + $0x39] sm:$0xff] }
 0x1cb   : > { %2311 = vmatmul.f32.gmra.mxu2 %v7146_v56  ;;  %1486 = vmatpush.msrb.mxu3 %v5611_v22  ;;  %v7183_v22 = vld [vmem:[#allocation2 + $0xe2] sm:$0xff]  ;;  %v7189_v30 = vpop.f32.mrf.mxu2 }
 0x1cc   : > { %2768 = vmatpush.msra.mxu0 %v5700_v21  ;;  %v7204_v21 = vld [vmem:[#allocation2 + $0xf2] sm:$0xff] }
 0x1cd   : > { %1487 = vmatpush.msrb.mxu3 %v5610_v8  ;;  %v5698_v8 = vld [vmem:[%s9861_s3 + $0x3c8] sm:$0xff] }
 0x1cf   : > { %v7169_v4 = vpop.f32.mrf.mxu1  ;;  %1488 = vmatpush.msrb.mxu3 %v5609_v7  ;;  %v5697_v7 = vld [vmem:[%s9861_s3 + $0x3c0] sm:$0xff] }
 0x1d0   : > { %9937 = vst [vmem:[#allocation45_spill] sm:$0xff] %v7169_v4  ;;  %1822 = vmatmul.f32.gmra.mxu0 %v6969_v3  ;;  %v5699_v3 = vld [vmem:[%s9861_s3 + $0x3d0] sm:$0xff] }
 0x1d1   : > { %2769 = vmatpush.msra.mxu0 %v5699_v3  ;;  %v5696_v3 = vld [vmem:[%s9861_s3 + $0x3b8] sm:$0xff] }
 0x1d2   : > { %1315 = vmatmul.f32.gmra.mxu3 %v6966_v53  ;;  %2041 = vmatmul.f32.gmra.mxu1 %v6681_v27  ;;  %v7196_v27 = vpop.f32.mrf.mxu0 }
 0x1d3   : > { %2314 = vmatmul.f32.gmra.mxu2 %v7183_v22  ;;  %9939 = vst [vmem:[#allocation47_spill] sm:$0xff] %v7196_v27  ;;  %2770 = vmatpush.msra.mxu0 %v5698_v8  ;;  %v5694_v8 = vld [vmem:[%s9861_s3 + $0x3a8] sm:$0xff]  ;;  %v7216_v27 = vpop.f32.mrf.mxu2 }
 0x1d5   : > { %2771 = vmatpush.msra.mxu0 %v5697_v7  ;;  %v5693_v7 = vld [vmem:[%s9861_s3 + $0x3a0] sm:$0xff] }
 0x1d7   : > { %v7194_v19 = vpop.f32.mrf.mxu1  ;;  %2772 = vmatpush.msra.mxu0 %v5696_v3  ;;  %v7228_v3 = vld [vmem:[#allocation2 + $0xfa] sm:$0xff] }
 0x1d8   : > { %9938 = vst [vmem:[#allocation46_spill] sm:$0xff] %v7194_v19  ;;  %1825 = vmatmul.f32.gmra.mxu0 %v6985_v16  ;;  %v5695_v16 = vld [vmem:[%s9861_s3 + $0x3b0] sm:$0xff] }
 0x1d9   : > { %2773 = vmatpush.msra.mxu0 %v5695_v16  ;;  %v5690_v16 = vld [vmem:[%s9861_s3 + $0x388] sm:$0xff] }
 0x1da   : > { %1318 = vmatmul.f32.gmra.mxu3 %v6982_v13  ;;  %2044 = vmatmul.f32.gmra.mxu1 %v6699_v38  ;;  %v7224_v49 = vpop.f32.mrf.mxu0 }
 0x1db   : > { %2317 = vmatmul.f32.gmra.mxu2 %v7204_v21  ;;  %2774 = vmatpush.msra.mxu0 %v5694_v8  ;;  %9941 = vst [vmem:[#allocation49_spill] sm:$0xff] %v7224_v49  ;;  %v7246_v49 = vpop.f32.mrf.mxu2 }
 0x1dc   : > { %9943 = vst [vmem:[#allocation51_spill] sm:$0xff] %v7246_v49 }
 0x1dd   : > { %2775 = vmatpush.msra.mxu0 %v5693_v7 }
 0x1df   : > { %v7218_v38 = vpop.f32.mrf.mxu1 }
 0x1e0   : > { %9940 = vst [vmem:[#allocation48_spill] sm:$0xff] %v7218_v38  ;;  %1828 = vmatmul.f32.gmra.mxu0 %v7000_v23  ;;  %v5692_v38 = vld [vmem:[%s9861_s3 + $0x398] sm:$0xff]  ;;  %v5691_v23 = vld [vmem:[%s9861_s3 + $0x390] sm:$0xff] }
 0x1e1   : > { %2776 = vmatpush.msra.mxu0 %v5692_v38  ;;  %v7250_v38 = vld [vmem:[#allocation2 + $0x10a] sm:$0xff] }
 0x1e2   : > { %1321 = vmatmul.f32.gmra.mxu3 %v6925_v34  ;;  %2047 = vmatmul.f32.gmra.mxu1 %v6720_v50  ;;  %v5689_v50 = vld [vmem:[%s9861_s3 + $0x380] sm:$0xff]  ;;  %v7253_v7 = vpop.f32.mrf.mxu0 }
 0x1e3   : > { %2320 = vmatmul.f32.gmra.mxu2 %v7228_v3  ;;  %2777 = vmatpush.msra.mxu0 %v5691_v23  ;;  %9944 = vst [vmem:[#allocation52_spill] sm:$0xff] %v7253_v7  ;;  %v1680_v7 = vld [vmem:[#allocation2 + $0x180] sm:$0xff] }
 0x1e5   : > { %2778 = vmatpush.msra.mxu0 %v5690_v16  ;;  %v7259_v16 = vld [vmem:[#allocation2 + $0x112] sm:$0xff] }
 0x1e7   : > { %v7240_v8 = vpop.f32.mrf.mxu1  ;;  %2779 = vmatpush.msra.mxu0 %v5689_v50 }
 0x1e8   : > { %9942 = vst [vmem:[#allocation50_spill] sm:$0xff] %v7240_v8  ;;  %1831 = vmatmul.f32.gmra.mxu0 %v7013_v46  ;;  %v1392_v46 = vld [vmem:[#allocation2 + $0x2] sm:$0xff]  ;;  %v7261_v8 = vpop.f32.mrf.mxu2 }
 0x1e9   : > { %9946 = vst [vmem:[#allocation54_spill] sm:$0xff] %v7261_v8  ;;  %v1681_v8 = vld [vmem:[#allocation2 + $0x188] sm:$0xff] }
 0x1ea   : > { %1324 = vmatmul.f32.gmra.mxu3 %v6941_v33  ;;  %2050 = vmatmul.f32.gmra.mxu1 %v6743_v12  ;;  %v7266_v19 = vpop.f32.mrf.mxu0 }
 0x1eb   : > { %2323 = vmatmul.f32.gmra.mxu2 %v7250_v38  ;;  %9947 = vst [vmem:[#allocation55_spill] sm:$0xff] %v7266_v19 }
 0x1ef   : > { %v7255_v23 = vpop.f32.mrf.mxu1 }
 0x1f0   : > { %9945 = vst [vmem:[#allocation53_spill] sm:$0xff] %v7255_v23  ;;  %1834 = vmatmul.f32.gmra.mxu0 %v7028_v15  ;;  %v1393_v23 = vld [vmem:[#allocation2 + $0xa] sm:$0xff]  ;;  %v7271_v15 = vld [vmem:[#allocation2 + $0x122] sm:$0xff] }
 0x1f2   : > { %1489 = vmatmul.f32.vlgmr.msrb.gmra.mxu3 %v1392_v46  ;;  %2053 = vmatmul.f32.gmra.mxu1 %v6768_v20  ;;  %v7274_v20 = vpop.f32.mrf.mxu2  ;;  %v7280_v19 = vpop.f32.mrf.mxu0 }
 0x1f3   : > { %2326 = vmatmul.f32.gmra.mxu2 %v7259_v16  ;;  %9949 = vst [vmem:[#allocation57_spill] sm:$0xff] %v7274_v20 }
 0x1f4   : > { %9951 = vst [vmem:[#allocation59_spill] sm:$0xff] %v7280_v19 }
 0x1f5   : > { %v7264_v12 = vpop.f32.mrf.mxu3 }
 0x1f7   : > { %v7268_v50 = vpop.f32.mrf.mxu1 }
 0x1f8   : > { %9948 = vst [vmem:[#allocation56_spill] sm:$0xff] %v7268_v50  ;;  %1837 = vmatmul.f32.gmra.mxu0 %v1680_v7  ;;  %v7282_v50 = vld [vmem:[#allocation2 + $0xf1] sm:$0xff] }
 0x1fa   : > { %1492 = vmatmul.f32.gmra.mxu3 %v1393_v23  ;;  %2056 = vmatmul.f32.gmra.mxu1 %v6784_v39  ;;  %v7286_v39 = vld [vmem:[#allocation2 + $0x12a] sm:$0xff]  ;;  %v7291_v23 = vpop.f32.mrf.mxu2  ;;  %v7295_v19 = vpop.f32.mrf.mxu0 }
 0x1fb   : > { %2329 = vmatmul.f32.gmra.mxu2 %v7271_v15  ;;  %9952 = vst [vmem:[#allocation60_spill] sm:$0xff] %v7291_v23 }
 0x1fc   : > { %9954 = vst [vmem:[#allocation62_spill] sm:$0xff] %v7295_v19  ;;  %v2685_v19 = vld [vmem:[#allocation2 + $0x49] sm:$0xff] }
 0x1fd   : > { %v7276_v46 = vpop.f32.mrf.mxu3 }
 0x1ff   : > { %v7278_v4 = vpop.f32.mrf.mxu1 }
 0x200   : > { %9950 = vst [vmem:[#allocation58_spill] sm:$0xff] %v7278_v4  ;;  %1840 = vmatmul.f32.gmra.mxu0 %v1681_v8  ;;  %v2683_v4 = vld [vmem:[#allocation2 + $0x31] sm:$0xff] }
 0x202   : > { %1495 = vmatmul.f32.gmra.mxu3 %v6864_v42  ;;  %2059 = vmatmul.f32.gmra.mxu1 %v7282_v50  ;;  %v7299_v42 = vld [vmem:[#allocation2 + $0x13a] sm:$0xff]  ;;  %v7306_v23 = vpop.f32.mrf.mxu2 }
 0x203   : > { %2332 = vmatmul.f32.gmra.mxu2 %v7286_v39  ;;  %9956 = vst [vmem:[#allocation64_spill] sm:$0xff] %v7306_v23 }
 0x205   : > { %v7289_v7 = vpop.f32.mrf.mxu3 }
 0x207   : > { %v7293_v20 = vpop.f32.mrf.mxu1 }
 0x208   : > { %9953 = vst [vmem:[#allocation61_spill] sm:$0xff] %v7293_v20  ;;  %2780 = vmatmul.f32.vlgmr.msra.gmra.mxu0 %v2683_v4  ;;  %v7310_v4 = vld [vmem:[#allocation2 + $0x142] sm:$0xff] }
 0x20a   : > { %1498 = vmatmul.f32.gmra.mxu3 %v6889_v47  ;;  %2062 = vmatmul.f32.gmra.mxu1 %v6829_v57  ;;  %v7313_v57 = vpop.f32.mrf.mxu0 }
 0x20b   : > { %2335 = vmatmul.f32.gmra.mxu2 %v7299_v42  ;;  %9957 = vst [vmem:[#allocation65_spill] sm:$0xff] %v7313_v57  ;;  %v2686_v57 = vld [vmem:[#allocation2 + $0x51] sm:$0xff] }
 0x20d   : > { %v7302_v8 = vpop.f32.mrf.mxu3 }
 0x20f   : > { %v7304_v49 = vpop.f32.mrf.mxu1 }
 0x210   : > { %9955 = vst [vmem:[#allocation63_spill] sm:$0xff] %v7304_v49  ;;  %2783 = vmatmul.f32.gmra.mxu0 %v2684_v52  ;;  %v7321_v52 = vld [vmem:[#allocation2 + $0x152] sm:$0xff] }
 0x212   : > { %1501 = vmatmul.f32.gmra.mxu3 %v6904_v18  ;;  %2065 = vmatmul.f32.gmra.mxu1 %v6854_v14  ;;  %v7323_v18 = vpop.f32.mrf.mxu2  ;;  %v7328_v49 = vpop.f32.mrf.mxu0 }
 0x213   : > { %2338 = vmatmul.f32.gmra.mxu2 %v7310_v4  ;;  %9959 = vst [vmem:[#allocation67_spill] sm:$0xff] %v7323_v18  ;;  %v2687_v18 = vld [vmem:[#allocation2 + $0x61] sm:$0xff] }
 0x214   : > { %9960 = vst [vmem:[#allocation68_spill] sm:$0xff] %v7328_v49 }
 0x215   : > { %v7315_v47 = vpop.f32.mrf.mxu3 }
 0x217   : > { %v7317_v20 = vpop.f32.mrf.mxu1 }
 0x218   : > { %2786 = vmatmul.f32.gmra.mxu0 %v2685_v19  ;;  %9958 = vst [vmem:[#allocation66_spill] sm:$0xff] %v7317_v20  ;;  %v7332_v19 = vld [vmem:[#allocation2 + $0x15a] sm:$0xff] }
 0x21a   : > { %1504 = vmatmul.f32.gmra.mxu3 %v6919_v31  ;;  %2068 = vmatmul.f32.gmra.mxu1 %v6881_v6  ;;  %v7337_v31 = vpop.f32.mrf.mxu2  ;;  %v7341_v23 = vpop.f32.mrf.mxu0 }
 0x21b   : > { %2341 = vmatmul.f32.gmra.mxu2 %v7321_v52  ;;  %9962 = vst [vmem:[#allocation70_spill] sm:$0xff] %v7337_v31 }
 0x21c   : > { %9963 = vst [vmem:[#allocation71_spill] sm:$0xff] %v7341_v23 }
 0x21d   : > { %v7326_v14 = vpop.f32.mrf.mxu3 }
 0x21f   : > { %v7335_v6 = vpop.f32.mrf.mxu1 }
 0x220   : > { %2789 = vmatmul.f32.gmra.mxu0 %v2686_v57  ;;  %9961 = vst [vmem:[#allocation69_spill] sm:$0xff] %v7335_v6  ;;  %v2688_v6 = vld [vmem:[#allocation2 + $0x69] sm:$0xff] }
 0x222   : > { %1507 = vmatmul.f32.gmra.mxu3 %v6939_v28  ;;  %2071 = vmatmul.f32.gmra.mxu1 %v6899_v63  ;;  %v7345_v28 = vld [vmem:[#allocation2 + $0x16a] sm:$0xff]  ;;  %v7352_v49 = vpop.f32.mrf.mxu2  ;;  %v7354_v31 = vpop.f32.mrf.mxu0 }
 0x223   : > { %2344 = vmatmul.f32.gmra.mxu2 %v7332_v19  ;;  %9965 = vst [vmem:[#allocation73_spill] sm:$0xff] %v7352_v49 }
 0x224   : > { %9966 = vst [vmem:[#allocation74_spill] sm:$0xff] %v7354_v31  ;;  %v2689_v31 = vld [vmem:[#allocation2 + $0x79] sm:$0xff] }
 0x225   : > { %v7339_v20 = vpop.f32.mrf.mxu3 }
 0x227   : > { %v7350_v57 = vpop.f32.mrf.mxu1 }
 0x228   : > { %2792 = vmatmul.f32.gmra.mxu0 %v2687_v18  ;;  %9964 = vst [vmem:[#allocation72_spill] sm:$0xff] %v7350_v57  ;;  %v5716_v57 = vld [vmem:[%s9861_s3 + $0x458] sm:$0xff] }
 0x22a   : > { %1510 = vmatmul.f32.gmra.mxu3 %v6960_v55  ;;  %2074 = vmatmul.f32.gmra.mxu1 %v6914_v29  ;;  %v7358_v55 = vld [vmem:[#allocation2 + $0x172] sm:$0xff]  ;;  %v7377_v23 = vpop.f32.mrf.mxu2 }
 0x22b   : > { %2347 = vmatmul.f32.gmra.mxu2 %v7345_v28  ;;  %v5720_v29 = vld [vmem:[%s9861_s3 + $0x478] sm:$0xff]  ;;  %9968 = vst [vmem:[#allocation76_spill] sm:$0xff] %v7377_v23 }
 0x22c   : > { %3022 = vmatpush.msra.mxu1 %v5720_v29  ;;  %v5717_v29 = vld [vmem:[%s9861_s3 + $0x460] sm:$0xff] }
 0x22d   : > { %v7348_v63 = vpop.f32.mrf.mxu3 }
 0x230   : > { %2795 = vmatmul.f32.gmra.mxu0 %v2688_v6  ;;  %v5719_v6 = vld [vmem:[%s9861_s3 + $0x470] sm:$0xff] }
 0x231   : > { %3023 = vmatpush.msra.mxu1 %v5719_v6  ;;  %v7381_v6 = vld [vmem:[#allocation2 + $0x182] sm:$0xff] }
 0x232   : > { %1513 = vmatmul.f32.gmra.mxu3 %v6974_v60  ;;  %2077 = vmatmul.f32.gmra.mxu1 %v6934_v26  ;;  %v5718_v26 = vld [vmem:[%s9861_s3 + $0x468] sm:$0xff]  ;;  %v7372_v60 = vpop.f32.mrf.mxu1  ;;  %9969 = vst [vmem:[#allocation77_spill] sm:$0xff] %v7381_v6  ;;  %v7414_v23 = vpop.f32.mrf.mxu2 }
 0x233   : > { %2350 = vmatmul.f32.gmra.mxu2 %v7358_v55  ;;  %9967 = vst [vmem:[#allocation75_spill] sm:$0xff] %v7372_v60  ;;  %3024 = vmatpush.msra.mxu1 %v5718_v26  ;;  %v2690_v60 = vld [vmem:[#allocation2 + $0x81] sm:$0xff] }
 0x234   : > { %9972 = vst [vmem:[#allocation80_spill] sm:$0xff] %v7414_v23  ;;  %v5710_v23 = vld [vmem:[%s9861_s3 + $0x428] sm:$0xff] }
 0x235   : > { %v7364_v18 = vpop.f32.mrf.mxu3  ;;  %3025 = vmatpush.msra.mxu1 %v5717_v29  ;;  %v5713_v29 = vld [vmem:[%s9861_s3 + $0x440] sm:$0xff] }
 0x237   : > { %3026 = vmatpush.msra.mxu1 %v5716_v57  ;;  %v7403_v57 = vld [vmem:[%s9862_s4] ss:$0 sm:$0xff] }
 0x238   : > { %2798 = vmatmul.f32.gmra.mxu0 %v2689_v31  ;;  %v7387_v31 = vpop.f32.mrf.mxu0 }
 0x239   : > { %9970 = vst [vmem:[#allocation78_spill] sm:$0xff] %v7387_v31 }
 0x23a   : > { %1516 = vmatmul.f32.gmra.mxu3 %v6990_v0  ;;  %2080 = vmatmul.f32.gmra.mxu1 %v6950_v43  ;;  %v5715_v0 = vld [vmem:[%s9861_s3 + $0x450] sm:$0xff]  ;;  %v5714_v43 = vld [vmem:[%s9861_s3 + $0x448] sm:$0xff]  ;;  %v7405_v31 = vpop.f32.mrf.mxu1 }
 0x23b   : > { %2353 = vmatmul.f32.gmra.mxu2 %v7381_v6  ;;  %3027 = vmatpush.msra.mxu1 %v5715_v0  ;;  %9971 = vst [vmem:[#allocation79_spill] sm:$0xff] %v7405_v31  ;;  %v7409_v0 = vld [vmem:[#allocation2 + $0x18a] sm:$0xff] }
 0x23c   : > { %v2691_v6 = vld [vmem:[#allocation2 + $0x91] sm:$0xff] }
 0x23d   : > { %v7389_v26 = vpop.f32.mrf.mxu3  ;;  %3028 = vmatpush.msra.mxu1 %v5714_v43  ;;  %v1096_v43 = vadd.f32 %v7403_v57, %v7264_v12  ;;  %v5709_v12 = vld [vmem:[%s9861_s3 + $0x420] sm:$0xff] }
 0x23f   : > { %3029 = vmatpush.msra.mxu1 %v5713_v29  ;;  %v1097_v29 = vadd.f32 %v7403_v57, %v7276_v46  ;;  %v5705_v46 = vld [vmem:[%s9861_s3 + $0x400] sm:$0xff] }
 0x240   : > { %2801 = vmatmul.f32.gmra.mxu0 %v2690_v60  ;;  %v5712_v60 = vld [vmem:[%s9861_s3 + $0x438] sm:$0xff] }
 0x241   : > { %3030 = vmatpush.msra.mxu1 %v5712_v60 }
 0x242   : > { %1519 = vmatmul.f32.gmra.mxu3 %v7004_v45  ;;  %2083 = vmatmul.f32.gmra.mxu1 %v6966_v53  ;;  %v5711_v45 = vld [vmem:[%s9861_s3 + $0x430] sm:$0xff]  ;;  %v7422_v53 = vpop.f32.mrf.mxu0  ;;  %v7439_v60 = vpop.f32.mrf.mxu1 }
 0x243   : > { %2356 = vmatmul.f32.gmra.mxu2 %v7409_v0  ;;  %9973 = vst [vmem:[#allocation81_spill] sm:$0xff] %v7422_v53  ;;  %3031 = vmatpush.msra.mxu1 %v5711_v45  ;;  %v2954_v53 = vld [vmem:[#allocation2 + $0xca] sm:$0xff] }
 0x245   : > { %v1310_v49 = vpop.f32.mrf.mxu3  ;;  %3032 = vmatpush.msra.mxu1 %v5710_v23  ;;  %v5707_v23 = vld [vmem:[%s9861_s3 + $0x410] sm:$0xff] }
 0x246   : > { %v7424_v31 = vadd.f32 %v1310_v49, %v1096_v43  ;;  %v5708_v49 = vld [vmem:[%s9861_s3 + $0x418] sm:$0xff] }
 0x247   : > { %3033 = vmatpush.msra.mxu1 %v5709_v12  ;;  %v1098_v12 = vadd.f32 %v7403_v57, %v7289_v7  ;;  %v2694_v7 = vld [vmem:[#allocation2 + $0xb1] sm:$0xff] }
 0x248   : > { %2804 = vmatmul.f32.gmra.mxu0 %v2691_v6 }
 0x249   : > { %3034 = vmatpush.msra.mxu1 %v5708_v49 }
 0x24a   : > { %1522 = vmatmul.f32.gmra.mxu3 %v7018_v37  ;;  %2086 = vmatmul.f32.gmra.mxu1 %v6982_v13  ;;  %v2692_v37 = vld [vmem:[#allocation2 + $0x99] sm:$0xff]  ;;  %v5706_v13 = vld [vmem:[%s9861_s3 + $0x408] sm:$0xff]  ;;  %v7449_v45 = vpop.f32.mrf.mxu0 }
 0x24b   : > { %3035 = vmatpush.msra.mxu1 %v5707_v23  ;;  %9974 = vst [vmem:[#allocation82_spill] sm:$0xff] %v7449_v45  ;;  %v2693_v23 = vld [vmem:[#allocation2 + $0xa9] sm:$0xff] }
 0x24d   : > { %v1313_v6 = vpop.f32.mrf.mxu3  ;;  %3036 = vmatpush.msra.mxu1 %v5706_v13 }
 0x24e   : > { %v7444_v43 = vadd.f32 %v1313_v6, %v1097_v29  ;;  %v7458_v29 = vpop.f32.mrf.mxu1 }
 0x24f   : > { %3037 = vmatpush.msra.mxu1 %v5705_v46 }
 0x250   : > { %2807 = vmatmul.f32.gmra.mxu0 %v2692_v37 }
 0x252   : > { %1525 = vmatmul.f32.gmra.mxu3 %v7032_v44  ;;  %2089 = vmatmul.f32.gmra.mxu1 %v6925_v34  ;;  %v7462_v37 = vpop.f32.mrf.mxu0  ;;  %v1099_v34 = vadd.f32 %v7403_v57, %v7302_v8  ;;  %v2695_v8 = vld [vmem:[#allocation2 + $0xc1] sm:$0xff] }
 0x253   : > { %9975 = vst [vmem:[#allocation83_spill] sm:$0xff] %v7462_v37 }
 0x255   : > { %v1316_v49 = vpop.f32.mrf.mxu3 }
 0x256   : > { %v7460_v6 = vadd.f32 %v1316_v49, %v1098_v12  ;;  %v7470_v46 = vpop.f32.mrf.mxu1  ;;  %v9976_v12 = vmax.f32 %v7102_v2, 0.0 }
 0x258   : > { %2810 = vmatmul.f32.gmra.mxu0 %v2693_v23 }
 0x25a   : > { %1528 = vmatmul.f32.gmra.mxu3 %v7042_v59  ;;  %2092 = vmatmul.f32.gmra.mxu1 %v6941_v33  ;;  %v1100_v59 = vadd.f32 %v7403_v57, %v7315_v47  ;;  %v7477_v49 = vpop.f32.mrf.mxu0 }
 0x25b   : > { %9977 = vst [vmem:[#allocation84_spill] sm:$0xff] %v7477_v49 }
 0x25d   : > { %v1319_v44 = vpop.f32.mrf.mxu3 }
 0x25e   : > { %v7468_v13 = vadd.f32 %v1319_v44, %v1099_v34  ;;  %v5688_v34 = vld [vmem:[%s9861_s3 + $0x378] sm:$0xff]  ;;  %v7484_v44 = vpop.f32.mrf.mxu1 }
 0x25f   : > { %2506 = vmatpush.msra.mxu3 %v5688_v34  ;;  %9978 = vst [vmem:[#allocation85_spill] sm:$0xff] %v7484_v44 }
 0x260   : > { %2813 = vmatmul.f32.gmra.mxu0 %v2694_v7 }
 0x262   : > { %1531 = vmatmul.f32.gmra.mxu3 %v7054_v40  ;;  %2095 = vmatmul.f32.gmra.mxu1 %v9976_v12  ;;  %v1101_v40 = vadd.f32 %v7403_v57, %v7326_v14  ;;  %v7490_v47 = vpop.f32.mrf.mxu0  ;;  %v2696_v12 = vld [vmem:[#allocation2 + $0xc9] sm:$0xff] }
 0x263   : > { %9979 = vst [vmem:[#allocation86_spill] sm:$0xff] %v7490_v47  ;;  %v5687_v14 = vld [vmem:[%s9861_s3 + $0x370] sm:$0xff] }
 0x264   : > { %2507 = vmatpush.msra.mxu3 %v5687_v14 }
 0x265   : > { %v1322_v33 = vpop.f32.mrf.mxu3 }
 0x266   : > { %v7479_v23 = vadd.f32 %v1322_v33, %v1100_v59  ;;  %v2941_v59 = vld [vmem:[#allocation2 + $0x32] sm:$0xff]  ;;  %v7495_v33 = vpop.f32.mrf.mxu1 }
 0x267   : > { %9980 = vst [vmem:[#allocation87_spill] sm:$0xff] %v7495_v33  ;;  %v10017_v33 = vld [vmem:[#allocation41_spill] sm:$0xff] }
 0x268   : > { %2816 = vmatmul.f32.gmra.mxu0 %v2695_v8 }
 0x26a   : > { %1534 = vmatmul.f32.gmra.mxu3 %v7066_v62  ;;  %2098 = vmatmul.f32.gmra.mxu1 %v7142_v61  ;;  %v2697_v62 = vld [vmem:[#allocation2 + $0xd9] sm:$0xff]  ;;  %v7499_v34 = vpop.f32.mrf.mxu0 }
 0x26b   : > { %9981 = vst [vmem:[#allocation88_spill] sm:$0xff] %v7499_v34  ;;  %v2943_v34 = vld [vmem:[#allocation2 + $0x4a] sm:$0xff] }
 0x26d   : > { %v1325_v2 = vpop.f32.mrf.mxu3 }
 0x26e   : > { %v7492_v7 = vadd.f32 %v1325_v2, %v1101_v40  ;;  %v2942_v40 = vld [vmem:[#allocation2 + $0x3a] sm:$0xff] }
 0x270   : > { %2819 = vmatmul.f32.gmra.mxu0 %v2696_v12  ;;  %v2698_v12 = vld [vmem:[#allocation2 + $0xe1] sm:$0xff] }
 0x272   : > { %1537 = vmatmul.f32.gmra.mxu3 %v7090_v36  ;;  %3038 = vmatmul.f32.vlgmr.msra.gmra.mxu1 %v2941_v59  ;;  %v7507_v36 = vpop.f32.mrf.mxu1  ;;  %v1072_v59 = vadd.f32 %v7403_v57, %v6782_v35  ;;  %v5686_v35 = vld [vmem:[%s9861_s3 + $0x368] sm:$0xff] }
 0x273   : > { %9982 = vst [vmem:[#allocation89_spill] sm:$0xff] %v7507_v36  ;;  %2508 = vmatpush.msra.mxu3 %v5686_v35 }
 0x274   : > { %v1330_v14 = vadd.f32 %v6798_v51, %v1072_v59  ;;  %v2945_v59 = vld [vmem:[#allocation2 + $0x62] sm:$0xff] }
 0x275   : > { %v7497_v8 = vpop.f32.mrf.mxu3 }
 0x278   : > { %2822 = vmatmul.f32.gmra.mxu0 %v2697_v62  ;;  %v7511_v62 = vpop.f32.mrf.mxu0 }
 0x279   : > { %9983 = vst [vmem:[#allocation90_spill] sm:$0xff] %v7511_v62 }
 0x27a   : > { %1540 = vmatmul.f32.gmra.mxu3 %v7116_v25  ;;  %3041 = vmatmul.f32.gmra.mxu1 %v2942_v40  ;;  %v1073_v40 = vadd.f32 %v7403_v57, %v6804_v1  ;;  %v7519_v49 = vpop.f32.mrf.mxu1  ;;  %v2700_v1 = vld [vmem:[#allocation2 + $0xf9] sm:$0xff] }
 0x27b   : > { %9984 = vst [vmem:[#allocation91_spill] sm:$0xff] %v7519_v49 }
 0x27c   : > { %v1331_v51 = vadd.f32 %v6825_v54, %v1073_v40 }
 0x27d   : > { %v7505_v2 = vpop.f32.mrf.mxu3 }
 0x280   : > { %2825 = vmatmul.f32.gmra.mxu0 %v2698_v12  ;;  %v2944_v12 = vld [vmem:[#allocation2 + $0x52] sm:$0xff] }
 0x282   : > { %1543 = vmatmul.f32.gmra.mxu3 %v7146_v56  ;;  %3044 = vmatmul.f32.gmra.mxu1 %v2943_v34  ;;  %v7527_v56 = vpop.f32.mrf.mxu0 }
 0x283   : > { %9985 = vst [vmem:[#allocation92_spill] sm:$0xff] %v7527_v56 }
 0x285   : > { %v1496_v47 = vpop.f32.mrf.mxu3 }
 0x286   : > { %v7515_v25 = vadd.f32 %v1496_v47, %v1330_v14  ;;  %v7533_v14 = vpop.f32.mrf.mxu1 }
 0x287   : > { %9986 = vst [vmem:[#allocation93_spill] sm:$0xff] %v7533_v14 }
 0x288   : > { %2828 = vmatmul.f32.gmra.mxu0 %v7282_v50  ;;  %v1074_v50 = vadd.f32 %v7403_v57, %v6827_v11  ;;  %v5685_v11 = vld [vmem:[%s9861_s3 + $0x360] sm:$0xff] }
 0x289   : > { %2509 = vmatpush.msra.mxu3 %v5685_v11 }
 0x28a   : > { %1546 = vmatmul.f32.gmra.mxu3 %v7183_v22  ;;  %3047 = vmatmul.f32.gmra.mxu1 %v2944_v12  ;;  %v1332_v22 = vadd.f32 %v6860_v32, %v1074_v50  ;;  %v7537_v54 = vpop.f32.mrf.mxu0  ;;  %v2701_v12 = vld [vmem:[#allocation2 + $0x109] sm:$0xff] }
 0x28b   : > { %9987 = vst [vmem:[#allocation94_spill] sm:$0xff] %v7537_v54  ;;  %v2949_v54 = vld [vmem:[#allocation2 + $0x92] sm:$0xff] }
 0x28d   : > { %v1499_v47 = vpop.f32.mrf.mxu3 }
 0x28e   : > { %v7529_v34 = vadd.f32 %v1499_v47, %v1331_v51  ;;  %v1075_v51 = vadd.f32 %v7403_v57, %v6852_v9  ;;  %v2946_v47 = vld [vmem:[#allocation2 + $0x6a] sm:$0xff]  ;;  %v1076_v9 = vadd.f32 %v7403_v57, %v6879_v41  ;;  %v5684_v41 = vld [vmem:[%s9861_s3 + $0x358] sm:$0xff] }
 0x28f   : > { %2510 = vmatpush.msra.mxu3 %v5684_v41  ;;  %v9995_v41 = vld [vmem:[#allocation18_spill] sm:$0xff] }
 0x290   : > { %2831 = vmatmul.f32.gmra.mxu0 %v2700_v1  ;;  %v1333_v32 = vadd.f32 %v6894_v48, %v1075_v51 }
 0x292   : > { %1549 = vmatmul.f32.gmra.mxu3 %v7204_v21  ;;  %3050 = vmatmul.f32.gmra.mxu1 %v2945_v59  ;;  %v7548_v21 = vpop.f32.mrf.mxu1  ;;  %v2702_v59 = vld [vmem:[#allocation2 + $0x111] sm:$0xff] }
 0x293   : > { %9988 = vst [vmem:[#allocation95_spill] sm:$0xff] %v7548_v21 }
 0x295   : > { %v1502_v35 = vpop.f32.mrf.mxu3 }
 0x296   : > { %v7539_v40 = vadd.f32 %v1502_v35, %v1332_v22  ;;  %v7554_v22 = vpop.f32.mrf.mxu0  ;;  %v2947_v35 = vld [vmem:[#allocation2 + $0x7a] sm:$0xff] }
 0x297   : > { %9989 = vst [vmem:[#allocation96_spill] sm:$0xff] %v7554_v22  ;;  %v9993_v22 = vld [vmem:[#allocation14_spill] sm:$0xff] }
 0x298   : > { %2834 = vmatmul.f32.gmra.mxu0 %v2701_v12  ;;  %v1334_v12 = vadd.f32 %v6909_v24, %v1076_v9  ;;  %v9992_v24 = vld [vmem:[#allocation15_spill] sm:$0xff] }
 0x29a   : > { %1552 = vmatmul.f32.gmra.mxu3 %v7228_v3  ;;  %3053 = vmatmul.f32.gmra.mxu1 %v2946_v47  ;;  %v7558_v48 = vpop.f32.mrf.mxu1  ;;  %v2703_v47 = vld [vmem:[#allocation2 + $0x121] sm:$0xff] }
 0x29b   : > { %9990 = vst [vmem:[#allocation97_spill] sm:$0xff] %v7558_v48 }
 0x29d   : > { %v1505_v1 = vpop.f32.mrf.mxu3 }
 0x29e   : > { %v7550_v50 = vadd.f32 %v1505_v1, %v1333_v32  ;;  %v1077_v32 = vadd.f32 %v7403_v57, %v6897_v58  ;;  %v2948_v1 = vld [vmem:[#allocation2 + $0x82] sm:$0xff]  ;;  %v1078_v58 = vadd.f32 %v7403_v57, %v9993_v22  ;;  %v5683_v22 = vld [vmem:[%s9861_s3 + $0x350] sm:$0xff] }
 0x29f   : > { %2511 = vmatpush.msra.mxu3 %v5683_v22  ;;  %v5682_v22 = vld [vmem:[%s9861_s3 + $0x348] sm:$0xff] }
 0x2a0   : > { %2837 = vmatmul.f32.gmra.mxu0 %v2702_v59  ;;  %v7567_v59 = vpop.f32.mrf.mxu0  ;;  %v1335_v9 = vadd.f32 %v9992_v24, %v1077_v32  ;;  %v2705_v24 = vld [vmem:[#allocation2 + $0x139] sm:$0xff] }
 0x2a1   : > { %9991 = vst [vmem:[#allocation98_spill] sm:$0xff] %v7567_v59  ;;  %v1336_v59 = vadd.f32 %v9995_v41, %v1078_v58  ;;  %2512 = vmatpush.msra.mxu3 %v5682_v22  ;;  %v5679_v22 = vld [vmem:[%s9861_s3 + $0x330] sm:$0xff] }
 0x2a2   : > { %1555 = vmatmul.f32.gmra.mxu3 %v7250_v38  ;;  %3056 = vmatmul.f32.gmra.mxu1 %v2947_v35 }
 0x2a5   : > { %v1508_v11 = vpop.f32.mrf.mxu3 }
 0x2a6   : > { %v7560_v51 = vadd.f32 %v1508_v11, %v1334_v12  ;;  %v2704_v11 = vld [vmem:[#allocation2 + $0x129] sm:$0xff] }
 0x2a8   : > { %2840 = vmatmul.f32.gmra.mxu0 %v2703_v47  ;;  %v7575_v47 = vpop.f32.mrf.mxu1  ;;  %v7579_v56 = vpop.f32.mrf.mxu0 }
 0x2a9   : > { %9994 = vst [vmem:[#allocation15_spill] sm:$0xff] %v7575_v47  ;;  %v2707_v47 = vld [vmem:[#allocation2 + $0x151] sm:$0xff] }
 0x2aa   : > { %1558 = vmatmul.f32.gmra.mxu3 %v7259_v16  ;;  %3059 = vmatmul.f32.gmra.mxu1 %v2948_v1  ;;  %9996 = vst [vmem:[#allocation14_spill] sm:$0xff] %v7579_v56 }
 0x2ad   : > { %v1511_v35 = vpop.f32.mrf.mxu3 }
 0x2ae   : > { %v7571_v12 = vadd.f32 %v1511_v35, %v1335_v9  ;;  %v9997_v9 = vld [vmem:[#allocation16_spill] sm:$0xff] }
 0x2af   : > { %v1079_v35 = vadd.f32 %v7403_v57, %v9997_v9  ;;  %v2706_v9 = vld [vmem:[#allocation2 + $0x141] sm:$0xff] }
 0x2b0   : > { %2843 = vmatmul.f32.gmra.mxu0 %v2704_v11  ;;  %v2950_v11 = vld [vmem:[#allocation2 + $0x9a] sm:$0xff]  ;;  %v7588_v62 = vpop.f32.mrf.mxu1  ;;  %v7592_v41 = vpop.f32.mrf.mxu0 }
 0x2b1   : > { %9998 = vst [vmem:[#allocation18_spill] sm:$0xff] %v7588_v62  ;;  %v2951_v62 = vld [vmem:[#allocation2 + $0xaa] sm:$0xff] }
 0x2b2   : > { %1561 = vmatmul.f32.gmra.mxu3 %v7271_v15  ;;  %3062 = vmatmul.f32.gmra.mxu1 %v2949_v54  ;;  %v9999_v54 = vld [vmem:[#allocation20_spill] sm:$0xff] }
 0x2b3   : > { %v1337_v58 = vadd.f32 %v9999_v54, %v1079_v35  ;;  %v5680_v35 = vld [vmem:[%s9861_s3 + $0x338] sm:$0xff] }
 0x2b4   : > { %v10001_v54 = vld [vmem:[#allocation22_spill] sm:$0xff] }
 0x2b5   : > { %v1514_v1 = vpop.f32.mrf.mxu3 }
 0x2b6   : > { %v7581_v32 = vadd.f32 %v1514_v1, %v1336_v59 }
 0x2b8   : > { %2846 = vmatmul.f32.gmra.mxu0 %v2705_v24  ;;  %v10000_v24 = vld [vmem:[#allocation17_spill] sm:$0xff]  ;;  %v7618_v48 = vpop.f32.mrf.mxu0 }
 0x2b9   : > { %v1080_v56 = vadd.f32 %v7403_v57, %v10000_v24 }
 0x2ba   : > { %1564 = vmatmul.f32.gmra.mxu3 %v7286_v39  ;;  %3065 = vmatmul.f32.gmra.mxu1 %v2950_v11  ;;  %v5681_v11 = vld [vmem:[%s9861_s3 + $0x340] sm:$0xff] }
 0x2bb   : > { %2513 = vmatpush.msra.mxu3 %v5681_v11  ;;  %v5677_v11 = vld [vmem:[%s9861_s3 + $0x320] sm:$0xff] }
 0x2bd   : > { %v1517_v59 = vpop.f32.mrf.mxu3  ;;  %2514 = vmatpush.msra.mxu3 %v5680_v35  ;;  %v2952_v35 = vld [vmem:[#allocation2 + $0xb2] sm:$0xff] }
 0x2be   : > { %v7594_v1 = vadd.f32 %v1517_v59, %v1337_v58  ;;  %v1338_v58 = vadd.f32 %v10001_v54, %v1080_v56  ;;  %v7609_v59 = vpop.f32.mrf.mxu1  ;;  %v5678_v56 = vld [vmem:[%s9861_s3 + $0x328] sm:$0xff]  ;;  %v5676_v54 = vld [vmem:[%s9861_s3 + $0x318] sm:$0xff] }
 0x2bf   : > { %10002 = vst [vmem:[#allocation16_spill] sm:$0xff] %v7609_v59  ;;  %2515 = vmatpush.msra.mxu3 %v5679_v22  ;;  %v2708_v59 = vld [vmem:[#allocation2 + $0x159] sm:$0xff] }
 0x2c0   : > { %2849 = vmatmul.f32.gmra.mxu0 %v2706_v9 }
 0x2c1   : > { %2516 = vmatpush.msra.mxu3 %v5678_v56  ;;  %v5675_v56 = vld [vmem:[%s9861_s3 + $0x310] sm:$0xff] }
 0x2c2   : > { %1567 = vmatmul.f32.gmra.mxu3 %v7299_v42  ;;  %3068 = vmatmul.f32.gmra.mxu1 %v2951_v62  ;;  %v10003_v62 = vld [vmem:[#allocation19_spill] sm:$0xff] }
 0x2c3   : > { %v1081_v37 = vadd.f32 %v7403_v57, %v10003_v62  ;;  %2517 = vmatpush.msra.mxu3 %v5677_v11  ;;  %v5673_v11 = vld [vmem:[%s9861_s3 + $0x300] sm:$0xff] }
 0x2c5   : > { %v1520_v9 = vpop.f32.mrf.mxu3  ;;  %2518 = vmatpush.msra.mxu3 %v5676_v54  ;;  %v2953_v54 = vld [vmem:[#allocation2 + $0xc2] sm:$0xff] }
 0x2c6   : > { %v7611_v24 = vadd.f32 %v1520_v9, %v1338_v58  ;;  %v10004_v58 = vld [vmem:[#allocation26_spill] sm:$0xff]  ;;  %v7631_v22 = vpop.f32.mrf.mxu1 }
 0x2c7   : > { %10005 = vst [vmem:[#allocation20_spill] sm:$0xff] %v7631_v22  ;;  %2519 = vmatpush.msra.mxu3 %v5675_v56  ;;  %v2709_v56 = vld [vmem:[#allocation2 + $0x169] sm:$0xff] }
 0x2c8   : > { %2852 = vmatmul.f32.gmra.mxu0 %v2707_v47  ;;  %v1339_v47 = vadd.f32 %v10004_v58, %v1081_v37  ;;  %v5674_v37 = vld [vmem:[%s9861_s3 + $0x308] sm:$0xff]  ;;  %v7646_v58 = vpop.f32.mrf.mxu0 }
 0x2c9   : > { %2520 = vmatpush.msra.mxu3 %v5674_v37 }
 0x2ca   : > { %1570 = vmatmul.f32.gmra.mxu3 %v7310_v4  ;;  %3071 = vmatmul.f32.gmra.mxu1 %v2952_v35  ;;  %v10006_v35 = vld [vmem:[#allocation21_spill] sm:$0xff] }
 0x2cb   : > { %v1082_v45 = vadd.f32 %v7403_v57, %v10006_v35  ;;  %2521 = vmatpush.msra.mxu3 %v5673_v11  ;;  %v10007_v35 = vld [vmem:[#allocation24_spill] sm:$0xff] }
 0x2cc   : > { %v1083_v22 = vadd.f32 %v7403_v57, %v10007_v35  ;;  %v2955_v35 = vld [vmem:[#allocation2 + $0xda] sm:$0xff] }
 0x2cd   : > { %v1523_v9 = vpop.f32.mrf.mxu3 }
 0x2ce   : > { %v7633_v62 = vadd.f32 %v1523_v9, %v1339_v47  ;;  %v1340_v47 = vadd.f32 %v7026_v5, %v1082_v45  ;;  %v7654_v21 = vpop.f32.mrf.mxu1  ;;  %v1341_v37 = vadd.f32 %v7044_v10, %v1083_v22  ;;  %v2710_v45 = vld [vmem:[#allocation2 + $0x171] sm:$0xff] }
 0x2cf   : > { %10008 = vst [vmem:[#allocation17_spill] sm:$0xff] %v7654_v21 }
 0x2d0   : > { %2855 = vmatmul.f32.gmra.mxu0 %v2708_v59 }
 0x2d2   : > { %1573 = vmatmul.f32.gmra.mxu3 %v7321_v52  ;;  %3074 = vmatmul.f32.gmra.mxu1 %v2953_v54  ;;  %v7658_v54 = vpop.f32.mrf.mxu0 }
 0x2d5   : > { %v1526_v9 = vpop.f32.mrf.mxu3 }
 0x2d6   : > { %v7650_v59 = vadd.f32 %v1526_v9, %v1340_v47  ;;  %v10009_v47 = vld [vmem:[#allocation27_spill] sm:$0xff]  ;;  %v7664_v14 = vpop.f32.mrf.mxu1 }
 0x2d7   : > { %v1084_v9 = vadd.f32 %v7403_v57, %v10009_v47  ;;  %10010 = vst [vmem:[#allocation22_spill] sm:$0xff] %v7664_v14  ;;  %v2956_v47 = vld [vmem:[#allocation2 + $0xe2] sm:$0xff] }
 0x2d8   : > { %2858 = vmatmul.f32.gmra.mxu0 %v2709_v56  ;;  %v10011_v56 = vld [vmem:[#allocation34_spill] sm:$0xff] }
 0x2da   : > { %1576 = vmatmul.f32.gmra.mxu3 %v7332_v19  ;;  %3077 = vmatmul.f32.gmra.mxu1 %v2954_v53  ;;  %v1342_v53 = vadd.f32 %v10011_v56, %v1084_v9  ;;  %v7668_v10 = vpop.f32.mrf.mxu0  ;;  %v10016_v56 = vld [vmem:[#allocation31_spill] sm:$0xff] }
 0x2dd   : > { %v1529_v11 = vpop.f32.mrf.mxu3 }
 0x2de   : > { %v7660_v5 = vadd.f32 %v1529_v11, %v1341_v37  ;;  %v2711_v37 = vld [vmem:[#allocation2 + $0x181] sm:$0xff]  ;;  %v10012_v11 = vld [vmem:[#allocation29_spill] sm:$0xff]  ;;  %v7676_v36 = vpop.f32.mrf.mxu1 }
 0x2df   : > { %v1085_v49 = vadd.f32 %v7403_v57, %v10012_v11  ;;  %10014 = vst [vmem:[#allocation19_spill] sm:$0xff] %v7676_v36  ;;  %v2425_v11 = vld [vmem:[#allocation2 + $0x30] sm:$0xff]  ;;  %v2426_v36 = vld [vmem:[#allocation2 + $0x38] sm:$0xff] }
 0x2e0   : > { %2861 = vmatmul.f32.gmra.mxu0 %v2710_v45  ;;  %v10013_v45 = vld [vmem:[#allocation37_spill] sm:$0xff] }
 0x2e1   : > { %v1343_v14 = vadd.f32 %v10013_v45, %v1085_v49 }
 0x2e2   : > { %1579 = vmatmul.f32.gmra.mxu3 %v7345_v28  ;;  %3080 = vmatmul.f32.gmra.mxu1 %v2955_v35 }
 0x2e5   : > { %v1532_v21 = vpop.f32.mrf.mxu3 }
 0x2e6   : > { %v7670_v22 = vadd.f32 %v1532_v21, %v1342_v53  ;;  %v1086_v21 = vadd.f32 %v7403_v57, %v10016_v56  ;;  %v7682_v53 = vpop.f32.mrf.mxu0  ;;  %v7686_v49 = vpop.f32.mrf.mxu1 }
 0x2e7   : > { %10018 = vst [vmem:[#allocation21_spill] sm:$0xff] %v7686_v49  ;;  %v2445_v49 = vld [vmem:[#allocation2 + $0x120] sm:$0xff] }
 0x2e8   : > { %2864 = vmatmul.f32.gmra.mxu0 %v2711_v37  ;;  %v2957_v37 = vld [vmem:[#allocation2 + $0xf2] sm:$0xff] }
 0x2ea   : > { %1582 = vmatmul.f32.gmra.mxu3 %v7358_v55  ;;  %3083 = vmatmul.f32.gmra.mxu1 %v2956_v47  ;;  %v1344_v47 = vadd.f32 %v10017_v33, %v1086_v21 }
 0x2ed   : > { %v1535_v35 = vpop.f32.mrf.mxu3 }
 0x2ee   : > { %v7678_v9 = vadd.f32 %v1535_v35, %v1343_v14  ;;  %v10019_v14 = vld [vmem:[#allocation33_spill] sm:$0xff]  ;;  %v7698_v21 = vpop.f32.mrf.mxu1 }
 0x2ef   : > { %v1087_v35 = vadd.f32 %v7403_v57, %v10019_v14  ;;  %10021 = vst [vmem:[#allocation24_spill] sm:$0xff] %v7698_v21  ;;  %v2428_v14 = vld [vmem:[#allocation2 + $0x50] sm:$0xff] }
 0x2f0   : > { %10015 = vst [vmem:[#allocation26_spill] sm:$0xff] %v7678_v9  ;;  %2867 = vmatmul.f32.gmra.mxu0 %v7142_v61 }
 0x2f1   : > { %v1345_v61 = vadd.f32 %v7154_v17, %v1087_v35 }
 0x2f2   : > { %2522 = vmatmul.f32.vlgmr.msra.gmra.mxu3 %v2425_v11  ;;  %3086 = vmatmul.f32.gmra.mxu1 %v2957_v37  ;;  %v10020_v11 = vld [vmem:[#allocation35_spill] sm:$0xff]  ;;  %v2427_v37 = vld [vmem:[#allocation2 + $0x48] sm:$0xff] }
 0x2f3   : > { %v1088_v33 = vadd.f32 %v7403_v57, %v10020_v11 }
 0x2f5   : > { %v1538_v44 = vpop.f32.mrf.mxu3 }
 0x2f6   : > { %v7688_v45 = vadd.f32 %v1538_v44, %v1344_v47  ;;  %v1346_v44 = vadd.f32 %v7189_v30, %v1088_v33  ;;  %v7706_v35 = vpop.f32.mrf.mxu1  ;;  %v2429_v33 = vld [vmem:[#allocation2 + $0x60] sm:$0xff] }
 0x2f7   : > { %10023 = vst [vmem:[#allocation27_spill] sm:$0xff] %v7706_v35  ;;  %v10051_v35 = vld [vmem:[#allocation13_spill] sm:$0xff] }
 0x2fa   : > { %2525 = vmatmul.f32.gmra.mxu3 %v2426_v36  ;;  %3089 = vmatmul.f32.gmra.mxu1 %v7228_v3  ;;  %v10022_v3 = vld [vmem:[#allocation38_spill] sm:$0xff] }
 0x2fb   : > { %v1089_v17 = vadd.f32 %v7403_v57, %v10022_v3 }
 0x2fd   : > { %v1541_v56 = vpop.f32.mrf.mxu3 }
 0x2fe   : > { %v7694_v9 = vadd.f32 %v1541_v56, %v1345_v61  ;;  %v1347_v61 = vadd.f32 %v7216_v27, %v1089_v17  ;;  %v2430_v17 = vld [vmem:[#allocation2 + $0x68] sm:$0xff] }
 0x302   : > { %2528 = vmatmul.f32.gmra.mxu3 %v2427_v37  ;;  %3092 = vmatmul.f32.gmra.mxu1 %v7250_v38  ;;  %v10025_v38 = vld [vmem:[#allocation40_spill] sm:$0xff]  ;;  %v10026_v37 = vld [vmem:[#allocation51_spill] sm:$0xff] }
 0x303   : > { %v1090_v30 = vadd.f32 %v7403_v57, %v10025_v38 }
 0x305   : > { %v1544_v47 = vpop.f32.mrf.mxu3 }
 0x306   : > { %v7702_v36 = vadd.f32 %v1544_v47, %v1346_v44  ;;  %v1348_v44 = vadd.f32 %v10026_v37, %v1090_v30  ;;  %v7716_v47 = vpop.f32.mrf.mxu1  ;;  %v2431_v30 = vld [vmem:[#allocation2 + $0x78] sm:$0xff]  ;;  %v10033_v37 = vld [vmem:[#allocation45_spill] sm:$0xff] }
 0x307   : > { %10027 = vst [vmem:[#allocation29_spill] sm:$0xff] %v7716_v47  ;;  %v1092_v47 = vadd.f32 %v7403_v57, %v10033_v37  ;;  %v10037_v37 = vld [vmem:[#allocation48_spill] sm:$0xff] }
 0x30a   : > { %2531 = vmatmul.f32.gmra.mxu3 %v2428_v14  ;;  %3095 = vmatmul.f32.gmra.mxu1 %v7259_v16  ;;  %v10029_v16 = vld [vmem:[#allocation43_spill] sm:$0xff] }
 0x30b   : > { %v1091_v27 = vadd.f32 %v7403_v57, %v10029_v16 }
 0x30d   : > { %v1547_v56 = vpop.f32.mrf.mxu3 }
 0x30e   : > { %v7710_v11 = vadd.f32 %v1547_v56, %v1347_v61  ;;  %v10030_v61 = vld [vmem:[#allocation54_spill] sm:$0xff] }
 0x30f   : > { %v1349_v56 = vadd.f32 %v10030_v61, %v1091_v27  ;;  %v2432_v27 = vld [vmem:[#allocation2 + $0x80] sm:$0xff] }
 0x310   : > { %10024 = vst [vmem:[#allocation34_spill] sm:$0xff] %v7710_v11  ;;  %v2972_v11 = vld [vmem:[#allocation2 + $0x1a2] sm:$0xff] }
 0x312   : > { %2534 = vmatmul.f32.gmra.mxu3 %v2429_v33  ;;  %3098 = vmatmul.f32.gmra.mxu1 %v7271_v15  ;;  %v7724_v33 = vpop.f32.mrf.mxu1 }
 0x313   : > { %10031 = vst [vmem:[#allocation31_spill] sm:$0xff] %v7724_v33 }
 0x315   : > { %v1550_v3 = vpop.f32.mrf.mxu3 }
 0x316   : > { %v7718_v14 = vadd.f32 %v1550_v3, %v1348_v44  ;;  %v1350_v44 = vadd.f32 %v7339_v20, %v1092_v47  ;;  %v1094_v20 = vadd.f32 %v7403_v57, %v10037_v37 }
 0x318   : > { %10028 = vst [vmem:[#allocation37_spill] sm:$0xff] %v7718_v14 }
 0x31a   : > { %2537 = vmatmul.f32.gmra.mxu3 %v2430_v17  ;;  %3101 = vmatmul.f32.gmra.mxu1 %v7286_v39  ;;  %v7734_v39 = vpop.f32.mrf.mxu1  ;;  %v10035_v17 = vld [vmem:[#allocation46_spill] sm:$0xff] }
 0x31b   : > { %v1093_v61 = vadd.f32 %v7403_v57, %v10035_v17  ;;  %v10039_v17 = vld [vmem:[#allocation50_spill] sm:$0xff] }
 0x31d   : > { %v1553_v38 = vpop.f32.mrf.mxu3 }
 0x31e   : > { %v7726_v15 = vadd.f32 %v1553_v38, %v1349_v56  ;;  %v1351_v56 = vadd.f32 %v7348_v63, %v1093_v61  ;;  %v1095_v63 = vadd.f32 %v7403_v57, %v10039_v17  ;;  %v10043_v17 = vld [vmem:[#allocation77_spill] sm:$0xff] }
 0x320   : > { %10032 = vst [vmem:[#allocation41_spill] sm:$0xff] %v7726_v15  ;;  %v1353_v61 = vadd.f32 %v7389_v26, %v1095_v63 }
 0x322   : > { %2540 = vmatmul.f32.gmra.mxu3 %v2431_v30  ;;  %3104 = vmatmul.f32.gmra.mxu1 %v7299_v42  ;;  %v2433_v42 = vld [vmem:[#allocation2 + $0x90] sm:$0xff]  ;;  %v7744_v47 = vpop.f32.mrf.mxu1 }
 0x325   : > { %v1556_v3 = vpop.f32.mrf.mxu3 }
 0x326   : > { %v7732_v16 = vadd.f32 %v1556_v3, %v1350_v44  ;;  %v1352_v44 = vadd.f32 %v7364_v18, %v1094_v20 }
 0x328   : > { %10034 = vst [vmem:[#allocation33_spill] sm:$0xff] %v7732_v16  ;;  %v2448_v16 = vld [vmem:[#allocation2 + $0x140] sm:$0xff] }
 0x32a   : > { %2543 = vmatmul.f32.gmra.mxu3 %v2432_v27  ;;  %3107 = vmatmul.f32.gmra.mxu1 %v7310_v4  ;;  %v2434_v4 = vld [vmem:[#allocation2 + $0x98] sm:$0xff] }
 0x32d   : > { %v1559_v38 = vpop.f32.mrf.mxu3 }
 0x32e   : > { %v7740_v30 = vadd.f32 %v1559_v38, %v1351_v56  ;;  %v7754_v56 = vpop.f32.mrf.mxu1 }
 0x330   : > { %10036 = vst [vmem:[#allocation35_spill] sm:$0xff] %v7740_v30 }
 0x332   : > { %2546 = vmatmul.f32.gmra.mxu3 %v2433_v42  ;;  %3110 = vmatmul.f32.gmra.mxu1 %v7321_v52  ;;  %v2435_v52 = vld [vmem:[#allocation2 + $0xa8] sm:$0xff] }
 0x335   : > { %v1562_v3 = vpop.f32.mrf.mxu3 }
 0x336   : > { %v7748_v27 = vadd.f32 %v1562_v3, %v1352_v44  ;;  %v7759_v37 = vpop.f32.mrf.mxu1  ;;  %v2436_v44 = vld [vmem:[#allocation2 + $0xb0] sm:$0xff] }
 0x338   : > { %10038 = vst [vmem:[#allocation38_spill] sm:$0xff] %v7748_v27  ;;  %v10075_v27 = vld [vmem:[#allocation76_spill] sm:$0xff] }
 0x33a   : > { %2549 = vmatmul.f32.gmra.mxu3 %v2434_v4  ;;  %3113 = vmatmul.f32.gmra.mxu1 %v7332_v19  ;;  %v2437_v4 = vld [vmem:[#allocation2 + $0xc0] sm:$0xff] }
 0x33d   : > { %v1565_v38 = vpop.f32.mrf.mxu3 }
 0x33e   : > { %v7756_v42 = vadd.f32 %v1565_v38, %v1353_v61  ;;  %v7768_v3 = vpop.f32.mrf.mxu1  ;;  %v2439_v38 = vld [vmem:[#allocation2 + $0xd8] sm:$0xff] }
 0x340   : > { %10040 = vst [vmem:[#allocation40_spill] sm:$0xff] %v7756_v42 }
 0x342   : > { %2552 = vmatmul.f32.gmra.mxu3 %v2435_v52  ;;  %3116 = vmatmul.f32.gmra.mxu1 %v7345_v28  ;;  %v10046_v52 = vld [vmem:[#allocation10_spill] sm:$0xff] }
 0x345   : > { %v1568_v18 = vpop.f32.mrf.mxu3 }
 0x346   : > { %v7762_v20 = vadd.f32 %v1568_v18, %v7424_v31  ;;  %v2438_v31 = vld [vmem:[#allocation2 + $0xc8] sm:$0xff]  ;;  %v7774_v61 = vpop.f32.mrf.mxu1  ;;  %v1070_v18 = vadd.f32 %v7403_v57, %v10046_v52 }
 0x348   : > { %10041 = vst [vmem:[#allocation51_spill] sm:$0xff] %v7762_v20 }
 0x34a   : > { %2555 = vmatmul.f32.gmra.mxu3 %v2436_v44  ;;  %3119 = vmatmul.f32.gmra.mxu1 %v7358_v55 }
 0x34d   : > { %v1571_v19 = vpop.f32.mrf.mxu3 }
 0x34e   : > { %v7766_v26 = vadd.f32 %v1571_v19, %v7444_v43  ;;  %v10047_v19 = vld [vmem:[#allocation11_spill] sm:$0xff] }
 0x350   : > { %10042 = vst [vmem:[#allocation43_spill] sm:$0xff] %v7766_v26 }
 0x352   : > { %2558 = vmatmul.f32.gmra.mxu3 %v2437_v4  ;;  %3122 = vmatmul.f32.gmra.mxu1 %v10043_v17  ;;  %v1328_v4 = vadd.f32 %v10047_v19, %v1070_v18  ;;  %v10053_v18 = vld [vmem:[#allocation53_spill] sm:$0xff] }
 0x354   : > { %v1586_v17 = vadd.f32 %v7497_v8, %v1328_v4  ;;  %v10054_v8 = vld [vmem:[#allocation25_spill] sm:$0xff] }
 0x355   : > { %v1574_v28 = vpop.f32.mrf.mxu3  ;;  %v10055_v4 = vld [vmem:[#allocation57_spill] sm:$0xff] }
 0x356   : > { %v7772_v63 = vadd.f32 %v1574_v28, %v7460_v6  ;;  %v2440_v28 = vld [vmem:[#allocation2 + $0xe0] sm:$0xff] }
 0x358   : > { %10044 = vst [vmem:[#allocation54_spill] sm:$0xff] %v7772_v63 }
 0x35a   : > { %2561 = vmatmul.f32.gmra.mxu3 %v2438_v31  ;;  %3125 = vmatmul.f32.gmra.mxu1 %v7409_v0  ;;  %v10049_v31 = vld [vmem:[#allocation12_spill] sm:$0xff] }
 0x35b   : > { %v1071_v0 = vadd.f32 %v7403_v57, %v10049_v31  ;;  %v7798_v57 = vpop.f32.mrf.mxu0  ;;  %v7802_v31 = vpop.f32.mrf.mxu1 }
 0x35d   : > { %v1577_v55 = vpop.f32.mrf.mxu3  ;;  %v1329_v21 = vadd.f32 %v10051_v35, %v1071_v0  ;;  %v10056_v35 = vld [vmem:[#allocation56_spill] sm:$0xff] }
 0x35e   : > { %v7778_v43 = vadd.f32 %v1577_v55, %v7468_v13  ;;  %v10050_v13 = vld [vmem:[#allocation23_spill] sm:$0xff]  ;;  %v10058_v0 = vld [vmem:[#allocation60_spill] sm:$0xff] }
 0x35f   : > { %v1844_v55 = vadd.f32 %v10050_v13, %v1586_v17  ;;  %v1587_v52 = vadd.f32 %v7505_v2, %v1329_v21  ;;  %v10057_v2 = vld [vmem:[#allocation28_spill] sm:$0xff] }
 0x360   : > { %10045 = vst [vmem:[#allocation45_spill] sm:$0xff] %v7778_v43  ;;  %v1846_v21 = vadd.f32 %v10057_v2, %v7515_v25  ;;  %v10062_v2 = vld [vmem:[#allocation61_spill] sm:$0xff]  ;;  %v10067_v43 = vld [vmem:[#allocation70_spill] sm:$0xff] }
 0x361   : > { %v1845_v19 = vadd.f32 %v10054_v8, %v1587_v52  ;;  %v2443_v8 = vld [vmem:[#allocation2 + $0x108] sm:$0xff] }
 0x362   : > { %2564 = vmatmul.f32.gmra.mxu3 %v2439_v38 }
 0x365   : > { %v1580_v44 = vpop.f32.mrf.mxu3 }
 0x366   : > { %v7784_v6 = vadd.f32 %v1580_v44, %v7479_v23  ;;  %v2102_v23 = vadd.f32 %v10053_v18, %v1844_v55  ;;  %v2441_v44 = vld [vmem:[#allocation2 + $0xf0] sm:$0xff]  ;;  %v7810_v18 = vpop.f32.mrf.mxu0 }
 0x368   : > { %10048 = vst [vmem:[#allocation46_spill] sm:$0xff] %v7784_v6  ;;  %v2360_v6 = vadd.f32 %v10055_v4, %v2102_v23  ;;  %v10059_v23 = vld [vmem:[#allocation58_spill] sm:$0xff] }
 0x36a   : > { %2567 = vmatmul.f32.gmra.mxu3 %v2440_v28 }
 0x36d   : > { %v1583_v33 = vpop.f32.mrf.mxu3 }
 0x36e   : > { %v7792_v38 = vadd.f32 %v1583_v33, %v7492_v7  ;;  %v2103_v7 = vadd.f32 %v10056_v35, %v1845_v19  ;;  %v2442_v33 = vld [vmem:[#allocation2 + $0xf8] sm:$0xff] }
 0x36f   : > { %v10060_v19 = vld [vmem:[#allocation30_spill] sm:$0xff] }
 0x370   : > { %10052 = vst [vmem:[#allocation48_spill] sm:$0xff] %v7792_v38  ;;  %v2361_v13 = vadd.f32 %v10058_v0, %v2103_v7  ;;  %v1847_v4 = vadd.f32 %v10060_v19, %v7529_v34  ;;  %v10064_v38 = vld [vmem:[#allocation67_spill] sm:$0xff] }
 0x372   : > { %2570 = vmatmul.f32.gmra.mxu3 %v2441_v44  ;;  %v2104_v44 = vadd.f32 %v10059_v23, %v1846_v21  ;;  %v2105_v0 = vadd.f32 %v10062_v2, %v1847_v4  ;;  %v10063_v23 = vld [vmem:[#allocation32_spill] sm:$0xff] }
 0x373   : > { %v10066_v2 = vld [vmem:[#allocation36_spill] sm:$0xff] }
 0x374   : > { %v2363_v34 = vadd.f32 %v10064_v38, %v2105_v0  ;;  %v10069_v0 = vld [vmem:[#allocation66_spill] sm:$0xff] }
 0x375   : > { %v2523_v28 = vpop.f32.mrf.mxu3 }
 0x376   : > { %v7800_v17 = vadd.f32 %v2523_v28, %v2360_v6  ;;  %v7813_v6 = vpop.f32.mrf.mxu1  ;;  %v10061_v28 = vld [vmem:[#allocation64_spill] sm:$0xff] }
 0x377   : > { %v2362_v35 = vadd.f32 %v10061_v28, %v2104_v44 }
 0x37a   : > { %2573 = vmatmul.f32.gmra.mxu3 %v2442_v33  ;;  %v7818_v33 = vpop.f32.mrf.mxu2 }
 0x37d   : > { %v2526_v55 = vpop.f32.mrf.mxu3 }
 0x37e   : > { %v7808_v52 = vadd.f32 %v2526_v55, %v2361_v13  ;;  %v7823_v13 = vpop.f32.mrf.mxu0  ;;  %v2444_v55 = vld [vmem:[#allocation2 + $0x110] sm:$0xff]  ;;  %v7825_v21 = vpop.f32.mrf.mxu1 }
 0x382   : > { %2576 = vmatmul.f32.gmra.mxu3 %v2443_v8  ;;  %v1848_v8 = vadd.f32 %v10063_v23, %v7539_v40  ;;  %v7832_v28 = vpop.f32.mrf.mxu2 }
 0x385   : > { %v2529_v25 = vpop.f32.mrf.mxu3 }
 0x386   : > { %v7820_v7 = vadd.f32 %v2529_v25, %v2362_v35  ;;  %v10065_v35 = vld [vmem:[#allocation63_spill] sm:$0xff]  ;;  %v7835_v4 = vpop.f32.mrf.mxu0  ;;  %v7840_v26 = vpop.f32.mrf.mxu1 }
 0x387   : > { %v2106_v25 = vadd.f32 %v10065_v35, %v1848_v8  ;;  %10068 = vst [vmem:[#allocation50_spill] sm:$0xff] %v7840_v26  ;;  %v10071_v35 = vld [vmem:[#allocation73_spill] sm:$0xff] }
 0x389   : > { %v2364_v63 = vadd.f32 %v10067_v43, %v2106_v25 }
 0x38a   : > { %2579 = vmatmul.f32.gmra.mxu3 %v2444_v55  ;;  %v1849_v55 = vadd.f32 %v10066_v2, %v7550_v50 }
 0x38c   : > { %v2107_v23 = vadd.f32 %v10069_v0, %v1849_v55  ;;  %v10074_v0 = vld [vmem:[#allocation42_spill] sm:$0xff] }
 0x38d   : > { %v2532_v19 = vpop.f32.mrf.mxu3 }
 0x38e   : > { %v7830_v44 = vadd.f32 %v2532_v19, %v2363_v34  ;;  %v7845_v34 = vpop.f32.mrf.mxu2  ;;  %v2446_v19 = vld [vmem:[#allocation2 + $0x128] sm:$0xff]  ;;  %v2365_v20 = vadd.f32 %v10071_v35, %v2107_v23  ;;  %v7850_v42 = vpop.f32.mrf.mxu0 }
 0x38f   : > { %v7854_v25 = vpop.f32.mrf.mxu1 }
 0x390   : > { %10072 = vst [vmem:[#allocation77_spill] sm:$0xff] %v7854_v25 }
 0x392   : > { %2582 = vmatmul.f32.gmra.mxu3 %v2445_v49  ;;  %v10070_v49 = vld [vmem:[#allocation39_spill] sm:$0xff] }
 0x393   : > { %v1850_v8 = vadd.f32 %v10070_v49, %v7560_v51 }
 0x395   : > { %v2535_v40 = vpop.f32.mrf.mxu3 }
 0x396   : > { %v7842_v38 = vadd.f32 %v2535_v40, %v2364_v63  ;;  %v10073_v63 = vld [vmem:[#allocation69_spill] sm:$0xff]  ;;  %v2447_v40 = vld [vmem:[#allocation2 + $0x138] sm:$0xff]  ;;  %v7857_v55 = vpop.f32.mrf.mxu2  ;;  %v7864_v35 = vpop.f32.mrf.mxu0 }
 0x397   : > { %v2108_v2 = vadd.f32 %v10073_v63, %v1850_v8  ;;  %10076 = vst [vmem:[#allocation10_spill] sm:$0xff] %v7864_v35  ;;  %v7867_v30 = vpop.f32.mrf.mxu1  ;;  %v10079_v8 = vld [vmem:[#allocation80_spill] sm:$0xff] }
 0x398   : > { %10078 = vst [vmem:[#allocation11_spill] sm:$0xff] %v7867_v30 }
 0x399   : > { %v2366_v51 = vadd.f32 %v10075_v27, %v2108_v2  ;;  %v2449_v27 = vld [vmem:[#allocation2 + $0x150] sm:$0xff] }
 0x39a   : > { %2585 = vmatmul.f32.gmra.mxu3 %v2446_v19  ;;  %v1851_v19 = vadd.f32 %v10074_v0, %v7571_v12 }
 0x39d   : > { %v2538_v50 = vpop.f32.mrf.mxu3 }
 0x39e   : > { %v7852_v43 = vadd.f32 %v2538_v50, %v2365_v20  ;;  %v10077_v20 = vld [vmem:[#allocation72_spill] sm:$0xff]  ;;  %v7874_v12 = vpop.f32.mrf.mxu0 }
 0x39f   : > { %v2109_v50 = vadd.f32 %v10077_v20, %v1851_v19  ;;  %10080 = vst [vmem:[#allocation12_spill] sm:$0xff] %v7874_v12  ;;  %v7876_v2 = vpop.f32.mrf.mxu1 }
 0x3a0   : > { %10081 = vst [vmem:[#allocation23_spill] sm:$0xff] %v7876_v2  ;;  %v2452_v2 = vld [vmem:[#allocation2 + $0x170] sm:$0xff] }
 0x3a1   : > { %v2367_v63 = vadd.f32 %v10079_v8, %v2109_v50  ;;  %v2451_v50 = vld [vmem:[#allocation2 + $0x168] sm:$0xff] }
 0x3a2   : > { %2588 = vmatmul.f32.gmra.mxu3 %v2447_v40  ;;  %v7870_v40 = vpop.f32.mrf.mxu2 }
 0x3a5   : > { %v2541_v49 = vpop.f32.mrf.mxu3 }
 0x3a6   : > { %v7862_v23 = vadd.f32 %v2541_v49, %v2366_v51  ;;  %v2450_v51 = vld [vmem:[#allocation2 + $0x158] sm:$0xff] }
 0x3a7   : > { %v7884_v49 = vpop.f32.mrf.mxu1 }
 0x3a8   : > { %10083 = vst [vmem:[#allocation53_spill] sm:$0xff] %v7884_v49 }
 0x3aa   : > { %2591 = vmatmul.f32.gmra.mxu3 %v2448_v16  ;;  %v7880_v19 = vpop.f32.mrf.mxu2  ;;  %v7882_v16 = vpop.f32.mrf.mxu0 }
 0x3ab   : > { %10082 = vst [vmem:[#allocation13_spill] sm:$0xff] %v7882_v16  ;;  %v2971_v16 = vld [vmem:[#allocation2 + $0x19a] sm:$0xff] }
 0x3ac   : > { %3128 = vmatmul.f32.gmra.mxu1 %v2971_v16 }
 0x3ad   : > { %v2544_v15 = vpop.f32.mrf.mxu3 }
 0x3ae   : > { %v7872_v14 = vadd.f32 %v2544_v15, %v2367_v63 }
 0x3b2   : > { %2594 = vmatmul.f32.gmra.mxu3 %v2449_v27  ;;  %v7888_v15 = vpop.f32.mrf.mxu2  ;;  %v7890_v8 = vpop.f32.mrf.mxu0 }
 0x3b3   : > { %10084 = vst [vmem:[#allocation25_spill] sm:$0xff] %v7890_v8  ;;  %v7894_v27 = vpop.f32.mrf.mxu1  ;;  %v2714_v8 = vld [vmem:[#allocation2 + $0x1a1] sm:$0xff] }
 0x3b4   : > { %10085 = vst [vmem:[#allocation57_spill] sm:$0xff] %v7894_v27  ;;  %3131 = vmatmul.f32.gmra.mxu1 %v2972_v11 }
 0x3b5   : > { %v7878_v0 = vpop.f32.mrf.mxu3 }
 0x3ba   : > { %2597 = vmatmul.f32.gmra.mxu3 %v2450_v51  ;;  %v7896_v30 = vpop.f32.mrf.mxu2  ;;  %v2713_v51 = vld [vmem:[#allocation2 + $0x199] sm:$0xff]  ;;  %v7900_v12 = vpop.f32.mrf.mxu0 }
 0x3bb   : > { %10086 = vst [vmem:[#allocation56_spill] sm:$0xff] %v7896_v30  ;;  %2870 = vmatmul.f32.gmra.mxu0 %v2713_v51  ;;  %v7902_v25 = vpop.f32.mrf.mxu1  ;;  %v2454_v51 = vld [vmem:[#allocation2 + $0x188] sm:$0xff] }
 0x3bc   : > { %10087 = vst [vmem:[#allocation28_spill] sm:$0xff] %v7900_v12 }
 0x3bd   : > { %v7886_v20 = vpop.f32.mrf.mxu3  ;;  %10088 = vst [vmem:[#allocation60_spill] sm:$0xff] %v7902_v25  ;;  %v6035_v25 = vld [vmem:[#allocation2] sm:$0xff] }
 0x3c2   : > { %2600 = vmatmul.f32.gmra.mxu3 %v2451_v50  ;;  %v2453_v50 = vld [vmem:[#allocation2 + $0x180] sm:$0xff]  ;;  %v7904_v27 = vpop.f32.mrf.mxu2  ;;  %v7908_v30 = vpop.f32.mrf.mxu0 }
 0x3c3   : > { %2873 = vmatmul.f32.gmra.mxu0 %v2714_v8  ;;  %10089 = vst [vmem:[#allocation58_spill] sm:$0xff] %v7904_v27  ;;  %v7910_v35 = vpop.f32.mrf.mxu1 }
 0x3c4   : > { %10090 = vst [vmem:[#allocation30_spill] sm:$0xff] %v7908_v30 }
 0x3c5   : > { %v7892_v63 = vpop.f32.mrf.mxu3  ;;  %10091 = vst [vmem:[#allocation64_spill] sm:$0xff] %v7910_v35 }
 0x3ca   : > { %2603 = vmatmul.f32.gmra.mxu3 %v2452_v2  ;;  %v7914_v12 = vpop.f32.mrf.mxu2 }
 0x3cb   : > { %10093 = vst [vmem:[#allocation32_spill] sm:$0xff] %v7914_v12  ;;  %v7918_v8 = vpop.f32.mrf.mxu1 }
 0x3cc   : > { %10095 = vst [vmem:[#allocation63_spill] sm:$0xff] %v7918_v8 }
 0x3cd   : > { %v7898_v49 = vpop.f32.mrf.mxu3 }
 0x3d2   : > { %2606 = vmatmul.f32.gmra.mxu3 %v2453_v50  ;;  %v7916_v50 = vpop.f32.mrf.mxu0  ;;  %v7922_v26 = vpop.f32.mrf.mxu2 }
 0x3d3   : > { %10094 = vst [vmem:[#allocation67_spill] sm:$0xff] %v7916_v50  ;;  %v7928_v35 = vpop.f32.mrf.mxu1 }
 0x3d4   : > { %10097 = vst [vmem:[#allocation70_spill] sm:$0xff] %v7922_v26 }
 0x3d5   : > { %v7906_v2 = vpop.f32.mrf.mxu3  ;;  %10100 = vst [vmem:[#allocation73_spill] sm:$0xff] %v7928_v35  ;;  %v3332_v35 = vld [vmem:[%s9863_s5 + $0x78] sm:$0xff] }
 0x3d6   : > { %3337 = vmatpush.msra.mxu2 %v3332_v35 }
 0x3da   : > { %2609 = vmatmul.f32.gmra.mxu3 %v2454_v51  ;;  %v7924_v11 = vpop.f32.mrf.mxu0  ;;  %v7930_v30 = vpop.f32.mrf.mxu2 }
 0x3db   : > { %10098 = vst [vmem:[#allocation66_spill] sm:$0xff] %v7924_v11  ;;  %v7936_v50 = vpop.f32.mrf.mxu1 }
 0x3dc   : > { %10101 = vst [vmem:[#allocation69_spill] sm:$0xff] %v7930_v30 }
 0x3dd   : > { %v7912_v16 = vpop.f32.mrf.mxu3  ;;  %10104 = vst [vmem:[#allocation72_spill] sm:$0xff] %v7936_v50 }
 0x3de   : > { %10092 = vst [vmem:[#allocation61_spill] sm:$0xff] %v7912_v16 }
 0x3e2   : > { %2612 = vmatmul.f32.gmra.mxu3 %v6035_v25  ;;  %v7934_v16 = vpop.f32.mrf.mxu0  ;;  %v7938_v8 = vpop.f32.mrf.mxu2 }
 0x3e3   : > { %10103 = vst [vmem:[#allocation76_spill] sm:$0xff] %v7934_v16 }
 0x3e4   : > { %10105 = vst [vmem:[#allocation80_spill] sm:$0xff] %v7938_v8 }
 0x3e5   : > { %v7920_v27 = vpop.f32.mrf.mxu3 }
 0x3e6   : > { %10096 = vst [vmem:[#allocation36_spill] sm:$0xff] %v7920_v27 }
 0x3ea   : > { %2615 = vmatmul.f32.gmra.mxu3 %v6035_v25  ;;  %v7942_v26 = vpop.f32.mrf.mxu0  ;;  %v7944_v25 = vpop.f32.mrf.mxu1 }
 0x3eb   : > { %10107 = vst [vmem:[#allocation100_spill] sm:$0xff] %v7942_v26  ;;  %v7951_v30 = vpop.f32.mrf.mxu2 }
 0x3ec   : > { %10108 = vst [vmem:[#allocation101_spill] sm:$0xff] %v7944_v25  ;;  %v3331_v25 = vld [vmem:[%s9863_s5 + $0x70] sm:$0xff] }
 0x3ed   : > { %v7926_v51 = vpop.f32.mrf.mxu3  ;;  %10110 = vst [vmem:[#allocation103_spill] sm:$0xff] %v7951_v30  ;;  %3338 = vmatpush.msra.mxu2 %v3331_v25 }
 0x3ee   : > { %10099 = vst [vmem:[#allocation39_spill] sm:$0xff] %v7926_v51  ;;  %v10129_v51 = vld [vmem:[#allocation47_spill] sm:$0xff] }
 0x3f2   : > { %v7953_v16 = vpop.f32.mrf.mxu0  ;;  %v7955_v50 = vpop.f32.mrf.mxu1 }
 0x3f3   : > { %10111 = vst [vmem:[#allocation104_spill] sm:$0xff] %v7953_v16 }
 0x3f4   : > { %10112 = vst [vmem:[#allocation105_spill] sm:$0xff] %v7955_v50 }
 0x3f5   : > { %v7932_v12 = vpop.f32.mrf.mxu3 }
 0x3f6   : > { %10102 = vst [vmem:[#allocation42_spill] sm:$0xff] %v7932_v12 }
 0x3fa   : > { %v7964_v26 = vpop.f32.mrf.mxu0  ;;  %v7968_v35 = vpop.f32.mrf.mxu1 }
 0x3fb   : > { %10115 = vst [vmem:[#allocation108_spill] sm:$0xff] %v7964_v26 }
 0x3fc   : > { %10117 = vst [vmem:[#allocation110_spill] sm:$0xff] %v7968_v35 }
 0x3fd   : > { %v7940_v27 = vpop.f32.mrf.mxu3 }
 0x3fe   : > { %10106 = vst [vmem:[#allocation99_spill] sm:$0xff] %v7940_v27  ;;  %v7959_v27 = vpop.f32.mrf.mxu2 }
 0x3ff   : > { %10114 = vst [vmem:[#allocation107_spill] sm:$0xff] %v7959_v27  ;;  %v3330_v27 = vld [vmem:[%s9863_s5 + $0x68] sm:$0xff] }
 0x400   : > { %3339 = vmatpush.msra.mxu2 %v3330_v27  ;;  %v2877_v27 = vadd.f32 %v7592_v41, %v7800_v17  ;;  %v10133_v41 = vld [vmem:[#allocation79_spill] sm:$0xff] }
 0x402   : > { %v7974_v50 = vpop.f32.mrf.mxu0 }
 0x403   : > { %10120 = vst [vmem:[#allocation113_spill] sm:$0xff] %v7974_v50  ;;  %v10128_v50 = vld [vmem:[#allocation44_spill] sm:$0xff] }
 0x405   : > { %v7949_v11 = vpop.f32.mrf.mxu3 }
 0x406   : > { %10109 = vst [vmem:[#allocation102_spill] sm:$0xff] %v7949_v11  ;;  %v7970_v30 = vpop.f32.mrf.mxu2 }
 0x407   : > { %10118 = vst [vmem:[#allocation111_spill] sm:$0xff] %v7970_v30 }
 0x40a   : > { %v7985_v25 = vpop.f32.mrf.mxu0 }
 0x40b   : > { %10124 = vst [vmem:[#allocation117_spill] sm:$0xff] %v7985_v25  ;;  %v2879_v25 = vadd.f32 %v7646_v58, %v7820_v7  ;;  %v3329_v58 = vld [vmem:[%s9863_s5 + $0x60] sm:$0xff] }
 0x40c   : > { %3340 = vmatpush.msra.mxu2 %v3329_v58 }
 0x40d   : > { %v7957_v8 = vpop.f32.mrf.mxu3 }
 0x40e   : > { %10113 = vst [vmem:[#allocation106_spill] sm:$0xff] %v7957_v8  ;;  %v7976_v8 = vpop.f32.mrf.mxu1  ;;  %v7981_v11 = vpop.f32.mrf.mxu2 }
 0x40f   : > { %10121 = vst [vmem:[#allocation114_spill] sm:$0xff] %v7976_v8  ;;  %v1852_v8 = vadd.f32 %v10128_v50, %v7581_v32  ;;  %v10131_v32 = vld [vmem:[#allocation75_spill] sm:$0xff] }
 0x410   : > { %10122 = vst [vmem:[#allocation115_spill] sm:$0xff] %v7981_v11  ;;  %v1853_v11 = vadd.f32 %v10129_v51, %v7594_v1  ;;  %v10132_v1 = vld [vmem:[#allocation52_spill] sm:$0xff] }
 0x411   : > { %v1855_v50 = vadd.f32 %v10132_v1, %v7633_v62  ;;  %v10134_v62 = vld [vmem:[#allocation55_spill] sm:$0xff] }
 0x412   : > { %v2111_v17 = vadd.f32 %v10133_v41, %v1853_v11  ;;  %v10141_v41 = vld [vmem:[#allocation87_spill] sm:$0xff] }
 0x415   : > { %v7966_v12 = vpop.f32.mrf.mxu3 }
 0x416   : > { %10116 = vst [vmem:[#allocation109_spill] sm:$0xff] %v7966_v12  ;;  %v7987_v35 = vpop.f32.mrf.mxu1  ;;  %v2878_v12 = vadd.f32 %v7618_v48, %v7808_v52  ;;  %v2880_v48 = vadd.f32 %v7658_v54, %v7830_v44  ;;  %v2110_v52 = vadd.f32 %v10131_v32, %v1852_v8  ;;  %v2881_v54 = vadd.f32 %v7668_v10, %v7842_v38  ;;  %v10135_v38 = vld [vmem:[#allocation59_spill] sm:$0xff] }
 0x417   : > { %10125 = vst [vmem:[#allocation118_spill] sm:$0xff] %v7987_v35  ;;  %v10130_v35 = vld [vmem:[#allocation49_spill] sm:$0xff]  ;;  %v1857_v51 = vadd.f32 %v10135_v38, %v7660_v5 }
 0x418   : > { %v8037_v11 = vadd.f32 %v7759_v37, %v2880_v48  ;;  %v2368_v10 = vadd.f32 %v7818_v33, %v2110_v52  ;;  %v2883_v37 = vadd.f32 %v7798_v57, %v7862_v23  ;;  %v10136_v33 = vld [vmem:[#allocation62_spill] sm:$0xff]  ;;  %v10138_v23 = vld [vmem:[#allocation65_spill] sm:$0xff] }
 0x419   : > { %v10137_v57 = vld [vmem:[#allocation26_spill] sm:$0xff] }
 0x41a   : > { %v8074_v1 = vadd.f32 %v7802_v31, %v2883_v37 }
 0x41d   : > { %v7972_v16 = vpop.f32.mrf.mxu3 }
 0x41e   : > { %10119 = vst [vmem:[#allocation112_spill] sm:$0xff] %v7972_v16  ;;  %v7991_v16 = vpop.f32.mrf.mxu2  ;;  %v8027_v7 = vpop.f32.mrf.mxu1 }
 0x41f   : > { %10127 = vst [vmem:[#allocation120_spill] sm:$0xff] %v7991_v16  ;;  %v8008_v16 = vadd.f32 %v7744_v47, %v2878_v12  ;;  %v8023_v47 = vadd.f32 %v7754_v56, %v2879_v25  ;;  %v1856_v12 = vadd.f32 %v10134_v62, %v7650_v59  ;;  %v2882_v56 = vadd.f32 %v7682_v53, %v7852_v43 }
 0x420   : > { %v2113_v59 = vadd.f32 %v7458_v29, %v1855_v50  ;;  %v2627_v53 = vadd.f32 %v7878_v0, %v2368_v10  ;;  %v1858_v43 = vadd.f32 %v10136_v33, %v7670_v22  ;;  %v1859_v0 = vadd.f32 %v10138_v23, %v10137_v57  ;;  %v10139_v22 = vld [vmem:[#allocation85_spill] sm:$0xff]  ;;  %v10144_v10 = vld [vmem:[#allocation74_spill] sm:$0xff]  ;;  %v10154_v23 = vld [vmem:[#allocation12_spill] sm:$0xff] }
 0x421   : > { %v2115_v52 = vadd.f32 %v10139_v22, %v1857_v51  ;;  %v1862_v38 = vadd.f32 %v10144_v10, %v7702_v36  ;;  %v10145_v51 = vld [vmem:[#allocation91_spill] sm:$0xff]  ;;  %v10149_v33 = vld [vmem:[#allocation34_spill] sm:$0xff] }
 0x422   : > { %v2371_v32 = vadd.f32 %v7857_v55, %v2113_v59  ;;  %v10146_v59 = vld [vmem:[#allocation50_spill] sm:$0xff] }
 0x425   : > { %v7983_v26 = vpop.f32.mrf.mxu3 }
 0x426   : > { %10123 = vst [vmem:[#allocation116_spill] sm:$0xff] %v7983_v26  ;;  %v8005_v26 = vpop.f32.mrf.mxu0  ;;  %v8046_v25 = vpop.f32.mrf.mxu2 }
 0x427   : > { %v8089_v62 = vpop.f32.mrf.mxu1 }
 0x42d   : > { %v7989_v30 = vpop.f32.mrf.mxu3 }
 0x42e   : > { %10126 = vst [vmem:[#allocation119_spill] sm:$0xff] %v7989_v30  ;;  %v1854_v30 = vadd.f32 %v10130_v35, %v7611_v24  ;;  %v8020_v24 = vadd.f32 %v7734_v39, %v2877_v27  ;;  %v2369_v35 = vadd.f32 %v7832_v28, %v2111_v17  ;;  %v2114_v28 = vadd.f32 %v7470_v46, %v1856_v12 }
 0x42f   : > { %v8061_v27 = vadd.f32 %v7774_v61, %v2882_v56  ;;  %v2885_v61 = vadd.f32 %v7823_v13, %v2627_v53  ;;  %v2116_v17 = vadd.f32 %v10141_v41, %v1858_v43  ;;  %v2630_v13 = vadd.f32 %v7898_v49, %v2371_v32  ;;  %v10148_v53 = vld [vmem:[#allocation61_spill] sm:$0xff]  ;;  %v10155_v32 = vld [vmem:[#allocation36_spill] sm:$0xff] }
 0x430   : > { %v2112_v8 = vadd.f32 %v7439_v60, %v1854_v30  ;;  %v3232_v39 = vadd.f32 %v8008_v16, %v8020_v24  ;;  %v8050_v30 = vadd.f32 %v7768_v3, %v2881_v54  ;;  %v2884_v3 = vadd.f32 %v7810_v18, %v7872_v14 }
 0x431   : > { %v2628_v48 = vadd.f32 %v7886_v20, %v2369_v35  ;;  %v10140_v20 = vld [vmem:[#allocation68_spill] sm:$0xff]  ;;  %v2372_v55 = vadd.f32 %v7870_v40, %v2114_v28  ;;  %v8098_v56 = vadd.f32 %v7825_v21, %v2885_v61  ;;  %v2374_v49 = vadd.f32 %v7888_v15, %v2116_v17  ;;  %v8106_v35 = vpop.f32.mrf.mxu2  ;;  %v10147_v21 = vld [vmem:[#allocation10_spill] sm:$0xff]  ;;  %v10152_v28 = vld [vmem:[#allocation93_spill] sm:$0xff] }
 0x432   : > { %v3233_v60 = vadd.f32 %v3232_v39, %v8023_v47  ;;  %v2370_v5 = vadd.f32 %v7845_v34, %v2112_v8  ;;  %v8070_v34 = vpop.f32.mrf.mxu0  ;;  %v1860_v50 = vadd.f32 %v10140_v20, %v7688_v45  ;;  %v8086_v54 = vadd.f32 %v7813_v6, %v2884_v3  ;;  %v10143_v8 = vld [vmem:[#allocation89_spill] sm:$0xff]  ;;  %v10158_v20 = vld [vmem:[#allocation58_spill] sm:$0xff] }
 0x433   : > { %v2886_v31 = vadd.f32 %v7835_v4, %v2628_v48  ;;  %v2373_v45 = vadd.f32 %v7880_v19, %v2115_v52  ;;  %v2117_v40 = vadd.f32 %v10143_v8, %v1859_v0  ;;  %v2631_v4 = vadd.f32 %v7906_v2, %v2372_v55  ;;  %v10150_v2 = vld [vmem:[#allocation78_spill] sm:$0xff]  ;;  %v10153_v48 = vld [vmem:[#allocation77_spill] sm:$0xff]  ;;  %v10159_v55 = vld [vmem:[#allocation95_spill] sm:$0xff] }
 0x434   : > { %v3234_v29 = vadd.f32 %v3233_v60, %v8037_v11  ;;  %v2629_v14 = vadd.f32 %v7892_v63, %v2370_v5  ;;  %v10142_v63 = vld [vmem:[#allocation71_spill] sm:$0xff]  ;;  %v2888_v37 = vadd.f32 %v10147_v21, %v2630_v13  ;;  %v1863_v43 = vadd.f32 %v10150_v2, %v10149_v33  ;;  %v10151_v5 = vld [vmem:[#allocation56_spill] sm:$0xff]  ;;  %v10157_v61 = vld [vmem:[#allocation81_spill] sm:$0xff] }
 0x435   : > { %v8029_v44 = vpop.f32.mrf.mxu3  ;;  %v1861_v12 = vadd.f32 %v10142_v63, %v7694_v9  ;;  %v2118_v9 = vadd.f32 %v10145_v51, %v1860_v50  ;;  %v8110_v60 = vadd.f32 %v10146_v59, %v2886_v31  ;;  %v2375_v36 = vadd.f32 %v10151_v5, %v2117_v40  ;;  %v10160_v31 = vld [vmem:[#allocation11_spill] sm:$0xff]  ;;  %v10161_v63 = vld [vmem:[#allocation13_spill] sm:$0xff] }
 0x436   : > { %v3235_v46 = vadd.f32 %v3234_v29, %v8050_v30  ;;  %v2887_v6 = vadd.f32 %v7850_v42, %v2629_v14  ;;  %v2632_v42 = vadd.f32 %v10148_v53, %v2373_v45  ;;  %v3328_v29 = vld [vmem:[%s9863_s5 + $0x58] sm:$0xff]  ;;  %v2889_v0 = vadd.f32 %v10154_v23, %v2631_v4  ;;  %v10162_v45 = vld [vmem:[#allocation39_spill] sm:$0xff]  ;;  %v10163_v40 = vld [vmem:[#allocation41_spill] sm:$0xff] }
 0x437   : > { %v2119_v15 = vadd.f32 %v10152_v28, %v1861_v12  ;;  %v2633_v22 = vadd.f32 %v10155_v32, %v2374_v49  ;;  %3341 = vmatpush.msra.mxu2 %v3328_v29  ;;  %v2376_v50 = vadd.f32 %v10158_v20, %v2118_v9  ;;  %v2120_v41 = vadd.f32 %v10159_v55, %v1862_v38  ;;  %v10165_v4 = vld [vmem:[#allocation32_spill] sm:$0xff]  ;;  %v10166_v49 = vld [vmem:[#allocation97_spill] sm:$0xff]  ;;  %v8146_v9 = vpop.f32.mrf.mxu1  ;;  %v10169_v53 = vld [vmem:[#allocation42_spill] sm:$0xff] }
 0x438   : > { %v3236_v58 = vadd.f32 %v3235_v46, %v8061_v27  ;;  %v8123_v57 = vadd.f32 %v10153_v48, %v2887_v6  ;;  %v10156_v46 = vld [vmem:[#allocation37_spill] sm:$0xff]  ;;  %v8137_v13 = vadd.f32 %v10160_v31, %v2888_v37  ;;  %v2890_v12 = vadd.f32 %v10161_v63, %v2632_v42  ;;  %v10171_v2 = vld [vmem:[#allocation83_spill] sm:$0xff]  ;;  %v10175_v23 = vld [vmem:[#allocation28_spill] sm:$0xff] }
 0x439   : > { %v1864_v14 = vadd.f32 %v10157_v61, %v10156_v46  ;;  %v2634_v8 = vadd.f32 %v10162_v45, %v2375_v36  ;;  %v2377_v10 = vadd.f32 %v10165_v4, %v2119_v15  ;;  %v2121_v51 = vadd.f32 %v10166_v49, %v1863_v43  ;;  %v10168_v21 = vld [vmem:[#allocation25_spill] sm:$0xff]  ;;  %v10172_v36 = vld [vmem:[#allocation70_spill] sm:$0xff]  ;;  %v10173_v29 = vld [vmem:[#allocation15_spill] sm:$0xff]  ;;  %v8167_v63 = vpop.f32.mrf.mxu2 }
 0x43a   : > { %v3237_v39 = vadd.f32 %v3236_v58, %v8074_v1  ;;  %v8133_v17 = vpop.f32.mrf.mxu0  ;;  %v2891_v37 = vadd.f32 %v10168_v21, %v2633_v22  ;;  %v2635_v42 = vadd.f32 %v10169_v53, %v2376_v50  ;;  %v10170_v33 = vld [vmem:[#allocation33_spill] sm:$0xff]  ;;  %v2378_v28 = vadd.f32 %v10172_v36, %v2120_v41  ;;  %v10177_v61 = vld [vmem:[#allocation35_spill] sm:$0xff]  ;;  %v10178_v22 = vld [vmem:[#allocation84_spill] sm:$0xff] }
 0x43b   : > { %v1866_v5 = vadd.f32 %v10171_v2, %v10170_v33  ;;  %v2122_v15 = vadd.f32 %v10173_v29, %v1864_v14  ;;  %v2892_v32 = vadd.f32 %v10175_v23, %v2634_v8  ;;  %v1867_v20 = vadd.f32 %v10178_v22, %v10177_v61  ;;  %v10179_v50 = vld [vmem:[#allocation69_spill] sm:$0xff]  ;;  %v10185_v49 = vld [vmem:[#allocation86_spill] sm:$0xff]  ;;  %v10187_v21 = vld [vmem:[#allocation16_spill] sm:$0xff] }
 0x43c   : > { %v3238_v19 = vadd.f32 %v3237_v39, %v8086_v54  ;;  %v10164_v39 = vld [vmem:[#allocation82_spill] sm:$0xff]  ;;  %v2379_v55 = vadd.f32 %v10179_v50, %v2121_v51  ;;  %v10181_v41 = vld [vmem:[#allocation57_spill] sm:$0xff]  ;;  %v10188_v33 = vld [vmem:[#allocation60_spill] sm:$0xff] }
 0x43d   : > { %v8078_v18 = vpop.f32.mrf.mxu3  ;;  %v1865_v6 = vadd.f32 %v10164_v39, %v10163_v40  ;;  %v8171_v45 = vadd.f32 %v10181_v41, %v2891_v37  ;;  %v10183_v39 = vld [vmem:[#allocation102_spill] sm:$0xff]  ;;  %v8183_v2 = vadd.f32 %v10188_v33, %v2892_v32  ;;  %v10189_v37 = vld [vmem:[#allocation67_spill] sm:$0xff]  ;;  %v10197_v41 = vld [vmem:[#allocation88_spill] sm:$0xff] }
 0x43e   : > { %v3239_v3 = vadd.f32 %v3238_v19, %v8098_v56  ;;  %v10167_v19 = vld [vmem:[#allocation23_spill] sm:$0xff]  ;;  %v2637_v8 = vadd.f32 %v10183_v39, %v2378_v28  ;;  %v10190_v29 = vld [vmem:[#allocation106_spill] sm:$0xff]  ;;  %v10199_v39 = vld [vmem:[#allocation17_spill] sm:$0xff] }
 0x43f   : > { %v8149_v59 = vadd.f32 %v10167_v19, %v2889_v0  ;;  %v10176_v0 = vld [vmem:[#allocation99_spill] sm:$0xff]  ;;  %v10186_v19 = vld [vmem:[#allocation80_spill] sm:$0xff] }
 0x440   : > { %v3240_v58 = vadd.f32 %v3239_v3, %v8110_v60  ;;  %v10174_v3 = vld [vmem:[#allocation53_spill] sm:$0xff]  ;;  %v2636_v46 = vadd.f32 %v10176_v0, %v2377_v10  ;;  %v10184_v10 = vld [vmem:[#allocation38_spill] sm:$0xff]  ;;  %v2380_v51 = vadd.f32 %v10186_v19, %v2122_v15  ;;  %v10193_v15 = vld [vmem:[#allocation64_spill] sm:$0xff] }
 0x441   : > { %v8159_v48 = vadd.f32 %v10174_v3, %v2890_v12  ;;  %v10182_v12 = vld [vmem:[#allocation30_spill] sm:$0xff]  ;;  %v10192_v3 = vld [vmem:[#allocation20_spill] sm:$0xff]  ;;  %v10203_v33 = vld [vmem:[#allocation51_spill] sm:$0xff] }
 0x442   : > { %v3241_v38 = vadd.f32 %v3240_v58, %v8123_v57  ;;  %v10180_v58 = vld [vmem:[#allocation18_spill] sm:$0xff]  ;;  %v2893_v40 = vadd.f32 %v10182_v12, %v2635_v42  ;;  %v2894_v36 = vadd.f32 %v10189_v37, %v2636_v46  ;;  %v2638_v42 = vadd.f32 %v10190_v29, %v2379_v55  ;;  %v8189_v0 = vpop.f32.mrf.mxu0  ;;  %v10198_v12 = vld [vmem:[#allocation107_spill] sm:$0xff] }
 0x443   : > { %v2123_v31 = vadd.f32 %v10180_v58, %v1865_v6  ;;  %v2124_v6 = vadd.f32 %v10187_v21, %v1866_v5  ;;  %v2125_v23 = vadd.f32 %v10192_v3, %v1867_v20  ;;  %v10194_v5 = vld [vmem:[#allocation66_spill] sm:$0xff]  ;;  %v10195_v58 = vld [vmem:[#allocation109_spill] sm:$0xff]  ;;  %v10205_v29 = vld [vmem:[#allocation111_spill] sm:$0xff] }
 0x444   : > { %v3242_v43 = vadd.f32 %v3241_v38, %v8137_v13  ;;  %v1868_v38 = vadd.f32 %v10185_v49, %v10184_v10  ;;  %v8193_v22 = vadd.f32 %v10193_v15, %v2893_v40  ;;  %v2895_v50 = vadd.f32 %v10194_v5, %v2637_v8  ;;  %v8201_v10 = vpop.f32.mrf.mxu1  ;;  %v10200_v49 = vld [vmem:[#allocation63_spill] sm:$0xff]  ;;  %v10201_v40 = vld [vmem:[#allocation76_spill] sm:$0xff]  ;;  %v10206_v3 = vld [vmem:[#allocation73_spill] sm:$0xff] }
 0x445   : > { %v8127_v52 = vpop.f32.mrf.mxu3  ;;  %v2639_v32 = vadd.f32 %v10195_v58, %v2380_v51  ;;  %v2382_v55 = vadd.f32 %v10198_v12, %v2124_v6  ;;  %v8205_v19 = vadd.f32 %v10200_v49, %v2894_v36  ;;  %v2896_v21 = vadd.f32 %v10201_v40, %v2638_v42  ;;  %v10204_v51 = vld [vmem:[#allocation90_spill] sm:$0xff]  ;;  %v10207_v15 = vld [vmem:[#allocation100_spill] sm:$0xff]  ;;  %v10211_v12 = vld [vmem:[#allocation115_spill] sm:$0xff]  ;;  %v2351_v40 = vpop.f32.mrf.mxu2 }
 0x446   : > { %v3243_v14 = vadd.f32 %v3242_v43, %v8149_v59  ;;  %v10191_v43 = vld [vmem:[#allocation103_spill] sm:$0xff]  ;;  %v1870_v37 = vadd.f32 %v10204_v51, %v10203_v33 }
 0x447   : > { %v2381_v28 = vadd.f32 %v10191_v43, %v2123_v31  ;;  %v2126_v31 = vadd.f32 %v10199_v39, %v1868_v38  ;;  %v2383_v43 = vadd.f32 %v10205_v29, %v2125_v23  ;;  %v8214_v38 = vadd.f32 %v10206_v3, %v2895_v50  ;;  %v10212_v39 = vld [vmem:[#allocation22_spill] sm:$0xff]  ;;  %v10214_v50 = vld [vmem:[#allocation104_spill] sm:$0xff]  ;;  %v10215_v51 = vld [vmem:[#allocation119_spill] sm:$0xff] }
 0x448   : > { %v3244_v53 = vadd.f32 %v3243_v14, %v8159_v48  ;;  %v10196_v14 = vld [vmem:[#allocation40_spill] sm:$0xff]  ;;  %v2897_v5 = vadd.f32 %v10207_v15, %v2639_v32  ;;  %v10216_v29 = vld [vmem:[#allocation54_spill] sm:$0xff]  ;;  %v10218_v15 = vld [vmem:[#allocation19_spill] sm:$0xff] }
 0x449   : > { %v1869_v46 = vadd.f32 %v10197_v41, %v10196_v14  ;;  %v10209_v14 = vld [vmem:[#allocation43_spill] sm:$0xff]  ;;  %v10210_v41 = vld [vmem:[#allocation92_spill] sm:$0xff]  ;;  %v2642_v32 = vadd.f32 %v10215_v51, %v2383_v43  ;;  %v10224_v43 = vld [vmem:[#allocation21_spill] sm:$0xff] }
 0x44a   : > { %v3245_v61 = vadd.f32 %v3244_v53, %v8171_v45  ;;  %v10202_v53 = vld [vmem:[#allocation112_spill] sm:$0xff]  ;;  %v1871_v42 = vadd.f32 %v10210_v41, %v10209_v14 }
 0x44b   : > { %v2640_v8 = vadd.f32 %v10202_v53, %v2381_v28  ;;  %v2384_v28 = vadd.f32 %v10211_v12, %v2126_v31  ;;  %v2127_v49 = vadd.f32 %v10212_v39, %v1869_v46  ;;  %v10213_v53 = vld [vmem:[#allocation72_spill] sm:$0xff]  ;;  %v10219_v31 = vld [vmem:[#allocation101_spill] sm:$0xff] }
 0x44c   : > { %v3246_v20 = vadd.f32 %v3245_v61, %v8183_v2  ;;  %v10208_v61 = vld [vmem:[#allocation116_spill] sm:$0xff]  ;;  %v8233_v41 = vadd.f32 %v10219_v31, %v2897_v5  ;;  %v2129_v51 = vadd.f32 %v10224_v43, %v1871_v42  ;;  %v10231_v43 = vld [vmem:[#allocation117_spill] sm:$0xff] }
 0x44d   : > { %v8175_v4 = vpop.f32.mrf.mxu3  ;;  %v2641_v58 = vadd.f32 %v10208_v61, %v2382_v55  ;;  %v2898_v33 = vadd.f32 %v10214_v50, %v2640_v8  ;;  %v10217_v55 = vld [vmem:[#allocation94_spill] sm:$0xff]  ;;  %v2128_v61 = vadd.f32 %v10218_v15, %v1870_v37  ;;  %v10220_v46 = vld [vmem:[#allocation108_spill] sm:$0xff]  ;;  %v3327_v37 = vld [vmem:[%s9863_s5 + $0x50] sm:$0xff] }
 0x44e   : > { %v3247_v6 = vadd.f32 %v3246_v20, %v8193_v22  ;;  %v8224_v20 = vadd.f32 %v10213_v53, %v2896_v21  ;;  %v1872_v3 = vadd.f32 %v10217_v55, %v10216_v29  ;;  %v10221_v21 = vld [vmem:[#allocation45_spill] sm:$0xff]  ;;  %v10222_v39 = vld [vmem:[#allocation96_spill] sm:$0xff]  ;;  %v8244_v29 = vpop.f32.mrf.mxu0  ;;  %3342 = vmatpush.msra.mxu2 %v3327_v37  ;;  %v10228_v15 = vld [vmem:[#allocation98_spill] sm:$0xff] }
 0x44f   : > { %v2899_v12 = vadd.f32 %v10220_v46, %v2641_v58  ;;  %v1873_v53 = vadd.f32 %v10222_v39, %v10221_v21  ;;  %v10223_v8 = vld [vmem:[#allocation120_spill] sm:$0xff]  ;;  %v10226_v58 = vld [vmem:[#allocation113_spill] sm:$0xff]  ;;  %v2386_v42 = vadd.f32 %v8046_v25, %v2128_v61  ;;  %v2387_v25 = vadd.f32 %v8106_v35, %v2129_v51  ;;  %v2354_v51 = vpop.f32.mrf.mxu2 }
 0x450   : > { %v3248_v23 = vadd.f32 %v3247_v6, %v8205_v19  ;;  %v2643_v6 = vadd.f32 %v8029_v44, %v2384_v28  ;;  %v2385_v50 = vadd.f32 %v10223_v8, %v2127_v49  ;;  %v2900_v44 = vadd.f32 %v10226_v58, %v2642_v32  ;;  %v10227_v28 = vld [vmem:[#allocation46_spill] sm:$0xff]  ;;  %v10229_v46 = vld [vmem:[#allocation24_spill] sm:$0xff] }
 0x451   : > { %v1874_v31 = vadd.f32 %v10228_v15, %v10227_v28  ;;  %v2130_v21 = vadd.f32 %v10229_v46, %v1872_v3  ;;  %v3326_v39 = vld [vmem:[%s9863_s5 + $0x48] sm:$0xff]  ;;  %v10230_v8 = vld [vmem:[#allocation110_spill] sm:$0xff]  ;;  %v10232_v3 = vld [vmem:[#allocation27_spill] sm:$0xff] }
 0x452   : > { %v3249_v14 = vadd.f32 %v3248_v23, %v8214_v38  ;;  %v10225_v23 = vld [vmem:[#allocation105_spill] sm:$0xff]  ;;  %v2644_v49 = vadd.f32 %v8078_v18, %v2385_v50  ;;  %v8263_v32 = vadd.f32 %v10230_v8, %v2899_v12  ;;  %v2901_v37 = vadd.f32 %v10231_v43, %v2643_v6  ;;  %3343 = vmatpush.msra.mxu2 %v3326_v39  ;;  %v3325_v50 = vld [vmem:[%s9863_s5 + $0x40] sm:$0xff]  ;;  %v10235_v46 = vld [vmem:[#allocation118_spill] sm:$0xff] }
 0x453   : > { %v8248_v55 = vadd.f32 %v10225_v23, %v2898_v33  ;;  %v2645_v18 = vadd.f32 %v8127_v52, %v2386_v42  ;;  %v2131_v61 = vadd.f32 %v10232_v3, %v1873_v53  ;;  %v2646_v6 = vadd.f32 %v8175_v4, %v2387_v25  ;;  %v10234_v15 = vld [vmem:[#allocation29_spill] sm:$0xff]  ;;  %v3324_v53 = vld [vmem:[%s9863_s5 + $0x38] sm:$0xff]  ;;  %v10236_v4 = vld [vmem:[#allocation48_spill] sm:$0xff] }
 0x454   : > { %v3250_v5 = vadd.f32 %v3249_v14, %v8224_v20  ;;  %v8259_v14 = vpop.f32.mrf.mxu1  ;;  %3344 = vmatpush.msra.mxu2 %v3325_v50  ;;  %v2902_v12 = vadd.f32 %v8005_v26, %v2644_v49  ;;  %v2388_v52 = vadd.f32 %v8167_v63, %v2130_v21  ;;  %v2132_v35 = vadd.f32 %v10234_v15, %v1874_v31  ;;  %v3323_v63 = vld [vmem:[%s9863_s5 + $0x30] sm:$0xff]  ;;  %v10237_v31 = vld [vmem:[#allocation14_spill] sm:$0xff] }
 0x455   : > { %v2607_v36 = vpop.f32.mrf.mxu3  ;;  %v8285_v39 = vadd.f32 %v10235_v46, %v2901_v37  ;;  %v2389_v49 = vadd.f32 %v2351_v40, %v2131_v61  ;;  %v1875_v21 = vadd.f32 %v10237_v31, %v10236_v4  ;;  %v2904_v37 = vadd.f32 %v8133_v17, %v2646_v6  ;;  %v10238_v6 = vld [vmem:[#allocation31_spill] sm:$0xff] }
 0x456   : > { %v3251_v33 = vadd.f32 %v3250_v5, %v8233_v41  ;;  %v10233_v5 = vld [vmem:[#allocation114_spill] sm:$0xff]  ;;  %3345 = vmatpush.msra.mxu2 %v3324_v53  ;;  %v2647_v26 = vadd.f32 %v2607_v36, %v2388_v52  ;;  %v2871_v8 = vpop.f32.mrf.mxu0  ;;  %v8295_v43 = vadd.f32 %v8027_v7, %v2902_v12  ;;  %v3322_v36 = vld [vmem:[%s9863_s5 + $0x28] sm:$0xff]  ;;  %v3279_v40 = vmax.f32 %v8008_v16, %v8061_v27 }
 0x457   : > { %v8274_v28 = vadd.f32 %v10233_v5, %v2900_v44  ;;  %v2903_v44 = vadd.f32 %v8070_v34, %v2645_v18  ;;  %v2390_v34 = vadd.f32 %v2354_v51, %v2132_v35  ;;  %v3320_v5 = vld [vmem:[%s9863_s5 + $0x18] sm:$0xff]  ;;  %v3278_v12 = vmax.f32 %v8020_v24, %v8050_v30  ;;  %v2357_v31 = vpop.f32.mrf.mxu2 }
 0x458   : > { %v3252_v58 = vadd.f32 %v3251_v33, %v8248_v55  ;;  %3346 = vmatpush.msra.mxu2 %v3323_v63  ;;  %v2905_v7 = vadd.f32 %v8189_v0, %v2647_v26  ;;  %v3281_v0 = vmax.f32 %v8037_v11, %v8086_v54  ;;  %v2133_v52 = vadd.f32 %v10238_v6, %v1875_v21 }
 0x459   : > { %v8305_v50 = vadd.f32 %v8089_v62, %v2903_v44  ;;  %v3280_v62 = vmax.f32 %v8023_v47, %v8074_v1  ;;  %v3283_v15 = vmax.f32 %v3279_v40, %v8110_v60  ;;  %v8324_v53 = vadd.f32 %v8146_v9, %v2904_v37  ;;  %v3317_v40 = vld [vmem:[%s9863_s5] sm:$0xff] }
 0x45a   : > { %v3253_v42 = vadd.f32 %v3252_v58, %v8263_v32  ;;  %3347 = vmatpush.msra.mxu2 %v3322_v36  ;;  %v3321_v58 = vld [vmem:[%s9863_s5 + $0x20] sm:$0xff]  ;;  %v3282_v46 = vmax.f32 %v3278_v12, %v8098_v56  ;;  %v3285_v26 = vmax.f32 %v3281_v0, %v8137_v13  ;;  %v8336_v9 = vadd.f32 %v8201_v10, %v2905_v7  ;;  %v3372_v0 = vld [vmem:[%s9865_s7 + $0x70] sm:$0xff] }
 0x45b   : > { %v3284_v44 = vmax.f32 %v3280_v62, %v8123_v57  ;;  %v2391_v36 = vadd.f32 %v2357_v31, %v2133_v52  ;;  %v3373_v62 = vld [vmem:[%s9865_s7 + $0x78] sm:$0xff] }
 0x45c   : > { %v3254_v33 = vadd.f32 %v3253_v42, %v8274_v28  ;;  %v3129_v61 = vpop.f32.mrf.mxu1  ;;  %3348 = vmatpush.msra.mxu2 %v3321_v58  ;;  %v3319_v42 = vld [vmem:[%s9863_s5 + $0x10] sm:$0xff]  ;;  %v3286_v21 = vmax.f32 %v3282_v46, %v8149_v59  ;;  %v3289_v37 = vmax.f32 %v3285_v26, %v8183_v2  ;;  %3378 = vmatpush.msrb.mxu3 %v3373_v62 }
 0x45d   : > { %v2610_v23 = vpop.f32.mrf.mxu3 }
 0x45e   : > { %v2648_v25 = vadd.f32 %v2610_v23, %v2389_v49  ;;  %v3255_v18 = vadd.f32 %v3254_v33, %v8285_v39  ;;  %v6102_v23 = vmov 256.0   ;;  %3349 = vmatpush.msra.mxu2 %v3320_v5  ;;  %v3287_v49 = vmax.f32 %v3283_v15, %v8159_v48  ;;  %3379 = vmatpush.msrb.mxu3 %v3372_v0 }
 0x45f   : > { %5901 = vrcp.f32 %v6102_v23  ;;  %v3288_v33 = vmax.f32 %v3284_v44, %v8171_v45  ;;  %v3293_v7 = vmax.f32 %v3289_v37, %v8224_v20  ;;  %v2874_v23 = vpop.f32.mrf.mxu0  ;;  %v3371_v44 = vld [vmem:[%s9865_s7 + $0x68] sm:$0xff] }
 0x460   : > { %v3256_v35 = vadd.f32 %v3255_v18, %v8295_v43  ;;  %v2906_v51 = vadd.f32 %v8244_v29, %v2648_v25  ;;  %v3318_v29 = vld [vmem:[%s9863_s5 + $0x8] sm:$0xff]  ;;  %3350 = vmatpush.msra.mxu2 %v3319_v42  ;;  %v3290_v18 = vmax.f32 %v3286_v21, %v8193_v22  ;;  %v3370_v21 = vld [vmem:[%s9865_s7 + $0x60] sm:$0xff]  ;;  %3380 = vmatpush.msrb.mxu3 %v3371_v44 }
 0x461   : > { %v3297_v46 = vmax.f32 %v3293_v7, %v8274_v28 }
 0x462   : > { %v3257_v63 = vadd.f32 %v3256_v35, %v8305_v50  ;;  %3351 = vmatpush.msra.mxu2 %v3318_v29  ;;  %v3294_v6 = vmax.f32 %v3290_v18, %v8233_v41  ;;  %3381 = vmatpush.msrb.mxu3 %v3370_v21  ;;  %v3362_v21 = vld [vmem:[%s9865_s7 + $0x20] sm:$0xff] }
 0x463   : > { %v3301_v31 = vmax.f32 %v3297_v46, %v8324_v53  ;;  %v3364_v46 = vld [vmem:[%s9865_s7 + $0x30] sm:$0xff] }
 0x464   : > { %v3258_v10 = vadd.f32 %v3257_v63, %v8324_v53  ;;  %v3132_v15 = vpop.f32.mrf.mxu1  ;;  %3352 = vmatpush.msra.mxu2 %v3317_v40  ;;  %v3298_v26 = vmax.f32 %v3294_v6, %v8285_v39  ;;  %v3369_v40 = vld [vmem:[%s9865_s7 + $0x58] sm:$0xff]  ;;  %v3366_v6 = vld [vmem:[%s9865_s7 + $0x40] sm:$0xff] }
 0x465   : > { %v2613_v3 = vpop.f32.mrf.mxu3  ;;  %v8344_v25 = vpop.eup %5901  ;;  %3382 = vmatpush.msrb.mxu3 %v3369_v40  ;;  %v5898_v40 = vld [vmem:[%s9864_s6] ss:$0 sm:$0xff] }
 0x466   : > { %v2649_v17 = vadd.f32 %v2613_v3, %v2390_v34  ;;  %v3291_v34 = vmax.f32 %v3287_v49, %v8205_v19  ;;  %v3292_v3 = vmax.f32 %v3288_v33, %v8214_v38  ;;  %v3270_v35 = vmul.f32 256.0, %v8344_v25 }
 0x467   : > { %v3302_v37 = vmax.f32 %v3298_v26, %v8336_v9  ;;  %vm3274_vm2 = vweird.f32 %v8344_v25 }
 0x468   : > { %v2907_v4 = vadd.f32 %v2871_v8, %v2649_v17  ;;  %v8349_v8 = vadd.f32 %v8259_v14, %v2906_v51  ;;  %v3295_v58 = vmax.f32 %v3291_v34, %v8248_v55  ;;  %v3259_v14 = vadd.f32 %v3258_v10, %v8336_v9 }
 0x469   : > { %v3296_v52 = vmax.f32 %v3292_v3, %v8263_v32  ;;  %v3271_v33 = vsub.f32 1.0, %v3270_v35 }
 0x46a   : > { %v8358_v5 = vadd.f32 %v3129_v61, %v2907_v4  ;;  %v3299_v61 = vmax.f32 %v3295_v58, %v8295_v43  ;;  %v3260_v51 = vadd.f32 %v3259_v14, %v8349_v8 }
 0x46b   : > { %v3300_v49 = vmax.f32 %v3296_v52, %v8305_v50 }
 0x46c   : > { %v3303_v63 = vmax.f32 %v3299_v61, %v8349_v8  ;;  %v3261_v4 = vadd.f32 %v3260_v51, %v8358_v5  ;;  %v3365_v61 = vld [vmem:[%s9865_s7 + $0x38] sm:$0xff] }
 0x46d   : > { %v2616_v17 = vpop.f32.mrf.mxu3  ;;  %v3304_v34 = vmax.f32 %v3300_v49, %v8358_v5 }
 0x46e   : > { %v2650_v12 = vadd.f32 %v2616_v17, %v2391_v36  ;;  %v3306_v3 = vmax.f32 %v3302_v37, %v3303_v63  ;;  %v3368_v17 = vld [vmem:[%s9865_s7 + $0x50] sm:$0xff]  ;;  %v3363_v63 = vld [vmem:[%s9865_s7 + $0x28] sm:$0xff] }
 0x46f   : > { %3383 = vmatpush.msrb.mxu3 %v3368_v17  ;;  %v5899_v17 = vld [vmem:[%s9866_s8] ss:$0 sm:$0xff] }
 0x470   : > { %v2908_v42 = vadd.f32 %v2874_v23, %v2650_v12  ;;  %v3272_v23 = vmul.f32 %v8344_v25, %v3271_v33  ;;  %v3367_v12 = vld [vmem:[%s9865_s7 + $0x48] sm:$0xff] }
 0x471   : > { %3384 = vmatpush.msrb.mxu3 %v3367_v12 }
 0x472   : > { %v8380_v29 = vadd.f32 %v3132_v15, %v2908_v42  ;;  %v3273_v52 = vadd.f32 %v8344_v25, %v3272_v23 }
 0x473   : > { %3385 = vmatpush.msrb.mxu3 %v3366_v6 }
 0x474   : > { %v3262_v10 = vadd.f32 %v3261_v4, %v8380_v29  ;;  %v3305_v36 = vmax.f32 %v3301_v31, %v8380_v29  ;;  %v3275_v44 = vsel %vm3274_vm2, %v8344_v25, %v3273_v52  ;;  %v3361_v25 = vld [vmem:[%s9865_s7 + $0x18] sm:$0xff] }
 0x475   : > { %3386 = vmatpush.msrb.mxu3 %v3365_v61 }
 0x476   : > { %v3263_v18 = vrot.slane %v3262_v10, 4  ;;  %v3307_v7 = vmax.f32 %v3304_v34, %v3305_v36  ;;  %v3360_v34 = vld [vmem:[%s9865_s7 + $0x10] sm:$0xff]  ;;  %v3358_v36 = vld [vmem:[%s9865_s7] sm:$0xff] }
 0x477   : > { %3387 = vmatpush.msrb.mxu3 %v3364_v46 }
 0x478   : > { %v3264_v58 = vadd.f32 %v3263_v18, %v3262_v10  ;;  %v3308_v14 = vmax.f32 %v3306_v3, %v3307_v7  ;;  %v3359_v10 = vld [vmem:[%s9865_s7 + $0x8] sm:$0xff] }
 0x479   : > { %3388 = vmatpush.msrb.mxu3 %v3363_v63 }
 0x47a   : > { %v3265_v62 = vrot.slane %v3264_v58, 2  ;;  %v3309_v0 = vrot.slane %v3308_v14, 4 }
 0x47b   : > { %3389 = vmatpush.msrb.mxu3 %v3362_v21 }
 0x47c   : > { %v3266_v15 = vadd.f32 %v3265_v62, %v3264_v58  ;;  %v3310_v35 = vmax.f32 %v3308_v14, %v3309_v0 }
 0x47d   : > { %3390 = vmatpush.msrb.mxu3 %v3361_v25 }
 0x47e   : > { %v3267_v51 = vrot.slane %v3266_v15, 1  ;;  %v3311_v42 = vrot.slane %v3310_v35, 2 }
 0x47f   : > { %3391 = vmatpush.msrb.mxu3 %v3360_v34 }
 0x480   : > { %v3268_v26 = vadd.f32 %v3267_v51, %v3266_v15  ;;  %v3312_v49 = vmax.f32 %v3310_v35, %v3311_v42  ;;  %v3454_v51 = vlaneseq }
 0x481   : > { %3392 = vmatpush.msrb.mxu3 %v3359_v10 }
 0x482   : > { %v3276_v4 = vmul.f32 %v3275_v44, %v3268_v26  ;;  %v3313_v31 = vrot.slane %v3312_v49, 1 }
 0x483   : > { %3393 = vmatpush.msrb.mxu3 %v3358_v36 }
 0x484   : > { %3277 = vst [vmem:[#allocation4] sm:$0x1] %v3276_v4  ;;  %v3314_v33 = vmax.f32 %v3312_v49, %v3313_v31  ;;  %v8436_v49 = vand.u32 127, %v3454_v51 }
 0x486   : > { %3315 = vst [vmem:[#allocation4 + $0x1] sm:$0x1] %v3314_v33  ;;  %vm3456_vm7 = vcmp.lt.s32.totalorder %v8436_v49, 32 }
 0x48d   : > { %v3316_v37 = vld [vmem:[#allocation4] sm:$0xff] }
 0x48e   : > { %3353 = vmatmul.f32.vlgmr.msra.gmra.mxu2 %v3316_v37 }
 0x511   : > { %v3354_v18 = vpop.f32.mrf.mxu2 }
 0x512   : > { %v3355_v3 = vadd.f32 %v5898_v40, %v3354_v18 }
 0x514   : > { %v3357_v7 = vmax.f32 %v3355_v3, 0.0 }
 0x516   : > { %3394 = vmatmul.f32.vlgmr.msrb.gmra.mxu3 %v3357_v7 }
 0x599   : > { %v3395_v23 = vpop.f32.mrf.mxu3 }
 0x59a   : > { %v3396_v58 = vadd.f32 %v5899_v17, %v3395_v23 }
 0x59c   : > { %v3399_v14 = vrot.slane %v3396_v58, 1 }
 0x59e   : > { %v3401_v12 = vadd.f32 %v3399_v14, %v3396_v58 }
 0x5a0   : > { %v5721_v62 = vmul.f32 -1.442695, %v3401_v12 }
 0x5a2   : > { %5903 = vpow2.f32 %v5721_v62 }
 0x5a8   : > { %v5904_v0 = vpop.eup %5903 }
 0x5a9   : > { %v3405_v6 = vadd.f32 1.0, %v5904_v0 }
 0x5ab   : > { %5905 = vrcp.f32 %v3405_v6  ;;  %v3417_v61 = vand.u32 2147483648, %v3405_v6  ;;  %v3415_v46 = vand.u32 2147483647, %v3405_v6  ;;  %vm3411_vm4 = vweird.f32 %v3405_v6 }
 0x5ad   : > { %v3418_v26 = vor.u32 1.1754944e-38, %v3417_v61  ;;  %vm3416_vm6 = vcmp.eq.f32.partialorder %v3415_v46, 8.507059e+37 }
 0x5b1   : > { %v5906_v52 = vpop.eup %5905 }
 0x5b2   : > { %v3407_v15 = vmul.f32 %v5906_v52, %v3405_v6  ;;  %vm3412_vm3 = vweird.f32 %v5906_v52 }
 0x5b3   : > { %vm3413_vm5 = vmor %vm3411_vm4, %vm3412_vm3 }
 0x5b4   : > { %v3408_v35 = vsub.f32 1.0, %v3407_v15 }
 0x5b6   : > { %v3409_v42 = vmul.f32 %v5906_v52, %v3408_v35 }
 0x5b8   : > { %v3410_v44 = vadd.f32 %v5906_v52, %v3409_v42 }
 0x5ba   : > { %v3414_v63 = vsel %vm3413_vm5, %v5906_v52, %v3410_v44 }
 0x5bb   : > { %v3419_v4 = vsel %vm3416_vm6, %v3418_v26, %v3414_v63 }
 0x5bc   : > { %v8438_v31 = vperm.slane %v3419_v4, 0 }
 0x5be   : > { %v8443_v21 = vmul.f32 %v8438_v31, %v8183_v2  ;;  %v8447_v33 = vmul.f32 %v8438_v31, %v8159_v48  ;;  %v8451_v25 = vmul.f32 %v8438_v31, %v8137_v13  ;;  %v8464_v48 = vmul.f32 %v8438_v31, %v8171_v45 }
 0x5bf   : > { %v8468_v13 = vmul.f32 %v8438_v31, %v8149_v59  ;;  %v8472_v10 = vmul.f32 %v8438_v31, %v8123_v57  ;;  %v8485_v59 = vmul.f32 %v8438_v31, %v8110_v60  ;;  %v8489_v57 = vmul.f32 %v8438_v31, %v8098_v56 }
 0x5c0   : > { %10239 = vst [vmem:[#allocation44_spill] sm:$0xff] %v8443_v21  ;;  %v3570_v37 = vsel %vm3456_vm7, %v8443_v21, -1e+30  ;;  %v3568_v34 = vsel %vm3456_vm7, %v8447_v33, -1e+30  ;;  %v8493_v18 = vmul.f32 %v8438_v31, %v8086_v54  ;;  %v8506_v56 = vmul.f32 %v8438_v31, %v8074_v1 }
 0x5c1   : > { %10240 = vst [vmem:[#allocation47_spill] sm:$0xff] %v8447_v33  ;;  %v3566_v2 = vsel %vm3456_vm7, %v8451_v25, -1e+30  ;;  %3617 = vmax.xlane.f32.xlu0 %v3570_v37  ;;  %3613 = vmax.xlane.f32.xlu1 %v3568_v34  ;;  %v3569_v36 = vsel %vm3456_vm7, %v8464_v48, -1e+30  ;;  %v8510_v54 = vmul.f32 %v8438_v31, %v8061_v27  ;;  %v8514_v17 = vmul.f32 %v8438_v31, %v8050_v30 }
 0x5c2   : > { %10241 = vst [vmem:[#allocation49_spill] sm:$0xff] %v8451_v25  ;;  %3609 = vmax.xlane.f32.xlu2 %v3566_v2  ;;  %v3567_v40 = vsel %vm3456_vm7, %v8468_v13, -1e+30  ;;  %v3565_v45 = vsel %vm3456_vm7, %v8472_v10, -1e+30  ;;  %v8527_v27 = vmul.f32 %v8438_v31, %v8037_v11  ;;  %v8531_v30 = vmul.f32 %v8438_v31, %v8023_v47 }
 0x5c3   : > { %10242 = vst [vmem:[#allocation75_spill] sm:$0xff] %v8464_v48  ;;  %v3564_v3 = vsel %vm3456_vm7, %v8485_v59, -1e+30  ;;  %v3563_v7 = vsel %vm3456_vm7, %v8489_v57, -1e+30  ;;  %v8535_v14 = vmul.f32 %v8438_v31, %v8008_v16  ;;  %v8548_v47 = vmul.f32 %v8438_v31, %v8020_v24 }
 0x5c4   : > { %v3562_v60 = vsel %vm3456_vm7, %v8493_v18, -1e+30  ;;  %v3561_v23 = vsel %vm3456_vm7, %v8506_v56, -1e+30  ;;  %v3560_v58 = vsel %vm3456_vm7, %v8510_v54, -1e+30  ;;  %v8560_v0 = vmul.f32 %v8438_v31, %v8380_v29 }
 0x5c5   : > { %v3559_v1 = vsel %vm3456_vm7, %v8514_v17, -1e+30  ;;  %v3558_v12 = vsel %vm3456_vm7, %v8527_v27, -1e+30  ;;  %v3557_v62 = vsel %vm3456_vm7, %v8531_v30, -1e+30  ;;  %v8567_v24 = vmul.f32 %v8438_v31, %v8349_v8 }
 0x5c6   : > { %v3556_v11 = vsel %vm3456_vm7, %v8535_v14, -1e+30  ;;  %v3555_v16 = vsel %vm3456_vm7, %v8548_v47, -1e+30  ;;  %10243 = vst [vmem:[#allocation52_spill] sm:$0xff] %v8560_v0  ;;  %v8571_v6 = vmul.f32 %v8438_v31, %v8358_v5  ;;  %v8580_v29 = vmul.f32 %v8438_v31, %v8295_v43 }
 0x5c7   : > { %10244 = vst [vmem:[#allocation79_spill] sm:$0xff] %v8567_v24  ;;  %v3584_v52 = vsel %vm3456_vm7, %v8567_v24, -1e+30  ;;  %v8589_v5 = vmul.f32 %v8438_v31, %v8336_v9  ;;  %v8596_v43 = vmul.f32 %v8438_v31, %v8274_v28  ;;  %v8600_v15 = vmul.f32 %v8438_v31, %v8324_v53 }
 0x5c8   : > { %10245 = vst [vmem:[#allocation55_spill] sm:$0xff] %v8571_v6  ;;  %v3580_v8 = vsel %vm3456_vm7, %v8580_v29, -1e+30  ;;  %v8607_v9 = vmul.f32 %v8438_v31, %v8263_v32  ;;  %v8611_v35 = vmul.f32 %v8438_v31, %v8305_v50  ;;  %v8620_v53 = vmul.f32 %v8438_v31, %v8248_v55 }
 0x5c9   : > { %3615 = vmax.xlane.f32.xlu0 %v3569_v36  ;;  %3611 = vmax.xlane.f32.xlu1 %v3567_v40  ;;  %10246 = vst [vmem:[#allocation59_spill] sm:$0xff] %v8580_v29  ;;  %v3586_v32 = vsel %vm3456_vm7, %v8560_v0, -1e+30  ;;  %v3585_v61 = vsel %vm3456_vm7, %v8571_v6, -1e+30  ;;  %v8633_v51 = vmul.f32 %v8438_v31, %v8233_v41  ;;  %v8646_v41 = vmul.f32 %v8438_v31, %v8224_v20 }
 0x5ca   : > { %3607 = vmax.xlane.f32.xlu2 %v3565_v45  ;;  %10247 = vst [vmem:[#allocation62_spill] sm:$0xff] %v8589_v5  ;;  %v3577_v28 = vsel %vm3456_vm7, %v8607_v9, -1e+30  ;;  %v3576_v50 = vsel %vm3456_vm7, %v8620_v53, -1e+30  ;;  %v8650_v4 = vmul.f32 %v8438_v31, %v8285_v39  ;;  %v8663_v39 = vmul.f32 %v8438_v31, %v8214_v38 }
 0x5cb   : > { %10248 = vst [vmem:[#allocation26_spill] sm:$0xff] %v8596_v43  ;;  %v3583_v55 = vsel %vm3456_vm7, %v8589_v5, -1e+30  ;;  %v3575_v42 = vsel %vm3456_vm7, %v8633_v51, -1e+30  ;;  %v8674_v38 = vmul.f32 %v8438_v31, %v8205_v19  ;;  %v8683_v19 = vmul.f32 %v8438_v31, %v8193_v22  ;;  %v3715_v22 = vld [vmem:[%s9868_s10] sm:$0xff] }
 0x5cc   : > { %10249 = vst [vmem:[#allocation65_spill] sm:$0xff] %v8600_v15  ;;  %v3582_v46 = vsel %vm3456_vm7, %v8600_v15, -1e+30  ;;  %v3581_v37 = vsel %vm3456_vm7, %v8611_v35, -1e+30 }
 0x5cd   : > { %10250 = vst [vmem:[#allocation85_spill] sm:$0xff] %v8607_v9  ;;  %v3574_v34 = vsel %vm3456_vm7, %v8646_v41, -1e+30  ;;  %v3579_v20 = vsel %vm3456_vm7, %v8650_v4, -1e+30 }
 0x5ce   : > { %10251 = vst [vmem:[#allocation68_spill] sm:$0xff] %v8611_v35  ;;  %v3578_v45 = vsel %vm3456_vm7, %v8596_v43, -1e+30 }
 0x5cf   : > { %10252 = vst [vmem:[#allocation87_spill] sm:$0xff] %v8620_v53 }
 0x5d0   : > { %10253 = vst [vmem:[#allocation71_spill] sm:$0xff] %v8633_v51 }
 0x5d1   : > { %3605 = vmax.xlane.f32.xlu0 %v3564_v3  ;;  %3603 = vmax.xlane.f32.xlu1 %v3563_v7  ;;  %10254 = vst [vmem:[#allocation89_spill] sm:$0xff] %v8646_v41  ;;  %v3573_v3 = vsel %vm3456_vm7, %v8663_v39, -1e+30 }
 0x5d2   : > { %3601 = vmax.xlane.f32.xlu2 %v3562_v60  ;;  %10255 = vst [vmem:[#allocation74_spill] sm:$0xff] %v8650_v4 }
 0x5d3   : > { %10256 = vst [vmem:[#allocation91_spill] sm:$0xff] %v8663_v39 }
 0x5d4   : > { %10257 = vst [vmem:[#allocation50_spill] sm:$0xff] %v8674_v38 }
 0x5d5   : > { %10258 = vst [vmem:[#allocation10_spill] sm:$0xff] %v8683_v19 }
 0x5d9   : > { %3599 = vmax.xlane.f32.xlu0 %v3561_v23  ;;  %3597 = vmax.xlane.f32.xlu1 %v3560_v58  ;;  %v3572_v58 = vsel %vm3456_vm7, %v8674_v38, -1e+30 }
 0x5da   : > { %3595 = vmax.xlane.f32.xlu2 %v3559_v1 }
 0x5e1   : > { %3593 = vmax.xlane.f32.xlu0 %v3558_v12  ;;  %3591 = vmax.xlane.f32.xlu1 %v3557_v62 }
 0x5e2   : > { %3589 = vmax.xlane.f32.xlu2 %v3556_v11  ;;  %v3571_v11 = vsel %vm3456_vm7, %v8683_v19, -1e+30 }
 0x5e9   : > { %3483 = vadd.xlane.f32.xlu1 %v8447_v33  ;;  %3587 = vmax.xlane.f32.xlu0 %v3555_v16 }
 0x5ea   : > { %3485 = vadd.xlane.f32.xlu2 %v8464_v48 }
 0x5f1   : > { %3477 = vadd.xlane.f32.xlu1 %v8472_v10  ;;  %3487 = vadd.xlane.f32.xlu0 %v8443_v21 }
 0x5f2   : > { %3479 = vadd.xlane.f32.xlu2 %v8451_v25 }
 0x5f9   : > { %3475 = vadd.xlane.f32.xlu1 %v8485_v59  ;;  %3481 = vadd.xlane.f32.xlu0 %v8468_v13 }
 0x5fa   : > { %3519 = vadd.xlane.f32.xlu2 %v8560_v0  ;;  %v4898_v0 = vld [vmem:[%s6252_s23 + $0xc8] sm:$0xff] }
 0x601   : > { %3473 = vadd.xlane.f32.xlu1 %v8489_v57  ;;  %3645 = vmax.xlane.f32.xlu0 %v3584_v52 }
 0x602   : > { %3517 = vadd.xlane.f32.xlu2 %v8571_v6  ;;  %v4902_v6 = vld [vmem:[%s6252_s23 + $0xe8] sm:$0xff] }
 0x609   : > { %3471 = vadd.xlane.f32.xlu1 %v8493_v18  ;;  %3637 = vmax.xlane.f32.xlu0 %v3580_v8 }
 0x60a   : > { %3515 = vadd.xlane.f32.xlu2 %v8567_v24  ;;  %v4900_v24 = vld [vmem:[%s6252_s23 + $0xd8] sm:$0xff] }
 0x611   : > { %3469 = vadd.xlane.f32.xlu1 %v8506_v56  ;;  %3463 = vadd.xlane.f32.xlu0 %v8527_v27 }
 0x612   : > { %3513 = vadd.xlane.f32.xlu2 %v8589_v5  ;;  %v3756_v5 = vld [vmem:[%s9868_s10 + $0x148] sm:$0xff] }
 0x619   : > { %3467 = vadd.xlane.f32.xlu1 %v8510_v54  ;;  %3503 = vadd.xlane.f32.xlu0 %v8596_v43 }
 0x61a   : > { %3511 = vadd.xlane.f32.xlu2 %v8600_v15 }
 0x621   : > { %3465 = vadd.xlane.f32.xlu1 %v8514_v17  ;;  %3631 = vmax.xlane.f32.xlu0 %v3577_v28 }
 0x622   : > { %3509 = vadd.xlane.f32.xlu2 %v8611_v35 }
 0x629   : > { %3649 = vmax.xlane.f32.xlu1 %v3586_v32  ;;  %3629 = vmax.xlane.f32.xlu0 %v3576_v50  ;;  %v3717_v32 = vld [vmem:[%s9868_s10 + $0x10] sm:$0xff] }
 0x62a   : > { %3647 = vmax.xlane.f32.xlu2 %v3585_v61 }
 0x631   : > { %3643 = vmax.xlane.f32.xlu1 %v3583_v55  ;;  %3627 = vmax.xlane.f32.xlu0 %v3575_v42 }
 0x632   : > { %3641 = vmax.xlane.f32.xlu2 %v3582_v46 }
 0x634   : > { %v3618_v44 = vpop.xlane.xlu0 %3617  ;;  %v3614_v26 = vpop.xlane.xlu1 %3613 }
 0x635   : > { %v3610_v63 = vpop.xlane.xlu2 %3609  ;;  %3779 = vmatpush.msrb.mxu2 %v3618_v44 }
 0x639   : > { %3639 = vmax.xlane.f32.xlu1 %v3581_v37  ;;  %3625 = vmax.xlane.f32.xlu0 %v3574_v34 }
 0x63a   : > { %3635 = vmax.xlane.f32.xlu2 %v3579_v20 }
 0x63c   : > { %v3616_v2 = vpop.xlane.xlu0 %3615  ;;  %v3612_v36 = vpop.xlane.xlu1 %3611 }
 0x63d   : > { %v3608_v40 = vpop.xlane.xlu2 %3607  ;;  %3780 = vmatpush.msrb.mxu2 %v3616_v2 }
 0x63f   : > { %3781 = vmatpush.msrb.mxu2 %v3614_v26  ;;  %v3719_v26 = vld [vmem:[%s9868_s10 + $0x20] sm:$0xff] }
 0x641   : > { %3782 = vmatpush.msrb.mxu2 %v3612_v36  ;;  %3633 = vmax.xlane.f32.xlu1 %v3578_v45 }
 0x642   : > { %3507 = vadd.xlane.f32.xlu2 %v8580_v29  ;;  %3623 = vmax.xlane.f32.xlu0 %v3573_v3  ;;  %v3721_v3 = vld [vmem:[%s9868_s10 + $0x30] sm:$0xff] }
 0x643   : > { %3783 = vmatpush.msrb.mxu2 %v3610_v63 }
 0x644   : > { %v3606_v7 = vpop.xlane.xlu0 %3605  ;;  %v3604_v60 = vpop.xlane.xlu1 %3603 }
 0x645   : > { %v3602_v23 = vpop.xlane.xlu2 %3601  ;;  %3784 = vmatpush.msrb.mxu2 %v3608_v40 }
 0x647   : > { %3785 = vmatpush.msrb.mxu2 %v3606_v7 }
 0x649   : > { %3786 = vmatpush.msrb.mxu2 %v3604_v60  ;;  %3505 = vadd.xlane.f32.xlu1 %v8650_v4 }
 0x64a   : > { %3461 = vadd.xlane.f32.xlu2 %v8531_v30  ;;  %3621 = vmax.xlane.f32.xlu0 %v3572_v58 }
 0x64b   : > { %3787 = vmatpush.msrb.mxu2 %v3602_v23 }
 0x64c   : > { %v3600_v1 = vpop.xlane.xlu0 %3599  ;;  %v3598_v12 = vpop.xlane.xlu1 %3597 }
 0x64d   : > { %v3596_v62 = vpop.xlane.xlu2 %3595  ;;  %3788 = vmatpush.msrb.mxu2 %v3600_v1 }
 0x64f   : > { %3789 = vmatpush.msrb.mxu2 %v3598_v12  ;;  %v3723_v12 = vld [vmem:[%s9868_s10 + $0x40] sm:$0xff] }
 0x651   : > { %3790 = vmatpush.msrb.mxu2 %v3596_v62  ;;  %3459 = vadd.xlane.f32.xlu1 %v8535_v14 }
 0x652   : > { %3501 = vadd.xlane.f32.xlu2 %v8607_v9  ;;  %3619 = vmax.xlane.f32.xlu0 %v3571_v11 }
 0x654   : > { %v3594_v16 = vpop.xlane.xlu0 %3593  ;;  %v3592_v52 = vpop.xlane.xlu1 %3591 }
 0x655   : > { %v3590_v8 = vpop.xlane.xlu2 %3589  ;;  %3791 = vmatpush.msrb.mxu2 %v3594_v16 }
 0x657   : > { %3792 = vmatpush.msrb.mxu2 %v3592_v52 }
 0x659   : > { %3499 = vadd.xlane.f32.xlu1 %v8620_v53  ;;  %3793 = vmatpush.msrb.mxu2 %v3590_v8 }
 0x65a   : > { %3497 = vadd.xlane.f32.xlu2 %v8633_v51  ;;  %3457 = vadd.xlane.f32.xlu0 %v8548_v47 }
 0x65c   : > { %v3484_v49 = vpop.xlane.xlu1 %3483  ;;  %v3588_v31 = vpop.xlane.xlu0 %3587 }
 0x65d   : > { %v3486_v28 = vpop.xlane.xlu2 %3485  ;;  %3794 = vmatpush.msrb.mxu2 %v3588_v31  ;;  %v3534_v44 = vmul.f32 0.03125, %v3484_v49 }
 0x65e   : > { %3795 = vmatmul.f32.vlgmr.msrb.gmra.mxu2 %v3715_v22  ;;  %v3535_v46 = vmul.f32 0.03125, %v3486_v28  ;;  %v3725_v22 = vld [vmem:[%s9868_s10 + $0x50] sm:$0xff] }
 0x661   : > { %3493 = vadd.xlane.f32.xlu1 %v8663_v39 }
 0x662   : > { %3491 = vadd.xlane.f32.xlu2 %v8674_v38  ;;  %3495 = vadd.xlane.f32.xlu0 %v8646_v41 }
 0x664   : > { %v3478_v50 = vpop.xlane.xlu1 %3477  ;;  %v3488_v61 = vpop.xlane.xlu0 %3487 }
 0x665   : > { %v3480_v55 = vpop.xlane.xlu2 %3479  ;;  %v3536_v42 = vmul.f32 0.03125, %v3488_v61  ;;  %v3531_v40 = vmul.f32 0.03125, %v3478_v50  ;;  %v3727_v61 = vld [vmem:[%s9868_s10 + $0x60] sm:$0xff] }
 0x666   : > { %3798 = vmatmul.f32.gmra.mxu2 %v3717_v32  ;;  %v3532_v36 = vmul.f32 0.03125, %v3480_v55 }
 0x667   : > { %4005 = vmatpush.msrb.mxu0 %v3536_v42 }
 0x669   : > { %4006 = vmatpush.msrb.mxu0 %v3535_v46 }
 0x66a   : > { %3489 = vadd.xlane.f32.xlu0 %v8683_v19 }
 0x66b   : > { %4007 = vmatpush.msrb.mxu0 %v3534_v44 }
 0x66c   : > { %v3476_v63 = vpop.xlane.xlu1 %3475  ;;  %v3482_v37 = vpop.xlane.xlu0 %3481 }
 0x66d   : > { %v3520_v34 = vpop.xlane.xlu2 %3519  ;;  %v3533_v20 = vmul.f32 0.03125, %v3482_v37  ;;  %v3530_v45 = vmul.f32 0.03125, %v3476_v63  ;;  %v3729_v63 = vld [vmem:[%s9868_s10 + $0x70] sm:$0xff] }
 0x66e   : > { %v8706_v2 = vmul.f32 0.03125, %v3520_v34  ;;  %3801 = vmatmul.f32.gmra.mxu2 %v3719_v26 }
 0x66f   : > { %4008 = vmatpush.msrb.mxu0 %v3533_v20 }
 0x670   : > { %4118 = vmatpush.msrb.mxu1 %v8706_v2 }
 0x671   : > { %4009 = vmatpush.msrb.mxu0 %v3532_v36 }
 0x673   : > { %4010 = vmatpush.msrb.mxu0 %v3531_v40 }
 0x674   : > { %v3474_v7 = vpop.xlane.xlu1 %3473  ;;  %v3646_v60 = vpop.xlane.xlu0 %3645 }
 0x675   : > { %v3529_v23 = vmul.f32 0.03125, %v3474_v7  ;;  %v3518_v58 = vpop.xlane.xlu2 %3517  ;;  %4011 = vmatpush.msrb.mxu0 %v3530_v45 }
 0x676   : > { %v8712_v1 = vmul.f32 0.03125, %v3518_v58  ;;  %3804 = vmatmul.f32.gmra.mxu2 %v3721_v3  ;;  %v3731_v3 = vld [vmem:[%s9868_s10 + $0x80] sm:$0xff] }
 0x677   : > { %4012 = vmatpush.msrb.mxu0 %v3529_v23 }
 0x678   : > { %4119 = vmatpush.msrb.mxu1 %v8712_v1 }
 0x67c   : > { %v3472_v62 = vpop.xlane.xlu1 %3471  ;;  %v3638_v11 = vpop.xlane.xlu0 %3637 }
 0x67d   : > { %v3528_v16 = vmul.f32 0.03125, %v3472_v62  ;;  %v3516_v52 = vpop.xlane.xlu2 %3515 }
 0x67e   : > { %v8718_v8 = vmul.f32 0.03125, %v3516_v52  ;;  %3807 = vmatmul.f32.gmra.mxu2 %v3723_v12  ;;  %v3733_v12 = vld [vmem:[%s9868_s10 + $0x90] sm:$0xff] }
 0x67f   : > { %4013 = vmatpush.msrb.mxu0 %v3528_v16 }
 0x680   : > { %4120 = vmatpush.msrb.mxu1 %v8718_v8 }
 0x684   : > { %v3470_v49 = vpop.xlane.xlu1 %3469  ;;  %v3464_v31 = vpop.xlane.xlu0 %3463 }
 0x685   : > { %v3527_v28 = vmul.f32 0.03125, %v3470_v49  ;;  %v3514_v32 = vpop.xlane.xlu2 %3513  ;;  %v3524_v45 = vmul.f32 0.03125, %v3464_v31 }
 0x686   : > { %v8724_v50 = vmul.f32 0.03125, %v3514_v32  ;;  %3810 = vmatmul.f32.gmra.mxu2 %v3725_v22  ;;  %v3735_v22 = vld [vmem:[%s9868_s10 + $0xa0] sm:$0xff] }
 0x687   : > { %4014 = vmatpush.msrb.mxu0 %v3527_v28 }
 0x688   : > { %4121 = vmatpush.msrb.mxu1 %v8724_v50 }
 0x68c   : > { %v3468_v55 = vpop.xlane.xlu1 %3467  ;;  %v3504_v42 = vpop.xlane.xlu0 %3503 }
 0x68d   : > { %v3526_v46 = vmul.f32 0.03125, %v3468_v55  ;;  %v3512_v44 = vpop.xlane.xlu2 %3511 }
 0x68e   : > { %v8730_v26 = vmul.f32 0.03125, %v3512_v44  ;;  %3813 = vmatmul.f32.gmra.mxu2 %v3727_v61  ;;  %v3739_v44 = vld [vmem:[%s9868_s10 + $0xc0] sm:$0xff] }
 0x68f   : > { %4015 = vmatpush.msrb.mxu0 %v3526_v46 }
 0x690   : > { %4122 = vmatpush.msrb.mxu1 %v8730_v26 }
 0x694   : > { %v3466_v37 = vpop.xlane.xlu1 %3465  ;;  %v3632_v34 = vpop.xlane.xlu0 %3631 }
 0x695   : > { %v3525_v20 = vmul.f32 0.03125, %v3466_v37  ;;  %v3510_v36 = vpop.xlane.xlu2 %3509 }
 0x696   : > { %v8736_v40 = vmul.f32 0.03125, %v3510_v36  ;;  %3816 = vmatmul.f32.gmra.mxu2 %v3729_v63 }
 0x697   : > { %4016 = vmatpush.msrb.mxu0 %v3525_v20 }
 0x698   : > { %4123 = vmatpush.msrb.mxu1 %v8736_v40 }
 0x699   : > { %4017 = vmatpush.msrb.mxu0 %v3524_v45  ;;  %v3544_v45 = vmul.f32 0.03125, %v3504_v42  ;;  %v4873_v42 = vld [vmem:[%s6252_s23] sm:$0xff] }
 0x69a   : > { %4942 = vrot.lane.b32.xlu1 %v4873_v42, %s6103_s27 }
 0x69c   : > { %v3650_v7 = vpop.xlane.xlu1 %3649  ;;  %v3630_v23 = vpop.xlane.xlu0 %3629 }
 0x69d   : > { %v3648_v58 = vpop.xlane.xlu2 %3647  ;;  %3892 = vmatpush.msra.mxu3 %v3650_v7  ;;  %v3716_v7 = vld [vmem:[%s9868_s10 + $0x8] sm:$0xff] }
 0x69e   : > { %3819 = vmatmul.f32.gmra.mxu2 %v3731_v3 }
 0x69f   : > { %3893 = vmatpush.msra.mxu3 %v3648_v58 }
 0x6a1   : > { %3894 = vmatpush.msra.mxu3 %v3646_v60  ;;  %v3737_v60 = vld [vmem:[%s9868_s10 + $0xb0] sm:$0xff] }
 0x6a4   : > { %v3644_v62 = vpop.xlane.xlu1 %3643  ;;  %v3628_v16 = vpop.xlane.xlu0 %3627 }
 0x6a5   : > { %v3642_v52 = vpop.xlane.xlu2 %3641  ;;  %3895 = vmatpush.msra.mxu3 %v3644_v62 }
 0x6a6   : > { %3822 = vmatmul.f32.gmra.mxu2 %v3733_v12 }
 0x6a7   : > { %3896 = vmatpush.msra.mxu3 %v3642_v52 }
 0x6ac   : > { %v3640_v49 = vpop.xlane.xlu1 %3639  ;;  %v3626_v31 = vpop.xlane.xlu0 %3625 }
 0x6ad   : > { %v3636_v28 = vpop.xlane.xlu2 %3635  ;;  %3897 = vmatpush.msra.mxu3 %v3640_v49 }
 0x6ae   : > { %3825 = vmatmul.f32.gmra.mxu2 %v3735_v22  ;;  %v3718_v22 = vld [vmem:[%s9868_s10 + $0x18] sm:$0xff] }
 0x6af   : > { %3898 = vmatpush.msra.mxu3 %v3638_v11 }
 0x6b1   : > { %3899 = vmatpush.msra.mxu3 %v3636_v28  ;;  %v3651_v28 = vld [vmem:[%s9867_s9] sm:$0xff] }
 0x6b4   : > { %v3634_v32 = vpop.xlane.xlu1 %3633 }
 0x6b5   : > { %v3508_v61 = vpop.xlane.xlu2 %3507  ;;  %v3624_v55 = vpop.xlane.xlu0 %3623  ;;  %3900 = vmatpush.msra.mxu3 %v3634_v32 }
 0x6b6   : > { %v3546_v46 = vmul.f32 0.03125, %v3508_v61  ;;  %3828 = vmatmul.f32.gmra.mxu2 %v3737_v60 }
 0x6b7   : > { %3901 = vmatpush.msra.mxu3 %v3632_v34  ;;  %v3741_v34 = vld [vmem:[%s9868_s10 + $0xd0] sm:$0xff] }
 0x6b8   : > { %4124 = vmatpush.msrb.mxu1 %v3546_v46 }
 0x6b9   : > { %3902 = vmatpush.msra.mxu3 %v3630_v23 }
 0x6bb   : > { %3903 = vmatpush.msra.mxu3 %v3628_v16  ;;  %v3743_v16 = vld [vmem:[%s9868_s10 + $0xe0] sm:$0xff] }
 0x6bc   : > { %v3506_v11 = vpop.xlane.xlu1 %3505 }
 0x6bd   : > { %v3545_v63 = vmul.f32 0.03125, %v3506_v11  ;;  %v3462_v37 = vpop.xlane.xlu2 %3461  ;;  %v3622_v20 = vpop.xlane.xlu0 %3621  ;;  %3904 = vmatpush.msra.mxu3 %v3626_v31 }
 0x6be   : > { %v3523_v36 = vmul.f32 0.03125, %v3462_v37  ;;  %3831 = vmatmul.f32.gmra.mxu2 %v3739_v44  ;;  %v3722_v37 = vld [vmem:[%s9868_s10 + $0x38] sm:$0xff] }
 0x6bf   : > { %3905 = vmatpush.msra.mxu3 %v3624_v55  ;;  %4125 = vmatpush.msrb.mxu1 %v3545_v63 }
 0x6c0   : > { %4018 = vmatpush.msrb.mxu0 %v3523_v36 }
 0x6c1   : > { %3906 = vmatpush.msra.mxu3 %v3622_v20  ;;  %4126 = vmatpush.msrb.mxu1 %v3544_v45 }
 0x6c4   : > { %v3460_v3 = vpop.xlane.xlu1 %3459 }
 0x6c5   : > { %v3522_v23 = vmul.f32 0.03125, %v3460_v3  ;;  %v3502_v58 = vpop.xlane.xlu2 %3501  ;;  %v3620_v12 = vpop.xlane.xlu0 %3619  ;;  %v4905_v3 = vld [vmem:[%s9870_s12] sm:$0xf] }
 0x6c6   : > { %v3543_v62 = vmul.f32 0.03125, %v3502_v58  ;;  %3907 = vmatpush.msra.mxu3 %v3620_v12  ;;  %3834 = vmatmul.f32.gmra.mxu2 %v3741_v34  ;;  %v3655_v34 = vld [vmem:[%s9867_s9 + $0x20] sm:$0xff]  ;;  %v3724_v58 = vld [vmem:[%s9868_s10 + $0x48] sm:$0xff]  ;;  %v3654_v12 = vld [vmem:[%s9867_s9 + $0x18] sm:$0xff] }
 0x6c7   : > { %3908 = vmatmul.f32.vlgmr.msra.gmra.mxu3 %v3716_v7  ;;  %4019 = vmatpush.msrb.mxu0 %v3522_v23  ;;  %v3749_v23 = vld [vmem:[%s9868_s10 + $0x110] sm:$0xff] }
 0x6c8   : > { %5831 = vmatpush.msrb.mxu3 %v8706_v2  ;;  %4127 = vmatpush.msrb.mxu1 %v3543_v62 }
 0x6c9   : > { %5754 = vmatpush.msk.msra.mxu2 %vm605_vm0, %v4905_v3 }
 0x6ca   : > { %5832 = vmatpush.msrb.mxu3 %v8712_v1 }
 0x6cc   : > { %5833 = vmatpush.msrb.mxu3 %v8718_v8  ;;  %v3500_v52 = vpop.xlane.xlu1 %3499  ;;  %v3745_v8 = vld [vmem:[%s9868_s10 + $0xf0] sm:$0xff] }
 0x6cd   : > { %v3542_v49 = vmul.f32 0.03125, %v3500_v52  ;;  %v3498_v2 = vpop.xlane.xlu2 %3497  ;;  %v3458_v31 = vpop.xlane.xlu0 %3457  ;;  %v4874_v52 = vld [vmem:[%s6252_s23 + $0x8] sm:$0xff] }
 0x6ce   : > { %5834 = vmatpush.msrb.mxu3 %v8724_v50  ;;  %v3521_v1 = vmul.f32 0.03125, %v3458_v31  ;;  %3837 = vmatmul.f32.gmra.mxu2 %v3743_v16  ;;  %v3541_v60 = vmul.f32 0.03125, %v3498_v2  ;;  %v3720_v50 = vld [vmem:[%s9868_s10 + $0x28] sm:$0xff]  ;;  %v4877_v16 = vld [vmem:[%s6252_s23 + $0x20] sm:$0xff] }
 0x6cf   : > { %3911 = vmatmul.f32.gmra.mxu3 %v3718_v22  ;;  %4128 = vmatpush.msrb.mxu1 %v3542_v49  ;;  %v3751_v22 = vld [vmem:[%s9868_s10 + $0x120] sm:$0xff]  ;;  %v3656_v2 = vld [vmem:[%s9867_s9 + $0x28] sm:$0xff] }
 0x6d0   : > { %5835 = vmatpush.msrb.mxu3 %v8730_v26  ;;  %4020 = vmatpush.msrb.mxu0 %v3521_v1  ;;  %v3653_v26 = vld [vmem:[%s9867_s9 + $0x10] sm:$0xff]  ;;  %v3659_v31 = vld [vmem:[%s9867_s9 + $0x40] sm:$0xff] }
 0x6d1   : > { %4129 = vmatpush.msrb.mxu1 %v3541_v60  ;;  %4021 = vmatmul.f32.vlgmr.msrb.gmra.mxu0 %v3651_v28  ;;  %v4878_v28 = vld [vmem:[%s6252_s23 + $0x28] sm:$0xff] }
 0x6d2   : > { %5836 = vmatpush.msrb.mxu3 %v8736_v40  ;;  %4950 = vrot.lane.b32.xlu1 %v4877_v16, %s6103_s27 }
 0x6d3   : > { %4944 = vrot.lane.b32.xlu2 %v4874_v52, %s6103_s27  ;;  %v4879_v52 = vld [vmem:[%s6252_s23 + $0x30] sm:$0xff] }
 0x6d4   : > { %5837 = vmatpush.msrb.mxu3 %v3546_v46  ;;  %v3494_v32 = vpop.xlane.xlu1 %3493  ;;  %v4875_v46 = vld [vmem:[%s6252_s23 + $0x10] sm:$0xff] }
 0x6d5   : > { %v3496_v61 = vpop.xlane.xlu0 %3495  ;;  %v3492_v40 = vpop.xlane.xlu2 %3491  ;;  %v3539_v44 = vmul.f32 0.03125, %v3494_v32  ;;  %4946 = vrot.lane.b32.xlu0 %v4875_v46, %s6103_s27  ;;  %v3661_v32 = vld [vmem:[%s9867_s9 + $0x50] sm:$0xff]  ;;  %v3663_v46 = vld [vmem:[%s9867_s9 + $0x60] sm:$0xff] }
 0x6d6   : > { %5838 = vmatpush.msrb.mxu3 %v3545_v63  ;;  %v3540_v55 = vmul.f32 0.03125, %v3496_v61  ;;  %3840 = vmatmul.f32.gmra.mxu2 %v3745_v8  ;;  %v3538_v11 = vmul.f32 0.03125, %v3492_v40  ;;  %v3747_v63 = vld [vmem:[%s9868_s10 + $0x100] sm:$0xff]  ;;  %v3728_v8 = vld [vmem:[%s9868_s10 + $0x68] sm:$0xff]  ;;  %v3730_v40 = vld [vmem:[%s9868_s10 + $0x78] sm:$0xff] }
 0x6d7   : > { %3914 = vmatmul.f32.gmra.mxu3 %v3720_v50  ;;  %v3658_v50 = vld [vmem:[%s9867_s9 + $0x38] sm:$0xff] }
 0x6d8   : > { %5839 = vmatpush.msrb.mxu3 %v3544_v45  ;;  %4130 = vmatpush.msrb.mxu1 %v3540_v55  ;;  %v3652_v45 = vld [vmem:[%s9867_s9 + $0x8] sm:$0xff] }
 0x6d9   : > { %4024 = vmatmul.f32.gmra.mxu0 %v3653_v26  ;;  %v3755_v26 = vld [vmem:[%s9868_s10 + $0x140] sm:$0xff] }
 0x6da   : > { %5840 = vmatpush.msrb.mxu3 %v3543_v62  ;;  %4131 = vmatpush.msrb.mxu1 %v3539_v44  ;;  %v3657_v62 = vld [vmem:[%s9867_s9 + $0x30] sm:$0xff] }
 0x6dc   : > { %5841 = vmatpush.msrb.mxu3 %v3542_v49  ;;  %4132 = vmatpush.msrb.mxu1 %v3538_v11  ;;  %v3726_v49 = vld [vmem:[%s9868_s10 + $0x58] sm:$0xff] }
 0x6dd   : > { %v3490_v20 = vpop.xlane.xlu0 %3489  ;;  %4952 = vrot.lane.b32.xlu0 %v4878_v28, %s6103_s27 }
 0x6de   : > { %5842 = vmatpush.msrb.mxu3 %v3541_v60  ;;  %v3537_v36 = vmul.f32 0.03125, %v3490_v20  ;;  %3843 = vmatmul.f32.gmra.mxu2 %v3747_v63  ;;  %v3753_v60 = vld [vmem:[%s9868_s10 + $0x130] sm:$0xff]  ;;  %v4880_v63 = vld [vmem:[%s6252_s23 + $0x38] sm:$0xff]  ;;  %v3732_v20 = vld [vmem:[%s9868_s10 + $0x88] sm:$0xff] }
 0x6df   : > { %3917 = vmatmul.f32.gmra.mxu3 %v3722_v37  ;;  %4956 = vrot.lane.b32.xlu1 %v4880_v63, %s6103_s27  ;;  %v3757_v37 = vld [vmem:[%s9868_s10 + $0x150] sm:$0xff]  ;;  %v3740_v63 = vld [vmem:[%s9868_s10 + $0xc8] sm:$0xff] }
 0x6e0   : > { %5843 = vmatpush.msrb.mxu3 %v3540_v55  ;;  %4133 = vmatpush.msrb.mxu1 %v3537_v36  ;;  %v4876_v55 = vld [vmem:[%s6252_s23 + $0x18] sm:$0xff] }
 0x6e1   : > { %4134 = vmatmul.f32.vlgmr.msrb.gmra.mxu1 %v3652_v45  ;;  %v8803_v7 = vpop.f32.mrf.mxu2  ;;  %4027 = vmatmul.f32.gmra.mxu0 %v3655_v34  ;;  %v3665_v45 = vld [vmem:[%s9867_s9 + $0x70] sm:$0xff] }
 0x6e2   : > { %5844 = vmatpush.msrb.mxu3 %v3539_v44  ;;  %4948 = vrot.lane.b32.xlu2 %v4876_v55, %s6103_s27  ;;  %v3660_v44 = vld [vmem:[%s9867_s9 + $0x48] sm:$0xff]  ;;  %v3671_v55 = vld [vmem:[%s9867_s9 + $0xa0] sm:$0xff] }
 0x6e4   : > { %5845 = vmatpush.msrb.mxu3 %v3538_v11 }
 0x6e6   : > { %5846 = vmatpush.msrb.mxu3 %v3537_v36  ;;  %3846 = vmatmul.f32.gmra.mxu2 %v3749_v23  ;;  %v3662_v36 = vld [vmem:[%s9867_s9 + $0x58] sm:$0xff]  ;;  %v3759_v23 = vld [vmem:[%s9868_s10 + $0x160] sm:$0xff] }
 0x6e7   : > { %3920 = vmatmul.f32.gmra.mxu3 %v3724_v58  ;;  %v3734_v58 = vld [vmem:[%s9868_s10 + $0x98] sm:$0xff] }
 0x6e8   : > { %5847 = vmatpush.msk.msra.mxu3 %vm605_vm0, %v4905_v3  ;;  %v4881_v3 = vld [vmem:[%s6252_s23 + $0x40] sm:$0xff] }
 0x6e9   : > { %4137 = vmatmul.f32.gmra.mxu1 %v3654_v12  ;;  %v8819_v42 = vpop.f32.mrf.mxu2  ;;  %4030 = vmatmul.f32.gmra.mxu0 %v3657_v62  ;;  %v3664_v12 = vld [vmem:[%s9867_s9 + $0x68] sm:$0xff]  ;;  %v3667_v62 = vld [vmem:[%s9867_s9 + $0x80] sm:$0xff] }
 0x6ea   : > { %4958 = vrot.lane.b32.xlu0 %v4881_v3, %s6103_s27  ;;  %4954 = vrot.lane.b32.xlu2 %v4879_v52, %s6103_s27  ;;  %v4885_v3 = vld [vmem:[%s6252_s23 + $0x60] sm:$0xff] }
 0x6ee   : > { %3849 = vmatmul.f32.gmra.mxu2 %v3751_v22  ;;  %v3761_v22 = vld [vmem:[%s9868_s10 + $0x170] sm:$0xff] }
 0x6ef   : > { %3923 = vmatmul.f32.gmra.mxu3 %v3726_v49  ;;  %v3736_v49 = vld [vmem:[%s9868_s10 + $0xa8] sm:$0xff] }
 0x6f1   : > { %4140 = vmatmul.f32.gmra.mxu1 %v3656_v2  ;;  %v8837_v1 = vpop.f32.mrf.mxu2  ;;  %4033 = vmatmul.f32.gmra.mxu0 %v3659_v31  ;;  %v3666_v2 = vld [vmem:[%s9867_s9 + $0x78] sm:$0xff]  ;;  %v3669_v31 = vld [vmem:[%s9867_s9 + $0x90] sm:$0xff] }
 0x6f6   : > { %3852 = vmatmul.f32.gmra.mxu2 %v3753_v60  ;;  %v4883_v60 = vld [vmem:[%s6252_s23 + $0x50] sm:$0xff] }
 0x6f7   : > { %3926 = vmatmul.f32.gmra.mxu3 %v3728_v8  ;;  %4962 = vrot.lane.b32.xlu1 %v4883_v60, %s6103_s27  ;;  %v3763_v8 = vld [vmem:[%s9868_s10 + $0x180] sm:$0xff]  ;;  %v4890_v60 = vld [vmem:[%s6252_s23 + $0x88] sm:$0xff] }
 0x6f9   : > { %4143 = vmatmul.f32.gmra.mxu1 %v3658_v50  ;;  %v8853_v61 = vpop.f32.mrf.mxu2  ;;  %4036 = vmatmul.f32.gmra.mxu0 %v3661_v32  ;;  %v3738_v50 = vld [vmem:[%s9868_s10 + $0xb8] sm:$0xff]  ;;  %v3668_v32 = vld [vmem:[%s9867_s9 + $0x88] sm:$0xff] }
 0x6fe   : > { %3855 = vmatmul.f32.gmra.mxu2 %v3755_v26 }
 0x6ff   : > { %3929 = vmatmul.f32.gmra.mxu3 %v3730_v40  ;;  %v4884_v40 = vld [vmem:[%s6252_s23 + $0x58] sm:$0xff] }
 0x700   : > { %4964 = vrot.lane.b32.xlu0 %v4884_v40, %s6103_s27  ;;  %v3746_v40 = vld [vmem:[%s9868_s10 + $0xf8] sm:$0xff] }
 0x701   : > { %4146 = vmatmul.f32.gmra.mxu1 %v3660_v44  ;;  %v8869_v11 = vpop.f32.mrf.mxu2  ;;  %4039 = vmatmul.f32.gmra.mxu0 %v3663_v46  ;;  %v4882_v44 = vld [vmem:[%s6252_s23 + $0x48] sm:$0xff]  ;;  %v3765_v46 = vld [vmem:[%s9868_s10 + $0x190] sm:$0xff] }
 0x702   : > { %4960 = vrot.lane.b32.xlu2 %v4882_v44, %s6103_s27  ;;  %v3676_v44 = vld [vmem:[%s9867_s9 + $0xc8] sm:$0xff] }
 0x706   : > { %3858 = vmatmul.f32.gmra.mxu2 %v3757_v37  ;;  %v3670_v37 = vld [vmem:[%s9867_s9 + $0x98] sm:$0xff] }
 0x707   : > { %3932 = vmatmul.f32.gmra.mxu3 %v3732_v20  ;;  %v3673_v20 = vld [vmem:[%s9867_s9 + $0xb0] sm:$0xff] }
 0x709   : > { %4149 = vmatmul.f32.gmra.mxu1 %v3662_v36  ;;  %v8885_v34 = vpop.f32.mrf.mxu2  ;;  %4042 = vmatmul.f32.gmra.mxu0 %v3665_v45  ;;  %v3767_v45 = vld [vmem:[%s9868_s10 + $0x1a0] sm:$0xff] }
 0x70a   : > { %4966 = vrot.lane.b32.xlu2 %v4885_v3, %s6103_s27  ;;  %v3681_v3 = vld [vmem:[%s9867_s9 + $0xf0] sm:$0xff] }
 0x70e   : > { %3861 = vmatmul.f32.gmra.mxu2 %v3759_v23  ;;  %v4887_v23 = vld [vmem:[%s6252_s23 + $0x70] sm:$0xff] }
 0x70f   : > { %3935 = vmatmul.f32.gmra.mxu3 %v3734_v58  ;;  %v3742_v58 = vld [vmem:[%s9868_s10 + $0xd8] sm:$0xff]  ;;  %4970 = vrot.lane.b32.xlu0 %v4887_v23, %s6103_s27 }
 0x711   : > { %4152 = vmatmul.f32.gmra.mxu1 %v3664_v12  ;;  %v8901_v16 = vpop.f32.mrf.mxu2  ;;  %4045 = vmatmul.f32.gmra.mxu0 %v3667_v62  ;;  %v3672_v12 = vld [vmem:[%s9867_s9 + $0xa8] sm:$0xff]  ;;  %v3675_v62 = vld [vmem:[%s9867_s9 + $0xc0] sm:$0xff] }
 0x716   : > { %3864 = vmatmul.f32.gmra.mxu2 %v3761_v22  ;;  %v3769_v22 = vld [vmem:[%s9868_s10 + $0x1b0] sm:$0xff] }
 0x717   : > { %3938 = vmatmul.f32.gmra.mxu3 %v3736_v49  ;;  %v4886_v49 = vld [vmem:[%s6252_s23 + $0x68] sm:$0xff]  ;;  %4976 = vrot.lane.b32.xlu0 %v4890_v60, %s6103_s27 }
 0x718   : > { %4968 = vrot.lane.b32.xlu1 %v4886_v49, %s6103_s27  ;;  %v4893_v49 = vld [vmem:[%s6252_s23 + $0xa0] sm:$0xff]  ;;  %v3680_v60 = vld [vmem:[%s9867_s9 + $0xe8] sm:$0xff] }
 0x719   : > { %4155 = vmatmul.f32.gmra.mxu1 %v3666_v2  ;;  %v8917_v28 = vpop.f32.mrf.mxu2  ;;  %4048 = vmatmul.f32.gmra.mxu0 %v3669_v31  ;;  %v4888_v2 = vld [vmem:[%s6252_s23 + $0x78] sm:$0xff]  ;;  %v3744_v31 = vld [vmem:[%s9868_s10 + $0xe8] sm:$0xff] }
 0x71a   : > { %4972 = vrot.lane.b32.xlu2 %v4888_v2, %s6103_s27  ;;  %v3750_v2 = vld [vmem:[%s9868_s10 + $0x118] sm:$0xff] }
 0x71e   : > { %3867 = vmatmul.f32.gmra.mxu2 %v3763_v8  ;;  %v3674_v8 = vld [vmem:[%s9867_s9 + $0xb8] sm:$0xff] }
 0x71f   : > { %3941 = vmatmul.f32.gmra.mxu3 %v3738_v50  ;;  %v3677_v50 = vld [vmem:[%s9867_s9 + $0xd0] sm:$0xff]  ;;  %4982 = vrot.lane.b32.xlu0 %v4893_v49, %s6103_s27 }
 0x721   : > { %4158 = vmatmul.f32.gmra.mxu1 %v3668_v32  ;;  %v8933_v26 = vpop.f32.mrf.mxu2  ;;  %4051 = vmatmul.f32.gmra.mxu0 %v3671_v55  ;;  %v3771_v55 = vld [vmem:[%s9868_s10 + $0x1c0] sm:$0xff] }
 0x726   : > { %3870 = vmatmul.f32.gmra.mxu2 %v3765_v46  ;;  %v3679_v46 = vld [vmem:[%s9867_s9 + $0xe0] sm:$0xff] }
 0x727   : > { %3944 = vmatmul.f32.gmra.mxu3 %v3740_v63 }
 0x729   : > { %4161 = vmatmul.f32.gmra.mxu1 %v3670_v37  ;;  %v8951_v36 = vpop.f32.mrf.mxu2  ;;  %4054 = vmatmul.f32.gmra.mxu0 %v3673_v20  ;;  %v3773_v37 = vld [vmem:[%s9868_s10 + $0x1d0] sm:$0xff]  ;;  %v3748_v20 = vld [vmem:[%s9868_s10 + $0x108] sm:$0xff] }
 0x72e   : > { %3873 = vmatmul.f32.gmra.mxu2 %v3767_v45  ;;  %v3678_v45 = vld [vmem:[%s9867_s9 + $0xd8] sm:$0xff] }
 0x72f   : > { %3947 = vmatmul.f32.gmra.mxu3 %v3742_v58 }
 0x731   : > { %4164 = vmatmul.f32.gmra.mxu1 %v3672_v12  ;;  %v8969_v52 = vpop.f32.mrf.mxu2  ;;  %4057 = vmatmul.f32.gmra.mxu0 %v3675_v62  ;;  %v3775_v12 = vld [vmem:[%s9868_s10 + $0x1e0] sm:$0xff] }
 0x732   : > { %v4889_v62 = vld [vmem:[%s6252_s23 + $0x80] sm:$0xff] }
 0x733   : > { %4974 = vrot.lane.b32.xlu1 %v4889_v62, %s6103_s27 }
 0x736   : > { %3876 = vmatmul.f32.gmra.mxu2 %v3769_v22  ;;  %v4891_v22 = vld [vmem:[%s6252_s23 + $0x90] sm:$0xff] }
 0x737   : > { %3950 = vmatmul.f32.gmra.mxu3 %v3744_v31  ;;  %4978 = vrot.lane.b32.xlu2 %v4891_v22, %s6103_s27 }
 0x739   : > { %4167 = vmatmul.f32.gmra.mxu1 %v3674_v8  ;;  %v8989_v32 = vpop.f32.mrf.mxu2  ;;  %4060 = vmatmul.f32.gmra.mxu0 %v3677_v50  ;;  %v3683_v8 = vld [vmem:[%s9867_s9 + $0x100] sm:$0xff] }
 0x73e   : > { %3879 = vmatmul.f32.gmra.mxu2 %v3771_v55 }
 0x73f   : > { %3953 = vmatmul.f32.gmra.mxu3 %v3746_v40  ;;  %v3777_v40 = vld [vmem:[%s9868_s10 + $0x1f0] sm:$0xff] }
 0x741   : > { %4170 = vmatmul.f32.gmra.mxu1 %v3676_v44  ;;  %v9003_v63 = vpop.f32.mrf.mxu2  ;;  %4063 = vmatmul.f32.gmra.mxu0 %v3679_v46  ;;  %v4892_v44 = vld [vmem:[%s6252_s23 + $0x98] sm:$0xff]  ;;  %v4894_v46 = vld [vmem:[%s6252_s23 + $0xa8] sm:$0xff] }
 0x742   : > { %4980 = vrot.lane.b32.xlu1 %v4892_v44, %s6103_s27  ;;  %4984 = vrot.lane.b32.xlu2 %v4894_v46, %s6103_s27  ;;  %v3754_v44 = vld [vmem:[%s9868_s10 + $0x138] sm:$0xff] }
 0x746   : > { %3882 = vmatmul.f32.gmra.mxu2 %v3773_v37  ;;  %v4896_v37 = vld [vmem:[%s6252_s23 + $0xb8] sm:$0xff] }
 0x747   : > { %3956 = vmatmul.f32.gmra.mxu3 %v3748_v20  ;;  %v3752_v20 = vld [vmem:[%s9868_s10 + $0x128] sm:$0xff]  ;;  %4988 = vrot.lane.b32.xlu0 %v4896_v37, %s6103_s27 }
 0x749   : > { %4173 = vmatmul.f32.gmra.mxu1 %v3678_v45  ;;  %v9017_v23 = vpop.f32.mrf.mxu2  ;;  %4066 = vmatmul.f32.gmra.mxu0 %v3681_v3  ;;  %v3682_v3 = vld [vmem:[%s9867_s9 + $0xf8] sm:$0xff] }
 0x74a   : > { %v3909_v58 = vpop.f32.mrf.mxu3 }
 0x74b   : > { %v3910_v49 = vadd.f32 %v3909_v58, %v8803_v7  ;;  %v3684_v58 = vld [vmem:[%s9867_s9 + $0x108] sm:$0xff] }
 0x74e   : > { %3885 = vmatmul.f32.gmra.mxu2 %v3775_v12  ;;  %v4022_v31 = vpop.f32.mrf.mxu0  ;;  %v3685_v12 = vld [vmem:[%s9867_s9 + $0x110] sm:$0xff] }
 0x74f   : > { %3959 = vmatmul.f32.gmra.mxu3 %v3750_v2  ;;  %v4943_v2 = vpop.permute.xlu1 %4942  ;;  %v4023_v46 = vadd.f32 %v4022_v31, %v3910_v49 }
 0x751   : > { %4176 = vmatmul.f32.gmra.mxu1 %v3680_v60  ;;  %v9037_v50 = vpop.f32.mrf.mxu2  ;;  %4069 = vmatmul.f32.gmra.mxu0 %v3683_v8  ;;  %v4895_v60 = vld [vmem:[%s6252_s23 + $0xb0] sm:$0xff]  ;;  %v4897_v8 = vld [vmem:[%s6252_s23 + $0xc0] sm:$0xff] }
 0x752   : > { %v3912_v55 = vpop.f32.mrf.mxu3  ;;  %4986 = vrot.lane.b32.xlu1 %v4895_v60, %s6103_s27  ;;  %4990 = vrot.lane.b32.xlu2 %v4897_v8, %s6103_s27 }
 0x756   : > { %3888 = vmatmul.f32.gmra.mxu2 %v3777_v40  ;;  %v4025_v45 = vpop.f32.mrf.mxu0  ;;  %v4899_v40 = vld [vmem:[%s6252_s23 + $0xd0] sm:$0xff] }
 0x757   : > { %3962 = vmatmul.f32.gmra.mxu3 %v3752_v20  ;;  %4994 = vrot.lane.b32.xlu0 %v4899_v40, %s6103_s27  ;;  %v9069_v20 = vstv %s4231_s26  ;;  %v4945_v40 = vpop.permute.xlu2 %4944  ;;  %s6057_s26 = scalar_lea.hbm %s9872_s14, 512 }
 0x758   : > { %p6059_p1 = scmp.lt.s32.totalorder %s6057_s26, %s6053_s21 }
 0x759   : > { %4179 = vmatmul.f32.gmra.mxu1 %v3682_v3  ;;  %v9057_v62 = vpop.f32.mrf.mxu2  ;;  %4072 = vmatmul.f32.gmra.mxu0 %v3685_v12  ;;  %v3687_v3 = vld [vmem:[%s9867_s9 + $0x120] sm:$0xff] }
 0x75a   : > { %v3915_v22 = vpop.f32.mrf.mxu3  ;;  %4992 = vrot.lane.b32.xlu1 %v4898_v0, %s6103_s27  ;;  %4996 = vrot.lane.b32.xlu2 %v4900_v24, %s6103_s27  ;;  %v6104_v24 = vmov 0   ;;  %p6060_p2 = por %p6059_p1, %p6058_p0 }
 0x75b   : > { %5893 = vset.pattern.permute.xlu0 %v6104_v24  ;;  %5894 = vset.pattern.permute.xlu2 %v6104_v24 }
 0x75c   : > { %5895 = vset.pattern.permute.xlu1 %v6104_v24  ;;  %p6061_p3 = pnand %p6060_p2, %p6056_p13 }
 0x75e   : > { %v4135_v37 = vpop.f32.mrf.mxu1  ;;  %5755 = vmatmul.msk.f32.vlgmr.msra.gmra.mxu2 %vm5006_vm8, %v4943_v2  ;;  %v4028_v7 = vpop.f32.mrf.mxu0  ;;  %v3913_v2 = vadd.f32 %v3912_v55, %v8819_v42  ;;  %v3686_v55 = vld [vmem:[%s9867_s9 + $0x118] sm:$0xff] }
 0x75f   : > { %v4136_v31 = vadd.f32 %v4135_v37, %v4023_v46  ;;  %3965 = vmatmul.f32.gmra.mxu3 %v3754_v44  ;;  %5000 = vrot.lane.b32.xlu0 %v4902_v6, %s6103_s27  ;;  %v3689_v37 = vld [vmem:[%s9867_s9 + $0x130] sm:$0xff] }
 0x760   : > { %v4026_v44 = vadd.f32 %v4025_v45, %v3913_v2  ;;  %v4947_v2 = vpop.permute.xlu0 %4946 }
 0x761   : > { %v4233_v12 = vadd.f32 %v9069_v20, %v4136_v31  ;;  %4182 = vmatmul.f32.gmra.mxu1 %v3684_v58  ;;  %v9079_v49 = vpop.f32.mrf.mxu2  ;;  %4075 = vmatmul.f32.gmra.mxu0 %v3687_v3  ;;  %v3916_v31 = vadd.f32 %v3915_v22, %v8837_v1  ;;  %v3688_v22 = vld [vmem:[%s9867_s9 + $0x128] sm:$0xff] }
 0x762   : > { %v3918_v60 = vpop.f32.mrf.mxu3 }
 0x763   : > { %v5722_v8 = vmul.f32 -1.442695, %v4233_v12 }
 0x765   : > { %5907 = vpow2.f32 %v5722_v8  ;;  %v4901_v8 = vld [vmem:[%s6252_s23 + $0xe0] sm:$0xff] }
 0x766   : > { %v4138_v46 = vpop.f32.mrf.mxu1  ;;  %5756 = vmatmul.msk.f32.gmra.mxu2 %vm5006_vm8, %v4945_v40  ;;  %v4031_v42 = vpop.f32.mrf.mxu0  ;;  %v4903_v40 = vld [vmem:[%s6252_s23 + $0xf0] sm:$0xff]  ;;  %4998 = vrot.lane.b32.xlu1 %v4901_v8, %s6103_s27  ;;  %v4904_v8 = vld [vmem:[%s6252_s23 + $0xf8] sm:$0xff]  ;;  %s9517_s23 = scalar_lea.vmem [#allocation6], %s5557_s30  ;;  %s5476_s30 = scalar_lea.sflag [#allocation7], %s459_s29 }
 0x767   : > { %v4139_v0 = vadd.f32 %v4138_v46, %v4026_v44  ;;  %3968 = vmatmul.f32.gmra.mxu3 %v3756_v5  ;;  %v3758_v5 = vld [vmem:[%s9868_s10 + $0x158] sm:$0xff]  ;;  %5002 = vrot.lane.b32.xlu2 %v4903_v40, %s6103_s27  ;;  %v4029_v46 = vadd.f32 %v4028_v7, %v3916_v31  ;;  %v3919_v31 = vadd.f32 %v3918_v60, %v8853_v61  ;;  %s5488_s11 = sshll.u32 %s9517_s23, 4  ;;  %s5489_s11 = int_to_ptr.vmem [resolvable:$true] %s5488_s11 }
 0x768   : > { %v3690_v60 = vld [vmem:[%s9867_s9 + $0x138] sm:$0xff] }
 0x769   : > { %v4234_v6 = vadd.f32 %v9069_v20, %v4139_v0  ;;  %4185 = vmatmul.f32.gmra.mxu1 %v3686_v55  ;;  %v9099_v45 = vpop.f32.mrf.mxu2  ;;  %4078 = vmatmul.f32.gmra.mxu0 %v3689_v37  ;;  %v3691_v37 = vld [vmem:[%s9867_s9 + $0x140] sm:$0xff] }
 0x76a   : > { %v3921_v58 = vpop.f32.mrf.mxu3 }
 0x76b   : > { %v5908_v3 = vpop.eup %5907  ;;  %v5723_v12 = vmul.f32 -1.442695, %v4234_v6 }
 0x76c   : > { %v9104_v44 = vadd.f32 1.0, %v5908_v3 }
 0x76d   : > { %5909 = vpow2.f32 %v5723_v12 }
 0x76e   : > { %5911 = vrcp.f32 %v9104_v44  ;;  %v4141_v55 = vpop.f32.mrf.mxu1  ;;  %5757 = vmatmul.msk.f32.gmra.mxu2 %vm5006_vm8, %v4947_v2  ;;  %v4034_v1 = vpop.f32.mrf.mxu0  ;;  %5004 = vrot.lane.b32.xlu1 %v4904_v8, %s6103_s27  ;;  %v3922_v8 = vadd.f32 %v3921_v58, %v8869_v11  ;;  %vm4398_vm10 = vweird.f32 %v9104_v44 }
 0x76f   : > { %v4142_v0 = vadd.f32 %v4141_v55, %v4029_v46  ;;  %3971 = vmatmul.f32.gmra.mxu3 %v3758_v5  ;;  %v4949_v2 = vpop.permute.xlu2 %4948  ;;  %v3760_v5 = vld [vmem:[%s9868_s10 + $0x168] sm:$0xff]  ;;  %v4032_v46 = vadd.f32 %v4031_v42, %v3919_v31 }
 0x771   : > { %v4235_v7 = vadd.f32 %v9069_v20, %v4142_v0  ;;  %4188 = vmatmul.f32.gmra.mxu1 %v3688_v22  ;;  %v9120_v24 = vpop.f32.mrf.mxu2  ;;  %4081 = vmatmul.f32.gmra.mxu0 %v3691_v37  ;;  %v3693_v37 = vld [vmem:[%s9867_s9 + $0x150] sm:$0xff] }
 0x772   : > { %v9122_v6 = vpop.f32.mrf.mxu3 }
 0x773   : > { %v5910_v3 = vpop.eup %5909  ;;  %v5724_v12 = vmul.f32 -1.442695, %v4235_v7  ;;  %v4404_v7 = vand.u32 2147483648, %v9104_v44 }
 0x774   : > { %v5912_v40 = vpop.eup %5911  ;;  %v9126_v35 = vadd.f32 1.0, %v5910_v3 }
 0x775   : > { %5913 = vpow2.f32 %v5724_v12  ;;  %v4394_v55 = vmul.f32 %v5912_v40, %v9104_v44  ;;  %vm4399_vm9 = vweird.f32 %v5912_v40 }
 0x776   : > { %5915 = vrcp.f32 %v9126_v35  ;;  %v4144_v22 = vpop.f32.mrf.mxu1  ;;  %5758 = vmatmul.msk.f32.gmra.mxu2 %vm5006_vm8, %v4949_v2  ;;  %v4037_v61 = vpop.f32.mrf.mxu0  ;;  %v4402_v2 = vand.u32 2147483647, %v9104_v44  ;;  %vm4400_vm11 = vmor %vm4398_vm10, %vm4399_vm9  ;;  %v3692_v44 = vld [vmem:[%s9867_s9 + $0x148] sm:$0xff]  ;;  %vm4413_vm14 = vweird.f32 %v9126_v35 }
 0x777   : > { %v4145_v0 = vadd.f32 %v4144_v22, %v4032_v46  ;;  %3974 = vmatmul.f32.gmra.mxu3 %v3760_v5  ;;  %v4395_v42 = vsub.f32 1.0, %v4394_v55  ;;  %v4951_v5 = vpop.permute.xlu1 %4950 }
 0x778   : > { %vm4403_vm12 = vcmp.eq.f32.partialorder %v4402_v2, 8.507059e+37  ;;  %v4419_v2 = vand.u32 2147483648, %v9126_v35 }
 0x779   : > { %v4236_v3 = vadd.f32 %v9069_v20, %v4145_v0  ;;  %4191 = vmatmul.f32.gmra.mxu1 %v3690_v60  ;;  %v9143_v31 = vpop.f32.mrf.mxu2  ;;  %4084 = vmatmul.f32.gmra.mxu0 %v3693_v37  ;;  %v4396_v12 = vmul.f32 %v5912_v40, %v4395_v42  ;;  %v4035_v60 = vadd.f32 %v4034_v1, %v3922_v8  ;;  %v3762_v37 = vld [vmem:[%s9868_s10 + $0x178] sm:$0xff]  ;;  %v4405_v42 = vor.u32 1.1754944e-38, %v4404_v7  ;;  %v3695_v1 = vld [vmem:[%s9867_s9 + $0x160] sm:$0xff] }
 0x77a   : > { %v9147_v15 = vpop.f32.mrf.mxu3 }
 0x77b   : > { %v5914_v29 = vpop.eup %5913  ;;  %v5725_v46 = vmul.f32 -1.442695, %v4236_v3  ;;  %v4397_v55 = vadd.f32 %v5912_v40, %v4396_v12 }
 0x77c   : > { %v5916_v22 = vpop.eup %5915  ;;  %v9150_v0 = vadd.f32 1.0, %v5914_v29 }
 0x77d   : > { %5917 = vpow2.f32 %v5725_v46  ;;  %v4401_v11 = vsel %vm4400_vm11, %v5912_v40, %v4397_v55  ;;  %v4409_v58 = vmul.f32 %v5916_v22, %v9126_v35  ;;  %vm4414_vm13 = vweird.f32 %v5916_v22 }
 0x77e   : > { %5919 = vrcp.f32 %v9150_v0  ;;  %v4147_v3 = vpop.f32.mrf.mxu1  ;;  %v4406_v12 = vsel %vm4403_vm12, %v4405_v42, %v4401_v11  ;;  %5759 = vmatmul.msk.f32.gmra.mxu2 %vm5006_vm8, %v4951_v5  ;;  %v4040_v29 = vpop.f32.mrf.mxu0  ;;  %v4417_v55 = vand.u32 2147483647, %v9126_v35  ;;  %v3925_v42 = vadd.f32 %v9122_v6, %v8885_v34  ;;  %vm4415_vm15 = vmor %vm4413_vm14, %vm4414_vm13 }
 0x77f   : > { %v4148_v7 = vadd.f32 %v4147_v3, %v4035_v60  ;;  %3977 = vmatmul.f32.gmra.mxu3 %v3762_v37  ;;  %5189 = vperm.xlu0 %5893, %v4406_v12   ;;  %v4410_v40 = vsub.f32 1.0, %v4409_v58  ;;  %v4953_v58 = vpop.permute.xlu0 %4952  ;;  %vm4428_vm2 = vweird.f32 %v9150_v0 }
 0x780   : > { %vm4418_vm0 = vcmp.eq.f32.partialorder %v4417_v55, 8.507059e+37  ;;  %v4434_v55 = vand.u32 2147483648, %v9150_v0 }
 0x781   : > { %v4237_v8 = vadd.f32 %v9069_v20, %v4148_v7  ;;  %4194 = vmatmul.f32.gmra.mxu1 %v3692_v44  ;;  %v9166_v46 = vpop.f32.mrf.mxu2  ;;  %4087 = vmatmul.f32.gmra.mxu0 %v3695_v1  ;;  %v4411_v5 = vmul.f32 %v5916_v22, %v4410_v40  ;;  %v4038_v7 = vadd.f32 %v4037_v61, %v3925_v42  ;;  %v3764_v1 = vld [vmem:[%s9868_s10 + $0x188] sm:$0xff]  ;;  %v4420_v40 = vor.u32 1.1754944e-38, %v4419_v2  ;;  %v3694_v61 = vld [vmem:[%s9867_s9 + $0x158] sm:$0xff]  ;;  %v3697_v2 = vld [vmem:[%s9867_s9 + $0x170] sm:$0xff] }
 0x782   : > { %v9171_v11 = vpop.f32.mrf.mxu3 }
 0x783   : > { %v5918_v60 = vpop.eup %5917  ;;  %v5726_v37 = vmul.f32 -1.442695, %v4237_v8  ;;  %v4412_v3 = vadd.f32 %v5916_v22, %v4411_v5 }
 0x784   : > { %v5920_v12 = vpop.eup %5919  ;;  %v9174_v44 = vadd.f32 1.0, %v5918_v60 }
 0x785   : > { %5921 = vpow2.f32 %v5726_v37  ;;  %v4416_v34 = vsel %vm4415_vm15, %v5916_v22, %v4412_v3  ;;  %v4424_v6 = vmul.f32 %v5920_v12, %v9150_v0  ;;  %vm4429_vm1 = vweird.f32 %v5920_v12 }
 0x786   : > { %5923 = vrcp.f32 %v9174_v44  ;;  %v4150_v8 = vpop.f32.mrf.mxu1  ;;  %v4421_v5 = vsel %vm4418_vm0, %v4420_v40, %v4416_v34  ;;  %5760 = vmatmul.msk.f32.gmra.mxu2 %vm5006_vm8, %v4953_v58  ;;  %v4043_v35 = vpop.f32.mrf.mxu0  ;;  %v4432_v3 = vand.u32 2147483647, %v9150_v0  ;;  %v3928_v40 = vadd.f32 %v9147_v15, %v8901_v16  ;;  %vm4430_vm3 = vmor %vm4428_vm2, %vm4429_vm1 }
 0x787   : > { %v4151_v42 = vadd.f32 %v4150_v8, %v4038_v7  ;;  %3980 = vmatmul.f32.gmra.mxu3 %v3764_v1  ;;  %5194 = vperm.xlu2 %5894, %v4421_v5   ;;  %v4425_v22 = vsub.f32 1.0, %v4424_v6  ;;  %v4955_v6 = vpop.permute.xlu2 %4954  ;;  %vm4443_vm6 = vweird.f32 %v9174_v44 }
 0x788   : > { %vm4433_vm4 = vcmp.eq.f32.partialorder %v4432_v3, 8.507059e+37  ;;  %v4449_v3 = vand.u32 2147483648, %v9174_v44 }
 0x789   : > { %v4238_v60 = vadd.f32 %v9069_v20, %v4151_v42  ;;  %4197 = vmatmul.f32.gmra.mxu1 %v3694_v61  ;;  %v9190_v37 = vpop.f32.mrf.mxu2  ;;  %4090 = vmatmul.f32.gmra.mxu0 %v3697_v2  ;;  %v4426_v58 = vmul.f32 %v5920_v12, %v4425_v22  ;;  %v4041_v42 = vadd.f32 %v4040_v29, %v3928_v40  ;;  %v3766_v2 = vld [vmem:[%s9868_s10 + $0x198] sm:$0xff]  ;;  %v4435_v22 = vor.u32 1.1754944e-38, %v4434_v55  ;;  %v3696_v29 = vld [vmem:[%s9867_s9 + $0x168] sm:$0xff]  ;;  %v3699_v55 = vld [vmem:[%s9867_s9 + $0x180] sm:$0xff] }
 0x78a   : > { %v9195_v34 = vpop.f32.mrf.mxu3 }
 0x78b   : > { %v5922_v7 = vpop.eup %5921  ;;  %v5727_v1 = vmul.f32 -1.442695, %v4238_v60  ;;  %v4427_v8 = vadd.f32 %v5920_v12, %v4426_v58 }
 0x78c   : > { %v5924_v5 = vpop.eup %5923  ;;  %v9198_v61 = vadd.f32 1.0, %v5922_v7 }
 0x78d   : > { %5925 = vpow2.f32 %v5727_v1  ;;  %v4431_v15 = vsel %vm4430_vm3, %v5920_v12, %v4427_v8  ;;  %v4439_v16 = vmul.f32 %v5924_v5, %v9174_v44  ;;  %vm4444_vm5 = vweird.f32 %v5924_v5 }
 0x78e   : > { %5927 = vrcp.f32 %v9198_v61  ;;  %v4153_v60 = vpop.f32.mrf.mxu1  ;;  %v4436_v58 = vsel %vm4433_vm4, %v4435_v22, %v4431_v15  ;;  %5761 = vmatmul.msk.f32.gmra.mxu2 %vm5006_vm8, %v4955_v6  ;;  %v4046_v0 = vpop.f32.mrf.mxu0  ;;  %v4447_v8 = vand.u32 2147483647, %v9174_v44  ;;  %v3931_v22 = vadd.f32 %v9171_v11, %v8917_v28  ;;  %vm4445_vm7 = vmor %vm4443_vm6, %vm4444_vm5 }
 0x78f   : > { %v4154_v40 = vadd.f32 %v4153_v60, %v4041_v42  ;;  %3983 = vmatmul.f32.gmra.mxu3 %v3766_v2  ;;  %5199 = vperm.xlu1 %5895, %v4436_v58   ;;  %v4440_v12 = vsub.f32 1.0, %v4439_v16  ;;  %v4957_v16 = vpop.permute.xlu1 %4956  ;;  %vm4458_vm11 = vweird.f32 %v9198_v61 }
 0x790   : > { %vm4448_vm9 = vcmp.eq.f32.partialorder %v4447_v8, 8.507059e+37  ;;  %v9236_v8 = vpop.permute.xlu2 %4960 }
 0x791   : > { %v4239_v7 = vadd.f32 %v9069_v20, %v4154_v40  ;;  %4200 = vmatmul.f32.gmra.mxu1 %v3696_v29  ;;  %v9214_v1 = vpop.f32.mrf.mxu2  ;;  %4093 = vmatmul.f32.gmra.mxu0 %v3699_v55  ;;  %v4441_v6 = vmul.f32 %v5924_v5, %v4440_v12  ;;  %v4044_v40 = vadd.f32 %v4043_v35, %v3931_v22  ;;  %v3768_v55 = vld [vmem:[%s9868_s10 + $0x1a8] sm:$0xff]  ;;  %v4450_v12 = vor.u32 1.1754944e-38, %v4449_v3  ;;  %v3698_v35 = vld [vmem:[%s9867_s9 + $0x178] sm:$0xff]  ;;  %v3701_v3 = vld [vmem:[%s9867_s9 + $0x190] sm:$0xff] }
 0x792   : > { %v9219_v15 = vpop.f32.mrf.mxu3 }
 0x793   : > { %v5926_v42 = vpop.eup %5925  ;;  %v5728_v2 = vmul.f32 -1.442695, %v4239_v7  ;;  %v4442_v60 = vadd.f32 %v5924_v5, %v4441_v6 }
 0x794   : > { %v5928_v58 = vpop.eup %5927  ;;  %v9222_v29 = vadd.f32 1.0, %v5926_v42  ;;  %v4464_v42 = vand.u32 2147483648, %v9198_v61 }
 0x795   : > { %5929 = vpow2.f32 %v5728_v2  ;;  %v4446_v28 = vsel %vm4445_vm7, %v5924_v5, %v4442_v60  ;;  %v4454_v11 = vmul.f32 %v5928_v58, %v9198_v61  ;;  %vm4459_vm10 = vweird.f32 %v5928_v58 }
 0x796   : > { %5931 = vrcp.f32 %v9222_v29  ;;  %v4156_v7 = vpop.f32.mrf.mxu1  ;;  %v4451_v6 = vsel %vm4448_vm9, %v4450_v12, %v4446_v28  ;;  %5762 = vmatmul.msk.f32.gmra.mxu2 %vm5006_vm8, %v4957_v16  ;;  %v4049_v44 = vpop.f32.mrf.mxu0  ;;  %v4462_v12 = vand.u32 2147483647, %v9198_v61  ;;  %vm4460_vm12 = vmor %vm4458_vm11, %vm4459_vm10  ;;  %vm4473_vm15 = vweird.f32 %v9222_v29 }
 0x797   : > { %v4157_v22 = vadd.f32 %v4156_v7, %v4044_v40  ;;  %3986 = vmatmul.f32.gmra.mxu3 %v3768_v55  ;;  %5204 = vperm.xlu2 %5894, %v4451_v6   ;;  %v4455_v5 = vsub.f32 1.0, %v4454_v11  ;;  %v3934_v40 = vadd.f32 %v9195_v34, %v8933_v26  ;;  %v4959_v7 = vpop.permute.xlu0 %4958 }
 0x798   : > { %vm4463_vm13 = vcmp.eq.f32.partialorder %v4462_v12, 8.507059e+37  ;;  %v4479_v12 = vand.u32 2147483648, %v9222_v29 }
 0x799   : > { %v4240_v2 = vadd.f32 %v9069_v20, %v4157_v22  ;;  %4203 = vmatmul.f32.gmra.mxu1 %v3698_v35  ;;  %v9240_v16 = vpop.f32.mrf.mxu2  ;;  %4096 = vmatmul.f32.gmra.mxu0 %v3701_v3  ;;  %v4456_v60 = vmul.f32 %v5928_v58, %v4455_v5  ;;  %v4047_v43 = vadd.f32 %v4046_v0, %v3934_v40  ;;  %v3770_v3 = vld [vmem:[%s9868_s10 + $0x1b8] sm:$0xff]  ;;  %v4465_v5 = vor.u32 1.1754944e-38, %v4464_v42  ;;  %v3700_v0 = vld [vmem:[%s9867_s9 + $0x188] sm:$0xff]  ;;  %v3703_v42 = vld [vmem:[%s9867_s9 + $0x1a0] sm:$0xff] }
 0x79a   : > { %v9245_v55 = vpop.f32.mrf.mxu3 }
 0x79b   : > { %v5930_v28 = vpop.eup %5929  ;;  %v5729_v11 = vmul.f32 -1.442695, %v4240_v2  ;;  %v4457_v6 = vadd.f32 %v5928_v58, %v4456_v60 }
 0x79c   : > { %v5932_v22 = vpop.eup %5931  ;;  %v9248_v35 = vadd.f32 1.0, %v5930_v28 }
 0x79d   : > { %5933 = vpow2.f32 %v5729_v11  ;;  %v4461_v26 = vsel %vm4460_vm12, %v5928_v58, %v4457_v6  ;;  %v4469_v34 = vmul.f32 %v5932_v22, %v9222_v29  ;;  %vm4474_vm14 = vweird.f32 %v5932_v22 }
 0x79e   : > { %5935 = vrcp.f32 %v9248_v35  ;;  %v4159_v2 = vpop.f32.mrf.mxu1  ;;  %v4466_v60 = vsel %vm4463_vm13, %v4465_v5, %v4461_v26  ;;  %5763 = vmatmul.msk.f32.gmra.mxu2 %vm5006_vm8, %v4959_v7  ;;  %v4052_v61 = vpop.f32.mrf.mxu0  ;;  %v4477_v6 = vand.u32 2147483647, %v9222_v29  ;;  %vm4475_vm0 = vmor %vm4473_vm15, %vm4474_vm14  ;;  %vm4488_vm3 = vweird.f32 %v9248_v35 }
 0x79f   : > { %v4160_v40 = vadd.f32 %v4159_v2, %v4047_v43  ;;  %3989 = vmatmul.f32.gmra.mxu3 %v3770_v3  ;;  %5209 = vperm.xlu1 %5895, %v4466_v60   ;;  %v4470_v58 = vsub.f32 1.0, %v4469_v34  ;;  %v9267_v5 = vpop.permute.xlu2 %4966  ;;  %v3937_v43 = vadd.f32 %v9219_v15, %v8951_v36 }
 0x7a0   : > { %vm4478_vm1 = vcmp.eq.f32.partialorder %v4477_v6, 8.507059e+37  ;;  %v4494_v6 = vand.u32 2147483648, %v9248_v35 }
 0x7a1   : > { %v4241_v28 = vadd.f32 %v9069_v20, %v4160_v40  ;;  %4206 = vmatmul.f32.gmra.mxu1 %v3700_v0  ;;  %v9264_v11 = vpop.f32.mrf.mxu2  ;;  %4099 = vmatmul.f32.gmra.mxu0 %v3703_v42  ;;  %v4471_v7 = vmul.f32 %v5932_v22, %v4470_v58  ;;  %v4050_v42 = vadd.f32 %v4049_v44, %v3937_v43  ;;  %v3772_v40 = vld [vmem:[%s9868_s10 + $0x1c8] sm:$0xff]  ;;  %v4480_v58 = vor.u32 1.1754944e-38, %v4479_v12  ;;  %v3702_v44 = vld [vmem:[%s9867_s9 + $0x198] sm:$0xff]  ;;  %v3705_v12 = vld [vmem:[%s9867_s9 + $0x1b0] sm:$0xff] }
 0x7a2   : > { %v9271_v3 = vpop.f32.mrf.mxu3 }
 0x7a3   : > { %v5934_v26 = vpop.eup %5933  ;;  %v5730_v34 = vmul.f32 -1.442695, %v4241_v28  ;;  %v4472_v2 = vadd.f32 %v5932_v22, %v4471_v7 }
 0x7a4   : > { %v5936_v60 = vpop.eup %5935  ;;  %v9274_v0 = vadd.f32 1.0, %v5934_v26  ;;  %v4492_v26 = vand.u32 2147483647, %v9248_v35 }
 0x7a5   : > { %5937 = vpow2.f32 %v5730_v34  ;;  %v4476_v4 = vsel %vm4475_vm0, %v5932_v22, %v4472_v2  ;;  %v4484_v36 = vmul.f32 %v5936_v60, %v9248_v35  ;;  %vm4489_vm2 = vweird.f32 %v5936_v60 }
 0x7a6   : > { %5939 = vrcp.f32 %v9274_v0  ;;  %v4162_v15 = vpop.f32.mrf.mxu1  ;;  %v4481_v28 = vsel %vm4478_vm1, %v4480_v58, %v4476_v4  ;;  %5764 = vmatmul.msk.f32.gmra.mxu2 %vm5006_vm8, %v9236_v8  ;;  %v4055_v29 = vpop.f32.mrf.mxu0  ;;  %v3940_v34 = vadd.f32 %v9245_v55, %v8969_v52  ;;  %vm4490_vm4 = vmor %vm4488_vm3, %vm4489_vm2  ;;  %v4495_v52 = vor.u32 1.1754944e-38, %v4494_v6  ;;  %v3707_v6 = vld [vmem:[%s9867_s9 + $0x1c0] sm:$0xff] }
 0x7a7   : > { %v4163_v22 = vadd.f32 %v4162_v15, %v4050_v42  ;;  %3992 = vmatmul.f32.gmra.mxu3 %v3772_v40  ;;  %5214 = vperm.xlu0 %5893, %v4481_v28   ;;  %v4485_v7 = vsub.f32 1.0, %v4484_v36  ;;  %v4963_v42 = vpop.permute.xlu1 %4962  ;;  %v9299_v15 = vpop.permute.xlu2 %4972  ;;  %vm4493_vm5 = vcmp.eq.f32.partialorder %v4492_v26, 8.507059e+37  ;;  %v4509_v26 = vand.u32 2147483648, %v9274_v0 }
 0x7a8   : > { %v4965_v28 = vpop.permute.xlu0 %4964  ;;  %vm4503_vm7 = vweird.f32 %v9274_v0 }
 0x7a9   : > { %v4242_v4 = vadd.f32 %v9069_v20, %v4163_v22  ;;  %4209 = vmatmul.f32.gmra.mxu1 %v3702_v44  ;;  %v9291_v43 = vpop.f32.mrf.mxu2  ;;  %4102 = vmatmul.f32.gmra.mxu0 %v3705_v12  ;;  %v4486_v8 = vmul.f32 %v5936_v60, %v4485_v7  ;;  %v4053_v22 = vadd.f32 %v4052_v61, %v3940_v34  ;;  %v3774_v7 = vld [vmem:[%s9868_s10 + $0x1d8] sm:$0xff]  ;;  %v3704_v61 = vld [vmem:[%s9867_s9 + $0x1a8] sm:$0xff] }
 0x7aa   : > { %v9296_v2 = vpop.f32.mrf.mxu3 }
 0x7ab   : > { %v5938_v40 = vpop.eup %5937  ;;  %v5731_v58 = vmul.f32 -1.442695, %v4242_v4  ;;  %v4487_v36 = vadd.f32 %v5936_v60, %v4486_v8 }
 0x7ac   : > { %v5940_v44 = vpop.eup %5939  ;;  %v9301_v12 = vadd.f32 1.0, %v5938_v40 }
 0x7ad   : > { %5941 = vpow2.f32 %v5731_v58  ;;  %v4491_v55 = vsel %vm4490_vm4, %v5936_v60, %v4487_v36  ;;  %v4499_v4 = vmul.f32 %v5940_v44, %v9274_v0  ;;  %vm4504_vm6 = vweird.f32 %v5940_v44 }
 0x7ae   : > { %5943 = vrcp.f32 %v9301_v12  ;;  %v4165_v35 = vpop.f32.mrf.mxu1  ;;  %v4496_v8 = vsel %vm4493_vm5, %v4495_v52, %v4491_v55  ;;  %5765 = vmatmul.msk.f32.gmra.mxu2 %vm5006_vm8, %v4963_v42  ;;  %v4058_v40 = vpop.f32.mrf.mxu0  ;;  %v4507_v52 = vand.u32 2147483647, %v9274_v0  ;;  %v3943_v55 = vadd.f32 %v9271_v3, %v8989_v32  ;;  %vm4505_vm9 = vmor %vm4503_vm7, %vm4504_vm6 }
 0x7af   : > { %v4166_v34 = vadd.f32 %v4165_v35, %v4053_v22  ;;  %3995 = vmatmul.f32.gmra.mxu3 %v3774_v7  ;;  %5219 = vperm.xlu2 %5894, %v4496_v8   ;;  %v4500_v60 = vsub.f32 1.0, %v4499_v4  ;;  %v9333_v3 = vpop.permute.xlu2 %4978  ;;  %vm4518_vm12 = vweird.f32 %v9301_v12 }
 0x7b0   : > { %v9326_v35 = vpop.permute.xlu0 %4970  ;;  %vm4508_vm10 = vcmp.eq.f32.partialorder %v4507_v52, 8.507059e+37 }
 0x7b1   : > { %v4243_v58 = vadd.f32 %v9069_v20, %v4166_v34  ;;  %4212 = vmatmul.f32.gmra.mxu1 %v3704_v61  ;;  %v9318_v36 = vpop.f32.mrf.mxu2  ;;  %4105 = vmatmul.f32.gmra.mxu0 %v3707_v6  ;;  %v4501_v42 = vmul.f32 %v5940_v44, %v4500_v60  ;;  %v4056_v6 = vadd.f32 %v4055_v29, %v3943_v55  ;;  %v3776_v34 = vld [vmem:[%s9868_s10 + $0x1e8] sm:$0xff]  ;;  %v4510_v60 = vor.u32 1.1754944e-38, %v4509_v26  ;;  %v3706_v55 = vld [vmem:[%s9867_s9 + $0x1b8] sm:$0xff] }
 0x7b2   : > { %v9323_v9 = vpop.f32.mrf.mxu3 }
 0x7b3   : > { %v5942_v22 = vpop.eup %5941  ;;  %v5732_v7 = vmul.f32 -1.442695, %v4243_v58  ;;  %v4502_v4 = vadd.f32 %v5940_v44, %v4501_v42 }
 0x7b4   : > { %v5944_v8 = vpop.eup %5943  ;;  %v9328_v61 = vadd.f32 1.0, %v5942_v22  ;;  %v9344_v22 = vpop.permute.xlu1 %4968 }
 0x7b5   : > { %5945 = vpow2.f32 %v5732_v7  ;;  %v4506_v32 = vsel %vm4505_vm9, %v5940_v44, %v4502_v4  ;;  %v4514_v58 = vmul.f32 %v5944_v8, %v9301_v12  ;;  %v3709_v44 = vld [vmem:[%s9867_s9 + $0x1d0] sm:$0xff]  ;;  %v4524_v7 = vand.u32 2147483648, %v9301_v12 }
 0x7b6   : > { %5947 = vrcp.f32 %v9328_v61  ;;  %v4168_v0 = vpop.f32.mrf.mxu1  ;;  %v4511_v42 = vsel %vm4508_vm10, %v4510_v60, %v4506_v32  ;;  %5766 = vmatmul.msk.f32.gmra.mxu2 %vm5006_vm8, %v4965_v28  ;;  %v4061_v29 = vpop.f32.mrf.mxu0  ;;  %vm4519_vm11 = vweird.f32 %v5944_v8  ;;  %v4522_v32 = vand.u32 2147483647, %v9301_v12 }
 0x7b7   : > { %v4169_v26 = vadd.f32 %v4168_v0, %v4056_v6  ;;  %3998 = vmatmul.f32.gmra.mxu3 %v3776_v34  ;;  %5224 = vperm.xlu1 %5895, %v4511_v42   ;;  %v4515_v52 = vsub.f32 1.0, %v4514_v58  ;;  %v3946_v6 = vadd.f32 %v9296_v2, %v9003_v63  ;;  %vm4520_vm13 = vmor %vm4518_vm12, %vm4519_vm11  ;;  %vm4533_vm0 = vweird.f32 %v9328_v61 }
 0x7b8   : > { %vm4523_vm14 = vcmp.eq.f32.partialorder %v4522_v32, 8.507059e+37  ;;  %v9362_v2 = vpop.permute.xlu0 %4976  ;;  %v9375_v32 = vpop.permute.xlu2 %4984 }
 0x7b9   : > { %v4244_v4 = vadd.f32 %v9069_v20, %v4169_v26  ;;  %4215 = vmatmul.f32.gmra.mxu1 %v3706_v55  ;;  %v9348_v28 = vpop.f32.mrf.mxu2  ;;  %4108 = vmatmul.f32.gmra.mxu0 %v3709_v44  ;;  %v4516_v60 = vmul.f32 %v5944_v8, %v4515_v52  ;;  %v4059_v55 = vadd.f32 %v4058_v40, %v3946_v6  ;;  %v3778_v44 = vld [vmem:[%s9868_s10 + $0x1f8] sm:$0xff]  ;;  %v4525_v52 = vor.u32 1.1754944e-38, %v4524_v7  ;;  %v3708_v7 = vld [vmem:[%s9867_s9 + $0x1c8] sm:$0xff] }
 0x7ba   : > { %v9353_v34 = vpop.f32.mrf.mxu3 }
 0x7bb   : > { %v5946_v58 = vpop.eup %5945  ;;  %v5733_v0 = vmul.f32 -1.442695, %v4244_v4  ;;  %v4517_v42 = vadd.f32 %v5944_v8, %v4516_v60 }
 0x7bc   : > { %v5948_v51 = vpop.eup %5947  ;;  %v9356_v26 = vadd.f32 1.0, %v5946_v58 }
 0x7bd   : > { %5949 = vpow2.f32 %v5733_v0  ;;  %v4521_v53 = vsel %vm4520_vm13, %v5944_v8, %v4517_v42  ;;  %v4529_v63 = vmul.f32 %v5948_v51, %v9328_v61  ;;  %v3711_v8 = vld [vmem:[%s9867_s9 + $0x1e0] sm:$0xff]  ;;  %vm4534_vm15 = vweird.f32 %v5948_v51 }
 0x7be   : > { %5951 = vrcp.f32 %v9356_v26  ;;  %v4171_v12 = vpop.f32.mrf.mxu1  ;;  %v4526_v4 = vsel %vm4523_vm14, %v4525_v52, %v4521_v53  ;;  %5767 = vmatmul.msk.f32.gmra.mxu2 %vm5006_vm8, %v9267_v5  ;;  %v9367_v40 = vpop.f32.mrf.mxu0  ;;  %v4539_v5 = vand.u32 2147483648, %v9328_v61  ;;  %v4537_v52 = vand.u32 2147483647, %v9328_v61  ;;  %vm4535_vm1 = vmor %vm4533_vm0, %vm4534_vm15 }
 0x7bf   : > { %v4172_v60 = vadd.f32 %v4171_v12, %v4059_v55  ;;  %4001 = vmatmul.f32.gmra.mxu3 %v3778_v44  ;;  %5229 = vperm.xlu0 %5893, %v4526_v4   ;;  %v4530_v6 = vsub.f32 1.0, %v4529_v63  ;;  %v9377_v53 = vpop.permute.xlu1 %4974  ;;  %v3949_v55 = vadd.f32 %v9323_v9, %v9017_v23  ;;  %vm4548_vm4 = vweird.f32 %v9356_v26 }
 0x7c0   : > { %vm4538_vm2 = vcmp.eq.f32.partialorder %v4537_v52, 8.507059e+37  ;;  %v9404_v52 = vpop.permute.xlu0 %4982 }
 0x7c1   : > { %v4245_v58 = vadd.f32 %v9069_v20, %v4172_v60  ;;  %4218 = vmatmul.f32.gmra.mxu1 %v3708_v7  ;;  %v9381_v0 = vpop.f32.mrf.mxu2  ;;  %4111 = vmatmul.f32.gmra.mxu0 %v3711_v8  ;;  %v4531_v42 = vmul.f32 %v5948_v51, %v4530_v6  ;;  %v4062_v7 = vadd.f32 %v4061_v29, %v3949_v55  ;;  %v3714_v8 = vld [vmem:[%s9867_s9 + $0x1f8] sm:$0xff]  ;;  %v4540_v6 = vor.u32 1.1754944e-38, %v4539_v5  ;;  %v3713_v5 = vld [vmem:[%s9867_s9 + $0x1f0] sm:$0xff] }
 0x7c2   : > { %v9386_v44 = vpop.f32.mrf.mxu3  ;;  %v3710_v29 = vld [vmem:[%s9867_s9 + $0x1d8] sm:$0xff] }
 0x7c3   : > { %v5950_v63 = vpop.eup %5949  ;;  %v5734_v12 = vmul.f32 -1.442695, %v4245_v58  ;;  %v4532_v4 = vadd.f32 %v5948_v51, %v4531_v42 }
 0x7c4   : > { %v5952_v41 = vpop.eup %5951  ;;  %v9389_v60 = vadd.f32 1.0, %v5950_v63  ;;  %v9410_v63 = vpop.permute.xlu2 %4990 }
 0x7c5   : > { %5953 = vpow2.f32 %v5734_v12  ;;  %v4536_v38 = vsel %vm4535_vm1, %v5948_v51, %v4532_v4  ;;  %v4544_v9 = vmul.f32 %v5952_v41, %v9356_v26  ;;  %vm4549_vm3 = vweird.f32 %v5952_v41 }
 0x7c6   : > { %5955 = vrcp.f32 %v9389_v60  ;;  %v4174_v23 = vpop.f32.mrf.mxu1  ;;  %v4541_v58 = vsel %vm4538_vm2, %v4540_v6, %v4536_v38  ;;  %5768 = vmatmul.msk.f32.gmra.mxu2 %vm5006_vm8, %v9344_v22  ;;  %v4067_v61 = vpop.f32.mrf.mxu0  ;;  %v4554_v38 = vand.u32 2147483648, %v9356_v26  ;;  %vm4550_vm5 = vmor %vm4548_vm4, %vm4549_vm3  ;;  %vm4563_vm9 = vweird.f32 %v9389_v60 }
 0x7c7   : > { %v4175_v51 = vadd.f32 %v4174_v23, %v4062_v7  ;;  %4227 = vmatmul.f32.vlgmr.msrb.gmra.mxu3 %v3714_v8  ;;  %5234 = vperm.xlu2 %5894, %v4541_v58   ;;  %v4545_v42 = vsub.f32 1.0, %v4544_v9  ;;  %v9406_v55 = vpop.permute.xlu1 %4980  ;;  %v4552_v7 = vand.u32 2147483647, %v9356_v26  ;;  %v3952_v8 = vadd.f32 %v9353_v34, %v9037_v50 }
 0x7c9   : > { %v4246_v22 = vadd.f32 %v9069_v20, %v4175_v51  ;;  %4221 = vmatmul.f32.gmra.mxu1 %v3710_v29  ;;  %v9412_v12 = vpop.f32.mrf.mxu2  ;;  %4114 = vmatmul.f32.gmra.mxu0 %v3713_v5  ;;  %v4546_v4 = vmul.f32 %v5952_v41, %v4545_v42  ;;  %v4065_v29 = vadd.f32 %v9367_v40, %v3952_v8  ;;  %v4555_v5 = vor.u32 1.1754944e-38, %v4554_v38 }
 0x7ca   : > { %v9417_v6 = vpop.f32.mrf.mxu3  ;;  %vm4553_vm6 = vcmp.eq.f32.partialorder %v4552_v7, 8.507059e+37 }
 0x7cb   : > { %v5954_v9 = vpop.eup %5953  ;;  %v5735_v23 = vmul.f32 -1.442695, %v4246_v22  ;;  %v4547_v58 = vadd.f32 %v5952_v41, %v4546_v4  ;;  %v3712_v22 = vld [vmem:[%s9867_s9 + $0x1e8] sm:$0xff] }
 0x7cc   : > { %v5956_v51 = vpop.eup %5955  ;;  %v9420_v39 = vadd.f32 1.0, %v5954_v9 }
 0x7cd   : > { %5957 = vpow2.f32 %v5735_v23  ;;  %v4551_v42 = vsel %vm4550_vm5, %v5952_v41, %v4547_v58  ;;  %v4559_v19 = vmul.f32 %v5956_v51, %v9389_v60  ;;  %v4569_v41 = vand.u32 2147483648, %v9389_v60  ;;  %v9437_v23 = vpop.permute.xlu0 %4988 }
 0x7ce   : > { %5959 = vrcp.f32 %v9420_v39  ;;  %v4177_v50 = vpop.f32.mrf.mxu1  ;;  %v4556_v34 = vsel %vm4553_vm6, %v4555_v5, %v4551_v42  ;;  %5769 = vmatmul.msk.f32.gmra.mxu2 %vm5006_vm8, %v9326_v35  ;;  %v4070_v26 = vpop.f32.mrf.mxu0  ;;  %vm4564_vm7 = vweird.f32 %v5956_v51  ;;  %v4567_v35 = vand.u32 2147483647, %v9389_v60 }
 0x7cf   : > { %v4178_v40 = vadd.f32 %v4177_v50, %v4065_v29  ;;  %5239 = vperm.xlu1 %5895, %v4556_v34   ;;  %v4560_v38 = vsub.f32 1.0, %v4559_v19  ;;  %v9430_v4 = vpop.permute.xlu1 %4986  ;;  %v3955_v58 = vadd.f32 %v9386_v44, %v9057_v62  ;;  %v9441_v42 = vpop.permute.xlu2 %4996  ;;  %vm4565_vm10 = vmor %vm4563_vm9, %vm4564_vm7  ;;  %vm4578_vm13 = vweird.f32 %v9420_v39 }
 0x7d0   : > { %vm4568_vm11 = vcmp.eq.f32.partialorder %v4567_v35, 8.507059e+37 }
 0x7d1   : > { %v4247_v7 = vadd.f32 %v9069_v20, %v4178_v40  ;;  %4224 = vmatmul.f32.gmra.mxu1 %v3712_v22  ;;  %v9434_v8 = vpop.f32.mrf.mxu2  ;;  %v4561_v9 = vmul.f32 %v5956_v51, %v4560_v38  ;;  %v4068_v40 = vadd.f32 %v4067_v61, %v3955_v58  ;;  %v4570_v38 = vor.u32 1.1754944e-38, %v4569_v41 }
 0x7d2   : > { %10259 = vst [vmem:[#allocation61_spill] sm:$0xff] %v9434_v8  ;;  %v3960_v29 = vpop.f32.mrf.mxu3  ;;  %v4584_v61 = vand.u32 2147483648, %v9420_v39  ;;  %v4582_v58 = vand.u32 2147483647, %v9420_v39 }
 0x7d3   : > { %v5958_v19 = vpop.eup %5957  ;;  %v5736_v5 = vmul.f32 -1.442695, %v4247_v7  ;;  %v4562_v50 = vadd.f32 %v5956_v51, %v4561_v9 }
 0x7d4   : > { %v5960_v34 = vpop.eup %5959  ;;  %v9444_v22 = vadd.f32 1.0, %v5958_v19  ;;  %vm4583_vm15 = vcmp.eq.f32.partialorder %v4582_v58, 8.507059e+37 }
 0x7d5   : > { %5961 = vpow2.f32 %v5736_v5  ;;  %v4566_v48 = vsel %vm4565_vm10, %v5956_v51, %v4562_v50  ;;  %v4574_v21 = vmul.f32 %v5960_v34, %v9420_v39  ;;  %vm4579_vm12 = vweird.f32 %v5960_v34 }
 0x7d6   : > { %5963 = vrcp.f32 %v9444_v22  ;;  %v4180_v62 = vpop.f32.mrf.mxu1  ;;  %v4571_v44 = vsel %vm4568_vm11, %v4570_v38, %v4566_v48  ;;  %5770 = vmatmul.msk.f32.gmra.mxu2 %vm5006_vm8, %v9299_v15  ;;  %v4073_v7 = vpop.f32.mrf.mxu0  ;;  %v3958_v48 = vadd.f32 %v9417_v6, %v9079_v49  ;;  %vm4580_vm14 = vmor %vm4578_vm13, %vm4579_vm12  ;;  %vm4593_vm1 = vweird.f32 %v9444_v22 }
 0x7d7   : > { %v4181_v60 = vadd.f32 %v4180_v62, %v4068_v40  ;;  %5244 = vperm.xlu0 %5893, %v4571_v44   ;;  %v4575_v9 = vsub.f32 1.0, %v4574_v21  ;;  %v9450_v19 = vpop.permute.xlu1 %4992  ;;  %v9462_v40 = vpop.permute.xlu0 %4994 }
 0x7d8   : > { %v4071_v44 = vadd.f32 %v4070_v26, %v3958_v48 }
 0x7d9   : > { %v4248_v51 = vadd.f32 %v9069_v20, %v4181_v60  ;;  %v9454_v41 = vpop.f32.mrf.mxu2  ;;  %v4576_v35 = vmul.f32 %v5960_v34, %v4575_v9  ;;  %v4585_v60 = vor.u32 1.1754944e-38, %v4584_v61  ;;  %v9466_v9 = vpop.permute.xlu2 %5002  ;;  %v4599_v61 = vand.u32 2147483648, %v9444_v22 }
 0x7da   : > { %v9459_v15 = vpop.f32.mrf.mxu3  ;;  %10260 = vst [vmem:[#allocation34_spill] sm:$0xff] %v9466_v9 }
 0x7db   : > { %v5962_v5 = vpop.eup %5961  ;;  %v5737_v50 = vmul.f32 -1.442695, %v4248_v51  ;;  %v4577_v21 = vadd.f32 %v5960_v34, %v4576_v35 }
 0x7dc   : > { %v5964_v38 = vpop.eup %5963  ;;  %v9464_v62 = vadd.f32 1.0, %v5962_v5 }
 0x7dd   : > { %5965 = vpow2.f32 %v5737_v50  ;;  %v4581_v33 = vsel %vm4580_vm14, %v5960_v34, %v4577_v21  ;;  %v4589_v49 = vmul.f32 %v5964_v38, %v9444_v22  ;;  %vm4594_vm0 = vweird.f32 %v5964_v38 }
 0x7de   : > { %5967 = vrcp.f32 %v9464_v62  ;;  %v4183_v6 = vpop.f32.mrf.mxu1  ;;  %v4586_v51 = vsel %vm4583_vm15, %v4585_v60, %v4581_v33  ;;  %5771 = vmatmul.msk.f32.gmra.mxu2 %vm5006_vm8, %v9377_v53  ;;  %v4076_v39 = vpop.f32.mrf.mxu0  ;;  %v4597_v50 = vand.u32 2147483647, %v9444_v22  ;;  %v3961_v33 = vadd.f32 %v3960_v29, %v9099_v45  ;;  %vm4595_vm2 = vmor %vm4593_vm1, %vm4594_vm0  ;;  %v9492_v29 = vld [vmem:[%s9871_s13] ss:$0 sm:$0xff] }
 0x7df   : > { %v4184_v35 = vadd.f32 %v4183_v6, %v4071_v44  ;;  %5249 = vperm.xlu2 %5894, %v4586_v51   ;;  %v4590_v26 = vsub.f32 1.0, %v4589_v49  ;;  %v9472_v48 = vpop.permute.xlu1 %4998  ;;  %v9485_v9 = vpop.permute.xlu0 %5000  ;;  %vm4608_vm5 = vweird.f32 %v9464_v62 }
 0x7e0   : > { %v4074_v51 = vadd.f32 %v4073_v7, %v3961_v33  ;;  %vm4598_vm3 = vcmp.eq.f32.partialorder %v4597_v50, 8.507059e+37  ;;  %v4614_v33 = vand.u32 2147483648, %v9464_v62 }
 0x7e1   : > { %v4249_v34 = vadd.f32 %v9069_v20, %v4184_v35  ;;  %v9476_v58 = vpop.f32.mrf.mxu2  ;;  %v4591_v5 = vmul.f32 %v5964_v38, %v4590_v26  ;;  %v4600_v35 = vor.u32 1.1754944e-38, %v4599_v61  ;;  %v5195_v61 = vpop.permute.xlu2 %5194 }
 0x7e2   : > { %v9480_v21 = vpop.f32.mrf.mxu3 }
 0x7e3   : > { %v5966_v53 = vpop.eup %5965  ;;  %v5738_v44 = vmul.f32 -1.442695, %v4249_v34  ;;  %v4592_v60 = vadd.f32 %v5964_v38, %v4591_v5 }
 0x7e4   : > { %v5968_v49 = vpop.eup %5967  ;;  %v9483_v6 = vadd.f32 1.0, %v5966_v53 }
 0x7e5   : > { %5969 = vpow2.f32 %v5738_v44  ;;  %v4596_v26 = vsel %vm4595_vm2, %v5964_v38, %v4592_v60  ;;  %v4604_v45 = vmul.f32 %v5968_v49, %v9464_v62  ;;  %vm4609_vm4 = vweird.f32 %v5968_v49 }
 0x7e6   : > { %5971 = vrcp.f32 %v9483_v6  ;;  %v4186_v22 = vpop.f32.mrf.mxu1  ;;  %v4601_v34 = vsel %vm4598_vm3, %v4600_v35, %v4596_v26  ;;  %5772 = vmatmul.msk.f32.gmra.mxu2 %vm5006_vm8, %v9362_v2  ;;  %v4079_v7 = vpop.f32.mrf.mxu0  ;;  %v4612_v35 = vand.u32 2147483647, %v9464_v62  ;;  %v3964_v2 = vadd.f32 %v9459_v15, %v9120_v24  ;;  %vm4610_vm6 = vmor %vm4608_vm5, %vm4609_vm4 }
 0x7e7   : > { %v4187_v38 = vadd.f32 %v4186_v22, %v4074_v51  ;;  %5254 = vperm.xlu1 %5895, %v4601_v34   ;;  %v4605_v5 = vsub.f32 1.0, %v4604_v45  ;;  %v5005_v50 = vpop.permute.xlu1 %5004  ;;  %v5348_v51 = vmul.f32 %v5195_v61, %v8535_v14  ;;  %v4615_v24 = vor.u32 1.1754944e-38, %v4614_v33 }
 0x7e8   : > { %5786 = vmatmul.msk.f32.vlgmr.msra.gmra.mxu3 %vm5006_vm8, %v5005_v50  ;;  %v4077_v25 = vadd.f32 %v4076_v39, %v3964_v2  ;;  %vm4613_vm7 = vcmp.eq.f32.partialorder %v4612_v35, 8.507059e+37  ;;  %vm4623_vm10 = vweird.f32 %v9483_v6 }
 0x7e9   : > { %v4250_v53 = vadd.f32 %v9069_v20, %v4187_v38  ;;  %v5094_v44 = vpop.f32.mrf.mxu2  ;;  %v4606_v60 = vmul.f32 %v5968_v49, %v4605_v5 }
 0x7ea   : > { %v9504_v26 = vpop.f32.mrf.mxu3  ;;  %v5095_v45 = vadd.f32 %v9492_v29, %v5094_v44 }
 0x7eb   : > { %v5970_v22 = vpop.eup %5969  ;;  %v5739_v34 = vmul.f32 -1.442695, %v4250_v53  ;;  %v4607_v50 = vadd.f32 %v5968_v49, %v4606_v60 }
 0x7ec   : > { %v5972_v38 = vpop.eup %5971  ;;  %v9510_v5 = vadd.f32 1.0, %v5970_v22  ;;  %v5380_v8 = vadd.f32 %v5348_v51, %v5095_v45 }
 0x7ed   : > { %5973 = vpow2.f32 %v5739_v34  ;;  %v4611_v14 = vsel %vm4610_vm6, %v5968_v49, %v4607_v50  ;;  %v4619_v15 = vmul.f32 %v5972_v38, %v9483_v6  ;;  %v4629_v49 = vand.u32 2147483648, %v9483_v6 }
 0x7ee   : > { %5975 = vrcp.f32 %v9510_v5  ;;  %v5412_v61 = vmax.f32 %v5380_v8, 0.0  ;;  %v4189_v53 = vpop.f32.mrf.mxu1  ;;  %v4616_v44 = vsel %vm4613_vm7, %v4615_v24, %v4611_v14  ;;  %5773 = vmatmul.msk.f32.gmra.mxu2 %vm5006_vm8, %v9333_v3  ;;  %v4082_v62 = vpop.f32.mrf.mxu0  ;;  %vm4624_vm9 = vweird.f32 %v5972_v38 }
 0x7ef   : > { %v4190_v60 = vadd.f32 %v4189_v53, %v4077_v25  ;;  %5259 = vperm.xlu0 %5893, %v4616_v44   ;;  %v4620_v39 = vsub.f32 1.0, %v4619_v15  ;;  %v4627_v8 = vand.u32 2147483647, %v9483_v6  ;;  %v3967_v3 = vadd.f32 %v9480_v21, %v9143_v31  ;;  %vm4625_vm11 = vmor %vm4623_vm10, %vm4624_vm9 }
 0x7f0   : > { %5444 = vst [vmem:[%s9517_s23 + $0x8] sm:$0xff] %v5412_v61  ;;  %v5092_v25 = vadd.f32 %v9492_v29, %v9476_v58  ;;  %v4630_v31 = vor.u32 1.1754944e-38, %v4629_v49  ;;  %v4642_v49 = vand.u32 2147483647, %v9510_v5  ;;  %vm4638_vm14 = vweird.f32 %v9510_v5 }
 0x7f1   : > { %v4251_v33 = vadd.f32 %v9069_v20, %v4190_v60  ;;  %v5190_v35 = vpop.permute.xlu0 %5189  ;;  %v4621_v2 = vmul.f32 %v5972_v38, %v4620_v39  ;;  %v9530_v22 = vpop.f32.mrf.mxu2  ;;  %v4080_v61 = vadd.f32 %v4079_v7, %v3967_v3  ;;  %vm4628_vm12 = vcmp.eq.f32.partialorder %v4627_v8, 8.507059e+37 }
 0x7f2   : > { %v5347_v51 = vmul.f32 %v5190_v35, %v8548_v47  ;;  %v9528_v45 = vpop.f32.mrf.mxu3  ;;  %v3970_v8 = vadd.f32 %v9504_v26, %v9166_v46  ;;  %vm4643_vm0 = vcmp.eq.f32.partialorder %v4642_v49, 8.507059e+37 }
 0x7f3   : > { %v5974_v34 = vpop.eup %5973  ;;  %v5740_v50 = vmul.f32 -1.442695, %v4251_v33  ;;  %v4622_v24 = vadd.f32 %v5972_v38, %v4621_v2  ;;  %v5205_v33 = vpop.permute.xlu2 %5204 }
 0x7f4   : > { %v5976_v14 = vpop.eup %5975  ;;  %v9533_v15 = vadd.f32 1.0, %v5974_v34  ;;  %v5379_v53 = vadd.f32 %v5347_v51, %v5092_v25  ;;  %v5350_v51 = vmul.f32 %v5205_v33, %v8527_v27 }
 0x7f5   : > { %5977 = vpow2.f32 %v5740_v50  ;;  %v4626_v47 = vsel %vm4625_vm11, %v5972_v38, %v4622_v24  ;;  %v4634_v58 = vmul.f32 %v5976_v14, %v9510_v5  ;;  %v4644_v38 = vand.u32 2147483648, %v9510_v5 }
 0x7f6   : > { %5979 = vrcp.f32 %v9533_v15  ;;  %v5411_v21 = vmax.f32 %v5379_v53, 0.0  ;;  %v4192_v44 = vpop.f32.mrf.mxu1  ;;  %v4631_v60 = vsel %vm4628_vm12, %v4630_v31, %v4626_v47  ;;  %5774 = vmatmul.msk.f32.gmra.mxu2 %vm5006_vm8, %v9406_v55  ;;  %v4085_v6 = vpop.f32.mrf.mxu0  ;;  %vm4639_vm13 = vweird.f32 %v5976_v14 }
 0x7f7   : > { %v4193_v7 = vadd.f32 %v4192_v44, %v4080_v61  ;;  %5264 = vperm.xlu2 %5894, %v4631_v60   ;;  %v4635_v39 = vsub.f32 1.0, %v4634_v58  ;;  %v4083_v31 = vadd.f32 %v4082_v62, %v3970_v8  ;;  %vm4640_vm15 = vmor %vm4638_vm14, %vm4639_vm13  ;;  %v4645_v46 = vor.u32 1.1754944e-38, %v4644_v38 }
 0x7f8   : > { %5443 = vst [vmem:[%s9517_s23] sm:$0xff] %v5411_v21  ;;  %v4657_v49 = vand.u32 2147483647, %v9533_v15  ;;  %v3973_v38 = vadd.f32 %v9528_v45, %v9190_v37  ;;  %vm4653_vm2 = vweird.f32 %v9533_v15 }
 0x7f9   : > { %v4252_v35 = vadd.f32 %v9069_v20, %v4193_v7  ;;  %v4636_v2 = vmul.f32 %v5976_v14, %v4635_v39  ;;  %v5100_v55 = vpop.f32.mrf.mxu2  ;;  %v4659_v7 = vand.u32 2147483648, %v9533_v15 }
 0x7fa   : > { %v9546_v3 = vpop.f32.mrf.mxu3  ;;  %v5101_v50 = vadd.f32 %v9492_v29, %v5100_v55  ;;  %vm4658_vm4 = vcmp.eq.f32.partialorder %v4657_v49, 8.507059e+37 }
 0x7fb   : > { %v5978_v25 = vpop.eup %5977  ;;  %v5741_v34 = vmul.f32 -1.442695, %v4252_v35  ;;  %v4637_v24 = vadd.f32 %v5976_v14, %v4636_v2  ;;  %v4660_v37 = vor.u32 1.1754944e-38, %v4659_v7 }
 0x7fc   : > { %v5980_v61 = vpop.eup %5979  ;;  %v9551_v53 = vadd.f32 1.0, %v5978_v25  ;;  %v5382_v26 = vadd.f32 %v5350_v51, %v5101_v50 }
 0x7fd   : > { %5981 = vpow2.f32 %v5741_v34  ;;  %v4641_v47 = vsel %vm4640_vm15, %v5976_v14, %v4637_v24  ;;  %v4649_v5 = vmul.f32 %v5980_v61, %v9533_v15  ;;  %vm4654_vm1 = vweird.f32 %v5980_v61 }
 0x7fe   : > { %5983 = vrcp.f32 %v9551_v53  ;;  %v4195_v27 = vpop.f32.mrf.mxu1  ;;  %v4646_v58 = vsel %vm4643_vm0, %v4645_v46, %v4641_v47  ;;  %5775 = vmatmul.msk.f32.gmra.mxu2 %vm5006_vm8, %v9404_v52  ;;  %v4088_v21 = vpop.f32.mrf.mxu0  ;;  %v5414_v44 = vmax.f32 %v5382_v26, 0.0  ;;  %v5098_v52 = vadd.f32 %v9492_v29, %v9530_v22  ;;  %vm4655_vm3 = vmor %vm4653_vm2, %vm4654_vm1 }
 0x7ff   : > { %v4196_v60 = vadd.f32 %v4195_v27, %v4083_v31  ;;  %5269 = vperm.xlu1 %5895, %v4646_v58   ;;  %v4650_v62 = vsub.f32 1.0, %v4649_v5  ;;  %v4086_v24 = vadd.f32 %v4085_v6, %v3973_v38  ;;  %v4674_v5 = vand.u32 2147483648, %v9551_v53 }
 0x800   : > { %5446 = vst [vmem:[%s9517_s23 + $0x18] sm:$0xff] %v5414_v44  ;;  %v4672_v58 = vand.u32 2147483647, %v9551_v53  ;;  %v3976_v44 = vadd.f32 %v9546_v3, %v9214_v1  ;;  %vm4668_vm6 = vweird.f32 %v9551_v53 }
 0x801   : > { %v4253_v39 = vadd.f32 %v9069_v20, %v4196_v60  ;;  %v5200_v14 = vpop.permute.xlu1 %5199  ;;  %v4651_v33 = vmul.f32 %v5980_v61, %v4650_v62  ;;  %v5103_v8 = vpop.f32.mrf.mxu2  ;;  %v4675_v38 = vor.u32 1.1754944e-38, %v4674_v5 }
 0x802   : > { %v5349_v35 = vmul.f32 %v5200_v14, %v8531_v30  ;;  %v3978_v2 = vpop.f32.mrf.mxu3  ;;  %v4089_v49 = vadd.f32 %v4088_v21, %v3976_v44  ;;  %vm4673_vm9 = vcmp.eq.f32.partialorder %v4672_v58, 8.507059e+37 }
 0x803   : > { %v5982_v55 = vpop.eup %5981  ;;  %v5742_v25 = vmul.f32 -1.442695, %v4253_v39  ;;  %v4652_v51 = vadd.f32 %v5980_v61, %v4651_v33  ;;  %v3979_v21 = vadd.f32 %v3978_v2, %v9240_v16 }
 0x804   : > { %v5984_v34 = vpop.eup %5983  ;;  %v9567_v50 = vadd.f32 1.0, %v5982_v55  ;;  %v5381_v31 = vadd.f32 %v5349_v35, %v5098_v52 }
 0x805   : > { %5985 = vpow2.f32 %v5742_v25  ;;  %v4656_v45 = vsel %vm4655_vm3, %v5980_v61, %v4652_v51  ;;  %v4664_v30 = vmul.f32 %v5984_v34, %v9551_v53  ;;  %vm4669_vm5 = vweird.f32 %v5984_v34 }
 0x806   : > { %5987 = vrcp.f32 %v9567_v50  ;;  %v5413_v22 = vmax.f32 %v5381_v31, 0.0  ;;  %v4198_v46 = vpop.f32.mrf.mxu1  ;;  %v4661_v26 = vsel %vm4658_vm4, %v4660_v37, %v4656_v45  ;;  %5776 = vmatmul.msk.f32.gmra.mxu2 %vm5006_vm8, %v9375_v32  ;;  %v4091_v15 = vpop.f32.mrf.mxu0  ;;  %vm4670_vm7 = vmor %vm4668_vm6, %vm4669_vm5  ;;  %vm4683_vm11 = vweird.f32 %v9567_v50 }
 0x807   : > { %v4199_v6 = vadd.f32 %v4198_v46, %v4086_v24  ;;  %5274 = vperm.xlu0 %5893, %v4661_v26   ;;  %v4665_v47 = vsub.f32 1.0, %v4664_v30  ;;  %v4687_v24 = vand.u32 2147483647, %v9567_v50  ;;  %v5104_v30 = vadd.f32 %v9492_v29, %v5103_v8 }
 0x808   : > { %5445 = vst [vmem:[%s9517_s23 + $0x10] sm:$0xff] %v5413_v22  ;;  %v4092_v22 = vadd.f32 %v4091_v15, %v3979_v21 }
 0x809   : > { %v4254_v61 = vadd.f32 %v9069_v20, %v4199_v6  ;;  %v4666_v27 = vmul.f32 %v5984_v34, %v4665_v47  ;;  %v9582_v62 = vpop.f32.mrf.mxu2  ;;  %v5220_v51 = vpop.permute.xlu2 %5219  ;;  %vm4688_vm13 = vcmp.eq.f32.partialorder %v4687_v24, 8.507059e+37 }
 0x80a   : > { %v9580_v60 = vpop.f32.mrf.mxu3  ;;  %v5353_v2 = vmul.f32 %v5220_v51, %v8506_v56 }
 0x80b   : > { %v5986_v32 = vpop.eup %5985  ;;  %v5743_v7 = vmul.f32 -1.442695, %v4254_v61  ;;  %v4667_v39 = vadd.f32 %v5984_v34, %v4666_v27 }
 0x80c   : > { %v5988_v14 = vpop.eup %5987  ;;  %v9585_v33 = vadd.f32 1.0, %v5986_v32 }
 0x80d   : > { %5989 = vpow2.f32 %v5743_v7  ;;  %v4671_v52 = vsel %vm4670_vm7, %v5984_v34, %v4667_v39  ;;  %v4679_v1 = vmul.f32 %v5988_v14, %v9567_v50  ;;  %v4689_v34 = vand.u32 2147483648, %v9567_v50 }
 0x80e   : > { %5991 = vrcp.f32 %v9585_v33  ;;  %v4201_v3 = vpop.f32.mrf.mxu1  ;;  %v4676_v35 = vsel %vm4673_vm9, %v4675_v38, %v4671_v52  ;;  %5777 = vmatmul.msk.f32.gmra.mxu2 %vm5006_vm8, %v9430_v4  ;;  %v4094_v55 = vpop.f32.mrf.mxu0  ;;  %vm4684_vm10 = vweird.f32 %v5988_v14  ;;  %v4704_v52 = vand.u32 2147483648, %v9585_v33 }
 0x80f   : > { %v4202_v53 = vadd.f32 %v4201_v3, %v4089_v49  ;;  %5279 = vperm.xlu2 %5894, %v4676_v35   ;;  %v4680_v25 = vsub.f32 1.0, %v4679_v1  ;;  %vm4685_vm12 = vmor %vm4683_vm11, %vm4684_vm10  ;;  %v4702_v35 = vand.u32 2147483647, %v9585_v33  ;;  %vm4698_vm15 = vweird.f32 %v9585_v33 }
 0x811   : > { %v4255_v31 = vadd.f32 %v9069_v20, %v4202_v53  ;;  %v5210_v37 = vpop.permute.xlu1 %5209  ;;  %v4681_v45 = vmul.f32 %v5988_v14, %v4680_v25  ;;  %v5109_v26 = vpop.f32.mrf.mxu2  ;;  %v3982_v53 = vadd.f32 %v9580_v60, %v9264_v11  ;;  %v4705_v11 = vor.u32 1.1754944e-38, %v4704_v52 }
 0x812   : > { %v5351_v4 = vmul.f32 %v5210_v37, %v8514_v17  ;;  %v9597_v46 = vpop.f32.mrf.mxu3  ;;  %v5110_v47 = vadd.f32 %v9492_v29, %v5109_v26  ;;  %v4690_v17 = vor.u32 1.1754944e-38, %v4689_v34  ;;  %vm4703_vm1 = vcmp.eq.f32.partialorder %v4702_v35, 8.507059e+37 }
 0x813   : > { %v5990_v16 = vpop.eup %5989  ;;  %v5744_v6 = vmul.f32 -1.442695, %v4255_v31  ;;  %v4682_v5 = vadd.f32 %v5988_v14, %v4681_v45 }
 0x814   : > { %v5992_v61 = vpop.eup %5991  ;;  %v9602_v27 = vadd.f32 1.0, %v5990_v16  ;;  %v5383_v58 = vadd.f32 %v5351_v4, %v5104_v30  ;;  %v5385_v8 = vadd.f32 %v5353_v2, %v5110_v47  ;;  %v4095_v30 = vadd.f32 %v4094_v55, %v3982_v53 }
 0x815   : > { %5993 = vpow2.f32 %v5744_v6  ;;  %v4686_v50 = vsel %vm4685_vm12, %v5988_v14, %v4682_v5  ;;  %v4694_v15 = vmul.f32 %v5992_v61, %v9585_v33  ;;  %vm4699_vm14 = vweird.f32 %v5992_v61 }
 0x816   : > { %5995 = vrcp.f32 %v9602_v27  ;;  %v5415_v56 = vmax.f32 %v5383_v58, 0.0  ;;  %v4204_v44 = vpop.f32.mrf.mxu1  ;;  %v4691_v32 = vsel %vm4688_vm13, %v4690_v17, %v4686_v50  ;;  %5778 = vmatmul.msk.f32.gmra.mxu2 %vm5006_vm8, %v9437_v23  ;;  %v4097_v7 = vpop.f32.mrf.mxu0  ;;  %v5417_v39 = vmax.f32 %v5385_v8, 0.0  ;;  %vm4700_vm0 = vmor %vm4698_vm15, %vm4699_vm14 }
 0x817   : > { %v4205_v49 = vadd.f32 %v4204_v44, %v4092_v22  ;;  %5284 = vperm.xlu1 %5895, %v4691_v32   ;;  %v4695_v38 = vsub.f32 1.0, %v4694_v15  ;;  %v5107_v23 = vadd.f32 %v9492_v29, %v9582_v62  ;;  %v4719_v2 = vand.u32 2147483648, %v9602_v27 }
 0x818   : > { %5447 = vst [vmem:[%s9517_s23 + $0x20] sm:$0xff] %v5415_v56  ;;  %v4717_v5 = vand.u32 2147483647, %v9602_v27  ;;  %vm4713_vm3 = vweird.f32 %v9602_v27 }
 0x819   : > { %5449 = vst [vmem:[%s9517_s23 + $0x30] sm:$0xff] %v5417_v39  ;;  %v4256_v14 = vadd.f32 %v9069_v20, %v4205_v49  ;;  %v5215_v1 = vpop.permute.xlu0 %5214  ;;  %v4696_v3 = vmul.f32 %v5992_v61, %v4695_v38  ;;  %v5112_v51 = vpop.f32.mrf.mxu2  ;;  %v4720_v32 = vor.u32 1.1754944e-38, %v4719_v2 }
 0x81a   : > { %v5352_v25 = vmul.f32 %v5215_v1, %v8510_v54  ;;  %v3987_v21 = vpop.f32.mrf.mxu3  ;;  %vm4718_vm5 = vcmp.eq.f32.partialorder %v4717_v5, 8.507059e+37 }
 0x81b   : > { %v5994_v24 = vpop.eup %5993  ;;  %v5745_v34 = vmul.f32 -1.442695, %v4256_v14  ;;  %v4697_v31 = vadd.f32 %v5992_v61, %v4696_v3 }
 0x81c   : > { %v5996_v37 = vpop.eup %5995  ;;  %v9620_v45 = vadd.f32 1.0, %v5994_v24  ;;  %v5384_v22 = vadd.f32 %v5352_v25, %v5107_v23  ;;  %v5113_v25 = vadd.f32 %v9492_v29, %v5112_v51 }
 0x81d   : > { %5997 = vpow2.f32 %v5745_v34  ;;  %v4701_v60 = vsel %vm4700_vm0, %v5992_v61, %v4697_v31  ;;  %v4709_v54 = vmul.f32 %v5996_v37, %v9602_v27  ;;  %vm4714_vm2 = vweird.f32 %v5996_v37 }
 0x81e   : > { %5999 = vrcp.f32 %v9620_v45  ;;  %v5416_v62 = vmax.f32 %v5384_v22, 0.0  ;;  %v4207_v4 = vpop.f32.mrf.mxu1  ;;  %v4706_v26 = vsel %vm4703_vm1, %v4705_v11, %v4701_v60  ;;  %5779 = vmatmul.msk.f32.gmra.mxu2 %vm5006_vm8, %v9410_v63  ;;  %v4100_v33 = vpop.f32.mrf.mxu0  ;;  %v3985_v61 = vadd.f32 %v9597_v46, %v9291_v43  ;;  %vm4715_vm4 = vmor %vm4713_vm3, %vm4714_vm2 }
 0x81f   : > { %v4208_v55 = vadd.f32 %v4207_v4, %v4095_v30  ;;  %5289 = vperm.xlu0 %5893, %v4706_v26   ;;  %v4710_v16 = vsub.f32 1.0, %v4709_v54  ;;  %v4732_v1 = vand.u32 2147483647, %v9620_v45  ;;  %v4734_v3 = vand.u32 2147483648, %v9620_v45 }
 0x820   : > { %5448 = vst [vmem:[%s9517_s23 + $0x28] sm:$0xff] %v5416_v62  ;;  %v4098_v44 = vadd.f32 %v4097_v7, %v3985_v61  ;;  %v3988_v7 = vadd.f32 %v3987_v21, %v9318_v36  ;;  %vm4728_vm7 = vweird.f32 %v9620_v45 }
 0x821   : > { %v4257_v6 = vadd.f32 %v9069_v20, %v4208_v55  ;;  %v4711_v47 = vmul.f32 %v5996_v37, %v4710_v16  ;;  %v9635_v17 = vpop.f32.mrf.mxu2  ;;  %v5235_v14 = vpop.permute.xlu2 %5234  ;;  %vm4733_vm10 = vcmp.eq.f32.partialorder %v4732_v1, 8.507059e+37 }
 0x822   : > { %v9633_v58 = vpop.f32.mrf.mxu3  ;;  %v4101_v24 = vadd.f32 %v4100_v33, %v3988_v7  ;;  %v5356_v21 = vmul.f32 %v5235_v14, %v8485_v59 }
 0x823   : > { %v5998_v63 = vpop.eup %5997  ;;  %v5746_v8 = vmul.f32 -1.442695, %v4257_v6  ;;  %v4712_v50 = vadd.f32 %v5996_v37, %v4711_v47 }
 0x824   : > { %v6000_v15 = vpop.eup %5999  ;;  %v9638_v56 = vadd.f32 1.0, %v5998_v63 }
 0x825   : > { %6001 = vpow2.f32 %v5746_v8  ;;  %v4716_v39 = vsel %vm4715_vm4, %v5996_v37, %v4712_v50  ;;  %v4724_v43 = vmul.f32 %v6000_v15, %v9620_v45  ;;  %vm4729_vm6 = vweird.f32 %v6000_v15 }
 0x826   : > { %6003 = vrcp.f32 %v9638_v56  ;;  %v4210_v46 = vpop.f32.mrf.mxu1  ;;  %v4721_v49 = vsel %vm4718_vm5, %v4720_v32, %v4716_v39  ;;  %5780 = vmatmul.msk.f32.gmra.mxu2 %vm5006_vm8, %v9450_v19  ;;  %v4103_v38 = vpop.f32.mrf.mxu0  ;;  %vm4730_vm9 = vmor %vm4728_vm7, %vm4729_vm6  ;;  %v4749_v6 = vand.u32 2147483648, %v9638_v56  ;;  %v4747_v63 = vand.u32 2147483647, %v9638_v56 }
 0x827   : > { %v4211_v27 = vadd.f32 %v4210_v46, %v4098_v44  ;;  %5294 = vperm.xlu2 %5894, %v4721_v49   ;;  %v4725_v52 = vsub.f32 1.0, %v4724_v43  ;;  %v3991_v8 = vadd.f32 %v9633_v58, %v9348_v28  ;;  %vm4743_vm12 = vweird.f32 %v9638_v56 }
 0x828   : > { %v4750_v28 = vor.u32 1.1754944e-38, %v4749_v6  ;;  %vm4748_vm14 = vcmp.eq.f32.partialorder %v4747_v63, 8.507059e+37 }
 0x829   : > { %v4258_v35 = vadd.f32 %v9069_v20, %v4211_v27  ;;  %v5225_v53 = vpop.permute.xlu1 %5224  ;;  %v4726_v23 = vmul.f32 %v6000_v15, %v4725_v52  ;;  %v5118_v31 = vpop.f32.mrf.mxu2  ;;  %v4104_v27 = vadd.f32 %v4103_v38, %v3991_v8 }
 0x82a   : > { %v5354_v19 = vmul.f32 %v5225_v53, %v8493_v18  ;;  %v9650_v34 = vpop.f32.mrf.mxu3  ;;  %v5119_v30 = vadd.f32 %v9492_v29, %v5118_v31  ;;  %v4735_v18 = vor.u32 1.1754944e-38, %v4734_v3 }
 0x82b   : > { %v6002_v36 = vpop.eup %6001  ;;  %v5747_v37 = vmul.f32 -1.442695, %v4258_v35  ;;  %v4727_v22 = vadd.f32 %v6000_v15, %v4726_v23 }
 0x82c   : > { %v6004_v11 = vpop.eup %6003  ;;  %v9655_v60 = vadd.f32 1.0, %v6002_v36  ;;  %v5386_v54 = vadd.f32 %v5354_v19, %v5113_v25  ;;  %v5388_v51 = vadd.f32 %v5356_v21, %v5119_v30  ;;  %v3994_v25 = vadd.f32 %v9650_v34, %v9381_v0 }
 0x82d   : > { %6005 = vpow2.f32 %v5747_v37  ;;  %v4731_v45 = vsel %vm4730_vm9, %v6000_v15, %v4727_v22  ;;  %v4739_v62 = vmul.f32 %v6004_v11, %v9638_v56  ;;  %vm4744_vm11 = vweird.f32 %v6004_v11 }
 0x82e   : > { %6007 = vrcp.f32 %v9655_v60  ;;  %v5418_v59 = vmax.f32 %v5386_v54, 0.0  ;;  %v4213_v4 = vpop.f32.mrf.mxu1  ;;  %v4736_v26 = vsel %vm4733_vm10, %v4735_v18, %v4731_v45  ;;  %5781 = vmatmul.msk.f32.gmra.mxu2 %vm5006_vm8, %v9462_v40  ;;  %v4106_v33 = vpop.f32.mrf.mxu0  ;;  %v5420_v55 = vmax.f32 %v5388_v51, 0.0  ;;  %vm4745_vm13 = vmor %vm4743_vm12, %vm4744_vm11 }
 0x82f   : > { %v4214_v16 = vadd.f32 %v4213_v4, %v4101_v24  ;;  %5299 = vperm.xlu1 %5895, %v4736_v26   ;;  %v4740_v2 = vsub.f32 1.0, %v4739_v62  ;;  %v5116_v40 = vadd.f32 %v9492_v29, %v9635_v17  ;;  %v4764_v3 = vand.u32 2147483648, %v9655_v60 }
 0x830   : > { %5450 = vst [vmem:[%s9517_s23 + $0x38] sm:$0xff] %v5418_v59  ;;  %v4762_v23 = vand.u32 2147483647, %v9655_v60  ;;  %vm4758_vm0 = vweird.f32 %v9655_v60  ;;  %v4107_v30 = vadd.f32 %v4106_v33, %v3994_v25 }
 0x831   : > { %5452 = vst [vmem:[%s9517_s23 + $0x48] sm:$0xff] %v5420_v55  ;;  %v4259_v47 = vadd.f32 %v9069_v20, %v4214_v16  ;;  %v5230_v5 = vpop.permute.xlu0 %5229  ;;  %v4741_v61 = vmul.f32 %v6004_v11, %v4740_v2  ;;  %v5121_v44 = vpop.f32.mrf.mxu2  ;;  %v4765_v22 = vor.u32 1.1754944e-38, %v4764_v3  ;;  %v10262_v3 = vld [vmem:[#allocation49_spill] sm:$0xff] }
 0x832   : > { %v5355_v50 = vmul.f32 %v5230_v5, %v8489_v57  ;;  %v3996_v15 = vpop.f32.mrf.mxu3  ;;  %vm4763_vm2 = vcmp.eq.f32.partialorder %v4762_v23, 8.507059e+37  ;;  %v5122_v16 = vadd.f32 %v9492_v29, %v5121_v44 }
 0x833   : > { %v6006_v32 = vpop.eup %6005  ;;  %v5748_v39 = vmul.f32 -1.442695, %v4259_v47  ;;  %v4742_v43 = vadd.f32 %v6004_v11, %v4741_v61  ;;  %v3997_v45 = vadd.f32 %v3996_v15, %v9412_v12 }
 0x834   : > { %v6008_v46 = vpop.eup %6007  ;;  %v9673_v49 = vadd.f32 1.0, %v6006_v32  ;;  %v5387_v52 = vadd.f32 %v5355_v50, %v5116_v40 }
 0x835   : > { %6009 = vpow2.f32 %v5748_v39  ;;  %v4746_v58 = vsel %vm4745_vm13, %v6004_v11, %v4742_v43  ;;  %v4754_v57 = vmul.f32 %v6008_v46, %v9655_v60  ;;  %vm4759_vm15 = vweird.f32 %v6008_v46 }
 0x836   : > { %6011 = vrcp.f32 %v9673_v49  ;;  %v5419_v17 = vmax.f32 %v5387_v52, 0.0  ;;  %v4216_v7 = vpop.f32.mrf.mxu1  ;;  %v4751_v14 = vsel %vm4748_vm14, %v4750_v28, %v4746_v58  ;;  %5782 = vmatmul.msk.f32.gmra.mxu2 %vm5006_vm8, %v9441_v42  ;;  %v4109_v56 = vpop.f32.mrf.mxu0  ;;  %vm4760_vm1 = vmor %vm4758_vm0, %vm4759_vm15  ;;  %v4777_v59 = vand.u32 2147483647, %v9673_v49 }
 0x837   : > { %v4217_v38 = vadd.f32 %v4216_v7, %v4104_v27  ;;  %5304 = vperm.xlu0 %5893, %v4751_v14   ;;  %v4755_v1 = vsub.f32 1.0, %v4754_v57  ;;  %v4779_v4 = vand.u32 2147483648, %v9673_v49  ;;  %v4110_v2 = vadd.f32 %v4109_v56, %v3997_v45  ;;  %v10261_v57 = vld [vmem:[#allocation61_spill] sm:$0xff] }
 0x838   : > { %5451 = vst [vmem:[%s9517_s23 + $0x40] sm:$0xff] %v5419_v17  ;;  %vm4773_vm4 = vweird.f32 %v9673_v49  ;;  %vm4778_vm6 = vcmp.eq.f32.partialorder %v4777_v59, 8.507059e+37 }
 0x839   : > { %v4260_v35 = vadd.f32 %v9069_v20, %v4217_v38  ;;  %v4756_v53 = vmul.f32 %v6008_v46, %v4755_v1  ;;  %v9688_v19 = vpop.f32.mrf.mxu2  ;;  %v5250_v62 = vpop.permute.xlu2 %5249  ;;  %v4780_v44 = vor.u32 1.1754944e-38, %v4779_v4 }
 0x83a   : > { %v9686_v24 = vpop.f32.mrf.mxu3  ;;  %v5359_v5 = vmul.f32 %v5250_v62, %v8468_v13 }
 0x83b   : > { %v6010_v42 = vpop.eup %6009  ;;  %v5749_v31 = vmul.f32 -1.442695, %v4260_v35  ;;  %v4757_v36 = vadd.f32 %v6008_v46, %v4756_v53  ;;  %v4000_v17 = vadd.f32 %v9686_v24, %v10261_v57 }
 0x83c   : > { %v6012_v21 = vpop.eup %6011  ;;  %v9691_v37 = vadd.f32 1.0, %v6010_v42 }
 0x83d   : > { %6013 = vpow2.f32 %v5749_v31  ;;  %v4761_v11 = vsel %vm4760_vm1, %v6008_v46, %v4757_v36  ;;  %v4769_v0 = vmul.f32 %v6012_v21, %v9673_v49  ;;  %vm4774_vm3 = vweird.f32 %v6012_v21 }
 0x83e   : > { %6015 = vrcp.f32 %v9691_v37  ;;  %v4219_v34 = vpop.f32.mrf.mxu1  ;;  %v4766_v54 = vsel %vm4763_vm2, %v4765_v22, %v4761_v11  ;;  %5783 = vmatmul.msk.f32.gmra.mxu2 %vm5006_vm8, %v9472_v48  ;;  %v4112_v18 = vpop.f32.mrf.mxu0  ;;  %vm4775_vm5 = vmor %vm4773_vm4, %vm4774_vm3  ;;  %v4792_v7 = vand.u32 2147483647, %v9691_v37  ;;  %v4794_v14 = vand.u32 2147483648, %v9691_v37 }
 0x83f   : > { %v4220_v60 = vadd.f32 %v4219_v34, %v4107_v30  ;;  %5309 = vperm.xlu2 %5894, %v4766_v54   ;;  %v4770_v51 = vsub.f32 1.0, %v4769_v0  ;;  %vm4788_vm9 = vweird.f32 %v9691_v37  ;;  %v4113_v24 = vadd.f32 %v4112_v18, %v4000_v17 }
 0x840   : > { %vm4793_vm11 = vcmp.eq.f32.partialorder %v4792_v7, 8.507059e+37  ;;  %v4795_v11 = vor.u32 1.1754944e-38, %v4794_v14 }
 0x841   : > { %v4261_v26 = vadd.f32 %v9069_v20, %v4220_v60  ;;  %v5240_v33 = vpop.permute.xlu1 %5239  ;;  %v4771_v55 = vmul.f32 %v6012_v21, %v4770_v51  ;;  %v5127_v47 = vpop.f32.mrf.mxu2  ;;  %v10263_v60 = vld [vmem:[#allocation34_spill] sm:$0xff] }
 0x842   : > { %v5357_v48 = vmul.f32 %v5240_v33, %v8472_v10  ;;  %v4002_v6 = vpop.f32.mrf.mxu3  ;;  %v5128_v63 = vadd.f32 %v9492_v29, %v5127_v47 }
 0x843   : > { %v6014_v12 = vpop.eup %6013  ;;  %v5750_v61 = vmul.f32 -1.442695, %v4261_v26  ;;  %v4772_v8 = vadd.f32 %v6012_v21, %v4771_v55  ;;  %v4003_v27 = vadd.f32 %v4002_v6, %v9454_v41  ;;  %v5125_v41 = vadd.f32 %v9492_v29, %v9688_v19 }
 0x844   : > { %v6016_v40 = vpop.eup %6015  ;;  %v9706_v50 = vadd.f32 1.0, %v6014_v12  ;;  %v5389_v15 = vadd.f32 %v5357_v48, %v5122_v16  ;;  %v5391_v10 = vadd.f32 %v5359_v5, %v5128_v63 }
 0x845   : > { %6017 = vpow2.f32 %v5750_v61  ;;  %v4776_v32 = vsel %vm4775_vm5, %v6012_v21, %v4772_v8  ;;  %v4784_v39 = vmul.f32 %v6016_v40, %v9691_v37  ;;  %vm4789_vm7 = vweird.f32 %v6016_v40 }
 0x846   : > { %6019 = vrcp.f32 %v9706_v50  ;;  %v5421_v13 = vmax.f32 %v5389_v15, 0.0  ;;  %v4222_v43 = vpop.f32.mrf.mxu1  ;;  %v4781_v46 = vsel %vm4778_vm6, %v4780_v44, %v4776_v32  ;;  %5784 = vmatmul.msk.f32.gmra.mxu2 %vm5006_vm8, %v9485_v9  ;;  %v4115_v49 = vpop.f32.mrf.mxu0  ;;  %v5423_v52 = vmax.f32 %v5391_v10, 0.0  ;;  %vm4790_vm10 = vmor %vm4788_vm9, %vm4789_vm7 }
 0x847   : > { %v4223_v28 = vadd.f32 %v4222_v43, %v4110_v2  ;;  %5314 = vperm.xlu1 %5895, %v4781_v46   ;;  %v4785_v58 = vsub.f32 1.0, %v4784_v39  ;;  %v4116_v38 = vadd.f32 %v4115_v49, %v4003_v27  ;;  %v4807_v59 = vand.u32 2147483647, %v9706_v50  ;;  %v10265_v27 = vld [vmem:[#allocation44_spill] sm:$0xff] }
 0x848   : > { %5453 = vst [vmem:[%s9517_s23 + $0x50] sm:$0xff] %v5421_v13  ;;  %v4809_v4 = vand.u32 2147483648, %v9706_v50  ;;  %v10264_v13 = vld [vmem:[#allocation47_spill] sm:$0xff] }
 0x849   : > { %5455 = vst [vmem:[%s9517_s23 + $0x60] sm:$0xff] %v5423_v52  ;;  %v4262_v56 = vadd.f32 %v9069_v20, %v4223_v28  ;;  %v5245_v9 = vpop.permute.xlu0 %5244  ;;  %v4786_v1 = vmul.f32 %v6016_v40, %v4785_v58  ;;  %v5130_v23 = vpop.f32.mrf.mxu2  ;;  %vm4808_vm14 = vcmp.eq.f32.partialorder %v4807_v59, 8.507059e+37 }
 0x84a   : > { %v5358_v35 = vmul.f32 %v5245_v9, %v10262_v3  ;;  %v4228_v53 = vpop.f32.mrf.mxu3  ;;  %v4810_v12 = vor.u32 1.1754944e-38, %v4809_v4  ;;  %v5131_v39 = vadd.f32 %v9492_v29, %v5130_v23 }
 0x84b   : > { %v6018_v25 = vpop.eup %6017  ;;  %v5751_v42 = vmul.f32 -1.442695, %v4262_v56  ;;  %v4229_v31 = vadd.f32 %v4228_v53, %v4116_v38  ;;  %v4787_v36 = vadd.f32 %v6016_v40, %v4786_v1 }
 0x84c   : > { %v6020_v21 = vpop.eup %6019  ;;  %v9725_v30 = vadd.f32 1.0, %v6018_v25  ;;  %v5390_v22 = vadd.f32 %v5358_v35, %v5125_v41 }
 0x84d   : > { %6021 = vpow2.f32 %v5751_v42  ;;  %v4264_v19 = vadd.f32 %v9069_v20, %v4229_v31  ;;  %v4791_v0 = vsel %vm4790_vm10, %v6016_v40, %v4787_v36  ;;  %v4799_v34 = vmul.f32 %v6020_v21, %v9706_v50  ;;  %v9763_v31 = vld [vmem:[%s9871_s13] ss:$0 sm:$0xff] }
 0x84e   : > { %6023 = vrcp.f32 %v9725_v30  ;;  %v5422_v37 = vmax.f32 %v5390_v22, 0.0  ;;  %v4225_v54 = vpop.f32.mrf.mxu1  ;;  %v4796_v18 = vsel %vm4793_vm11, %v4795_v11, %v4791_v0  ;;  %5785 = vmatmul.msk.f32.gmra.mxu2 %vm5006_vm8, %v10263_v60  ;;  %vm4804_vm12 = vweird.f32 %v6020_v21 }
 0x84f   : > { %v5753_v51 = vmul.f32 -1.442695, %v4264_v19  ;;  %v4226_v45 = vadd.f32 %v4225_v54, %v4113_v24  ;;  %5319 = vperm.xlu0 %5893, %v4796_v18   ;;  %v4800_v62 = vsub.f32 1.0, %v4799_v34  ;;  %vm4803_vm8 = vweird.f32 %v9706_v50 }
 0x850   : > { %5454 = vst [vmem:[%s9517_s23 + $0x58] sm:$0xff] %v5422_v37  ;;  %vm4805_vm13 = vmor %vm4803_vm8, %vm4804_vm12  ;;  %v4824_v50 = vand.u32 2147483648, %v9725_v30  ;;  %v4822_v32 = vand.u32 2147483647, %v9725_v30  ;;  %vm4818_vm0 = vweird.f32 %v9725_v30 }
 0x851   : > { %6025 = vpow2.f32 %v5753_v51  ;;  %v4263_v26 = vadd.f32 %v9069_v20, %v4226_v45  ;;  %v4801_v33 = vmul.f32 %v6020_v21, %v4800_v62  ;;  %v5133_v55 = vpop.f32.mrf.mxu2  ;;  %v5265_v15 = vpop.permute.xlu2 %5264 }
 0x852   : > { %v5362_v52 = vmul.f32 %v5265_v15, %v10265_v27  ;;  %v4825_v14 = vor.u32 1.1754944e-38, %v4824_v50  ;;  %vm4823_vm2 = vcmp.eq.f32.partialorder %v4822_v32, 8.507059e+37  ;;  %v5134_v36 = vadd.f32 %v9763_v31, %v5133_v55  ;;  %v10267_v15 = vld [vmem:[#allocation10_spill] sm:$0xff] }
 0x853   : > { %v6022_v16 = vpop.eup %6021  ;;  %v5752_v2 = vmul.f32 -1.442695, %v4263_v26  ;;  %v4802_v48 = vadd.f32 %v6020_v21, %v4801_v33 }
 0x854   : > { %v6024_v6 = vpop.eup %6023  ;;  %v9737_v47 = vadd.f32 1.0, %v6022_v16 }
 0x855   : > { %6027 = vpow2.f32 %v5752_v2  ;;  %v4806_v5 = vsel %vm4805_vm13, %v6020_v21, %v4802_v48  ;;  %v4814_v61 = vmul.f32 %v6024_v6, %v9725_v30  ;;  %vm4819_vm15 = vweird.f32 %v6024_v6  ;;  %v10266_v21 = vld [vmem:[#allocation75_spill] sm:$0xff] }
 0x856   : > { %6029 = vrcp.f32 %v9737_v47  ;;  %v4811_v20 = vsel %vm4808_vm14, %v4810_v12, %v4806_v5  ;;  %vm4820_vm1 = vmor %vm4818_vm0, %vm4819_vm15  ;;  %v4837_v35 = vand.u32 2147483647, %v9737_v47  ;;  %v4839_v23 = vand.u32 2147483648, %v9737_v47 }
 0x857   : > { %v6026_v63 = vpop.eup %6025  ;;  %5324 = vperm.xlu2 %5894, %v4811_v20   ;;  %v4815_v8 = vsub.f32 1.0, %v4814_v61  ;;  %vm4833_vm4 = vweird.f32 %v9737_v47 }
 0x858   : > { %v9741_v40 = vadd.f32 1.0, %v6026_v63  ;;  %vm4838_vm5 = vcmp.eq.f32.partialorder %v4837_v35, 8.507059e+37  ;;  %v4840_v37 = vor.u32 1.1754944e-38, %v4839_v23 }
 0x859   : > { %v5255_v44 = vpop.permute.xlu1 %5254  ;;  %v4816_v10 = vmul.f32 %v6024_v6, %v4815_v8  ;;  %v5136_v46 = vpop.f32.mrf.mxu2 }
 0x85a   : > { %6031 = vrcp.f32 %v9741_v40  ;;  %v5360_v43 = vmul.f32 %v5255_v44, %v10264_v13  ;;  %v5137_v28 = vadd.f32 %v9492_v29, %v5136_v46  ;;  %v4867_v54 = vand.u32 2147483647, %v9741_v40 }
 0x85b   : > { %v6028_v49 = vpop.eup %6027  ;;  %v4817_v58 = vadd.f32 %v6024_v6, %v4816_v10  ;;  %v4869_v18 = vand.u32 2147483648, %v9741_v40  ;;  %vm4863_vm9 = vweird.f32 %v9741_v40  ;;  %v10268_v10 = vld [vmem:[#allocation91_spill] sm:$0xff] }
 0x85c   : > { %v6030_v57 = vpop.eup %6029  ;;  %v9751_v17 = vadd.f32 1.0, %v6028_v49  ;;  %v5392_v7 = vadd.f32 %v5360_v43, %v5131_v39  ;;  %v5394_v56 = vadd.f32 %v5362_v52, %v5137_v28  ;;  %vm4868_vm11 = vcmp.eq.f32.partialorder %v4867_v54, 8.507059e+37  ;;  %v10269_v28 = vld [vmem:[#allocation50_spill] sm:$0xff] }
 0x85d   : > { %v4821_v38 = vsel %vm4820_vm1, %v6024_v6, %v4817_v58  ;;  %v4829_v9 = vmul.f32 %v6030_v57, %v9737_v47  ;;  %vm4834_vm3 = vweird.f32 %v6030_v57  ;;  %v4870_v33 = vor.u32 1.1754944e-38, %v4869_v18 }
 0x85e   : > { %6033 = vrcp.f32 %v9751_v17  ;;  %v5424_v1 = vmax.f32 %v5392_v7, 0.0  ;;  %v4826_v29 = vsel %vm4823_vm2, %v4825_v14, %v4821_v38  ;;  %v5426_v41 = vmax.f32 %v5394_v56, 0.0  ;;  %vm4835_vm6 = vmor %vm4833_vm4, %vm4834_vm3 }
 0x85f   : > { %5329 = vperm.xlu1 %5895, %v4826_v29   ;;  %v4830_v3 = vsub.f32 1.0, %v4829_v9  ;;  %v4854_v55 = vand.u32 2147483648, %v9751_v17  ;;  %v4852_v48 = vand.u32 2147483647, %v9751_v17  ;;  %vm4848_vm8 = vweird.f32 %v9751_v17 }
 0x860   : > { %v6032_v53 = vpop.eup %6031  ;;  %5456 = vst [vmem:[%s9517_s23 + $0x68] sm:$0xff] %v5424_v1  ;;  %v10270_v1 = vld [vmem:[#allocation89_spill] sm:$0xff] }
 0x861   : > { %5458 = vst [vmem:[%s9517_s23 + $0x78] sm:$0xff] %v5426_v41  ;;  %v5260_v25 = vpop.permute.xlu0 %5259  ;;  %v4831_v24 = vmul.f32 %v6030_v57, %v4830_v3  ;;  %v4859_v42 = vmul.f32 %v6032_v53, %v9741_v40  ;;  %v5139_v22 = vpop.f32.mrf.mxu2  ;;  %vm4864_vm7 = vweird.f32 %v6032_v53  ;;  %v4855_v5 = vor.u32 1.1754944e-38, %v4854_v55  ;;  %v10271_v3 = vld [vmem:[#allocation87_spill] sm:$0xff] }
 0x862   : > { %v5361_v30 = vmul.f32 %v5260_v25, %v10266_v21  ;;  %vm4865_vm10 = vmor %vm4863_vm9, %vm4864_vm7  ;;  %vm4853_vm14 = vcmp.eq.f32.partialorder %v4852_v48, 8.507059e+37  ;;  %v5140_v40 = vadd.f32 %v9763_v31, %v5139_v22 }
 0x863   : > { %v4832_v11 = vadd.f32 %v6030_v57, %v4831_v24  ;;  %v4860_v19 = vsub.f32 1.0, %v4859_v42 }
 0x864   : > { %v6034_v0 = vpop.eup %6033  ;;  %v5393_v34 = vadd.f32 %v5361_v30, %v5134_v36  ;;  %v10272_v30 = vld [vmem:[#allocation71_spill] sm:$0xff] }
 0x865   : > { %v4836_v60 = vsel %vm4835_vm6, %v6030_v57, %v4832_v11  ;;  %v4861_v51 = vmul.f32 %v6032_v53, %v4860_v19  ;;  %v4844_v45 = vmul.f32 %v6034_v0, %v9751_v17  ;;  %vm4849_vm12 = vweird.f32 %v6034_v0 }
 0x866   : > { %v5425_v62 = vmax.f32 %v5393_v34, 0.0  ;;  %v4841_v59 = vsel %vm4838_vm5, %v4840_v37, %v4836_v60  ;;  %vm4850_vm13 = vmor %vm4848_vm8, %vm4849_vm12  ;;  %v10273_v60 = vld [vmem:[#allocation85_spill] sm:$0xff] }
 0x867   : > { %5334 = vperm.xlu0 %5893, %v4841_v59   ;;  %v4862_v4 = vadd.f32 %v6032_v53, %v4861_v51  ;;  %v4845_v26 = vsub.f32 1.0, %v4844_v45 }
 0x868   : > { %5457 = vst [vmem:[%s9517_s23 + $0x70] sm:$0xff] %v5425_v62  ;;  %v10274_v62 = vld [vmem:[#allocation74_spill] sm:$0xff] }
 0x869   : > { %v4866_v16 = vsel %vm4865_vm10, %v6032_v53, %v4862_v4  ;;  %v4846_v2 = vmul.f32 %v6034_v0, %v4845_v26  ;;  %v5142_v6 = vpop.f32.mrf.mxu2  ;;  %v5280_v63 = vpop.permute.xlu2 %5279 }
 0x86a   : > { %v4871_v47 = vsel %vm4868_vm11, %v4870_v33, %v4866_v16  ;;  %v5365_v32 = vmul.f32 %v5280_v63, %v10268_v10  ;;  %v5143_v52 = vadd.f32 %v9763_v31, %v5142_v6  ;;  %v10275_v6 = vld [vmem:[#allocation26_spill] sm:$0xff]  ;;  %v10277_v10 = vld [vmem:[#allocation65_spill] sm:$0xff] }
 0x86b   : > { %5344 = vperm.xlu1 %5895, %v4871_v47   ;;  %v4847_v12 = vadd.f32 %v6034_v0, %v4846_v2 }
 0x86d   : > { %v4851_v61 = vsel %vm4850_vm13, %v6034_v0, %v4847_v12 }
 0x86e   : > { %v4856_v20 = vsel %vm4853_vm14, %v4855_v5, %v4851_v61 }
 0x86f   : > { %5339 = vperm.xlu2 %5894, %v4856_v20  }
 0x871   : > { %v5270_v8 = vpop.permute.xlu1 %5269  ;;  %v5145_v44 = vpop.f32.mrf.mxu2 }
 0x872   : > { %v5363_v50 = vmul.f32 %v5270_v8, %v10267_v15  ;;  %v5146_v39 = vadd.f32 %v9763_v31, %v5145_v44  ;;  %v10276_v15 = vld [vmem:[#allocation59_spill] sm:$0xff] }
 0x874   : > { %v5395_v13 = vadd.f32 %v5363_v50, %v5140_v40  ;;  %v5397_v43 = vadd.f32 %v5365_v32, %v5146_v39 }
 0x876   : > { %v5427_v46 = vmax.f32 %v5395_v13, 0.0  ;;  %v5429_v49 = vmax.f32 %v5397_v43, 0.0 }
 0x878   : > { %5459 = vst [vmem:[%s9517_s23 + $0x80] sm:$0xff] %v5427_v46 }
 0x879   : > { %5461 = vst [vmem:[%s9517_s23 + $0x90] sm:$0xff] %v5429_v49  ;;  %v5275_v27 = vpop.permute.xlu0 %5274  ;;  %v5148_v57 = vpop.f32.mrf.mxu2 }
 0x87a   : > { %v5364_v58 = vmul.f32 %v5275_v27, %v10269_v28  ;;  %v5149_v9 = vadd.f32 %v9763_v31, %v5148_v57  ;;  %v10278_v28 = vld [vmem:[#allocation68_spill] sm:$0xff] }
 0x87c   : > { %v5396_v17 = vadd.f32 %v5364_v58, %v5143_v52 }
 0x87e   : > { %v5428_v7 = vmax.f32 %v5396_v17, 0.0 }
 0x880   : > { %5460 = vst [vmem:[%s9517_s23 + $0x88] sm:$0xff] %v5428_v7 }
 0x881   : > { %v5151_v14 = vpop.f32.mrf.mxu2  ;;  %v5295_v56 = vpop.permute.xlu2 %5294 }
 0x882   : > { %v5368_v35 = vmul.f32 %v5295_v56, %v10271_v3  ;;  %v5152_v21 = vadd.f32 %v9763_v31, %v5151_v14  ;;  %v10280_v3 = vld [vmem:[#allocation55_spill] sm:$0xff] }
 0x889   : > { %v5285_v38 = vpop.permute.xlu1 %5284  ;;  %v5154_v41 = vpop.f32.mrf.mxu2 }
 0x88a   : > { %v5366_v29 = vmul.f32 %v5285_v38, %v10270_v1  ;;  %v5155_v53 = vadd.f32 %v9763_v31, %v5154_v41  ;;  %v10279_v1 = vld [vmem:[#allocation62_spill] sm:$0xff] }
 0x88c   : > { %v5398_v23 = vadd.f32 %v5366_v29, %v5149_v9  ;;  %v5400_v25 = vadd.f32 %v5368_v35, %v5155_v53 }
 0x88e   : > { %v5430_v24 = vmax.f32 %v5398_v23, 0.0  ;;  %v5432_v42 = vmax.f32 %v5400_v25, 0.0 }
 0x890   : > { %5462 = vst [vmem:[%s9517_s23 + $0x98] sm:$0xff] %v5430_v24 }
 0x891   : > { %5464 = vst [vmem:[%s9517_s23 + $0xa8] sm:$0xff] %v5432_v42  ;;  %v5290_v36 = vpop.permute.xlu0 %5289  ;;  %v5157_v11 = vpop.f32.mrf.mxu2 }
 0x892   : > { %v5367_v22 = vmul.f32 %v5290_v36, %v10272_v30  ;;  %v5158_v18 = vadd.f32 %v9763_v31, %v5157_v11 }
 0x894   : > { %v5399_v19 = vadd.f32 %v5367_v22, %v5152_v21  ;;  %v5184_v21 = vpop.f32.mrf.mxu3  ;;  %v10281_v22 = vld [vmem:[#allocation79_spill] sm:$0xff] }
 0x896   : > { %v5431_v0 = vmax.f32 %v5399_v19, 0.0 }
 0x898   : > { %5463 = vst [vmem:[%s9517_s23 + $0xa0] sm:$0xff] %v5431_v0  ;;  %v5185_v0 = vadd.f32 %v9763_v31, %v5184_v21 }
 0x899   : > { %v5160_v34 = vpop.f32.mrf.mxu2  ;;  %v5310_v37 = vpop.permute.xlu2 %5309 }
 0x89a   : > { %v5371_v59 = vmul.f32 %v5310_v37, %v10274_v62  ;;  %v5161_v48 = vadd.f32 %v9763_v31, %v5160_v34 }
 0x8a1   : > { %v5300_v54 = vpop.permute.xlu1 %5299  ;;  %v5163_v45 = vpop.f32.mrf.mxu2 }
 0x8a2   : > { %v5369_v51 = vmul.f32 %v5300_v54, %v10273_v60  ;;  %v5164_v4 = vadd.f32 %v9763_v31, %v5163_v45  ;;  %v10282_v54 = vld [vmem:[#allocation52_spill] sm:$0xff] }
 0x8a4   : > { %v5401_v26 = vadd.f32 %v5369_v51, %v5158_v18  ;;  %v5403_v33 = vadd.f32 %v5371_v59, %v5164_v4 }
 0x8a6   : > { %v5433_v55 = vmax.f32 %v5401_v26, 0.0  ;;  %v5435_v16 = vmax.f32 %v5403_v33, 0.0 }
 0x8a8   : > { %5465 = vst [vmem:[%s9517_s23 + $0xb0] sm:$0xff] %v5433_v55 }
 0x8a9   : > { %5467 = vst [vmem:[%s9517_s23 + $0xc0] sm:$0xff] %v5435_v16  ;;  %v5305_v2 = vpop.permute.xlu0 %5304  ;;  %v5166_v12 = vpop.f32.mrf.mxu2 }
 0x8aa   : > { %v5370_v47 = vmul.f32 %v5305_v2, %v10275_v6  ;;  %v5167_v40 = vadd.f32 %v9763_v31, %v5166_v12 }
 0x8ac   : > { %v5402_v5 = vadd.f32 %v5370_v47, %v5161_v48 }
 0x8ae   : > { %v5434_v61 = vmax.f32 %v5402_v5, 0.0 }
 0x8b0   : > { %5466 = vst [vmem:[%s9517_s23 + $0xb8] sm:$0xff] %v5434_v61 }
 0x8b1   : > { %v5169_v20 = vpop.f32.mrf.mxu2  ;;  %v5325_v63 = vpop.permute.xlu2 %5324 }
 0x8b2   : > { %v5374_v32 = vmul.f32 %v5325_v63, %v10277_v10  ;;  %v5170_v52 = vadd.f32 %v9763_v31, %v5169_v20 }
 0x8b9   : > { %v5315_v8 = vpop.permute.xlu1 %5314  ;;  %v5172_v44 = vpop.f32.mrf.mxu2 }
 0x8ba   : > { %v5372_v50 = vmul.f32 %v5315_v8, %v10276_v15  ;;  %v5173_v39 = vadd.f32 %v9763_v31, %v5172_v44 }
 0x8bc   : > { %v5404_v13 = vadd.f32 %v5372_v50, %v5167_v40  ;;  %v5406_v43 = vadd.f32 %v5374_v32, %v5173_v39 }
 0x8be   : > { %v5436_v46 = vmax.f32 %v5404_v13, 0.0  ;;  %v5438_v49 = vmax.f32 %v5406_v43, 0.0 }
 0x8c0   : > { %5468 = vst [vmem:[%s9517_s23 + $0xc8] sm:$0xff] %v5436_v46 }
 0x8c1   : > { %5470 = vst [vmem:[%s9517_s23 + $0xd8] sm:$0xff] %v5438_v49  ;;  %v5320_v27 = vpop.permute.xlu0 %5319  ;;  %v5175_v57 = vpop.f32.mrf.mxu2 }
 0x8c2   : > { %v5373_v58 = vmul.f32 %v5320_v27, %v10278_v28  ;;  %v5176_v9 = vadd.f32 %v9763_v31, %v5175_v57 }
 0x8c4   : > { %v5405_v17 = vadd.f32 %v5373_v58, %v5170_v52 }
 0x8c6   : > { %v5437_v7 = vmax.f32 %v5405_v17, 0.0 }
 0x8c8   : > { %5469 = vst [vmem:[%s9517_s23 + $0xd0] sm:$0xff] %v5437_v7 }
 0x8c9   : > { %v5178_v14 = vpop.f32.mrf.mxu2  ;;  %v5340_v56 = vpop.permute.xlu2 %5339 }
 0x8ca   : > { %v5377_v35 = vmul.f32 %v5340_v56, %v10280_v3  ;;  %v5179_v30 = vadd.f32 %v9763_v31, %v5178_v14 }
 0x8d1   : > { %v5330_v38 = vpop.permute.xlu1 %5329  ;;  %v5181_v41 = vpop.f32.mrf.mxu2 }
 0x8d2   : > { %v5375_v29 = vmul.f32 %v5330_v38, %v10279_v1  ;;  %v5182_v53 = vadd.f32 %v9763_v31, %v5181_v41 }
 0x8d4   : > { %v5407_v23 = vadd.f32 %v5375_v29, %v5176_v9  ;;  %v5409_v25 = vadd.f32 %v5377_v35, %v5182_v53 }
 0x8d6   : > { %v5439_v24 = vmax.f32 %v5407_v23, 0.0  ;;  %v5441_v42 = vmax.f32 %v5409_v25, 0.0 }
 0x8d8   : > { %5471 = vst [vmem:[%s9517_s23 + $0xe0] sm:$0xff] %v5439_v24 }
 0x8d9   : > { %5473 = vst [vmem:[%s9517_s23 + $0xf0] sm:$0xff] %v5441_v42  ;;  %v5335_v36 = vpop.permute.xlu0 %5334 }
 0x8da   : > { %v5376_v11 = vmul.f32 %v5335_v36, %v10281_v22 }
 0x8dc   : > { %v5408_v19 = vadd.f32 %v5376_v11, %v5179_v30 }
 0x8dd   : > { %v5345_v34 = vpop.permute.xlu1 %5344 }
 0x8de   : > { %v5440_v37 = vmax.f32 %v5408_v19, 0.0  ;;  %v5378_v18 = vmul.f32 %v5345_v34, %v10282_v54 }
 0x8e0   : > { %5472 = vst [vmem:[%s9517_s23 + $0xe8] sm:$0xff] %v5440_v37  ;;  %v5410_v60 = vadd.f32 %v5378_v18, %v5185_v0 }
 0x8e2   : > { %v5442_v51 = vmax.f32 %v5410_v60, 0.0 }
 0x8e4   : > { %5474 = vst [vmem:[%s9517_s23 + $0xf8] sm:$0xff] %v5442_v51 }
 0x8e5   : > { %6064 = shalt.err (!%p6061_p3)
}
 0x8e6   : > { %s6105_s29 = smov 128   ;;  %s6106_s23 = smov 8  }
 0x8e7   : > { %5848 = dma.vmem_to_hbm [thread:$0]  (%p6223_p5), %s5489_s11, 4096, %s5491_s28, %s5476_s30, %s6105_s29, %s6105_s29, %s6106_s23  }
 0x8e8 PF: > { %p5854_p4 = scmp.ge.s32.totalorder %s6099_s18, 2  ;;  %s5505_s22 = sand.u32 1, %s6087_s15  }
 0x8e9   : > { %s5506_s1 = scalar_lea.sflag [#allocation7], %s5505_s22 }
 0x8ea   : > { %p5851_p7 = pnand %p5854_p4, %p6227_p6 }
 0x8ec   : > { %p5852_p8 = pneg %p5851_p7 }
 0x8ee   : > { %6082 = dma.done.wait (%p5852_p8), %s5506_s1, 4096  }
 0x8ef   : > { %6084 = vsyncadd (%p5852_p8), %s5506_s1, 4294963200  ;;  %s10283_s19 = sld [smem:[#allocation9_spill]]  ;;  %p25_p9 = scmp.ge.s32.totalorder %s6210_s20, 4  }
 0x8f0   : > { %s10284_s15 = smov %s6091_s16  ;;  %s10285_s16 = smov %s6095_s17 }
 0x8f1   : > { %s10287_s18 = smov %s6210_s20  ;;  %27 = sbr.rel (!%p25_p9) target bundleno = 7 (0x7), region = 121 }
 0x8f5   : > { %s10286_s17 = smov %s10283_s19 }
 0x8f6   :  { %5512 = vsyncpa [#allocation7], 1 }
 0x8f7   :  { %5514 = vsyncpa [#allocation7 + $0x1], 1 }

</bundles_post_ra>
